<compile_context>
chip_gen: v7x
topology: tpu7x:2x2x1
jax: 0.10.0
libtpu: 0.0.40
codegen_flags: <defaults>
</compile_context>

<pallas_src>
import numpy as np
import jax
import jax.numpy as jnp
from jax import lax
from jax.experimental import pallas as pl
from jax.experimental.pallas import tpu as pltpu


# -----------------------------------------------------------------------------
# Fused convnet: Conv5x5(SAME)+bias+ReLU, twice, one image per grid step.
# -----------------------------------------------------------------------------
def fused_convnet(x_rows, w1b, b1row, w2b, b2row, *, H, W, Cin, C1, C2, G):
    """x_rows: (B, H, W*Cin) f32 (NHWC with channels folded into lanes).
    w1b:  (5, (W+4)*Cin, W*C1) bf16 banded conv1 weights (full-row group).
    b1row:(1, W*C1) f32 conv1 bias tiled per x.
    w2b:  (5, (G+4)*C1, G*C2)  bf16 banded conv2 weights (x-groups of G).
    b2row:(1, G*C2) f32 conv2 bias tiled per group column.
    Returns enc: (B, H, W*C2) bf16 in NHWC-flatten order."""
    B = x_rows.shape[0]
    Hp, Wp = H + 4, W + 4
    KG = (G + 4) * C1
    NG = G * C2
    n_groups = W // G

    def kernel(x_ref, w1_ref, b1_ref, w2_ref, b2_ref, o_ref, xp1, xp2):
        # ---- zero only the 2-pixel halo frames (interiors are fully
        # overwritten each grid step; scratch may hold stale data) ----------
        def zero_halo(ref, c):
            ref[0:2, :] = jnp.zeros((2, Wp * c), ref.dtype)
            ref[2 + H:Hp, :] = jnp.zeros((2, Wp * c), ref.dtype)
            ref[2:2 + H, 0:2 * c] = jnp.zeros((H, 2 * c), ref.dtype)
            ref[2:2 + H, (2 + W) * c:Wp * c] = jnp.zeros((H, 2 * c), ref.dtype)

        zero_halo(xp1, Cin)
        zero_halo(xp2, C1)

        # ---- conv1: 5 row-band bf16 matmuls, f32 accumulation --------------
        xp1[2:2 + H, 2 * Cin:(2 + W) * Cin] = x_ref[0].astype(xp1.dtype)
        acc1 = jnp.zeros((H, W * C1), jnp.float32)
        for dy in range(5):
            acc1 = acc1 + jnp.dot(xp1[dy:dy + H, :], w1_ref[dy],
                                  preferred_element_type=jnp.float32)
        h1 = jnp.maximum(acc1 + b1_ref[...], 0.0)            # (H, W*C1) f32

        # ---- conv2: h1 never leaves VMEM; 5 x n_groups banded matmuls ------
        xp2[2:2 + H, 2 * C1:(2 + W) * C1] = h1.astype(xp2.dtype)
        accs = [jnp.zeros((H, NG), jnp.float32) for _ in range(n_groups)]
        for dy in range(5):                       # dy outer: one RHS, G LHS
            w_dy = w2_ref[dy]
            for gi in range(n_groups):
                x0 = gi * G                       # lane offset x0*C1 % 128 == 0
                accs[gi] = accs[gi] + jnp.dot(
                    xp2[dy:dy + H, x0 * C1:(x0 + G + 4) * C1], w_dy,
                    preferred_element_type=jnp.float32)
        out = jnp.concatenate(
            [jnp.maximum(a + b2_ref[...], 0.0) for a in accs], axis=1)
        o_ref[0] = out.astype(o_ref.dtype)        # single lane-dense store

    flops = int(2 * B * H * 5 * (Wp * Cin * W * C1 + n_groups * KG * NG))
    bytes_accessed = int(x_rows.size * 4 + w1b.size * 2 + w2b.size * 2 +
                         b1row.size * 4 + b2row.size * 4 + B * H * W * C2 * 2)

    return pl.pallas_call(
        kernel,
        out_shape=jax.ShapeDtypeStruct((B, H, W * C2), jnp.bfloat16),
        grid_spec=pltpu.PrefetchScalarGridSpec(
            num_scalar_prefetch=0,
            grid=(B,),
            in_specs=[
                pl.BlockSpec((1, H, W * Cin), lambda b: (b, 0, 0)),
                pl.BlockSpec((5, Wp * Cin, W * C1), lambda b: (0, 0, 0)),
                pl.BlockSpec((1, W * C1), lambda b: (0, 0)),
                pl.BlockSpec((5, KG, NG), lambda b: (0, 0, 0)),
                pl.BlockSpec((1, NG), lambda b: (0, 0)),
            ],
            out_specs=pl.BlockSpec((1, H, W * C2), lambda b: (b, 0, 0)),
            scratch_shapes=[
                pltpu.VMEM((Hp, Wp * Cin), jnp.bfloat16),   # padded input
                pltpu.VMEM((Hp, Wp * C1), jnp.bfloat16),    # padded h1
            ],
        ),
        compiler_params=pltpu.CompilerParams(
            dimension_semantics=("parallel",),
            vmem_limit_bytes=32 * 1024 * 1024),
        cost_estimate=pl.CostEstimate(flops=flops, transcendentals=0,
                                      bytes_accessed=bytes_accessed),
    )(x_rows, w1b, b1row, w2b, b2row)


# -----------------------------------------------------------------------------
# Fused policy/value heads: Linear(F,256)+ReLU+Linear(256,{5,1}), both heads.
# -----------------------------------------------------------------------------
def mlp_heads(x, w1, b1, w2, b2):
    """x: (B, F) bf16 (NHWC-flatten enc).
    w1: (F, 2*H1) bf16 — [policy | value] first-layer weights, rows already
        permuted to NHWC-flatten order.
    b1: (2, 1, H1) f32; w2: (2, H1, NPAD) f32 (zero-padded lane-dense second
        layer); b2: (2, 1, NPAD) f32.
    Returns (2, B, NPAD) f32: [0,:,:5] = logits, [1,:,:1] = value."""
    B, F = x.shape
    NH, _, H1 = b1.shape
    NPAD = w2.shape[2]

    # tk=2048 -> 4 K-steps per head: keeps the HBM weight DMA pipeline full on
    # v5e/v6e; per-step DMA (2 MiB) still exceeds the ~0.35us step overhead on
    # v7x, so it is a safe choice across generations.
    tk = F
    for cand in (2048, 4096, 1024, 512, 256, 128):
        if F % cand == 0:
            tk = cand
            break
    nk = F // tk

    def kernel(x_ref, w1_ref, b1_ref, w2_ref, b2_ref, o_ref, acc):
        # NOTE: acc is shared across the outer "parallel" head axis; this is
        # only correct because the head axis is OUTERMOST and k==0 resets it.
        k = pl.program_id(1)

        @pl.when(k == 0)
        def _():
            acc[...] = jnp.zeros_like(acc)

        acc[...] += jnp.dot(x_ref[...], w1_ref[...],
                            preferred_element_type=jnp.float32)

        @pl.when(k == pl.num_programs(1) - 1)
        def _():
            h = jnp.maximum(acc[...] + b1_ref[0], 0.0)          # (B, H1)
            o_ref[0] = (jnp.dot(h, w2_ref[0],
                                preferred_element_type=jnp.float32)
                        + b2_ref[0]).astype(o_ref.dtype)

    flops = int(2 * B * F * NH * H1 + 2 * NH * B * H1 * NPAD)
    bytes_accessed = int(x.size * x.dtype.itemsize + w1.size * 2 +
                         b1.size * 4 + w2.size * 4 + b2.size * 4 +
                         NH * B * NPAD * 4)

    return pl.pallas_call(
        kernel,
        out_shape=jax.ShapeDtypeStruct((NH, B, NPAD), jnp.float32),
        grid_spec=pltpu.PrefetchScalarGridSpec(
            num_scalar_prefetch=0,
            grid=(NH, nk),
            in_specs=[
                pl.BlockSpec((B, tk), lambda j, k: (0, k)),
                pl.BlockSpec((tk, H1), lambda j, k: (k, j)),
                pl.BlockSpec((1, 1, H1), lambda j, k: (j, 0, 0)),
                pl.BlockSpec((1, H1, NPAD), lambda j, k: (j, 0, 0)),
                pl.BlockSpec((1, 1, NPAD), lambda j, k: (j, 0, 0)),
            ],
            out_specs=pl.BlockSpec((1, B, NPAD), lambda j, k: (j, 0, 0)),
            scratch_shapes=[pltpu.VMEM((B, H1), jnp.float32)],
        ),
        compiler_params=pltpu.CompilerParams(
            dimension_semantics=("parallel", "arbitrary"),
            vmem_limit_bytes=32 * 1024 * 1024),
        cost_estimate=pl.CostEstimate(flops=flops, transcendentals=0,
                                      bytes_accessed=bytes_accessed),
    )(x, w1, b1, w2, b2)


# -----------------------------------------------------------------------------
# Parameter init (matches ScreenNet.__init__: dirac convs, xavier_normal(relu))
# -----------------------------------------------------------------------------
def init_params(in_channel, screen_size, key):
    F = screen_size * screen_size * 32
    gain = float(np.sqrt(2.0))  # calculate_gain('relu')

    w1 = np.zeros((64, in_channel, 5, 5), np.float32)
    for k in range(min(64, in_channel)):
        w1[k, k, 2, 2] = 1.0
    w2 = np.zeros((32, 64, 5, 5), np.float32)
    for k in range(min(32, 64)):
        w2[k, k, 2, 2] = 1.0

    k1, k2, k3, k4 = jax.random.split(key, 4)

    def xavier(k, fan_in, fan_out):
        std = gain * np.sqrt(2.0 / (fan_in + fan_out))
        return jax.random.normal(k, (fan_in, fan_out), jnp.float32) * std

    return dict(
        w1=jnp.asarray(w1), b1=jnp.zeros((64,), jnp.float32),
        w2=jnp.asarray(w2), b2=jnp.zeros((32,), jnp.float32),
        wp1=xavier(k1, F, 256), bp1=jnp.zeros((256,), jnp.float32),
        wp2=xavier(k2, 256, 5), bp2=jnp.zeros((5,), jnp.float32),
        wv1=xavier(k3, F, 256), bv1=jnp.zeros((256,), jnp.float32),
        wv2=xavier(k4, 256, 1), bv2=jnp.zeros((1,), jnp.float32),
    )


# -----------------------------------------------------------------------------
# One-time repack of PyTorch-convention params into kernel layouts.
# -----------------------------------------------------------------------------
def pack_params(p, in_channel, screen_size):
    H = W = screen_size
    C1 = p["w1"].shape[0]            # 64
    C2 = p["w2"].shape[0]            # 32
    F = H * W * C2
    H1 = p["wp1"].shape[1]           # 256
    NP = p["wp2"].shape[1]           # 5
    NV = p["wv2"].shape[1]           # 1
    NPAD = 128
    G = 4 if W % 4 == 0 else 1       # conv2 x-group size (G*C2 = 128 lanes)

    def band(w, group):
        """w: (Cout, Cin, 5, 5) OIHW.  Block-Toeplitz row-band weights
        (5, (group+4)*cin, group*cout) such that
          band[dy, (v+dx)*cin + ci, v*cout + co] = w[co, ci, dy, dx]."""
        wn = np.asarray(w, np.float32)
        cout, cin = wn.shape[0], wn.shape[1]
        out = np.zeros((5, (group + 4) * cin, group * cout), np.float32)
        for dy in range(5):
            for v in range(group):
                for dx in range(5):
                    u = v + dx
                    out[dy, u * cin:(u + 1) * cin,
                        v * cout:(v + 1) * cout] = wn[:, :, dy, dx].T
        return jnp.asarray(out, jnp.bfloat16)

    def perm_rows(w):                # NCHW-flatten row order -> NHWC-flatten
        n = w.shape[1]
        return w.reshape(C2, H, W, n).transpose(1, 2, 0, 3).reshape(F, n)

    w2h = jnp.zeros((2, H1, NPAD), jnp.float32)
    w2h = w2h.at[0, :, :NP].set(p["wp2"])
    w2h = w2h.at[1, :, :NV].set(p["wv2"])
    b2h = jnp.zeros((2, 1, NPAD), jnp.float32)
    b2h = b2h.at[0, 0, :NP].set(p["bp2"])
    b2h = b2h.at[1, 0, :NV].set(p["bv2"])

    return dict(
        w1b=band(p["w1"], W),
        b1row=jnp.tile(p["b1"], W).reshape(1, W * C1),
        w2b=band(p["w2"], G),
        b2row=jnp.tile(p["b2"], G).reshape(1, G * C2),
        w1h=jnp.concatenate([perm_rows(p["wp1"]), perm_rows(p["wv1"])],
                            axis=1).astype(jnp.bfloat16),
        b1h=jnp.stack([p["bp1"], p["bv1"]], axis=0).reshape(2, 1, H1),
        w2h=w2h, b2h=b2h,
    )


# -----------------------------------------------------------------------------
# Full forward (Pallas) and pure-JAX reference
# -----------------------------------------------------------------------------
@jax.jit
def screen_net_forward(state_nchw, pk):
    B, Cin, H, W = state_nchw.shape
    x = jnp.transpose(state_nchw, (0, 2, 3, 1)).reshape(B, H, W * Cin)
    C1 = pk["w1b"].shape[2] // W
    KG, NG = pk["w2b"].shape[1], pk["w2b"].shape[2]
    G = KG // C1 - 4
    C2 = NG // G
    enc = fused_convnet(x, pk["w1b"], pk["b1row"], pk["w2b"], pk["b2row"],
                        H=H, W=W, Cin=Cin, C1=C1, C2=C2, G=G)
    enc = enc.reshape(B, H * W * C2)              # contiguous (free) reshape
    out = mlp_heads(enc, pk["w1h"], pk["b1h"], pk["w2h"], pk["b2h"])
    logits = out[0, :, :5]
    value = out[1, :, :1]
    return logits, value


def screen_net_reference(state_nchw, p):
    dn = ("NCHW", "OIHW", "NCHW")
    x = lax.conv_general_dilated(state_nchw, p["w1"], (1, 1), "SAME",
                                 dimension_numbers=dn)
    x = jnp.maximum(x + p["b1"][None, :, None, None], 0.0)
    x = lax.conv_general_dilated(x, p["w2"], (1, 1), "SAME",
                                 dimension_numbers=dn)
    x = jnp.maximum(x + p["b2"][None, :, None, None], 0.0)
    enc = x.reshape(state_nchw.shape[0], -1)
    hp = jnp.maximum(enc @ p["wp1"] + p["bp1"], 0.0)
    logits = hp @ p["wp2"] + p["bp2"]
    hv = jnp.maximum(enc @ p["wv1"] + p["bv1"], 0.0)
    value = hv @ p["wv2"] + p["bv2"]
    return logits, value


if __name__ == "__main__":
    B, IN_CH, SCREEN = 2, 4, 16
    key = jax.random.PRNGKey(0)
    k_state, k_param, k_conv = jax.random.split(key, 3)

    state = jax.random.normal(k_state, (B, IN_CH, SCREEN, SCREEN), jnp.float32)

    # -- Check 1: the module's own init (dirac convs, xavier heads) ----------
    params = init_params(IN_CH, SCREEN, k_param)
    packed = pack_params(params, IN_CH, SCREEN)          # one-time prologue
    logits, value = jax.block_until_ready(screen_net_forward(state, packed))
    ref_logits, ref_value = screen_net_reference(state, params)
    assert logits.shape == (B, 5) and value.shape == (B, 1)
    # bf16 weights/activations with f32 accumulation -> slightly looser tol.
    assert jnp.allclose(logits, ref_logits, rtol=2e-2, atol=2e-2)
    assert jnp.allclose(value, ref_value, rtol=2e-2, atol=2e-2)

    # -- Check 2: random conv weights/biases.  The dirac init only exercises
    #    the centre tap; this validates every tap / halo / bias path of the
    #    banded-conv formulation against the XLA reference. ------------------
    kw1, kb1, kw2, kb2 = jax.random.split(k_conv, 4)
    params_r = dict(params)
    params_r["w1"] = 0.05 * jax.random.normal(kw1, params["w1"].shape,
                                              jnp.float32)
    params_r["b1"] = 0.1 * jax.random.normal(kb1, params["b1"].shape,
                                             jnp.float32)
    params_r["w2"] = 0.05 * jax.random.normal(kw2, params["w2"].shape,
                                              jnp.float32)
    params_r["b2"] = 0.1 * jax.random.normal(kb2, params["b2"].shape,
                                             jnp.float32)
    packed_r = pack_params(params_r, IN_CH, SCREEN)
    logits_r, value_r = jax.block_until_ready(
        screen_net_forward(state, packed_r))
    ref_lr, ref_vr = screen_net_reference(state, params_r)
    assert jnp.allclose(logits_r, ref_lr, rtol=5e-2, atol=5e-2)
    assert jnp.allclose(value_r, ref_vr, rtol=5e-2, atol=5e-2)

    print("KERNEL_OK")
</pallas_src>

<mosaic_0001>
module attributes {stable_mosaic.version = 11 : i64} {
  func.func @kernel(%arg0: i32, %arg1: memref<1x16x64xf32, #tpu.memory_space<vmem>>, %arg2: memref<5x80x1024xbf16, #tpu.memory_space<vmem>>, %arg3: memref<1x1024xf32, #tpu.memory_space<vmem>>, %arg4: memref<5x512x128xbf16, #tpu.memory_space<vmem>>, %arg5: memref<1x128xf32, #tpu.memory_space<vmem>>, %arg6: memref<1x16x512xbf16, #tpu.memory_space<vmem>>, %arg7: memref<20x80xbf16, #tpu.memory_space<vmem>>, %arg8: memref<20x1280xbf16, #tpu.memory_space<vmem>>) attributes {dimension_semantics = [#tpu.dimension_semantics<parallel>], iteration_bounds = array<i64: 2>, scalar_prefetch = 0 : i64, scratch_operands = 2 : i64, tpu.core_type = #tpu.core_type<tc>, window_params = [{transform_indices = @transform_0, window_bounds = array<i64: 1, 16, 64>}, {pipeline_mode = #tpu.pipeline_mode<synchronous>, transform_indices = @transform_1, window_bounds = array<i64: 5, 80, 1024>}, {pipeline_mode = #tpu.pipeline_mode<synchronous>, transform_indices = @transform_2, window_bounds = array<i64: 1, 1024>}, {pipeline_mode = #tpu.pipeline_mode<synchronous>, transform_indices = @transform_3, window_bounds = array<i64: 5, 512, 128>}, {pipeline_mode = #tpu.pipeline_mode<synchronous>, transform_indices = @transform_4, window_bounds = array<i64: 1, 128>}, {transform_indices = @transform_5, window_bounds = array<i64: 1, 16, 512>}]} {
    %cst = arith.constant 0.000000e+00 : bf16
    %0 = vector.broadcast %cst : bf16 to vector<2x80xbf16>
    %c0 = arith.constant 0 : index
    %c0_0 = arith.constant 0 : index
    %1 = vector.load %arg7[%c0, %c0_0] : memref<20x80xbf16, #tpu.memory_space<vmem>>, vector<2x80xbf16>
    tpu.vector_store %arg7[%c0, %c0_0], %0 {strides = array<i32>} : memref<20x80xbf16, #tpu.memory_space<vmem>>, vector<2x80xbf16>,
    %cst_1 = arith.constant 0.000000e+00 : bf16
    %2 = vector.broadcast %cst_1 : bf16 to vector<2x80xbf16>
    %c18 = arith.constant 18 : index
    %c0_2 = arith.constant 0 : index
    %3 = vector.load %arg7[%c18, %c0_2] : memref<20x80xbf16, #tpu.memory_space<vmem>>, vector<2x80xbf16>
    tpu.vector_store %arg7[%c18, %c0_2], %2 {strides = array<i32>} : memref<20x80xbf16, #tpu.memory_space<vmem>>, vector<2x80xbf16>,
    %cst_3 = arith.constant 0.000000e+00 : bf16
    %4 = vector.broadcast %cst_3 : bf16 to vector<16x8xbf16>
    %c2 = arith.constant 2 : index
    %c0_4 = arith.constant 0 : index
    %5 = vector.load %arg7[%c2, %c0_4] : memref<20x80xbf16, #tpu.memory_space<vmem>>, vector<16x8xbf16>
    tpu.vector_store %arg7[%c2, %c0_4], %4 {strides = array<i32>} : memref<20x80xbf16, #tpu.memory_space<vmem>>, vector<16x8xbf16>,
    %cst_5 = arith.constant 0.000000e+00 : bf16
    %6 = vector.broadcast %cst_5 : bf16 to vector<16x8xbf16>
    %c2_6 = arith.constant 2 : index
    %c72 = arith.constant 72 : index
    %7 = vector.load %arg7[%c2_6, %c72] : memref<20x80xbf16, #tpu.memory_space<vmem>>, vector<16x8xbf16>
    tpu.vector_store %arg7[%c2_6, %c72], %6 {strides = array<i32>} : memref<20x80xbf16, #tpu.memory_space<vmem>>, vector<16x8xbf16>,
    %cst_7 = arith.constant 0.000000e+00 : bf16
    %8 = vector.broadcast %cst_7 : bf16 to vector<2x1280xbf16>
    %c0_8 = arith.constant 0 : index
    %c0_9 = arith.constant 0 : index
    %9 = vector.load %arg8[%c0_8, %c0_9] : memref<20x1280xbf16, #tpu.memory_space<vmem>>, vector<2x1280xbf16>
    tpu.vector_store %arg8[%c0_8, %c0_9], %8 {strides = array<i32>} : memref<20x1280xbf16, #tpu.memory_space<vmem>>, vector<2x1280xbf16>,
    %cst_10 = arith.constant 0.000000e+00 : bf16
    %10 = vector.broadcast %cst_10 : bf16 to vector<2x1280xbf16>
    %c18_11 = arith.constant 18 : index
    %c0_12 = arith.constant 0 : index
    %11 = vector.load %arg8[%c18_11, %c0_12] : memref<20x1280xbf16, #tpu.memory_space<vmem>>, vector<2x1280xbf16>
    tpu.vector_store %arg8[%c18_11, %c0_12], %10 {strides = array<i32>} : memref<20x1280xbf16, #tpu.memory_space<vmem>>, vector<2x1280xbf16>,
    %cst_13 = arith.constant 0.000000e+00 : bf16
    %12 = vector.broadcast %cst_13 : bf16 to vector<16x128xbf16>
    %c2_14 = arith.constant 2 : index
    %c0_15 = arith.constant 0 : index
    %13 = vector.load %arg8[%c2_14, %c0_15] : memref<20x1280xbf16, #tpu.memory_space<vmem>>, vector<16x128xbf16>
    tpu.vector_store %arg8[%c2_14, %c0_15], %12 {strides = array<i32>} : memref<20x1280xbf16, #tpu.memory_space<vmem>>, vector<16x128xbf16>,
    %cst_16 = arith.constant 0.000000e+00 : bf16
    %14 = vector.broadcast %cst_16 : bf16 to vector<16x128xbf16>
    %c2_17 = arith.constant 2 : index
    %c1152 = arith.constant 1152 : index
    %15 = vector.load %arg8[%c2_17, %c1152] : memref<20x1280xbf16, #tpu.memory_space<vmem>>, vector<16x128xbf16>
    tpu.vector_store %arg8[%c2_17, %c1152], %14 {strides = array<i32>} : memref<20x1280xbf16, #tpu.memory_space<vmem>>, vector<16x128xbf16>,
    %c0_18 = arith.constant 0 : index
    %c0_19 = arith.constant 0 : index
    %c0_20 = arith.constant 0 : index
    %16 = vector.load %arg1[%c0_18, %c0_19, %c0_20] : memref<1x16x64xf32, #tpu.memory_space<vmem>>, vector<1x16x64xf32>
    %17 = vector.shape_cast %16 : vector<1x16x64xf32> to vector<16x64xf32>
    %18 = arith.truncf %17 : vector<16x64xf32> to vector<16x64xbf16>
    %c2_21 = arith.constant 2 : index
    %c8 = arith.constant 8 : index
    %19 = vector.load %arg7[%c2_21, %c8] : memref<20x80xbf16, #tpu.memory_space<vmem>>, vector<16x64xbf16>
    tpu.vector_store %arg7[%c2_21, %c8], %18 {strides = array<i32>} : memref<20x80xbf16, #tpu.memory_space<vmem>>, vector<16x64xbf16>,
    %cst_22 = arith.constant 0.000000e+00 : f32
    %20 = vector.broadcast %cst_22 : f32 to vector<16x1024xf32>
    %c0_23 = arith.constant 0 : index
    %c0_24 = arith.constant 0 : index
    %21 = vector.load %arg7[%c0_23, %c0_24] : memref<20x80xbf16, #tpu.memory_space<vmem>>, vector<16x80xbf16>
    %c0_25 = arith.constant 0 : index
    %c0_26 = arith.constant 0 : index
    %c0_27 = arith.constant 0 : index
    %22 = vector.load %arg2[%c0_25, %c0_26, %c0_27] : memref<5x80x1024xbf16, #tpu.memory_space<vmem>>, vector<1x80x1024xbf16>
    %23 = vector.shape_cast %22 : vector<1x80x1024xbf16> to vector<80x1024xbf16>
    %cst_28 = arith.constant dense<0.000000e+00> : vector<16x1024xf32>
    %24 = tpu.matmul %21, %23, %cst_28 {dimension_numbers = #tpu.dot_dimension_numbers<[1], [0], [0], [1], [0, 0, 1, 1], [], []>} : vector<16x80xbf16>, vector<80x1024xbf16>, vector<16x1024xf32> -> vector<16x1024xf32>
    %25 = arith.addf %20, %24 : vector<16x1024xf32>
    %c1 = arith.constant 1 : index
    %c0_29 = arith.constant 0 : index
    %26 = vector.load %arg7[%c1, %c0_29] : memref<20x80xbf16, #tpu.memory_space<vmem>>, vector<16x80xbf16>
    %c1_30 = arith.constant 1 : index
    %c0_31 = arith.constant 0 : index
    %c0_32 = arith.constant 0 : index
    %27 = vector.load %arg2[%c1_30, %c0_31, %c0_32] : memref<5x80x1024xbf16, #tpu.memory_space<vmem>>, vector<1x80x1024xbf16>
    %28 = vector.shape_cast %27 : vector<1x80x1024xbf16> to vector<80x1024xbf16>
    %cst_33 = arith.constant dense<0.000000e+00> : vector<16x1024xf32>
    %29 = tpu.matmul %26, %28, %cst_33 {dimension_numbers = #tpu.dot_dimension_numbers<[1], [0], [0], [1], [0, 0, 1, 1], [], []>} : vector<16x80xbf16>, vector<80x1024xbf16>, vector<16x1024xf32> -> vector<16x1024xf32>
    %30 = arith.addf %25, %29 : vector<16x1024xf32>
    %c2_34 = arith.constant 2 : index
    %c0_35 = arith.constant 0 : index
    %31 = vector.load %arg7[%c2_34, %c0_35] : memref<20x80xbf16, #tpu.memory_space<vmem>>, vector<16x80xbf16>
    %c2_36 = arith.constant 2 : index
    %c0_37 = arith.constant 0 : index
    %c0_38 = arith.constant 0 : index
    %32 = vector.load %arg2[%c2_36, %c0_37, %c0_38] : memref<5x80x1024xbf16, #tpu.memory_space<vmem>>, vector<1x80x1024xbf16>
    %33 = vector.shape_cast %32 : vector<1x80x1024xbf16> to vector<80x1024xbf16>
    %cst_39 = arith.constant dense<0.000000e+00> : vector<16x1024xf32>
    %34 = tpu.matmul %31, %33, %cst_39 {dimension_numbers = #tpu.dot_dimension_numbers<[1], [0], [0], [1], [0, 0, 1, 1], [], []>} : vector<16x80xbf16>, vector<80x1024xbf16>, vector<16x1024xf32> -> vector<16x1024xf32>
    %35 = arith.addf %30, %34 : vector<16x1024xf32>
    %c3 = arith.constant 3 : index
    %c0_40 = arith.constant 0 : index
    %36 = vector.load %arg7[%c3, %c0_40] : memref<20x80xbf16, #tpu.memory_space<vmem>>, vector<16x80xbf16>
    %c3_41 = arith.constant 3 : index
    %c0_42 = arith.constant 0 : index
    %c0_43 = arith.constant 0 : index
    %37 = vector.load %arg2[%c3_41, %c0_42, %c0_43] : memref<5x80x1024xbf16, #tpu.memory_space<vmem>>, vector<1x80x1024xbf16>
    %38 = vector.shape_cast %37 : vector<1x80x1024xbf16> to vector<80x1024xbf16>
    %cst_44 = arith.constant dense<0.000000e+00> : vector<16x1024xf32>
    %39 = tpu.matmul %36, %38, %cst_44 {dimension_numbers = #tpu.dot_dimension_numbers<[1], [0], [0], [1], [0, 0, 1, 1], [], []>} : vector<16x80xbf16>, vector<80x1024xbf16>, vector<16x1024xf32> -> vector<16x1024xf32>
    %40 = arith.addf %35, %39 : vector<16x1024xf32>
    %c4 = arith.constant 4 : index
    %c0_45 = arith.constant 0 : index
    %41 = vector.load %arg7[%c4, %c0_45] : memref<20x80xbf16, #tpu.memory_space<vmem>>, vector<16x80xbf16>
    %c4_46 = arith.constant 4 : index
    %c0_47 = arith.constant 0 : index
    %c0_48 = arith.constant 0 : index
    %42 = vector.load %arg2[%c4_46, %c0_47, %c0_48] : memref<5x80x1024xbf16, #tpu.memory_space<vmem>>, vector<1x80x1024xbf16>
    %43 = vector.shape_cast %42 : vector<1x80x1024xbf16> to vector<80x1024xbf16>
    %cst_49 = arith.constant dense<0.000000e+00> : vector<16x1024xf32>
    %44 = tpu.matmul %41, %43, %cst_49 {dimension_numbers = #tpu.dot_dimension_numbers<[1], [0], [0], [1], [0, 0, 1, 1], [], []>} : vector<16x80xbf16>, vector<80x1024xbf16>, vector<16x1024xf32> -> vector<16x1024xf32>
    %45 = arith.addf %40, %44 : vector<16x1024xf32>
    %c0_50 = arith.constant 0 : index
    %c0_51 = arith.constant 0 : index
    %46 = vector.load %arg3[%c0_50, %c0_51] : memref<1x1024xf32, #tpu.memory_space<vmem>>, vector<1x1024xf32>
    %47 = vector.broadcast %46 : vector<1x1024xf32> to vector<16x1024xf32>
    %48 = arith.addf %45, %47 : vector<16x1024xf32>
    %cst_52 = arith.constant 0.000000e+00 : f32
    %49 = vector.broadcast %cst_52 : f32 to vector<16x1024xf32>
    %50 = arith.maximumf %48, %49 : vector<16x1024xf32>
    %51 = arith.truncf %50 : vector<16x1024xf32> to vector<16x1024xbf16>
    %c2_53 = arith.constant 2 : index
    %c128 = arith.constant 128 : index
    %52 = vector.load %arg8[%c2_53, %c128] : memref<20x1280xbf16, #tpu.memory_space<vmem>>, vector<16x1024xbf16>
    tpu.vector_store %arg8[%c2_53, %c128], %51 {strides = array<i32>} : memref<20x1280xbf16, #tpu.memory_space<vmem>>, vector<16x1024xbf16>,
    %cst_54 = arith.constant 0.000000e+00 : f32
    %53 = vector.broadcast %cst_54 : f32 to vector<16x128xf32>
    %cst_55 = arith.constant 0.000000e+00 : f32
    %54 = vector.broadcast %cst_55 : f32 to vector<16x128xf32>
    %cst_56 = arith.constant 0.000000e+00 : f32
    %55 = vector.broadcast %cst_56 : f32 to vector<16x128xf32>
    %cst_57 = arith.constant 0.000000e+00 : f32
    %56 = vector.broadcast %cst_57 : f32 to vector<16x128xf32>
    %c0_58 = arith.constant 0 : index
    %c0_59 = arith.constant 0 : index
    %c0_60 = arith.constant 0 : index
    %57 = vector.load %arg4[%c0_58, %c0_59, %c0_60] : memref<5x512x128xbf16, #tpu.memory_space<vmem>>, vector<1x512x128xbf16>
    %58 = vector.shape_cast %57 : vector<1x512x128xbf16> to vector<512x128xbf16>
    %c0_61 = arith.constant 0 : index
    %c0_62 = arith.constant 0 : index
    %59 = vector.load %arg8[%c0_61, %c0_62] : memref<20x1280xbf16, #tpu.memory_space<vmem>>, vector<16x512xbf16>
    %cst_63 = arith.constant dense<0.000000e+00> : vector<16x128xf32>
    %60 = tpu.matmul %59, %58, %cst_63 {dimension_numbers = #tpu.dot_dimension_numbers<[1], [0], [0], [1], [0, 0, 1, 1], [], []>} : vector<16x512xbf16>, vector<512x128xbf16>, vector<16x128xf32> -> vector<16x128xf32>
    %61 = arith.addf %53, %60 : vector<16x128xf32>
    %c0_64 = arith.constant 0 : index
    %c256 = arith.constant 256 : index
    %62 = vector.load %arg8[%c0_64, %c256] : memref<20x1280xbf16, #tpu.memory_space<vmem>>, vector<16x512xbf16>
    %cst_65 = arith.constant dense<0.000000e+00> : vector<16x128xf32>
    %63 = tpu.matmul %62, %58, %cst_65 {dimension_numbers = #tpu.dot_dimension_numbers<[1], [0], [0], [1], [0, 0, 1, 1], [], []>} : vector<16x512xbf16>, vector<512x128xbf16>, vector<16x128xf32> -> vector<16x128xf32>
    %64 = arith.addf %54, %63 : vector<16x128xf32>
    %c0_66 = arith.constant 0 : index
    %c512 = arith.constant 512 : index
    %65 = vector.load %arg8[%c0_66, %c512] : memref<20x1280xbf16, #tpu.memory_space<vmem>>, vector<16x512xbf16>
    %cst_67 = arith.constant dense<0.000000e+00> : vector<16x128xf32>
    %66 = tpu.matmul %65, %58, %cst_67 {dimension_numbers = #tpu.dot_dimension_numbers<[1], [0], [0], [1], [0, 0, 1, 1], [], []>} : vector<16x512xbf16>, vector<512x128xbf16>, vector<16x128xf32> -> vector<16x128xf32>
    %67 = arith.addf %55, %66 : vector<16x128xf32>
    %c0_68 = arith.constant 0 : index
    %c768 = arith.constant 768 : index
    %68 = vector.load %arg8[%c0_68, %c768] : memref<20x1280xbf16, #tpu.memory_space<vmem>>, vector<16x512xbf16>
    %cst_69 = arith.constant dense<0.000000e+00> : vector<16x128xf32>
    %69 = tpu.matmul %68, %58, %cst_69 {dimension_numbers = #tpu.dot_dimension_numbers<[1], [0], [0], [1], [0, 0, 1, 1], [], []>} : vector<16x512xbf16>, vector<512x128xbf16>, vector<16x128xf32> -> vector<16x128xf32>
    %70 = arith.addf %56, %69 : vector<16x128xf32>
    %c1_70 = arith.constant 1 : index
    %c0_71 = arith.constant 0 : index
    %c0_72 = arith.constant 0 : index
    %71 = vector.load %arg4[%c1_70, %c0_71, %c0_72] : memref<5x512x128xbf16, #tpu.memory_space<vmem>>, vector<1x512x128xbf16>
    %72 = vector.shape_cast %71 : vector<1x512x128xbf16> to vector<512x128xbf16>
    %c1_73 = arith.constant 1 : index
    %c0_74 = arith.constant 0 : index
    %73 = vector.load %arg8[%c1_73, %c0_74] : memref<20x1280xbf16, #tpu.memory_space<vmem>>, vector<16x512xbf16>
    %cst_75 = arith.constant dense<0.000000e+00> : vector<16x128xf32>
    %74 = tpu.matmul %73, %72, %cst_75 {dimension_numbers = #tpu.dot_dimension_numbers<[1], [0], [0], [1], [0, 0, 1, 1], [], []>} : vector<16x512xbf16>, vector<512x128xbf16>, vector<16x128xf32> -> vector<16x128xf32>
    %75 = arith.addf %61, %74 : vector<16x128xf32>
    %c1_76 = arith.constant 1 : index
    %c256_77 = arith.constant 256 : index
    %76 = vector.load %arg8[%c1_76, %c256_77] : memref<20x1280xbf16, #tpu.memory_space<vmem>>, vector<16x512xbf16>
    %cst_78 = arith.constant dense<0.000000e+00> : vector<16x128xf32>
    %77 = tpu.matmul %76, %72, %cst_78 {dimension_numbers = #tpu.dot_dimension_numbers<[1], [0], [0], [1], [0, 0, 1, 1], [], []>} : vector<16x512xbf16>, vector<512x128xbf16>, vector<16x128xf32> -> vector<16x128xf32>
    %78 = arith.addf %64, %77 : vector<16x128xf32>
    %c1_79 = arith.constant 1 : index
    %c512_80 = arith.constant 512 : index
    %79 = vector.load %arg8[%c1_79, %c512_80] : memref<20x1280xbf16, #tpu.memory_space<vmem>>, vector<16x512xbf16>
    %cst_81 = arith.constant dense<0.000000e+00> : vector<16x128xf32>
    %80 = tpu.matmul %79, %72, %cst_81 {dimension_numbers = #tpu.dot_dimension_numbers<[1], [0], [0], [1], [0, 0, 1, 1], [], []>} : vector<16x512xbf16>, vector<512x128xbf16>, vector<16x128xf32> -> vector<16x128xf32>
    %81 = arith.addf %67, %80 : vector<16x128xf32>
    %c1_82 = arith.constant 1 : index
    %c768_83 = arith.constant 768 : index
    %82 = vector.load %arg8[%c1_82, %c768_83] : memref<20x1280xbf16, #tpu.memory_space<vmem>>, vector<16x512xbf16>
    %cst_84 = arith.constant dense<0.000000e+00> : vector<16x128xf32>
    %83 = tpu.matmul %82, %72, %cst_84 {dimension_numbers = #tpu.dot_dimension_numbers<[1], [0], [0], [1], [0, 0, 1, 1], [], []>} : vector<16x512xbf16>, vector<512x128xbf16>, vector<16x128xf32> -> vector<16x128xf32>
    %84 = arith.addf %70, %83 : vector<16x128xf32>
    %c2_85 = arith.constant 2 : index
    %c0_86 = arith.constant 0 : index
    %c0_87 = arith.constant 0 : index
    %85 = vector.load %arg4[%c2_85, %c0_86, %c0_87] : memref<5x512x128xbf16, #tpu.memory_space<vmem>>, vector<1x512x128xbf16>
    %86 = vector.shape_cast %85 : vector<1x512x128xbf16> to vector<512x128xbf16>
    %c2_88 = arith.constant 2 : index
    %c0_89 = arith.constant 0 : index
    %87 = vector.load %arg8[%c2_88, %c0_89] : memref<20x1280xbf16, #tpu.memory_space<vmem>>, vector<16x512xbf16>
    %cst_90 = arith.constant dense<0.000000e+00> : vector<16x128xf32>
    %88 = tpu.matmul %87, %86, %cst_90 {dimension_numbers = #tpu.dot_dimension_numbers<[1], [0], [0], [1], [0, 0, 1, 1], [], []>} : vector<16x512xbf16>, vector<512x128xbf16>, vector<16x128xf32> -> vector<16x128xf32>
    %89 = arith.addf %75, %88 : vector<16x128xf32>
    %c2_91 = arith.constant 2 : index
    %c256_92 = arith.constant 256 : index
    %90 = vector.load %arg8[%c2_91, %c256_92] : memref<20x1280xbf16, #tpu.memory_space<vmem>>, vector<16x512xbf16>
    %cst_93 = arith.constant dense<0.000000e+00> : vector<16x128xf32>
    %91 = tpu.matmul %90, %86, %cst_93 {dimension_numbers = #tpu.dot_dimension_numbers<[1], [0], [0], [1], [0, 0, 1, 1], [], []>} : vector<16x512xbf16>, vector<512x128xbf16>, vector<16x128xf32> -> vector<16x128xf32>
    %92 = arith.addf %78, %91 : vector<16x128xf32>
    %c2_94 = arith.constant 2 : index
    %c512_95 = arith.constant 512 : index
    %93 = vector.load %arg8[%c2_94, %c512_95] : memref<20x1280xbf16, #tpu.memory_space<vmem>>, vector<16x512xbf16>
    %cst_96 = arith.constant dense<0.000000e+00> : vector<16x128xf32>
    %94 = tpu.matmul %93, %86, %cst_96 {dimension_numbers = #tpu.dot_dimension_numbers<[1], [0], [0], [1], [0, 0, 1, 1], [], []>} : vector<16x512xbf16>, vector<512x128xbf16>, vector<16x128xf32> -> vector<16x128xf32>
    %95 = arith.addf %81, %94 : vector<16x128xf32>
    %c2_97 = arith.constant 2 : index
    %c768_98 = arith.constant 768 : index
    %96 = vector.load %arg8[%c2_97, %c768_98] : memref<20x1280xbf16, #tpu.memory_space<vmem>>, vector<16x512xbf16>
    %cst_99 = arith.constant dense<0.000000e+00> : vector<16x128xf32>
    %97 = tpu.matmul %96, %86, %cst_99 {dimension_numbers = #tpu.dot_dimension_numbers<[1], [0], [0], [1], [0, 0, 1, 1], [], []>} : vector<16x512xbf16>, vector<512x128xbf16>, vector<16x128xf32> -> vector<16x128xf32>
    %98 = arith.addf %84, %97 : vector<16x128xf32>
    %c3_100 = arith.constant 3 : index
    %c0_101 = arith.constant 0 : index
    %c0_102 = arith.constant 0 : index
    %99 = vector.load %arg4[%c3_100, %c0_101, %c0_102] : memref<5x512x128xbf16, #tpu.memory_space<vmem>>, vector<1x512x128xbf16>
    %100 = vector.shape_cast %99 : vector<1x512x128xbf16> to vector<512x128xbf16>
    %c3_103 = arith.constant 3 : index
    %c0_104 = arith.constant 0 : index
    %101 = vector.load %arg8[%c3_103, %c0_104] : memref<20x1280xbf16, #tpu.memory_space<vmem>>, vector<16x512xbf16>
    %cst_105 = arith.constant dense<0.000000e+00> : vector<16x128xf32>
    %102 = tpu.matmul %101, %100, %cst_105 {dimension_numbers = #tpu.dot_dimension_numbers<[1], [0], [0], [1], [0, 0, 1, 1], [], []>} : vector<16x512xbf16>, vector<512x128xbf16>, vector<16x128xf32> -> vector<16x128xf32>
    %103 = arith.addf %89, %102 : vector<16x128xf32>
    %c3_106 = arith.constant 3 : index
    %c256_107 = arith.constant 256 : index
    %104 = vector.load %arg8[%c3_106, %c256_107] : memref<20x1280xbf16, #tpu.memory_space<vmem>>, vector<16x512xbf16>
    %cst_108 = arith.constant dense<0.000000e+00> : vector<16x128xf32>
    %105 = tpu.matmul %104, %100, %cst_108 {dimension_numbers = #tpu.dot_dimension_numbers<[1], [0], [0], [1], [0, 0, 1, 1], [], []>} : vector<16x512xbf16>, vector<512x128xbf16>, vector<16x128xf32> -> vector<16x128xf32>
    %106 = arith.addf %92, %105 : vector<16x128xf32>
    %c3_109 = arith.constant 3 : index
    %c512_110 = arith.constant 512 : index
    %107 = vector.load %arg8[%c3_109, %c512_110] : memref<20x1280xbf16, #tpu.memory_space<vmem>>, vector<16x512xbf16>
    %cst_111 = arith.constant dense<0.000000e+00> : vector<16x128xf32>
    %108 = tpu.matmul %107, %100, %cst_111 {dimension_numbers = #tpu.dot_dimension_numbers<[1], [0], [0], [1], [0, 0, 1, 1], [], []>} : vector<16x512xbf16>, vector<512x128xbf16>, vector<16x128xf32> -> vector<16x128xf32>
    %109 = arith.addf %95, %108 : vector<16x128xf32>
    %c3_112 = arith.constant 3 : index
    %c768_113 = arith.constant 768 : index
    %110 = vector.load %arg8[%c3_112, %c768_113] : memref<20x1280xbf16, #tpu.memory_space<vmem>>, vector<16x512xbf16>
    %cst_114 = arith.constant dense<0.000000e+00> : vector<16x128xf32>
    %111 = tpu.matmul %110, %100, %cst_114 {dimension_numbers = #tpu.dot_dimension_numbers<[1], [0], [0], [1], [0, 0, 1, 1], [], []>} : vector<16x512xbf16>, vector<512x128xbf16>, vector<16x128xf32> -> vector<16x128xf32>
    %112 = arith.addf %98, %111 : vector<16x128xf32>
    %c4_115 = arith.constant 4 : index
    %c0_116 = arith.constant 0 : index
    %c0_117 = arith.constant 0 : index
    %113 = vector.load %arg4[%c4_115, %c0_116, %c0_117] : memref<5x512x128xbf16, #tpu.memory_space<vmem>>, vector<1x512x128xbf16>
    %114 = vector.shape_cast %113 : vector<1x512x128xbf16> to vector<512x128xbf16>
    %c4_118 = arith.constant 4 : index
    %c0_119 = arith.constant 0 : index
    %115 = vector.load %arg8[%c4_118, %c0_119] : memref<20x1280xbf16, #tpu.memory_space<vmem>>, vector<16x512xbf16>
    %cst_120 = arith.constant dense<0.000000e+00> : vector<16x128xf32>
    %116 = tpu.matmul %115, %114, %cst_120 {dimension_numbers = #tpu.dot_dimension_numbers<[1], [0], [0], [1], [0, 0, 1, 1], [], []>} : vector<16x512xbf16>, vector<512x128xbf16>, vector<16x128xf32> -> vector<16x128xf32>
    %117 = arith.addf %103, %116 : vector<16x128xf32>
    %c4_121 = arith.constant 4 : index
    %c256_122 = arith.constant 256 : index
    %118 = vector.load %arg8[%c4_121, %c256_122] : memref<20x1280xbf16, #tpu.memory_space<vmem>>, vector<16x512xbf16>
    %cst_123 = arith.constant dense<0.000000e+00> : vector<16x128xf32>
    %119 = tpu.matmul %118, %114, %cst_123 {dimension_numbers = #tpu.dot_dimension_numbers<[1], [0], [0], [1], [0, 0, 1, 1], [], []>} : vector<16x512xbf16>, vector<512x128xbf16>, vector<16x128xf32> -> vector<16x128xf32>
    %120 = arith.addf %106, %119 : vector<16x128xf32>
    %c4_124 = arith.constant 4 : index
    %c512_125 = arith.constant 512 : index
    %121 = vector.load %arg8[%c4_124, %c512_125] : memref<20x1280xbf16, #tpu.memory_space<vmem>>, vector<16x512xbf16>
    %cst_126 = arith.constant dense<0.000000e+00> : vector<16x128xf32>
    %122 = tpu.matmul %121, %114, %cst_126 {dimension_numbers = #tpu.dot_dimension_numbers<[1], [0], [0], [1], [0, 0, 1, 1], [], []>} : vector<16x512xbf16>, vector<512x128xbf16>, vector<16x128xf32> -> vector<16x128xf32>
    %123 = arith.addf %109, %122 : vector<16x128xf32>
    %c4_127 = arith.constant 4 : index
    %c768_128 = arith.constant 768 : index
    %124 = vector.load %arg8[%c4_127, %c768_128] : memref<20x1280xbf16, #tpu.memory_space<vmem>>, vector<16x512xbf16>
    %cst_129 = arith.constant dense<0.000000e+00> : vector<16x128xf32>
    %125 = tpu.matmul %124, %114, %cst_129 {dimension_numbers = #tpu.dot_dimension_numbers<[1], [0], [0], [1], [0, 0, 1, 1], [], []>} : vector<16x512xbf16>, vector<512x128xbf16>, vector<16x128xf32> -> vector<16x128xf32>
    %126 = arith.addf %112, %125 : vector<16x128xf32>
    %c0_130 = arith.constant 0 : index
    %c0_131 = arith.constant 0 : index
    %127 = vector.load %arg5[%c0_130, %c0_131] : memref<1x128xf32, #tpu.memory_space<vmem>>, vector<1x128xf32>
    %128 = vector.broadcast %127 : vector<1x128xf32> to vector<16x128xf32>
    %129 = arith.addf %117, %128 : vector<16x128xf32>
    %cst_132 = arith.constant 0.000000e+00 : f32
    %130 = vector.broadcast %cst_132 : f32 to vector<16x128xf32>
    %131 = arith.maximumf %129, %130 : vector<16x128xf32>
    %c0_133 = arith.constant 0 : index
    %c0_134 = arith.constant 0 : index
    %132 = vector.load %arg5[%c0_133, %c0_134] : memref<1x128xf32, #tpu.memory_space<vmem>>, vector<1x128xf32>
    %133 = vector.broadcast %132 : vector<1x128xf32> to vector<16x128xf32>
    %134 = arith.addf %120, %133 : vector<16x128xf32>
    %cst_135 = arith.constant 0.000000e+00 : f32
    %135 = vector.broadcast %cst_135 : f32 to vector<16x128xf32>
    %136 = arith.maximumf %134, %135 : vector<16x128xf32>
    %c0_136 = arith.constant 0 : index
    %c0_137 = arith.constant 0 : index
    %137 = vector.load %arg5[%c0_136, %c0_137] : memref<1x128xf32, #tpu.memory_space<vmem>>, vector<1x128xf32>
    %138 = vector.broadcast %137 : vector<1x128xf32> to vector<16x128xf32>
    %139 = arith.addf %123, %138 : vector<16x128xf32>
    %cst_138 = arith.constant 0.000000e+00 : f32
    %140 = vector.broadcast %cst_138 : f32 to vector<16x128xf32>
    %141 = arith.maximumf %139, %140 : vector<16x128xf32>
    %c0_139 = arith.constant 0 : index
    %c0_140 = arith.constant 0 : index
    %142 = vector.load %arg5[%c0_139, %c0_140] : memref<1x128xf32, #tpu.memory_space<vmem>>, vector<1x128xf32>
    %143 = vector.broadcast %142 : vector<1x128xf32> to vector<16x128xf32>
    %144 = arith.addf %126, %143 : vector<16x128xf32>
    %cst_141 = arith.constant 0.000000e+00 : f32
    %145 = vector.broadcast %cst_141 : f32 to vector<16x128xf32>
    %146 = arith.maximumf %144, %145 : vector<16x128xf32>
    %147 = tpu.concatenate %131, %136, %141, %146 in 1 : vector<16x128xf32>, vector<16x128xf32>, vector<16x128xf32>, vector<16x128xf32> -> vector<16x512xf32>
    %148 = arith.truncf %147 : vector<16x512xf32> to vector<16x512xbf16>
    %c0_142 = arith.constant 0 : index
    %c0_143 = arith.constant 0 : index
    %c0_144 = arith.constant 0 : index
    %149 = vector.load %arg6[%c0_142, %c0_143, %c0_144] : memref<1x16x512xbf16, #tpu.memory_space<vmem>>, vector<1x16x512xbf16>
    %150 = vector.shape_cast %149 : vector<1x16x512xbf16> to vector<16x512xbf16>
    %151 = vector.shape_cast %148 : vector<16x512xbf16> to vector<1x16x512xbf16>
    tpu.vector_store %arg6[%c0_142, %c0_143, %c0_144], %151 {strides = array<i32>} : memref<1x16x512xbf16, #tpu.memory_space<vmem>>, vector<1x16x512xbf16>,
    return
  }
  func.func @transform_0(%arg0: i32) -> (i32, i32, i32) {
    %c0_i32 = arith.constant 0 : i32
    %c0_i32_0 = arith.constant 0 : i32
    %c0_i32_1 = arith.constant 0 : i32
    return %arg0, %c0_i32, %c0_i32_0 : i32, i32, i32
  }
  func.func @transform_1(%arg0: i32) -> (i32, i32, i32) {
    %c0_i32 = arith.constant 0 : i32
    %c0_i32_0 = arith.constant 0 : i32
    %c0_i32_1 = arith.constant 0 : i32
    %c0_i32_2 = arith.constant 0 : i32
    return %c0_i32, %c0_i32_0, %c0_i32_1 : i32, i32, i32
  }
  func.func @transform_2(%arg0: i32) -> (i32, i32) {
    %c0_i32 = arith.constant 0 : i32
    %c0_i32_0 = arith.constant 0 : i32
    %c0_i32_1 = arith.constant 0 : i32
    return %c0_i32, %c0_i32_0 : i32, i32
  }
  func.func @transform_3(%arg0: i32) -> (i32, i32, i32) {
    %c0_i32 = arith.constant 0 : i32
    %c0_i32_0 = arith.constant 0 : i32
    %c0_i32_1 = arith.constant 0 : i32
    %c0_i32_2 = arith.constant 0 : i32
    return %c0_i32, %c0_i32_0, %c0_i32_1 : i32, i32, i32
  }
  func.func @transform_4(%arg0: i32) -> (i32, i32) {
    %c0_i32 = arith.constant 0 : i32
    %c0_i32_0 = arith.constant 0 : i32
    %c0_i32_1 = arith.constant 0 : i32
    return %c0_i32, %c0_i32_0 : i32, i32
  }
  func.func @transform_5(%arg0: i32) -> (i32, i32, i32) {
    %c0_i32 = arith.constant 0 : i32
    %c0_i32_0 = arith.constant 0 : i32
    %c0_i32_1 = arith.constant 0 : i32
    return %arg0, %c0_i32, %c0_i32_0 : i32, i32, i32
  }
}

module attributes {stable_mosaic.version = 11 : i64} {
  func.func @kernel(%arg0: i32, %arg1: i32, %arg2: memref<2x2048xbf16, #tpu.memory_space<vmem>>, %arg3: memref<2048x256xbf16, #tpu.memory_space<vmem>>, %arg4: memref<1x1x256xf32, #tpu.memory_space<vmem>>, %arg5: memref<1x256x128xf32, #tpu.memory_space<vmem>>, %arg6: memref<1x1x128xf32, #tpu.memory_space<vmem>>, %arg7: memref<1x2x128xf32, #tpu.memory_space<vmem>>, %arg8: memref<2x256xf32, #tpu.memory_space<vmem>>) attributes {dimension_semantics = [#tpu.dimension_semantics<parallel>, #tpu.dimension_semantics<arbitrary>], iteration_bounds = array<i64: 2, 4>, scalar_prefetch = 0 : i64, scratch_operands = 1 : i64, tpu.core_type = #tpu.core_type<tc>, window_params = [{transform_indices = @transform_0, window_bounds = array<i64: 2, 2048>}, {transform_indices = @transform_1, window_bounds = array<i64: 2048, 256>}, {transform_indices = @transform_2, window_bounds = array<i64: 1, 1, 256>}, {transform_indices = @transform_3, window_bounds = array<i64: 1, 256, 128>}, {transform_indices = @transform_4, window_bounds = array<i64: 1, 1, 128>}, {transform_indices = @transform_5, window_bounds = array<i64: 1, 2, 128>}]} {
    %c0_i32 = arith.constant 0 : i32
    %0 = arith.cmpi eq, %arg1, %c0_i32 : i32
    %1 = arith.extui %0 : i1 to i32
    %c0_i32_0 = arith.constant 0 : i32
    %2 = arith.cmpi ne, %1, %c0_i32_0 : i32
    scf.if %2 {
      %cst_9 = arith.constant 0.000000e+00 : f32
      %12 = vector.broadcast %cst_9 : f32 to vector<2x256xf32>
      %c0_10 = arith.constant 0 : index
      %c0_11 = arith.constant 0 : index
      %13 = vector.load %arg8[%c0_10, %c0_11] : memref<2x256xf32, #tpu.memory_space<vmem>>, vector<2x256xf32>
      tpu.vector_store %arg8[%c0_10, %c0_11], %12 {strides = array<i32>} : memref<2x256xf32, #tpu.memory_space<vmem>>, vector<2x256xf32>,
    } else {
    }
    %c0 = arith.constant 0 : index
    %c0_1 = arith.constant 0 : index
    %3 = vector.load %arg8[%c0, %c0_1] : memref<2x256xf32, #tpu.memory_space<vmem>>, vector<2x256xf32>
    %c0_2 = arith.constant 0 : index
    %c0_3 = arith.constant 0 : index
    %4 = vector.load %arg2[%c0_2, %c0_3] : memref<2x2048xbf16, #tpu.memory_space<vmem>>, vector<2x2048xbf16>
    %c0_4 = arith.constant 0 : index
    %c0_5 = arith.constant 0 : index
    %5 = vector.load %arg3[%c0_4, %c0_5] : memref<2048x256xbf16, #tpu.memory_space<vmem>>, vector<2048x256xbf16>
    %cst = arith.constant dense<0.000000e+00> : vector<2x256xf32>
    %6 = tpu.matmul %4, %5, %cst {dimension_numbers = #tpu.dot_dimension_numbers<[1], [0], [0], [1], [0, 0, 1, 1], [], []>} : vector<2x2048xbf16>, vector<2048x256xbf16>, vector<2x256xf32> -> vector<2x256xf32>
    %7 = arith.addf %3, %6 : vector<2x256xf32>
    %c0_6 = arith.constant 0 : index
    %c0_7 = arith.constant 0 : index
    %8 = vector.load %arg8[%c0_6, %c0_7] : memref<2x256xf32, #tpu.memory_space<vmem>>, vector<2x256xf32>
    tpu.vector_store %arg8[%c0_6, %c0_7], %7 {strides = array<i32>} : memref<2x256xf32, #tpu.memory_space<vmem>>, vector<2x256xf32>,
    %c3_i32 = arith.constant 3 : i32
    %9 = arith.cmpi eq, %arg1, %c3_i32 : i32
    %10 = arith.extui %9 : i1 to i32
    %c0_i32_8 = arith.constant 0 : i32
    %11 = arith.cmpi ne, %10, %c0_i32_8 : i32
    scf.if %11 {
      %c0_9 = arith.constant 0 : index
      %c0_10 = arith.constant 0 : index
      %12 = vector.load %arg8[%c0_9, %c0_10] : memref<2x256xf32, #tpu.memory_space<vmem>>, vector<2x256xf32>
      %c0_11 = arith.constant 0 : index
      %c0_12 = arith.constant 0 : index
      %c0_13 = arith.constant 0 : index
      %13 = vector.load %arg4[%c0_11, %c0_12, %c0_13] : memref<1x1x256xf32, #tpu.memory_space<vmem>>, vector<1x1x256xf32>
      %14 = vector.shape_cast %13 : vector<1x1x256xf32> to vector<1x256xf32>
      %15 = vector.broadcast %14 : vector<1x256xf32> to vector<2x256xf32>
      %16 = arith.addf %12, %15 : vector<2x256xf32>
      %cst_14 = arith.constant 0.000000e+00 : f32
      %17 = vector.broadcast %cst_14 : f32 to vector<2x256xf32>
      %18 = arith.maximumf %16, %17 : vector<2x256xf32>
      %c0_15 = arith.constant 0 : index
      %c0_16 = arith.constant 0 : index
      %c0_17 = arith.constant 0 : index
      %19 = vector.load %arg5[%c0_15, %c0_16, %c0_17] : memref<1x256x128xf32, #tpu.memory_space<vmem>>, vector<1x256x128xf32>
      %20 = vector.shape_cast %19 : vector<1x256x128xf32> to vector<256x128xf32>
      %cst_18 = arith.constant dense<0.000000e+00> : vector<2x128xf32>
      %21 = tpu.matmul %18, %20, %cst_18 {dimension_numbers = #tpu.dot_dimension_numbers<[1], [0], [0], [1], [0, 0, 1, 1], [], []>} : vector<2x256xf32>, vector<256x128xf32>, vector<2x128xf32> -> vector<2x128xf32>
      %c0_19 = arith.constant 0 : index
      %c0_20 = arith.constant 0 : index
      %c0_21 = arith.constant 0 : index
      %22 = vector.load %arg6[%c0_19, %c0_20, %c0_21] : memref<1x1x128xf32, #tpu.memory_space<vmem>>, vector<1x1x128xf32>
      %23 = vector.shape_cast %22 : vector<1x1x128xf32> to vector<1x128xf32>
      %24 = vector.broadcast %23 : vector<1x128xf32> to vector<2x128xf32>
      %25 = arith.addf %21, %24 : vector<2x128xf32>
      %c0_22 = arith.constant 0 : index
      %c0_23 = arith.constant 0 : index
      %c0_24 = arith.constant 0 : index
      %26 = vector.load %arg7[%c0_22, %c0_23, %c0_24] : memref<1x2x128xf32, #tpu.memory_space<vmem>>, vector<1x2x128xf32>
      %27 = vector.shape_cast %26 : vector<1x2x128xf32> to vector<2x128xf32>
      %28 = vector.shape_cast %25 : vector<2x128xf32> to vector<1x2x128xf32>
      tpu.vector_store %arg7[%c0_22, %c0_23, %c0_24], %28 {strides = array<i32>} : memref<1x2x128xf32, #tpu.memory_space<vmem>>, vector<1x2x128xf32>,
    } else {
    }
    return
  }
  func.func @transform_0(%arg0: i32, %arg1: i32) -> (i32, i32) {
    %c0_i32 = arith.constant 0 : i32
    %c0_i32_0 = arith.constant 0 : i32
    return %c0_i32, %arg1 : i32, i32
  }
  func.func @transform_1(%arg0: i32, %arg1: i32) -> (i32, i32) {
    %c0_i32 = arith.constant 0 : i32
    return %arg1, %arg0 : i32, i32
  }
  func.func @transform_2(%arg0: i32, %arg1: i32) -> (i32, i32, i32) {
    %c0_i32 = arith.constant 0 : i32
    %c0_i32_0 = arith.constant 0 : i32
    %c0_i32_1 = arith.constant 0 : i32
    return %arg0, %c0_i32, %c0_i32_0 : i32, i32, i32
  }
  func.func @transform_3(%arg0: i32, %arg1: i32) -> (i32, i32, i32) {
    %c0_i32 = arith.constant 0 : i32
    %c0_i32_0 = arith.constant 0 : i32
    %c0_i32_1 = arith.constant 0 : i32
    return %arg0, %c0_i32, %c0_i32_0 : i32, i32, i32
  }
  func.func @transform_4(%arg0: i32, %arg1: i32) -> (i32, i32, i32) {
    %c0_i32 = arith.constant 0 : i32
    %c0_i32_0 = arith.constant 0 : i32
    %c0_i32_1 = arith.constant 0 : i32
    return %arg0, %c0_i32, %c0_i32_0 : i32, i32, i32
  }
  func.func @transform_5(%arg0: i32, %arg1: i32) -> (i32, i32, i32) {
    %c0_i32 = arith.constant 0 : i32
    %c0_i32_0 = arith.constant 0 : i32
    %c0_i32_1 = arith.constant 0 : i32
    return %arg0, %c0_i32, %c0_i32_0 : i32, i32, i32
  }
}

</mosaic_0001>

<bundles_post_ra>
// kernel: screen_net_forward.3
= control target key start
LH: loop header
LB: loop body
LE: loop exit
PB: predicated region body
PF: predicated region fallthrough
CT: control target
= control target key end

     0   :  { %s4515_s0 = inlined_call_operand.vmem [shape: bf16[2,8192], index: 0, kind: input, shape index: {}]   ;;  %s4516_s1 = inlined_call_operand.hbm [shape: bf16[8192,512], index: 1, kind: input, shape index: {}]   ;;  %s4517_s2 = inlined_call_operand.hbm [shape: f32[2,1,256], index: 2, kind: input, shape index: {}]   ;;  %s4518_s3 = inlined_call_operand.hbm [shape: f32[2,256,128], index: 3, kind: input, shape index: {}]   ;;  %s4519_s4 = inlined_call_operand.hbm [shape: f32[2,1,128], index: 4, kind: input, shape index: {}]   ;;  %s4520_s5 = inlined_call_operand.vmem [shape: f32[2,2,128], index: 5, kind: output, shape index: {}]  }
   0x1   :  { %4534 = sst [smem:[#allocation19_spill]] %s4515_s0 }
   0x2   :  { %4535 = sst [smem:[#allocation20_spill]] %s4516_s1 }
   0x3   :  { %4536 = sst [smem:[#allocation21_spill]] %s4517_s2 }
   0x4   :  { %4537 = sst [smem:[#allocation22_spill]] %s4520_s5 }
   0x5   :  { %10 = vsyncpa [#allocation4], 0 }
   0x6   :  { %12 = vsyncpa [#allocation4 + $0x1], 0 }
   0x7   :  { %13 = vsyncpa [#allocation6], 0 }
   0x8   :  { %15 = vsyncpa [#allocation6 + $0x1], 0 }
   0x9   :  { %16 = vsyncpa [#allocation9], 0 }
   0xa   :  { %18 = vsyncpa [#allocation9 + $0x1], 0  ;;  %s3830_s18 = smov 0   ;;  %s3832_s19 = smov 0  }
   0xb   :  { %s3834_s20 = smov 0   ;;  %s3836_s21 = smov 0  }
   0xc   :  { %s3838_s22 = smov 0   ;;  %s3840_s23 = smov 0  }
   0xd   :  { %s3842_s24 = smov 0   ;;  %s3844_s25 = smov 0  }
   0xe   :  { %s3846_s26 = smov 0   ;;  %s3848_s27 = smov 0  }
   0xf   :  { %s3850_s28 = smov 0  }
  0x10 LB: > { %4538 = sst [smem:[#allocation13_spill]] %s3752_s19  ;;  %s4521_s29 = sadd.s32 4294967295, %s3788_s28   ;;  %s3788_s28 = sphi %s3850_s28, %s24_s28   ;;  %s3784_s27 = sphi %s3848_s27, %s4583_s27   ;;  %s3780_s26 = sphi %s3846_s26, %s4582_s26   ;;  %s3776_s25 = sphi %s3844_s25, %s4581_s25   ;;  %s3772_s24 = sphi %s3842_s24, %s4580_s24   ;;  %s3768_s23 = sphi %s3840_s23, %s4579_s23   ;;  %s3764_s22 = sphi %s3838_s22, %s4578_s22   ;;  %s3760_s21 = sphi %s3836_s21, %s4577_s21   ;;  %s3756_s20 = sphi %s3834_s20, %s4576_s20   ;;  %s3752_s19 = sphi %s3832_s19, %s4575_s19   ;;  %s3748_s18 = sphi %s3830_s18, %s4574_s18  }
  0x11   : > { %4539 = sst [smem:[#allocation14_spill]] %s3772_s24  ;;  %p78_p0 = scmp.ne.s32.totalorder %s3768_s23, %s3764_s22 }
  0x12   : > { %4540 = sst [smem:[#allocation15_spill]] %s3776_s25  ;;  %p79_p1 = scmp.eq.s32.totalorder %s3788_s28, 0 }
  0x13   : > { %p84_p2 = scmp.ne.s32.totalorder %s3764_s22, %s3760_s21  ;;  %p85_p3 = scmp.eq.s32.totalorder %s4521_s29, 0 }
  0x14   : > { %p80_p4 = por %p79_p1, %p78_p0  ;;  %p104_p6 = scmp.ne.s32.totalorder %s3756_s20, %s3752_s19 }
  0x15   : > { %p3890_p5 = por %p85_p3, %p84_p2  ;;  %p110_p7 = scmp.ne.s32.totalorder %s3752_s19, %s3748_s18 }
  0x16   : > { %p106_p8 = por %p104_p6, %p79_p1  ;;  %p3089_p9 = scmp.lt.s32.totalorder %s3788_s28, 8 }
  0x17   : > { %s4541_s7 = scalar_select %p3890_p5, 1, 0 }
  0x18   : > { %p3898_p10 = por %p110_p7, %p85_p3  ;;  %s244_s9 = sand.u32 1, %s3788_s28  }
  0x19   : > { %p3903_p11 = pnand %p3089_p9, %p80_p4  ;;  %s3908_s11 = sand.u32 1, %s3756_s20  }
  0x1a   : > { %s4542_s8 = scalar_select %p3898_p10, 1, 0 }
  0x1b   : > { %s4544_s10 = scalar_select %p3903_p11, 1, 0 }
  0x1c   : > { %4543 = sst [smem:[#allocation16_spill]] %s4542_s8  ;;  %s2973_s12 = sshll.u32 %s3784_s27, 5 }
  0x1d   : > { %s2698_s13 = sshll.u32 %s3908_s11, 1  ;;  %s4545_s2 = sld [smem:[#allocation21_spill]] }
  0x1e   : > { %s248_s17 = scalar_lea.vmem [#allocation5], %s2698_s13  ;;  %p3917_p12 = pnand %p3089_p9, %p106_p8 }
  0x1f   : > { %s256_s18 = sshll.u32 %s248_s17, 4  ;;  %s3925_s30 = scalar_lea.sflag [#allocation6], %s244_s9  ;;  %s3921_s18 = int_to_ptr.vmem [resolvable:$true] %s256_s18 }
  0x20   : > { %s4546_s21 = scalar_select %p3917_p12, 1, 0 }
  0x21   : > { %p3931_p1 = pneg %p3917_p12 }
  0x23   : > { %s3915_s16 = scalar_lea.hbm %s4545_s2, %s2973_s12  ;;  %s3575_s17 = scalar_lea.hbm %s4545_s2, 64 }
  0x24   : > { %s3570_s14 = scalar_lea.hbm %s3915_s16, 32  ;;  %p3576_p4 = scmp.lt.u32.totalorder %s3915_s16, %s4545_s2 }
  0x25   : > { %p3571_p0 = scmp.ne.s32.totalorder %s3915_s16, %s3570_s14  ;;  %p3577_p6 = scmp.lt.u32.totalorder %s3575_s17, %s3570_s14 }
  0x26   : > { %p3579_p8 = scmp.lt.u32.totalorder %s3570_s14, %s3915_s16 }
  0x27   : > { %p3573_p2 = pnand %p3931_p1, %p3571_p0  ;;  %p3578_p7 = por %p3577_p6, %p3576_p4 }
  0x29   : > { %p3574_p3 = pneg %p3573_p2  ;;  %p3580_p9 = por %p3579_p8, %p3578_p7 }
  0x2b   : > { %p3581_p13 = pnand %p3580_p9, %p3574_p3 }
  0x2d   : > { %3584 = shalt.err (!%p3581_p13)
}
  0x2e   : > { %s3585_s9 = scalar_lea.vmem %s3921_s18, 32  ;;  %s3790_s13 = smov [#allocation5]  }
  0x2f   : > { %p3586_p0 = scmp.ne.s32.totalorder %s3921_s18, %s3585_s9  ;;  %s3590_s15 = sshll.u32 %s3790_s13, 4  ;;  %s3591_s15 = int_to_ptr.vmem [resolvable:$false] %s3590_s15 }
  0x30   : > { %s3592_s29 = scalar_lea.vmem %s3591_s15, 64  ;;  %p3593_p5 = scmp.lt.s32.totalorder %s3921_s18, %s3591_s15 }
  0x31   : > { %p3588_p2 = pnand %p3586_p0, %p3931_p1  ;;  %p3594_p11 = scmp.lt.s32.totalorder %s3592_s29, %s3585_s9 }
  0x33   : > { %p3589_p10 = pneg %p3588_p2  ;;  %p3595_p4 = por %p3594_p11, %p3593_p5 }
  0x35   : > { %p3596_p6 = pnand %p3595_p4, %p3589_p10 }
  0x37   : > { %3599 = shalt.err (!%p3596_p6)
}
  0x38   : > { %3082 = dma.hbm_to_vmem [thread:$0]  (!%p3917_p12), %s3915_s16, 32, %s3921_s18, %s3925_s30  }
  0x39   : > { %p299_p13 = scmp.lt.s32.totalorder %s3788_s28, 9  ;;  %p4548_p3 = scmp.ge.s32.totalorder %s3788_s28, 1 }
  0x3a   : > { %s33_s14 = sadd.s32 1, %s3780_s26  ;;  %s36_s17 = sadd.s32 1, %s3784_s27 }
  0x3b   : > { %p3958_p5 = pnand %p4548_p3, %p299_p13  ;;  %p34_p10 = scmp.ge.s32.totalorder %s33_s14, 4 }
  0x3c   : > { %s220_s9 = sand.u32 1, %s3768_s23   ;;  %s2695_s16 = sshll.u32 %s3784_s27, 1 }
  0x3d   : > { %s4549_s6 = scalar_select %p3958_p5, 1, 0 }
  0x3e   : > { %s2693_s13 = sshll.u32 %s220_s9, 11  ;;  %s4585_s14 = smov (%p34_p10, %s33_s14), 0 }
  0x3f   : > { %4550 = sst [smem:[#allocation17_spill]] %s4585_s14  ;;  %s4587_s17 = smov (!%p34_p10, %s36_s17), %s3784_s27 }
  0x40   : > { %s66_s15 = ssub.s32 %s3780_s26, %s4585_s14  ;;  %p38_p11 = scmp.ge.s32.totalorder %s4587_s17, 2 }
  0x41   : > { %s2972_s18 = sshll.u32 %s3780_s26, 10  ;;  %s224_s29 = scalar_lea.vmem [#allocation3], %s2693_s13 }
  0x42   : > { %s234_s2 = sshll.u32 %s224_s29, 4  ;;  %s4589_s17 = smov (%p38_p11, %s4587_s17), 0  ;;  %s3974_s2 = int_to_ptr.vmem [resolvable:$true] %s234_s2 }
  0x43   : > { %4551 = sst [smem:[#allocation18_spill]] %s4589_s17  ;;  %s231_s5 = sadd.s32 %s2972_s18, %s2695_s16 }
  0x44   : > { %s67_s0 = ssub.s32 %s3784_s27, %s4589_s17  ;;  %s2697_s25 = sshll.u32 %s231_s5, 6 }
  0x45   : > { %s68_s24 = sor.u32 %s67_s0, %s66_s15  ;;  %p95_p7 = scmp.eq.s32.totalorder %s67_s0, 0 }
  0x46   : > { %p69_p8 = scmp.eq.s32.totalorder %s68_s24, 0  ;;  %s4552_s1 = sld [smem:[#allocation20_spill]] }
  0x47   : > { %s4553_s13 = sadd.s32 1, %s3756_s20  ;;  %s4554_s16 = sadd.s32 1, %s3768_s23 }
  0x48   : > { %s3986_s29 = scalar_select %p95_p7, %s3756_s20, %s4553_s13  }
  0x49   : > { %s3991_s18 = scalar_select %p69_p8, %s3768_s23, %s4554_s16  }
  0x4a   : > { %s3993_s17 = scalar_lea.sflag [#allocation4], %s220_s9  ;;  %p4555_p0 = scmp.ne.s32.totalorder %s4544_s10, 0 }
  0x4c   : > { %s3981_s19 = scalar_lea.hbm %s4552_s1, %s2697_s25  ;;  %p3602_p2 = pneg %p4555_p0 }
  0x4d   : > { %s3600_s5 = scalar_lea.hbm %s3981_s19, 32768  ;;  %s3605_s25 = scalar_lea.hbm %s4552_s1, 262144 }
  0x4e   : > { %p3601_p9 = scmp.ne.s32.totalorder %s3981_s19, %s3600_s5  ;;  %p3606_p13 = scmp.lt.u32.totalorder %s3981_s19, %s4552_s1 }
  0x4f   : > { %p3607_p3 = scmp.lt.u32.totalorder %s3605_s25, %s3600_s5  ;;  %p3609_p11 = scmp.lt.u32.totalorder %s3600_s5, %s3981_s19 }
  0x50   : > { %p3603_p4 = pnand %p3602_p2, %p3601_p9 }
  0x51   : > { %p3608_p10 = por %p3607_p3, %p3606_p13 }
  0x52   : > { %p3604_p6 = pneg %p3603_p4 }
  0x53   : > { %p3610_p7 = por %p3609_p11, %p3608_p10 }
  0x55   : > { %p3611_p8 = pnand %p3610_p7, %p3604_p6 }
  0x57   : > { %3614 = shalt.err (!%p3611_p8)
}
  0x58   : > { %s3615_s9 = scalar_lea.vmem %s3974_s2, 32768  ;;  %s3791_s15 = smov [#allocation3]  }
  0x59   : > { %p3616_p9 = scmp.ne.s32.totalorder %s3974_s2, %s3615_s9  ;;  %s3620_s13 = sshll.u32 %s3791_s15, 4  ;;  %s3621_s13 = int_to_ptr.vmem [resolvable:$false] %s3620_s13 }
  0x5a   : > { %s3622_s16 = scalar_lea.vmem %s3621_s13, 65536  ;;  %p3623_p12 = scmp.lt.s32.totalorder %s3974_s2, %s3621_s13 }
  0x5b   : > { %p3618_p4 = pnand %p3616_p9, %p3602_p2  ;;  %p3624_p13 = scmp.lt.s32.totalorder %s3622_s16, %s3615_s9 }
  0x5d   : > { %p3619_p5 = pneg %p3618_p4  ;;  %p3625_p3 = por %p3624_p13, %p3623_p12 }
  0x5f   : > { %p3626_p10 = pnand %p3625_p3, %p3619_p5 }
  0x61   : > { %3629 = shalt.err (!%p3626_p10)
}
  0x62   : > { %s3792_s5 = smov 256   ;;  %s3793_s0 = smov 128  }
  0x63   : > { %s3794_s24 = smov 8   ;;  %s2974_s25 = sshll.u32 %s3784_s27, 12 }
  0x64   : > { %3079 = dma.hbm_to_vmem [thread:$0]  (!%p4555_p0), %s3981_s19, 32768, %s3974_s2, %s3993_s17, %s3792_s5, %s3793_s0, %s3794_s24  }
  0x65   : > { %s4556_s8 = sshll.u32 %s3908_s11, 8  ;;  %s4029_s16 = scalar_lea.hbm %s4518_s3, %s2974_s25 }
  0x66   : > { %s267_s14 = scalar_lea.vmem [#allocation7], %s4556_s8  ;;  %s3630_s1 = scalar_lea.hbm %s4029_s16, 4096 }
  0x67   : > { %s274_s9 = sshll.u32 %s267_s14, 4  ;;  %p3631_p12 = scmp.ne.s32.totalorder %s4029_s16, %s3630_s1  ;;  %s4031_s9 = int_to_ptr.vmem [resolvable:$true] %s274_s9 }
  0x68   : > { %s3635_s10 = scalar_lea.hbm %s4518_s3, 8192  ;;  %p3636_p2 = scmp.lt.u32.totalorder %s4029_s16, %s4518_s3 }
  0x69   : > { %p3633_p5 = pnand %p3631_p12, %p3931_p1  ;;  %p3637_p6 = scmp.lt.u32.totalorder %s3635_s10, %s3630_s1 }
  0x6a   : > { %p3639_p7 = scmp.lt.u32.totalorder %s3630_s1, %s4029_s16 }
  0x6b   : > { %p3634_p0 = pneg %p3633_p5  ;;  %p3638_p11 = por %p3637_p6, %p3636_p2 }
  0x6d   : > { %p3640_p8 = por %p3639_p7, %p3638_p11 }
  0x6f   : > { %p3641_p9 = pnand %p3640_p8, %p3634_p0 }
  0x71   : > { %3644 = shalt.err (!%p3641_p9)
}
  0x72   : > { %s3645_s25 = scalar_lea.vmem %s4031_s9, 4096  ;;  %s3795_s8 = smov [#allocation7]  }
  0x73   : > { %p3646_p4 = scmp.ne.s32.totalorder %s4031_s9, %s3645_s25  ;;  %s3650_s14 = sshll.u32 %s3795_s8, 4  ;;  %s3651_s14 = int_to_ptr.vmem [resolvable:$false] %s3650_s14 }
  0x74   : > { %s3652_s15 = scalar_lea.vmem %s3651_s14, 8192  ;;  %p3653_p10 = scmp.lt.s32.totalorder %s4031_s9, %s3651_s14 }
  0x75   : > { %p3648_p13 = pnand %p3646_p4, %p3931_p1  ;;  %p3654_p12 = scmp.lt.s32.totalorder %s3652_s15, %s3645_s25 }
  0x77   : > { %p3649_p3 = pneg %p3648_p13  ;;  %p3655_p5 = por %p3654_p12, %p3653_p10 }
  0x79   : > { %p3656_p2 = pnand %p3655_p5, %p3649_p3 }
  0x7b   : > { %3659 = shalt.err (!%p3656_p2)
}
  0x7c   : > { %p4557_p0 = scmp.ne.s32.totalorder %s4546_s21, 0  ;;  %s2704_s1 = sshll.u32 %s3784_s27, 4 }
  0x7d   : > { %s287_s13 = scalar_lea.vmem [#allocation8], %s3908_s11  ;;  %s4063_s17 = scalar_lea.hbm %s4519_s4, %s2704_s1 }
  0x7e   : > { %3085 = dma.hbm_to_vmem [thread:$0]  (!%p4557_p0), %s4029_s16, 4096, %s4031_s9, %s3925_s30, %s3793_s0, %s3793_s0, %s3794_s24  }
  0x7f   : > { %s294_s2 = sshll.u32 %s287_s13, 4  ;;  %s285_s5 = scalar_lea.sflag [#allocation9], %s3908_s11  ;;  %s295_s2 = int_to_ptr.vmem [resolvable:$true] %s294_s2 }
  0x80   : > { %s3660_s25 = scalar_lea.hbm %s4063_s17, 16  ;;  %s3665_s24 = scalar_lea.hbm %s4519_s4, 32 }
  0x81   : > { %p3661_p6 = scmp.ne.s32.totalorder %s4063_s17, %s3660_s25  ;;  %p3666_p8 = scmp.lt.u32.totalorder %s4063_s17, %s4519_s4 }
  0x82   : > { %p3667_p9 = scmp.lt.u32.totalorder %s3665_s24, %s3660_s25  ;;  %p3669_p13 = scmp.lt.u32.totalorder %s3660_s25, %s4063_s17 }
  0x83   : > { %p3663_p11 = pnand %p3661_p6, %p3931_p1 }
  0x84   : > { %p3668_p4 = por %p3667_p9, %p3666_p8 }
  0x85   : > { %p3664_p7 = pneg %p3663_p11 }
  0x86   : > { %p3670_p3 = por %p3669_p13, %p3668_p4 }
  0x88   : > { %p3671_p10 = pnand %p3670_p3, %p3664_p7 }
  0x8a   : > { %3674 = shalt.err (!%p3671_p10)
}
  0x8b   : > { %s3675_s11 = scalar_lea.vmem %s295_s2, 16  ;;  %s3796_s8 = smov [#allocation8]  }
  0x8c   : > { %p3676_p12 = scmp.ne.s32.totalorder %s295_s2, %s3675_s11  ;;  %s3680_s14 = sshll.u32 %s3796_s8, 4  ;;  %s3681_s14 = int_to_ptr.vmem [resolvable:$false] %s3680_s14 }
  0x8d   : > { %s3682_s15 = scalar_lea.vmem %s3681_s14, 32  ;;  %p3683_p6 = scmp.lt.s32.totalorder %s295_s2, %s3681_s14 }
  0x8e   : > { %p3678_p5 = pnand %p3676_p12, %p3931_p1  ;;  %p3684_p11 = scmp.lt.s32.totalorder %s3682_s15, %s3675_s11 }
  0x90   : > { %p3679_p2 = pneg %p3678_p5  ;;  %p3685_p0 = por %p3684_p11, %p3683_p6 }
  0x92   : > { %p3686_p8 = pnand %p3685_p0, %p3679_p2 }
  0x94   : > { %3689 = shalt.err (!%p3686_p8)
}
  0x95   : > { %p4558_p9 = scmp.ne.s32.totalorder %s4546_s21, 0  ;;  %p4559_p7 = scmp.ne.s32.totalorder %s4549_s6, 0 }
  0x96   : > { %s305_s12 = sand.u32 (!%p4559_p7), 1, %s3764_s22   ;;  %p4560_p1 = scmp.ne.s32.totalorder (!%p4559_p7), %s4541_s7, 0 }
  0x97   : > { %3088 = dma.hbm_to_vmem [thread:$0]  (!%p4558_p9), %s4063_s17, 16, %s295_s2, %s285_s5  }
  0x98   : > { %303 = sbr.rel (%p4559_p7) target bundleno = 905 (0x389), region = 40  ;;  %s2706_s1 = sshll.u32 (!%p4559_p7), %s305_s12, 11 }
  0x99   : > { %s306_s13 = scalar_lea.sflag (!%p4559_p7), [#allocation4], %s305_s12  ;;  %s4086_s19 = scalar_lea.vmem (!%p4559_p7), [#allocation3], %s2706_s1 }
  0x9f   : > { %3735 = dma.done.wait (%p4560_p1), %s306_s13, 32768  }
  0xa0   : > { %3737 = vsyncadd (%p4560_p1), %s306_s13, 4294934528  ;;  %s4561_s10 = sadd.s32 4294967295, %s3788_s28   ;;  %s4562_s21 = sld [smem:[#allocation13_spill]] }
  0xa1   : > { %s4563_s25 = sld [smem:[#allocation16_spill]]  ;;  %s314_s2 = sand.u32 1, %s4561_s10  }
  0xa2   : > { %s315_s5 = scalar_lea.sflag [#allocation6], %s314_s2 }
  0xa6   : > { %s4095_s17 = sand.u32 1, %s4562_s21  }
  0xa7   : > { %s2707_s6 = sshll.u32 %s4095_s17, 1  ;;  %p4564_p0 = scmp.ne.s32.totalorder %s4563_s25, 0 }
  0xa8   : > { %s4098_s30 = scalar_lea.vmem [#allocation5], %s2707_s6 }
  0xa9   : > { %3739 = dma.done.wait (%p4564_p0), %s315_s5, 4128  }
  0xaa   : > { %3741 = vsyncadd (%p4564_p0), %s315_s5, 4294963168  ;;  %s2708_s7 = sshll.u32 %s4095_s17, 8  ;;  %s333_s24 = scalar_lea.sflag [#allocation9], %s4095_s17 }
  0xab   : > { %s4105_s0 = scalar_lea.vmem [#allocation7], %s2708_s7  ;;  %s335_s9 = scalar_lea.vmem [#allocation8], %s4095_s17 }
  0xac   : > { %3743 = dma.done.wait (%p4564_p0), %s333_s24, 16  }
  0xad   : > { %3745 = vsyncadd (%p4564_p0), %s333_s24, 4294967280  ;;  %s4565_s16 = sld [smem:[#allocation14_spill]]  ;;  %s4566_s11 = sld [smem:[#allocation15_spill]] }
  0xae   : > { %s4567_s1 = sld [smem:[#allocation19_spill]]  ;;  %s4568_s2 = sld [smem:[#allocation22_spill]] }
  0xb3   : > { %s2709_s8 = sshll.u32 %s4565_s16, 4  ;;  %p386_p4 = scmp.lt.s32.totalorder %s4566_s11, 1 }
  0xb4   : > { %p380_p13 = scmp.lt.s32.totalorder %s2709_s8, 63  ;;  %p2711_p3 = scmp.ne.s32.totalorder %s4565_s16, 0 }
  0xb5   : > { %s4591_s11 = smov (!%p386_p4, %s4566_s11), 1  ;;  %v3797_v0 = vmov (!%p2711_p3), 0.0  }
  0xb6   : > { %s4593_s8 = smov (!%p380_p13, %s2709_s8), 63  ;;  %s2710_s14 = sshll.u32 %s4591_s11, 1  ;;  %394 = vst [vmem:[#allocation2] sm:$0xf] (!%p2711_p3), %v3797_v0 }
  0xb7   : > { %s4119_s13 = scalar_lea.vmem %s4567_s1, %s4593_s8  ;;  %s4124_s6 = scalar_lea.vmem %s4568_s2, %s2710_s14 }
  0xb8   : > { %393 = sbr.rel (%p2711_p3) target bundleno = 191 (0xbf), region = 60 }
  0xbf PF: > { %v3184_v1 = vld [vmem:[%s4086_s19 + $0x4] ss:$8 sps:$4 sm:$0xff]   ;;  %v3188_v3 = vld [vmem:[%s4086_s19] ss:$8 sps:$4 sm:$0xff]   ;;  %v3190_v5 = vld [vmem:[%s4086_s19 + $0x14] ss:$8 sps:$4 sm:$0xff]   ;;  %v660_v39 = vlaneseq }
  0xc0   : > { %v3186_v2 = vld [vmem:[%s4086_s19 + $0x404] ss:$8 sps:$4 sm:$0xff]   ;;  %2050 = vmatprep.subr.bf16.mxu1 %v3184_v1  ;;  %v3189_v4 = vld [vmem:[%s4086_s19 + $0x400] ss:$8 sps:$4 sm:$0xff]   ;;  %v3192_v6 = vld [vmem:[%s4086_s19 + $0x414] ss:$8 sps:$4 sm:$0xff]  }
  0xc1   : > { %2214 = vmatprep.subr.bf16.mxu0 %v3186_v2  ;;  %2051 = vmatpush1.bf16.msra.mxu1 %v3188_v3  ;;  %v3194_v7 = vld [vmem:[%s4086_s19 + $0x10] ss:$8 sps:$4 sm:$0xff]   ;;  %v3196_v9 = vld [vmem:[%s4086_s19 + $0x24] ss:$8 sps:$4 sm:$0xff]   ;;  %v3200_v11 = vld [vmem:[%s4086_s19 + $0x20] ss:$8 sps:$4 sm:$0xff]  }
  0xc2   : > { %2215 = vmatpush1.bf16.msra.mxu0 %v3189_v4  ;;  %2052 = vmatprep.subr.bf16.mxu1 %v3190_v5  ;;  %v3195_v8 = vld [vmem:[%s4086_s19 + $0x410] ss:$8 sps:$4 sm:$0xff]   ;;  %v3198_v10 = vld [vmem:[%s4086_s19 + $0x424] ss:$8 sps:$4 sm:$0xff]   ;;  %v3201_v12 = vld [vmem:[%s4086_s19 + $0x420] ss:$8 sps:$4 sm:$0xff]  }
  0xc3   : > { %2216 = vmatprep.subr.bf16.mxu0 %v3192_v6  ;;  %v3202_v13 = vld [vmem:[%s4086_s19 + $0x34] ss:$8 sps:$4 sm:$0xff]   ;;  %v3206_v15 = vld [vmem:[%s4086_s19 + $0x30] ss:$8 sps:$4 sm:$0xff]   ;;  %v3208_v17 = vld [vmem:[%s4086_s19 + $0x44] ss:$8 sps:$4 sm:$0xff]  }
  0xc4   : > { %v3204_v14 = vld [vmem:[%s4086_s19 + $0x434] ss:$8 sps:$4 sm:$0xff]   ;;  %v3207_v16 = vld [vmem:[%s4086_s19 + $0x430] ss:$8 sps:$4 sm:$0xff]   ;;  %v3210_v18 = vld [vmem:[%s4086_s19 + $0x444] ss:$8 sps:$4 sm:$0xff]  }
  0xc5   : > { %2053 = vmatpush1.bf16.msra.mxu1 %v3194_v7  ;;  %v3212_v19 = vld [vmem:[%s4086_s19 + $0x40] ss:$8 sps:$4 sm:$0xff]   ;;  %v3214_v21 = vld [vmem:[%s4086_s19 + $0x54] ss:$8 sps:$4 sm:$0xff]   ;;  %v3218_v23 = vld [vmem:[%s4086_s19 + $0x50] ss:$8 sps:$4 sm:$0xff]  }
  0xc6   : > { %2217 = vmatpush1.bf16.msra.mxu0 %v3195_v8  ;;  %2054 = vmatprep.subr.bf16.mxu1 %v3196_v9  ;;  %v3213_v20 = vld [vmem:[%s4086_s19 + $0x440] ss:$8 sps:$4 sm:$0xff]   ;;  %v3216_v22 = vld [vmem:[%s4086_s19 + $0x454] ss:$8 sps:$4 sm:$0xff]   ;;  %v3219_v24 = vld [vmem:[%s4086_s19 + $0x450] ss:$8 sps:$4 sm:$0xff]  }
  0xc7   : > { %2218 = vmatprep.subr.bf16.mxu0 %v3198_v10  ;;  %v3220_v25 = vld [vmem:[%s4086_s19 + $0x64] ss:$8 sps:$4 sm:$0xff]   ;;  %v3224_v27 = vld [vmem:[%s4086_s19 + $0x60] ss:$8 sps:$4 sm:$0xff]   ;;  %v3226_v29 = vld [vmem:[%s4086_s19 + $0x74] ss:$8 sps:$4 sm:$0xff]  }
  0xc8   : > { %v3222_v26 = vld [vmem:[%s4086_s19 + $0x464] ss:$8 sps:$4 sm:$0xff]   ;;  %v3225_v28 = vld [vmem:[%s4086_s19 + $0x460] ss:$8 sps:$4 sm:$0xff]   ;;  %v3228_v30 = vld [vmem:[%s4086_s19 + $0x474] ss:$8 sps:$4 sm:$0xff]  }
  0xc9   : > { %2055 = vmatpush1.bf16.msra.mxu1 %v3200_v11  ;;  %v3230_v31 = vld [vmem:[%s4086_s19 + $0x70] ss:$8 sps:$4 sm:$0xff]   ;;  %v3232_v33 = vld [vmem:[%s4086_s19 + $0x84] ss:$8 sps:$4 sm:$0xff]   ;;  %v3236_v35 = vld [vmem:[%s4086_s19 + $0x80] ss:$8 sps:$4 sm:$0xff]  }
  0xca   : > { %2219 = vmatpush1.bf16.msra.mxu0 %v3201_v12  ;;  %2056 = vmatprep.subr.bf16.mxu1 %v3202_v13  ;;  %v3231_v32 = vld [vmem:[%s4086_s19 + $0x470] ss:$8 sps:$4 sm:$0xff]   ;;  %v3234_v34 = vld [vmem:[%s4086_s19 + $0x484] ss:$8 sps:$4 sm:$0xff]   ;;  %v3237_v36 = vld [vmem:[%s4086_s19 + $0x480] ss:$8 sps:$4 sm:$0xff]  }
  0xcb   : > { %2220 = vmatprep.subr.bf16.mxu0 %v3204_v14  ;;  %v3798_v37 = vmov 1966171168   ;;  %v3238_v40 = vld [vmem:[%s4086_s19 + $0x94] ss:$8 sps:$4 sm:$0xff]   ;;  %v3242_v42 = vld [vmem:[%s4086_s19 + $0x90] ss:$8 sps:$4 sm:$0xff]  }
  0xcc   : > { %v658_v38 = vunpack.c.l.s4 %v3798_v37  ;;  %v3240_v41 = vld [vmem:[%s4086_s19 + $0x494] ss:$8 sps:$4 sm:$0xff]   ;;  %v4166_v44 = vshrl.u32 %v660_v39, 7  ;;  %v3243_v45 = vld [vmem:[%s4086_s19 + $0x490] ss:$8 sps:$4 sm:$0xff]   ;;  %v397_v57 = vld [vmem:[%s4119_s13 + $0x8] sm:$0xff] }
  0xcd   : > { %2057 = vmatpush1.bf16.msra.mxu1 %v3206_v15  ;;  %v3244_v46 = vld [vmem:[%s4086_s19 + $0xa4] ss:$8 sps:$4 sm:$0xff]   ;;  %v3248_v48 = vld [vmem:[%s4086_s19 + $0xa0] ss:$8 sps:$4 sm:$0xff]   ;;  %v3250_v51 = vld [vmem:[%s4086_s19 + $0xb4] ss:$8 sps:$4 sm:$0xff]   ;;  %v705_v14 = vcombine.high %v397_v57, %v397_v57 }
  0xce   : > { %2221 = vmatpush1.bf16.msra.mxu0 %v3207_v16  ;;  %2058 = vmatprep.subr.bf16.mxu1 %v3208_v17  ;;  %v659_v43 = vunpack.c.0.s8 %v658_v38  ;;  %v3246_v47 = vld [vmem:[%s4086_s19 + $0x4a4] ss:$8 sps:$4 sm:$0xff]   ;;  %v3249_v49 = vld [vmem:[%s4086_s19 + $0x4a0] ss:$8 sps:$4 sm:$0xff]   ;;  %v3252_v52 = vld [vmem:[%s4086_s19 + $0x4b4] ss:$8 sps:$4 sm:$0xff]  }
  0xcf   : > { %2222 = vmatprep.subr.bf16.mxu0 %v3210_v18  ;;  %v396_v53 = vld [vmem:[%s4119_s13] sm:$0xff]  ;;  %v3254_v54 = vld [vmem:[%s4086_s19 + $0xb0] ss:$8 sps:$4 sm:$0xff]   ;;  %v3256_v58 = vld [vmem:[%s4086_s19 + $0xc4] ss:$8 sps:$4 sm:$0xff]  }
  0xd0   : > { %v4174_v50 = vsub.s32 %v659_v43, %v4166_v44  ;;  %v3255_v56 = vld [vmem:[%s4086_s19 + $0x4b0] ss:$8 sps:$4 sm:$0xff]   ;;  %v3258_v59 = vld [vmem:[%s4086_s19 + $0x4c4] ss:$8 sps:$4 sm:$0xff]   ;;  %v3260_v0 = vld [vmem:[%s4086_s19 + $0xc0] ss:$8 sps:$4 sm:$0xff]   ;;  %v656_v13 = vcombine.high %v396_v53, %v396_v53 }
  0xd1   : > { %2059 = vmatpush1.bf16.msra.mxu1 %v3212_v19  ;;  %v3261_v1 = vld [vmem:[%s4086_s19 + $0x4c0] ss:$8 sps:$4 sm:$0xff]   ;;  %v3262_v2 = vld [vmem:[%s4086_s19 + $0xd4] ss:$8 sps:$4 sm:$0xff]   ;;  %v3266_v5 = vld [vmem:[%s4086_s19 + $0xd0] ss:$8 sps:$4 sm:$0xff]  }
  0xd2   : > { %2223 = vmatpush1.bf16.msra.mxu0 %v3213_v20  ;;  %2060 = vmatprep.subr.bf16.mxu1 %v3214_v21  ;;  %v663_v55 = vrot.slane %v396_v53, %v4174_v50  ;;  %v712_v61 = vrot.slane %v397_v57, %v4174_v50  ;;  %v3264_v3 = vld [vmem:[%s4086_s19 + $0x4d4] ss:$8 sps:$4 sm:$0xff]   ;;  %v3267_v6 = vld [vmem:[%s4086_s19 + $0x4d0] ss:$8 sps:$4 sm:$0xff]   ;;  %v3268_v7 = vld [vmem:[%s4086_s19 + $0xe4] ss:$8 sps:$4 sm:$0xff]   ;;  %v670_v19 = vrot.slane %v656_v13, %v4174_v50 }
  0xd3   : > { %2224 = vmatprep.subr.bf16.mxu0 %v3216_v22  ;;  %v3270_v8 = vld [vmem:[%s4086_s19 + $0x4e4] ss:$8 sps:$4 sm:$0xff]   ;;  %v3272_v9 = vld [vmem:[%s4086_s19 + $0xe0] ss:$8 sps:$4 sm:$0xff]   ;;  %v3274_v11 = vld [vmem:[%s4086_s19 + $0xf4] ss:$8 sps:$4 sm:$0xff]   ;;  %v719_v20 = vrot.slane %v705_v14, %v4174_v50 }
  0xd4   : > { %v671_v60 = vcombine.high %v663_v55, %v663_v55  ;;  %v720_v63 = vcombine.high %v712_v61, %v712_v61  ;;  %v3273_v10 = vld [vmem:[%s4086_s19 + $0x4e0] ss:$8 sps:$4 sm:$0xff]   ;;  %v3276_v12 = vld [vmem:[%s4086_s19 + $0x4f4] ss:$8 sps:$4 sm:$0xff]   ;;  %v3278_v15 = vld [vmem:[%s4086_s19 + $0xf0] ss:$8 sps:$4 sm:$0xff]   ;;  %v4210_v21 = vrot.slane %v663_v55, %v4174_v50  ;;  %v4213_v22 = vrot.slane %v712_v61, %v4174_v50 }
  0xd5   : > { %2061 = vmatpush1.bf16.msra.mxu1 %v3218_v23  ;;  %v3279_v16 = vld [vmem:[%s4086_s19 + $0x4f0] ss:$8 sps:$4 sm:$0xff]   ;;  %v3283_v17 = vld [vmem:[%s4086_s19 + $0x104] ss:$8 sps:$4 sm:$0xff]   ;;  %v672_v23 = vcombine.high %v670_v19, %v670_v19  ;;  %v3294_v39 = vld [vmem:[%s4086_s19 + $0x120] ss:$8 sps:$4 sm:$0xff]  }
  0xd6   : > { %2225 = vmatpush1.bf16.msra.mxu0 %v3219_v24  ;;  %2062 = vmatprep.subr.bf16.mxu1 %v3220_v25  ;;  %v4187_v62 = vrot.slane %v671_v60, %v4174_v50  ;;  %v742_v4 = vrot.slane %v720_v63, %v4174_v50  ;;  %v3287_v18 = vld [vmem:[%s4086_s19 + $0x504] ss:$8 sps:$4 sm:$0xff]   ;;  %v721_v24 = vcombine.high %v719_v20, %v719_v20  ;;  %v3281_v25 = vld [vmem:[%s4086_s19 + $0x100] ss:$8 sps:$4 sm:$0xff]   ;;  %v3300_v43 = vld [vmem:[%s4086_s19 + $0x130] ss:$8 sps:$4 sm:$0xff]  }
  0xd7   : > { %2226 = vmatprep.subr.bf16.mxu0 %v3222_v26  ;;  %v3285_v26 = vld [vmem:[%s4086_s19 + $0x500] ss:$8 sps:$4 sm:$0xff]   ;;  %v3296_v37 = vld [vmem:[%s4086_s19 + $0x124] ss:$8 sps:$4 sm:$0xff]   ;;  %v3315_v53 = vld [vmem:[%s4086_s19 + $0x550] ss:$8 sps:$4 sm:$0xff]  }
  0xd8   : > { %2082 = vmatprep.mubr.bf16.mxu1 %v4187_v62  ;;  %2246 = vmatprep.mubr.bf16.mxu0 %v742_v4  ;;  %v3299_v38 = vld [vmem:[%s4086_s19 + $0x524] ss:$8 sps:$4 sm:$0xff]   ;;  %v3321_v57 = vld [vmem:[%s4086_s19 + $0x560] ss:$8 sps:$4 sm:$0xff]   ;;  %v3324_v60 = vld [vmem:[%s4086_s19 + $0x170] ss:$8 sps:$4 sm:$0xff]  }
  0xd9   : > { %2063 = vmatpush1.bf16.msra.mxu1 %v3224_v27  ;;  %v3290_v27 = vld [vmem:[%s4086_s19 + $0x114] ss:$8 sps:$4 sm:$0xff]   ;;  %v3323_v55 = vld [vmem:[%s4086_s19 + $0x564] ss:$8 sps:$4 sm:$0xff]   ;;  %v3327_v61 = vld [vmem:[%s4086_s19 + $0x570] ss:$8 sps:$4 sm:$0xff]  }
  0xda   : > { %2227 = vmatpush1.bf16.msra.mxu0 %v3225_v28  ;;  %2064 = vmatprep.subr.bf16.mxu1 %v3226_v29  ;;  %v3293_v28 = vld [vmem:[%s4086_s19 + $0x514] ss:$8 sps:$4 sm:$0xff]   ;;  %v4220_v29 = vrot.slane %v672_v23, %v4174_v50  ;;  %v3335_v63 = vld [vmem:[%s4086_s19 + $0x584] ss:$8 sps:$4 sm:$0xff]   ;;  %v3351_v13 = vld [vmem:[%s4086_s19 + $0x5b0] ss:$8 sps:$4 sm:$0xff]  }
  0xdb   : > { %2228 = vmatprep.subr.bf16.mxu0 %v3228_v30  ;;  %v4223_v30 = vrot.slane %v721_v24, %v4174_v50  ;;  %v3356_v14 = vld [vmem:[%s4086_s19 + $0x1c4] ss:$8 sps:$4 sm:$0xff]   ;;  %v3363_v23 = vld [vmem:[%s4086_s19 + $0x5d0] ss:$8 sps:$4 sm:$0xff]  }
  0xdc   : > { %v3368_v24 = vld [vmem:[%s4086_s19 + $0x1e4] ss:$8 sps:$4 sm:$0xff]  }
  0xdd   : > { %2065 = vmatpush1.bf16.msra.mxu1 %v3230_v31  ;;  %v4226_v31 = vrot.slane %v670_v19, %v4174_v50  ;;  %v3365_v19 = vld [vmem:[%s4086_s19 + $0x5d4] ss:$8 sps:$4 sm:$0xff]  }
  0xde   : > { %2229 = vmatpush1.bf16.msra.mxu0 %v3231_v32  ;;  %2066 = vmatprep.subr.bf16.mxu1 %v3232_v33  ;;  %v703_v32 = vcombine.high %v4187_v62, %v4187_v62  ;;  %v752_v33 = vcombine.high %v742_v4, %v742_v4  ;;  %v3332_v62 = vld [vmem:[%s4086_s19 + $0x184] ss:$8 sps:$4 sm:$0xff]   ;;  %v3336_v4 = vld [vmem:[%s4086_s19 + $0x190] ss:$8 sps:$4 sm:$0xff]  }
  0xdf   : > { %2230 = vmatprep.subr.bf16.mxu0 %v3234_v34  ;;  %v4231_v34 = vrot.slane %v719_v20, %v4174_v50  ;;  %v3314_v50 = vld [vmem:[%s4086_s19 + $0x154] ss:$8 sps:$4 sm:$0xff]   ;;  %v3360_v20 = vld [vmem:[%s4086_s19 + $0x1d0] ss:$8 sps:$4 sm:$0xff]  }
  0xe1   : > { %2067 = vmatpush1.bf16.msra.mxu1 %v3236_v35  ;;  %v3288_v35 = vld [vmem:[%s4086_s19 + $0x110] ss:$8 sps:$4 sm:$0xff]  }
  0xe2   : > { %2231 = vmatpush1.bf16.msra.mxu0 %v3237_v36  ;;  %2068 = vmatprep.subr.bf16.mxu1 %v3238_v40  ;;  %v3291_v36 = vld [vmem:[%s4086_s19 + $0x510] ss:$8 sps:$4 sm:$0xff]   ;;  %v3297_v40 = vld [vmem:[%s4086_s19 + $0x520] ss:$8 sps:$4 sm:$0xff]  }
  0xe3   : > { %2232 = vmatprep.subr.bf16.mxu0 %v3240_v41  ;;  %v3302_v41 = vld [vmem:[%s4086_s19 + $0x134] ss:$8 sps:$4 sm:$0xff]  }
  0xe5   : > { %2069 = vmatpush1.bf16.msra.mxu1 %v3242_v42  ;;  %v3305_v42 = vld [vmem:[%s4086_s19 + $0x534] ss:$8 sps:$4 sm:$0xff]  }
  0xe6   : > { %2233 = vmatpush1.bf16.msra.mxu0 %v3243_v45  ;;  %2070 = vmatprep.subr.bf16.mxu1 %v3244_v46  ;;  %v3303_v45 = vld [vmem:[%s4086_s19 + $0x530] ss:$8 sps:$4 sm:$0xff]   ;;  %v3308_v46 = vld [vmem:[%s4086_s19 + $0x144] ss:$8 sps:$4 sm:$0xff]  }
  0xe7   : > { %2234 = vmatprep.subr.bf16.mxu0 %v3246_v47  ;;  %v3311_v47 = vld [vmem:[%s4086_s19 + $0x544] ss:$8 sps:$4 sm:$0xff]  }
  0xe9   : > { %2071 = vmatpush1.bf16.msra.mxu1 %v3248_v48  ;;  %v3306_v48 = vld [vmem:[%s4086_s19 + $0x140] ss:$8 sps:$4 sm:$0xff]  }
  0xea   : > { %2235 = vmatpush1.bf16.msra.mxu0 %v3249_v49  ;;  %2072 = vmatprep.subr.bf16.mxu1 %v3250_v51  ;;  %v3309_v49 = vld [vmem:[%s4086_s19 + $0x540] ss:$8 sps:$4 sm:$0xff]   ;;  %v3317_v51 = vld [vmem:[%s4086_s19 + $0x554] ss:$8 sps:$4 sm:$0xff]  }
  0xeb   : > { %2236 = vmatprep.subr.bf16.mxu0 %v3252_v52  ;;  %v3312_v52 = vld [vmem:[%s4086_s19 + $0x150] ss:$8 sps:$4 sm:$0xff]  }
  0xed   : > { %2073 = vmatpush1.bf16.msra.mxu1 %v3254_v54  ;;  %v3320_v54 = vld [vmem:[%s4086_s19 + $0x164] ss:$8 sps:$4 sm:$0xff]  }
  0xee   : > { %2237 = vmatpush1.bf16.msra.mxu0 %v3255_v56  ;;  %2074 = vmatprep.subr.bf16.mxu1 %v3256_v58  ;;  %v3318_v56 = vld [vmem:[%s4086_s19 + $0x160] ss:$8 sps:$4 sm:$0xff]   ;;  %v3326_v58 = vld [vmem:[%s4086_s19 + $0x174] ss:$8 sps:$4 sm:$0xff]  }
  0xef   : > { %2238 = vmatprep.subr.bf16.mxu0 %v3258_v59  ;;  %v3329_v59 = vld [vmem:[%s4086_s19 + $0x574] ss:$8 sps:$4 sm:$0xff]  }
  0xf1   : > { %2075 = vmatpush1.bf16.msra.mxu1 %v3260_v0  ;;  %v3330_v0 = vld [vmem:[%s4086_s19 + $0x180] ss:$8 sps:$4 sm:$0xff]  }
  0xf2   : > { %2239 = vmatpush1.bf16.msra.mxu0 %v3261_v1  ;;  %2076 = vmatprep.subr.bf16.mxu1 %v3262_v2  ;;  %v3333_v1 = vld [vmem:[%s4086_s19 + $0x580] ss:$8 sps:$4 sm:$0xff]   ;;  %v3338_v2 = vld [vmem:[%s4086_s19 + $0x194] ss:$8 sps:$4 sm:$0xff]  }
  0xf3   : > { %2240 = vmatprep.subr.bf16.mxu0 %v3264_v3  ;;  %v3341_v3 = vld [vmem:[%s4086_s19 + $0x594] ss:$8 sps:$4 sm:$0xff]  }
  0xf5   : > { %2077 = vmatpush1.bf16.msra.mxu1 %v3266_v5  ;;  %v3339_v5 = vld [vmem:[%s4086_s19 + $0x590] ss:$8 sps:$4 sm:$0xff]  }
  0xf6   : > { %2241 = vmatpush1.bf16.msra.mxu0 %v3267_v6  ;;  %2078 = vmatprep.subr.bf16.mxu1 %v3268_v7  ;;  %v3344_v6 = vld [vmem:[%s4086_s19 + $0x1a4] ss:$8 sps:$4 sm:$0xff]  }
  0xf7   : > { %2242 = vmatprep.subr.bf16.mxu0 %v3270_v8  ;;  %v3347_v7 = vld [vmem:[%s4086_s19 + $0x5a4] ss:$8 sps:$4 sm:$0xff]   ;;  %v3342_v8 = vld [vmem:[%s4086_s19 + $0x1a0] ss:$8 sps:$4 sm:$0xff]  }
  0xf9   : > { %2079 = vmatpush1.bf16.msra.mxu1 %v3272_v9  ;;  %v3345_v9 = vld [vmem:[%s4086_s19 + $0x5a0] ss:$8 sps:$4 sm:$0xff]  }
  0xfa   : > { %2243 = vmatpush1.bf16.msra.mxu0 %v3273_v10  ;;  %2080 = vmatprep.subr.bf16.mxu1 %v3274_v11  ;;  %v3350_v10 = vld [vmem:[%s4086_s19 + $0x1b4] ss:$8 sps:$4 sm:$0xff]  }
  0xfb   : > { %2244 = vmatprep.subr.bf16.mxu0 %v3276_v12  ;;  %v3353_v11 = vld [vmem:[%s4086_s19 + $0x5b4] ss:$8 sps:$4 sm:$0xff]   ;;  %v3348_v12 = vld [vmem:[%s4086_s19 + $0x1b0] ss:$8 sps:$4 sm:$0xff]  }
  0xfd   : > { %2081 = vmatpush1.bf16.msra.mxu1 %v3278_v15  ;;  %v3359_v15 = vld [vmem:[%s4086_s19 + $0x5c4] ss:$8 sps:$4 sm:$0xff]  }
  0xfe   : > { %2245 = vmatpush1.bf16.msra.mxu0 %v3279_v16  ;;  %2091 = vmatprep.subr.bf16.mxu1 %v3283_v17  ;;  %v3354_v16 = vld [vmem:[%s4086_s19 + $0x1c0] ss:$8 sps:$4 sm:$0xff]  }
  0xff   : > { %2255 = vmatprep.subr.bf16.mxu0 %v3287_v18  ;;  %v3357_v17 = vld [vmem:[%s4086_s19 + $0x5c0] ss:$8 sps:$4 sm:$0xff]   ;;  %v3362_v18 = vld [vmem:[%s4086_s19 + $0x1d4] ss:$8 sps:$4 sm:$0xff]  }
 0x100   : > { %2083 = vmatmul.mubr.bf16.vlgmr.msra.gmra.mrb[0].mxu1 %v4210_v21 }
 0x101   : > { %2247 = vmatmul.mubr.bf16.vlgmr.msra.gmra.mrb[0].mxu0 %v4213_v22  ;;  %2092 = vmatpush1.bf16.msra.mxu1 %v3281_v25  ;;  %v3371_v25 = vld [vmem:[%s4086_s19 + $0x5e4] ss:$8 sps:$4 sm:$0xff]  }
 0x102   : > { %2256 = vmatpush1.bf16.msra.mxu0 %v3285_v26  ;;  %2093 = vmatprep.subr.bf16.mxu1 %v3290_v27  ;;  %v3366_v26 = vld [vmem:[%s4086_s19 + $0x1e0] ss:$8 sps:$4 sm:$0xff]  }
 0x103   : > { %2257 = vmatprep.subr.bf16.mxu0 %v3293_v28  ;;  %2123 = vmatprep.mubr.bf16.mxu1 %v703_v32  ;;  %v3369_v27 = vld [vmem:[%s4086_s19 + $0x5e0] ss:$8 sps:$4 sm:$0xff]   ;;  %v3374_v28 = vld [vmem:[%s4086_s19 + $0x1f4] ss:$8 sps:$4 sm:$0xff]  }
 0x104   : > { %2287 = vmatprep.mubr.bf16.mxu0 %v752_v33  ;;  %v3377_v32 = vld [vmem:[%s4086_s19 + $0x5f4] ss:$8 sps:$4 sm:$0xff]   ;;  %v3372_v33 = vld [vmem:[%s4086_s19 + $0x1f0] ss:$8 sps:$4 sm:$0xff]  }
 0x105   : > { %2094 = vmatpush1.bf16.msra.mxu1 %v3288_v35  ;;  %v3375_v35 = vld [vmem:[%s4086_s19 + $0x5f0] ss:$8 sps:$4 sm:$0xff]  }
 0x106   : > { %2258 = vmatpush1.bf16.msra.mxu0 %v3291_v36  ;;  %2095 = vmatprep.subr.bf16.mxu1 %v3296_v37  ;;  %v3380_v36 = vld [vmem:[%s4086_s19 + $0x204] ss:$8 sps:$4 sm:$0xff]  }
 0x107   : > { %2259 = vmatprep.subr.bf16.mxu0 %v3299_v38  ;;  %v3383_v37 = vld [vmem:[%s4086_s19 + $0x604] ss:$8 sps:$4 sm:$0xff]   ;;  %v701_v38 = vcombine.high %v4210_v21, %v4210_v21  ;;  %v3384_v21 = vld [vmem:[%s4086_s19 + $0x210] ss:$8 sps:$4 sm:$0xff]  }
 0x109   : > { %2096 = vmatpush1.bf16.msra.mxu1 %v3294_v39  ;;  %v750_v39 = vcombine.high %v4213_v22, %v4213_v22  ;;  %v3387_v22 = vld [vmem:[%s4086_s19 + $0x610] ss:$8 sps:$4 sm:$0xff]  }
 0x10a   : > { %2260 = vmatpush1.bf16.msra.mxu0 %v3297_v40  ;;  %2097 = vmatprep.subr.bf16.mxu1 %v3302_v41  ;;  %v3378_v40 = vld [vmem:[%s4086_s19 + $0x200] ss:$8 sps:$4 sm:$0xff]  }
 0x10b   : > { %2261 = vmatprep.subr.bf16.mxu0 %v3305_v42  ;;  %v3381_v41 = vld [vmem:[%s4086_s19 + $0x600] ss:$8 sps:$4 sm:$0xff]   ;;  %v3386_v42 = vld [vmem:[%s4086_s19 + $0x214] ss:$8 sps:$4 sm:$0xff]  }
 0x10d   : > { %2098 = vmatpush1.bf16.msra.mxu1 %v3300_v43  ;;  %v3389_v43 = vld [vmem:[%s4086_s19 + $0x614] ss:$8 sps:$4 sm:$0xff]  }
 0x10e   : > { %2262 = vmatpush1.bf16.msra.mxu0 %v3303_v45  ;;  %2099 = vmatprep.subr.bf16.mxu1 %v3308_v46  ;;  %v3392_v45 = vld [vmem:[%s4086_s19 + $0x224] ss:$8 sps:$4 sm:$0xff]  }
 0x10f   : > { %2263 = vmatprep.subr.bf16.mxu0 %v3311_v47  ;;  %v3395_v46 = vld [vmem:[%s4086_s19 + $0x624] ss:$8 sps:$4 sm:$0xff]   ;;  %v3390_v47 = vld [vmem:[%s4086_s19 + $0x220] ss:$8 sps:$4 sm:$0xff]  }
 0x111   : > { %2100 = vmatpush1.bf16.msra.mxu1 %v3306_v48  ;;  %v3393_v48 = vld [vmem:[%s4086_s19 + $0x620] ss:$8 sps:$4 sm:$0xff]  }
 0x112   : > { %2264 = vmatpush1.bf16.msra.mxu0 %v3309_v49  ;;  %2101 = vmatprep.subr.bf16.mxu1 %v3314_v50  ;;  %v3398_v49 = vld [vmem:[%s4086_s19 + $0x234] ss:$8 sps:$4 sm:$0xff]  }
 0x113   : > { %2265 = vmatprep.subr.bf16.mxu0 %v3317_v51  ;;  %v3401_v50 = vld [vmem:[%s4086_s19 + $0x634] ss:$8 sps:$4 sm:$0xff]   ;;  %v3396_v51 = vld [vmem:[%s4086_s19 + $0x230] ss:$8 sps:$4 sm:$0xff]  }
 0x115   : > { %2102 = vmatpush1.bf16.msra.mxu1 %v3312_v52  ;;  %v3399_v52 = vld [vmem:[%s4086_s19 + $0x630] ss:$8 sps:$4 sm:$0xff]  }
 0x116   : > { %2266 = vmatpush1.bf16.msra.mxu0 %v3315_v53  ;;  %2103 = vmatprep.subr.bf16.mxu1 %v3320_v54  ;;  %v3404_v53 = vld [vmem:[%s4086_s19 + $0x244] ss:$8 sps:$4 sm:$0xff]  }
 0x117   : > { %2267 = vmatprep.subr.bf16.mxu0 %v3323_v55  ;;  %v3407_v54 = vld [vmem:[%s4086_s19 + $0x644] ss:$8 sps:$4 sm:$0xff]   ;;  %v3402_v55 = vld [vmem:[%s4086_s19 + $0x240] ss:$8 sps:$4 sm:$0xff]  }
 0x119   : > { %2104 = vmatpush1.bf16.msra.mxu1 %v3318_v56  ;;  %v3405_v56 = vld [vmem:[%s4086_s19 + $0x640] ss:$8 sps:$4 sm:$0xff]  }
 0x11a   : > { %2268 = vmatpush1.bf16.msra.mxu0 %v3321_v57  ;;  %2105 = vmatprep.subr.bf16.mxu1 %v3326_v58  ;;  %v3410_v57 = vld [vmem:[%s4086_s19 + $0x254] ss:$8 sps:$4 sm:$0xff]  }
 0x11b   : > { %2269 = vmatprep.subr.bf16.mxu0 %v3329_v59  ;;  %v3413_v58 = vld [vmem:[%s4086_s19 + $0x654] ss:$8 sps:$4 sm:$0xff]   ;;  %v3408_v59 = vld [vmem:[%s4086_s19 + $0x250] ss:$8 sps:$4 sm:$0xff]  }
 0x11d   : > { %2106 = vmatpush1.bf16.msra.mxu1 %v3324_v60  ;;  %v3411_v60 = vld [vmem:[%s4086_s19 + $0x650] ss:$8 sps:$4 sm:$0xff]  }
 0x11e   : > { %2270 = vmatpush1.bf16.msra.mxu0 %v3327_v61  ;;  %2107 = vmatprep.subr.bf16.mxu1 %v3332_v62  ;;  %v3416_v61 = vld [vmem:[%s4086_s19 + $0x264] ss:$8 sps:$4 sm:$0xff]  }
 0x11f   : > { %2271 = vmatprep.subr.bf16.mxu0 %v3335_v63  ;;  %v3419_v62 = vld [vmem:[%s4086_s19 + $0x664] ss:$8 sps:$4 sm:$0xff]   ;;  %v3414_v63 = vld [vmem:[%s4086_s19 + $0x260] ss:$8 sps:$4 sm:$0xff]  }
 0x121   : > { %2108 = vmatpush1.bf16.msra.mxu1 %v3330_v0  ;;  %v3417_v0 = vld [vmem:[%s4086_s19 + $0x660] ss:$8 sps:$4 sm:$0xff]  }
 0x122   : > { %2272 = vmatpush1.bf16.msra.mxu0 %v3333_v1  ;;  %2109 = vmatprep.subr.bf16.mxu1 %v3338_v2  ;;  %v3422_v1 = vld [vmem:[%s4086_s19 + $0x274] ss:$8 sps:$4 sm:$0xff]  }
 0x123   : > { %2273 = vmatprep.subr.bf16.mxu0 %v3341_v3  ;;  %v3425_v2 = vld [vmem:[%s4086_s19 + $0x674] ss:$8 sps:$4 sm:$0xff]   ;;  %v3420_v3 = vld [vmem:[%s4086_s19 + $0x270] ss:$8 sps:$4 sm:$0xff]  }
 0x125   : > { %2110 = vmatpush1.bf16.msra.mxu1 %v3336_v4  ;;  %v3423_v4 = vld [vmem:[%s4086_s19 + $0x670] ss:$8 sps:$4 sm:$0xff]  }
 0x126   : > { %2274 = vmatpush1.bf16.msra.mxu0 %v3339_v5  ;;  %2111 = vmatprep.subr.bf16.mxu1 %v3344_v6  ;;  %v3428_v5 = vld [vmem:[%s4086_s19 + $0x284] ss:$8 sps:$4 sm:$0xff]  }
 0x127   : > { %2275 = vmatprep.subr.bf16.mxu0 %v3347_v7  ;;  %v3431_v6 = vld [vmem:[%s4086_s19 + $0x684] ss:$8 sps:$4 sm:$0xff]   ;;  %v3426_v7 = vld [vmem:[%s4086_s19 + $0x280] ss:$8 sps:$4 sm:$0xff]  }
 0x129   : > { %2112 = vmatpush1.bf16.msra.mxu1 %v3342_v8  ;;  %v3429_v8 = vld [vmem:[%s4086_s19 + $0x680] ss:$8 sps:$4 sm:$0xff]  }
 0x12a   : > { %2276 = vmatpush1.bf16.msra.mxu0 %v3345_v9  ;;  %2113 = vmatprep.subr.bf16.mxu1 %v3350_v10  ;;  %v3434_v9 = vld [vmem:[%s4086_s19 + $0x294] ss:$8 sps:$4 sm:$0xff]  }
 0x12b   : > { %2277 = vmatprep.subr.bf16.mxu0 %v3353_v11  ;;  %v3437_v10 = vld [vmem:[%s4086_s19 + $0x694] ss:$8 sps:$4 sm:$0xff]   ;;  %v3432_v11 = vld [vmem:[%s4086_s19 + $0x290] ss:$8 sps:$4 sm:$0xff]  }
 0x12d   : > { %2114 = vmatpush1.bf16.msra.mxu1 %v3348_v12  ;;  %v3435_v12 = vld [vmem:[%s4086_s19 + $0x690] ss:$8 sps:$4 sm:$0xff]  }
 0x12e   : > { %2278 = vmatpush1.bf16.msra.mxu0 %v3351_v13  ;;  %2115 = vmatprep.subr.bf16.mxu1 %v3356_v14  ;;  %v3440_v13 = vld [vmem:[%s4086_s19 + $0x2a4] ss:$8 sps:$4 sm:$0xff]  }
 0x12f   : > { %2279 = vmatprep.subr.bf16.mxu0 %v3359_v15  ;;  %v3443_v14 = vld [vmem:[%s4086_s19 + $0x6a4] ss:$8 sps:$4 sm:$0xff]   ;;  %v3438_v15 = vld [vmem:[%s4086_s19 + $0x2a0] ss:$8 sps:$4 sm:$0xff]  }
 0x131   : > { %2116 = vmatpush1.bf16.msra.mxu1 %v3354_v16  ;;  %v3441_v16 = vld [vmem:[%s4086_s19 + $0x6a0] ss:$8 sps:$4 sm:$0xff]  }
 0x132   : > { %2280 = vmatpush1.bf16.msra.mxu0 %v3357_v17  ;;  %2117 = vmatprep.subr.bf16.mxu1 %v3362_v18  ;;  %v3446_v17 = vld [vmem:[%s4086_s19 + $0x2b4] ss:$8 sps:$4 sm:$0xff]  }
 0x133   : > { %2281 = vmatprep.subr.bf16.mxu0 %v3365_v19  ;;  %v3449_v18 = vld [vmem:[%s4086_s19 + $0x6b4] ss:$8 sps:$4 sm:$0xff]   ;;  %v3444_v19 = vld [vmem:[%s4086_s19 + $0x2b0] ss:$8 sps:$4 sm:$0xff]  }
 0x135   : > { %2118 = vmatpush1.bf16.msra.mxu1 %v3360_v20  ;;  %v3447_v20 = vld [vmem:[%s4086_s19 + $0x6b0] ss:$8 sps:$4 sm:$0xff]  }
 0x136   : > { %2282 = vmatpush1.bf16.msra.mxu0 %v3363_v23  ;;  %2119 = vmatprep.subr.bf16.mxu1 %v3368_v24  ;;  %v3452_v23 = vld [vmem:[%s4086_s19 + $0x2c4] ss:$8 sps:$4 sm:$0xff]  }
 0x137   : > { %2283 = vmatprep.subr.bf16.mxu0 %v3371_v25  ;;  %v3455_v24 = vld [vmem:[%s4086_s19 + $0x6c4] ss:$8 sps:$4 sm:$0xff]   ;;  %v3450_v25 = vld [vmem:[%s4086_s19 + $0x2c0] ss:$8 sps:$4 sm:$0xff]  }
 0x139   : > { %2120 = vmatpush1.bf16.msra.mxu1 %v3366_v26  ;;  %v3453_v26 = vld [vmem:[%s4086_s19 + $0x6c0] ss:$8 sps:$4 sm:$0xff]  }
 0x13a   : > { %2284 = vmatpush1.bf16.msra.mxu0 %v3369_v27  ;;  %2121 = vmatprep.subr.bf16.mxu1 %v3374_v28  ;;  %v3458_v27 = vld [vmem:[%s4086_s19 + $0x2d4] ss:$8 sps:$4 sm:$0xff]  }
 0x13b   : > { %2285 = vmatprep.subr.bf16.mxu0 %v3377_v32  ;;  %v3461_v28 = vld [vmem:[%s4086_s19 + $0x6d4] ss:$8 sps:$4 sm:$0xff]   ;;  %v3456_v32 = vld [vmem:[%s4086_s19 + $0x2d0] ss:$8 sps:$4 sm:$0xff]  }
 0x13d   : > { %2122 = vmatpush1.bf16.msra.mxu1 %v3372_v33  ;;  %v3459_v33 = vld [vmem:[%s4086_s19 + $0x6d0] ss:$8 sps:$4 sm:$0xff]  }
 0x13e   : > { %2286 = vmatpush1.bf16.msra.mxu0 %v3375_v35  ;;  %2132 = vmatprep.subr.bf16.mxu1 %v3380_v36  ;;  %v3464_v35 = vld [vmem:[%s4086_s19 + $0x2e4] ss:$8 sps:$4 sm:$0xff]  }
 0x13f   : > { %2296 = vmatprep.subr.bf16.mxu0 %v3383_v37  ;;  %v3467_v36 = vld [vmem:[%s4086_s19 + $0x6e4] ss:$8 sps:$4 sm:$0xff]   ;;  %v3462_v37 = vld [vmem:[%s4086_s19 + $0x2e0] ss:$8 sps:$4 sm:$0xff]  }
 0x140   : > { %2124 = vmatmul.mubr.bf16.vlgmr.msra.gmra.mrb[0].mxu1 %v701_v38  ;;  %v3465_v38 = vld [vmem:[%s4086_s19 + $0x6e0] ss:$8 sps:$4 sm:$0xff]  }
 0x141   : > { %2288 = vmatmul.mubr.bf16.vlgmr.msra.gmra.mrb[0].mxu0 %v750_v39  ;;  %2133 = vmatpush1.bf16.msra.mxu1 %v3378_v40  ;;  %v3470_v39 = vld [vmem:[%s4086_s19 + $0x2f4] ss:$8 sps:$4 sm:$0xff]  }
 0x142   : > { %2297 = vmatpush1.bf16.msra.mxu0 %v3381_v41  ;;  %2134 = vmatprep.subr.bf16.mxu1 %v3386_v42  ;;  %v3473_v40 = vld [vmem:[%s4086_s19 + $0x6f4] ss:$8 sps:$4 sm:$0xff]   ;;  %v3468_v41 = vld [vmem:[%s4086_s19 + $0x2f0] ss:$8 sps:$4 sm:$0xff]  }
 0x143   : > { %2298 = vmatprep.subr.bf16.mxu0 %v3389_v43  ;;  %2164 = vmatprep.mubr.bf16.mxu1 %v4220_v29  ;;  %v3471_v42 = vld [vmem:[%s4086_s19 + $0x6f0] ss:$8 sps:$4 sm:$0xff]   ;;  %v3476_v43 = vld [vmem:[%s4086_s19 + $0x304] ss:$8 sps:$4 sm:$0xff]  }
 0x144   : > { %2328 = vmatprep.mubr.bf16.mxu0 %v4223_v30 }
 0x145   : > { %2135 = vmatpush1.bf16.msra.mxu1 %v3384_v21  ;;  %v3479_v21 = vld [vmem:[%s4086_s19 + $0x704] ss:$8 sps:$4 sm:$0xff]  }
 0x146   : > { %2299 = vmatpush1.bf16.msra.mxu0 %v3387_v22  ;;  %2136 = vmatprep.subr.bf16.mxu1 %v3392_v45  ;;  %v3474_v22 = vld [vmem:[%s4086_s19 + $0x300] ss:$8 sps:$4 sm:$0xff]  }
 0x147   : > { %2300 = vmatprep.subr.bf16.mxu0 %v3395_v46  ;;  %v3477_v45 = vld [vmem:[%s4086_s19 + $0x700] ss:$8 sps:$4 sm:$0xff]   ;;  %v3482_v46 = vld [vmem:[%s4086_s19 + $0x314] ss:$8 sps:$4 sm:$0xff]  }
 0x149   : > { %2137 = vmatpush1.bf16.msra.mxu1 %v3390_v47  ;;  %v3485_v47 = vld [vmem:[%s4086_s19 + $0x714] ss:$8 sps:$4 sm:$0xff]  }
 0x14a   : > { %2301 = vmatpush1.bf16.msra.mxu0 %v3393_v48  ;;  %2138 = vmatprep.subr.bf16.mxu1 %v3398_v49  ;;  %v704_v48 = vcombine.high %v4220_v29, %v4220_v29  ;;  %v753_v49 = vcombine.high %v4223_v30, %v4223_v30  ;;  %v3488_v29 = vld [vmem:[%s4086_s19 + $0x324] ss:$8 sps:$4 sm:$0xff]   ;;  %v3486_v30 = vld [vmem:[%s4086_s19 + $0x320] ss:$8 sps:$4 sm:$0xff]  }
 0x14b   : > { %2302 = vmatprep.subr.bf16.mxu0 %v3401_v50  ;;  %v3480_v50 = vld [vmem:[%s4086_s19 + $0x310] ss:$8 sps:$4 sm:$0xff]  }
 0x14d   : > { %2139 = vmatpush1.bf16.msra.mxu1 %v3396_v51  ;;  %v3483_v51 = vld [vmem:[%s4086_s19 + $0x710] ss:$8 sps:$4 sm:$0xff]  }
 0x14e   : > { %2303 = vmatpush1.bf16.msra.mxu0 %v3399_v52  ;;  %2140 = vmatprep.subr.bf16.mxu1 %v3404_v53  ;;  %v3491_v52 = vld [vmem:[%s4086_s19 + $0x724] ss:$8 sps:$4 sm:$0xff]   ;;  %v3489_v53 = vld [vmem:[%s4086_s19 + $0x720] ss:$8 sps:$4 sm:$0xff]  }
 0x14f   : > { %2304 = vmatprep.subr.bf16.mxu0 %v3407_v54  ;;  %v3494_v54 = vld [vmem:[%s4086_s19 + $0x334] ss:$8 sps:$4 sm:$0xff]  }
 0x151   : > { %2141 = vmatpush1.bf16.msra.mxu1 %v3402_v55  ;;  %v3497_v55 = vld [vmem:[%s4086_s19 + $0x734] ss:$8 sps:$4 sm:$0xff]  }
 0x152   : > { %2305 = vmatpush1.bf16.msra.mxu0 %v3405_v56  ;;  %2142 = vmatprep.subr.bf16.mxu1 %v3410_v57  ;;  %v3492_v56 = vld [vmem:[%s4086_s19 + $0x330] ss:$8 sps:$4 sm:$0xff]  }
 0x153   : > { %2306 = vmatprep.subr.bf16.mxu0 %v3413_v58  ;;  %v3495_v57 = vld [vmem:[%s4086_s19 + $0x730] ss:$8 sps:$4 sm:$0xff]   ;;  %v3500_v58 = vld [vmem:[%s4086_s19 + $0x344] ss:$8 sps:$4 sm:$0xff]  }
 0x155   : > { %2143 = vmatpush1.bf16.msra.mxu1 %v3408_v59  ;;  %v3503_v59 = vld [vmem:[%s4086_s19 + $0x744] ss:$8 sps:$4 sm:$0xff]  }
 0x156   : > { %2307 = vmatpush1.bf16.msra.mxu0 %v3411_v60  ;;  %2144 = vmatprep.subr.bf16.mxu1 %v3416_v61  ;;  %v3498_v60 = vld [vmem:[%s4086_s19 + $0x340] ss:$8 sps:$4 sm:$0xff]  }
 0x157   : > { %2308 = vmatprep.subr.bf16.mxu0 %v3419_v62  ;;  %v3501_v61 = vld [vmem:[%s4086_s19 + $0x740] ss:$8 sps:$4 sm:$0xff]   ;;  %v3506_v62 = vld [vmem:[%s4086_s19 + $0x354] ss:$8 sps:$4 sm:$0xff]  }
 0x159   : > { %2145 = vmatpush1.bf16.msra.mxu1 %v3414_v63  ;;  %v3509_v63 = vld [vmem:[%s4086_s19 + $0x754] ss:$8 sps:$4 sm:$0xff]  }
 0x15a   : > { %2309 = vmatpush1.bf16.msra.mxu0 %v3417_v0  ;;  %2146 = vmatprep.subr.bf16.mxu1 %v3422_v1  ;;  %v3504_v0 = vld [vmem:[%s4086_s19 + $0x350] ss:$8 sps:$4 sm:$0xff]  }
 0x15b   : > { %2310 = vmatprep.subr.bf16.mxu0 %v3425_v2  ;;  %v3507_v1 = vld [vmem:[%s4086_s19 + $0x750] ss:$8 sps:$4 sm:$0xff]   ;;  %v3512_v2 = vld [vmem:[%s4086_s19 + $0x364] ss:$8 sps:$4 sm:$0xff]  }
 0x15d   : > { %2147 = vmatpush1.bf16.msra.mxu1 %v3420_v3  ;;  %v3515_v3 = vld [vmem:[%s4086_s19 + $0x764] ss:$8 sps:$4 sm:$0xff]  }
 0x15e   : > { %2311 = vmatpush1.bf16.msra.mxu0 %v3423_v4  ;;  %2148 = vmatprep.subr.bf16.mxu1 %v3428_v5  ;;  %v3510_v4 = vld [vmem:[%s4086_s19 + $0x360] ss:$8 sps:$4 sm:$0xff]  }
 0x15f   : > { %2312 = vmatprep.subr.bf16.mxu0 %v3431_v6  ;;  %v3513_v5 = vld [vmem:[%s4086_s19 + $0x760] ss:$8 sps:$4 sm:$0xff]   ;;  %v3518_v6 = vld [vmem:[%s4086_s19 + $0x374] ss:$8 sps:$4 sm:$0xff]  }
 0x161   : > { %2149 = vmatpush1.bf16.msra.mxu1 %v3426_v7  ;;  %v3521_v7 = vld [vmem:[%s4086_s19 + $0x774] ss:$8 sps:$4 sm:$0xff]  }
 0x162   : > { %2313 = vmatpush1.bf16.msra.mxu0 %v3429_v8  ;;  %2150 = vmatprep.subr.bf16.mxu1 %v3434_v9  ;;  %v3516_v8 = vld [vmem:[%s4086_s19 + $0x370] ss:$8 sps:$4 sm:$0xff]  }
 0x163   : > { %2314 = vmatprep.subr.bf16.mxu0 %v3437_v10  ;;  %v3519_v9 = vld [vmem:[%s4086_s19 + $0x770] ss:$8 sps:$4 sm:$0xff]   ;;  %v3524_v10 = vld [vmem:[%s4086_s19 + $0x384] ss:$8 sps:$4 sm:$0xff]  }
 0x165   : > { %2151 = vmatpush1.bf16.msra.mxu1 %v3432_v11  ;;  %v3527_v11 = vld [vmem:[%s4086_s19 + $0x784] ss:$8 sps:$4 sm:$0xff]  }
 0x166   : > { %2315 = vmatpush1.bf16.msra.mxu0 %v3435_v12  ;;  %2152 = vmatprep.subr.bf16.mxu1 %v3440_v13  ;;  %v3522_v12 = vld [vmem:[%s4086_s19 + $0x380] ss:$8 sps:$4 sm:$0xff]  }
 0x167   : > { %2316 = vmatprep.subr.bf16.mxu0 %v3443_v14  ;;  %v3525_v13 = vld [vmem:[%s4086_s19 + $0x780] ss:$8 sps:$4 sm:$0xff]   ;;  %v3530_v14 = vld [vmem:[%s4086_s19 + $0x394] ss:$8 sps:$4 sm:$0xff]  }
 0x169   : > { %2153 = vmatpush1.bf16.msra.mxu1 %v3438_v15  ;;  %v3533_v15 = vld [vmem:[%s4086_s19 + $0x794] ss:$8 sps:$4 sm:$0xff]  }
 0x16a   : > { %2317 = vmatpush1.bf16.msra.mxu0 %v3441_v16  ;;  %2154 = vmatprep.subr.bf16.mxu1 %v3446_v17  ;;  %v3528_v16 = vld [vmem:[%s4086_s19 + $0x390] ss:$8 sps:$4 sm:$0xff]  }
 0x16b   : > { %2318 = vmatprep.subr.bf16.mxu0 %v3449_v18  ;;  %v3531_v17 = vld [vmem:[%s4086_s19 + $0x790] ss:$8 sps:$4 sm:$0xff]   ;;  %v3536_v18 = vld [vmem:[%s4086_s19 + $0x3a4] ss:$8 sps:$4 sm:$0xff]  }
 0x16d   : > { %2155 = vmatpush1.bf16.msra.mxu1 %v3444_v19  ;;  %v3539_v19 = vld [vmem:[%s4086_s19 + $0x7a4] ss:$8 sps:$4 sm:$0xff]  }
 0x16e   : > { %2319 = vmatpush1.bf16.msra.mxu0 %v3447_v20  ;;  %2156 = vmatprep.subr.bf16.mxu1 %v3452_v23  ;;  %v3534_v20 = vld [vmem:[%s4086_s19 + $0x3a0] ss:$8 sps:$4 sm:$0xff]  }
 0x16f   : > { %2320 = vmatprep.subr.bf16.mxu0 %v3455_v24  ;;  %v3537_v23 = vld [vmem:[%s4086_s19 + $0x7a0] ss:$8 sps:$4 sm:$0xff]   ;;  %v3542_v24 = vld [vmem:[%s4086_s19 + $0x3b4] ss:$8 sps:$4 sm:$0xff]  }
 0x171   : > { %2157 = vmatpush1.bf16.msra.mxu1 %v3450_v25  ;;  %v3545_v25 = vld [vmem:[%s4086_s19 + $0x7b4] ss:$8 sps:$4 sm:$0xff]  }
 0x172   : > { %2321 = vmatpush1.bf16.msra.mxu0 %v3453_v26  ;;  %2158 = vmatprep.subr.bf16.mxu1 %v3458_v27  ;;  %v3540_v26 = vld [vmem:[%s4086_s19 + $0x3b0] ss:$8 sps:$4 sm:$0xff]  }
 0x173   : > { %2322 = vmatprep.subr.bf16.mxu0 %v3461_v28  ;;  %v3543_v27 = vld [vmem:[%s4086_s19 + $0x7b0] ss:$8 sps:$4 sm:$0xff]   ;;  %v3548_v28 = vld [vmem:[%s4086_s19 + $0x3c4] ss:$8 sps:$4 sm:$0xff]  }
 0x175   : > { %2159 = vmatpush1.bf16.msra.mxu1 %v3456_v32  ;;  %v3551_v32 = vld [vmem:[%s4086_s19 + $0x7c4] ss:$8 sps:$4 sm:$0xff]  }
 0x176   : > { %2323 = vmatpush1.bf16.msra.mxu0 %v3459_v33  ;;  %2160 = vmatprep.subr.bf16.mxu1 %v3464_v35  ;;  %v3546_v33 = vld [vmem:[%s4086_s19 + $0x3c0] ss:$8 sps:$4 sm:$0xff]  }
 0x177   : > { %2324 = vmatprep.subr.bf16.mxu0 %v3467_v36  ;;  %v3549_v35 = vld [vmem:[%s4086_s19 + $0x7c0] ss:$8 sps:$4 sm:$0xff]   ;;  %v3554_v36 = vld [vmem:[%s4086_s19 + $0x3d4] ss:$8 sps:$4 sm:$0xff]  }
 0x179   : > { %2161 = vmatpush1.bf16.msra.mxu1 %v3462_v37  ;;  %v3557_v37 = vld [vmem:[%s4086_s19 + $0x7d4] ss:$8 sps:$4 sm:$0xff]  }
 0x17a   : > { %2325 = vmatpush1.bf16.msra.mxu0 %v3465_v38  ;;  %2162 = vmatprep.subr.bf16.mxu1 %v3470_v39  ;;  %v3552_v38 = vld [vmem:[%s4086_s19 + $0x3d0] ss:$8 sps:$4 sm:$0xff]  }
 0x17b   : > { %2326 = vmatprep.subr.bf16.mxu0 %v3473_v40  ;;  %v3555_v39 = vld [vmem:[%s4086_s19 + $0x7d0] ss:$8 sps:$4 sm:$0xff]   ;;  %v3560_v40 = vld [vmem:[%s4086_s19 + $0x3e4] ss:$8 sps:$4 sm:$0xff]  }
 0x17d   : > { %2163 = vmatpush1.bf16.msra.mxu1 %v3468_v41  ;;  %v3563_v41 = vld [vmem:[%s4086_s19 + $0x7e4] ss:$8 sps:$4 sm:$0xff]  }
 0x17e   : > { %2327 = vmatpush1.bf16.msra.mxu0 %v3471_v42  ;;  %2173 = vmatprep.subr.bf16.mxu1 %v3476_v43  ;;  %v3558_v42 = vld [vmem:[%s4086_s19 + $0x3e0] ss:$8 sps:$4 sm:$0xff]  }
 0x17f   : > { %2337 = vmatprep.subr.bf16.mxu0 %v3479_v21  ;;  %v3561_v43 = vld [vmem:[%s4086_s19 + $0x7e0] ss:$8 sps:$4 sm:$0xff]   ;;  %v3566_v21 = vld [vmem:[%s4086_s19 + $0x3f4] ss:$8 sps:$4 sm:$0xff]  }
 0x180   : > { %2165 = vmatmul.mubr.bf16.vlgmr.msra.gmra.mrb[0].mxu1 %v4226_v31 }
 0x181   : > { %2329 = vmatmul.mubr.bf16.vlgmr.msra.gmra.mrb[0].mxu0 %v4231_v34  ;;  %2174 = vmatpush1.bf16.msra.mxu1 %v3474_v22  ;;  %v3569_v22 = vld [vmem:[%s4086_s19 + $0x7f4] ss:$8 sps:$4 sm:$0xff]  }
 0x182   : > { %2338 = vmatpush1.bf16.msra.mxu0 %v3477_v45  ;;  %2175 = vmatprep.subr.bf16.mxu1 %v3482_v46  ;;  %v3564_v45 = vld [vmem:[%s4086_s19 + $0x3f0] ss:$8 sps:$4 sm:$0xff]  }
 0x183   : > { %2339 = vmatprep.subr.bf16.mxu0 %v3485_v47  ;;  %2205 = vmatprep.mubr.bf16.mxu1 %v704_v48  ;;  %v3567_v46 = vld [vmem:[%s4086_s19 + $0x7f0] ss:$8 sps:$4 sm:$0xff]   ;;  %v702_v47 = vcombine.high %v4226_v31, %v4226_v31  ;;  %v751_v48 = vcombine.high %v4231_v34, %v4231_v34  ;;  %s4569_s19 = sld [smem:[#allocation14_spill]] }
 0x184   : > { %2369 = vmatprep.mubr.bf16.mxu0 %v753_v49  ;;  %v3799_v49 = vmov 1983009808  }
 0x185   : > { %2176 = vmatpush1.bf16.msra.mxu1 %v3480_v50  ;;  %v2382_v50 = vunpack.c.l.s4 %v3799_v49 }
 0x186   : > { %2340 = vmatpush1.bf16.msra.mxu0 %v3483_v51  ;;  %2177 = vmatprep.subr.bf16.mxu1 %v3488_v29 }
 0x187   : > { %2341 = vmatprep.subr.bf16.mxu0 %v3491_v52  ;;  %v2383_v51 = vunpack.c.0.s8 %v2382_v50 }
 0x189   : > { %2178 = vmatpush1.bf16.msra.mxu1 %v3486_v30  ;;  %p2968_p10 = scmp.ne.s32.totalorder %s4569_s19, 3 }
 0x18a   : > { %2342 = vmatpush1.bf16.msra.mxu0 %v3489_v53  ;;  %2179 = vmatprep.subr.bf16.mxu1 %v3494_v54 }
 0x18b   : > { %2343 = vmatprep.subr.bf16.mxu0 %v3497_v55 }
 0x18d   : > { %2180 = vmatpush1.bf16.msra.mxu1 %v3492_v56  ;;  %v4438_v56 = vsub.s32 %v2383_v51, %v4166_v44 }
 0x18e   : > { %2344 = vmatpush1.bf16.msra.mxu0 %v3495_v57  ;;  %2181 = vmatprep.subr.bf16.mxu1 %v3500_v58 }
 0x18f   : > { %2345 = vmatprep.subr.bf16.mxu0 %v3503_v59 }
 0x191   : > { %2182 = vmatpush1.bf16.msra.mxu1 %v3498_v60  ;;  %v395_v60 = vld [vmem:[#allocation2] sm:$0xf] }
 0x192   : > { %2346 = vmatpush1.bf16.msra.mxu0 %v3501_v61  ;;  %2183 = vmatprep.subr.bf16.mxu1 %v3506_v62 }
 0x193   : > { %2347 = vmatprep.subr.bf16.mxu0 %v3509_v63  ;;  %v2433_v63 = vld [vmem:[%s4105_s0 + $0x80] sm:$0xff] (!%p2968_p10) }
 0x195   : > { %2184 = vmatpush1.bf16.msra.mxu1 %v3504_v0  ;;  %v2434_v0 = vld [vmem:[%s4105_s0 + $0x88] sm:$0xff] (!%p2968_p10) }
 0x196   : > { %2348 = vmatpush1.bf16.msra.mxu0 %v3507_v1  ;;  %2185 = vmatprep.subr.bf16.mxu1 %v3512_v2  ;;  %v2417_v1 = vld [vmem:[%s4105_s0] sm:$0xff] (!%p2968_p10)  ;;  %v3010_v2 = vpack.c.bf16 (!%p2968_p10), %v2434_v0, %v2433_v63 }
 0x197   : > { %2349 = vmatprep.subr.bf16.mxu0 %v3515_v3  ;;  %v2418_v3 = vld [vmem:[%s4105_s0 + $0x8] sm:$0xff] (!%p2968_p10) }
 0x199   : > { %2186 = vmatpush1.bf16.msra.mxu1 %v3510_v4  ;;  %v2435_v4 = vld [vmem:[%s4105_s0 + $0x90] sm:$0xff] (!%p2968_p10) }
 0x19a   : > { %2350 = vmatpush1.bf16.msra.mxu0 %v3513_v5  ;;  %2187 = vmatprep.subr.bf16.mxu1 %v3518_v6  ;;  %v2436_v5 = vld [vmem:[%s4105_s0 + $0x98] sm:$0xff] (!%p2968_p10)  ;;  %v3012_v6 = vpack.c.bf16 (!%p2968_p10), %v2418_v3, %v2417_v1 }
 0x19b   : > { %2351 = vmatprep.subr.bf16.mxu0 %v3521_v7  ;;  %v3014_v7 = vpack.c.bf16 (!%p2968_p10), %v2436_v5, %v2435_v4 }
 0x19d   : > { %2188 = vmatpush1.bf16.msra.mxu1 %v3516_v8  ;;  %v2419_v8 = vld [vmem:[%s4105_s0 + $0x10] sm:$0xff] (!%p2968_p10) }
 0x19e   : > { %2352 = vmatpush1.bf16.msra.mxu0 %v3519_v9  ;;  %2189 = vmatprep.subr.bf16.mxu1 %v3524_v10  ;;  %v2420_v9 = vld [vmem:[%s4105_s0 + $0x18] sm:$0xff] (!%p2968_p10)  ;;  %v2437_v10 = vld [vmem:[%s4105_s0 + $0xa0] sm:$0xff] (!%p2968_p10) }
 0x19f   : > { %2353 = vmatprep.subr.bf16.mxu0 %v3527_v11  ;;  %v2438_v11 = vld [vmem:[%s4105_s0 + $0xa8] sm:$0xff] (!%p2968_p10) }
 0x1a1   : > { %2190 = vmatpush1.bf16.msra.mxu1 %v3522_v12  ;;  %v3016_v12 = vpack.c.bf16 (!%p2968_p10), %v2420_v9, %v2419_v8 }
 0x1a2   : > { %2354 = vmatpush1.bf16.msra.mxu0 %v3525_v13  ;;  %2191 = vmatprep.subr.bf16.mxu1 %v3530_v14  ;;  %v3018_v13 = vpack.c.bf16 (!%p2968_p10), %v2438_v11, %v2437_v10  ;;  %v2421_v14 = vld [vmem:[%s4105_s0 + $0x20] sm:$0xff] (!%p2968_p10) }
 0x1a3   : > { %2355 = vmatprep.subr.bf16.mxu0 %v3533_v15  ;;  %v2422_v15 = vld [vmem:[%s4105_s0 + $0x28] sm:$0xff] (!%p2968_p10) }
 0x1a5   : > { %2192 = vmatpush1.bf16.msra.mxu1 %v3528_v16  ;;  %v2439_v16 = vld [vmem:[%s4105_s0 + $0xb0] sm:$0xff] (!%p2968_p10) }
 0x1a6   : > { %2356 = vmatpush1.bf16.msra.mxu0 %v3531_v17  ;;  %2193 = vmatprep.subr.bf16.mxu1 %v3536_v18  ;;  %v2440_v17 = vld [vmem:[%s4105_s0 + $0xb8] sm:$0xff] (!%p2968_p10)  ;;  %v3020_v18 = vpack.c.bf16 (!%p2968_p10), %v2422_v15, %v2421_v14 }
 0x1a7   : > { %2357 = vmatprep.subr.bf16.mxu0 %v3539_v19  ;;  %v2400_v19 = vsub.s32 (!%p2968_p10), 0, %v4166_v44 }
 0x1a9   : > { %2194 = vmatpush1.bf16.msra.mxu1 %v3534_v20  ;;  %v2404_v20 = vsub.s32 (!%p2968_p10), 1, %v4166_v44  ;;  %v2425_v44 = vld [vmem:[%s4105_s0 + $0x40] sm:$0xff] (!%p2968_p10) }
 0x1aa   : > { %2358 = vmatpush1.bf16.msra.mxu0 %v3537_v23  ;;  %2195 = vmatprep.subr.bf16.mxu1 %v3542_v24  ;;  %v3022_v23 = vpack.c.bf16 (!%p2968_p10), %v2440_v17, %v2439_v16  ;;  %v2423_v24 = vld [vmem:[%s4105_s0 + $0x30] sm:$0xff] (!%p2968_p10) }
 0x1ab   : > { %2359 = vmatprep.subr.bf16.mxu0 %v3545_v25  ;;  %v2424_v25 = vld [vmem:[%s4105_s0 + $0x38] sm:$0xff] (!%p2968_p10) }
 0x1ad   : > { %2196 = vmatpush1.bf16.msra.mxu1 %v3540_v26  ;;  %v2441_v26 = vld [vmem:[%s4105_s0 + $0xc0] sm:$0xff] (!%p2968_p10) }
 0x1ae   : > { %2360 = vmatpush1.bf16.msra.mxu0 %v3543_v27  ;;  %2197 = vmatprep.subr.bf16.mxu1 %v3548_v28  ;;  %v2442_v27 = vld [vmem:[%s4105_s0 + $0xc8] sm:$0xff] (!%p2968_p10)  ;;  %v2396_v28 = vld [vmem:[%s4098_s30] sm:$0x3] (!%p2968_p10) }
 0x1af   : > { %2361 = vmatprep.subr.bf16.mxu0 %v3551_v32  ;;  %v3024_v32 = vpack.c.bf16 (!%p2968_p10), %v2424_v25, %v2423_v24 }
 0x1b1   : > { %2198 = vmatpush1.bf16.msra.mxu1 %v3546_v33  ;;  %v2401_v33 = vrot.slane (!%p2968_p10), %v2396_v28, %v2400_v19 }
 0x1b2   : > { %2362 = vmatpush1.bf16.msra.mxu0 %v3549_v35  ;;  %2199 = vmatprep.subr.bf16.mxu1 %v3554_v36  ;;  %v2405_v35 = vrot.slane (!%p2968_p10), %v2396_v28, %v2404_v20  ;;  %v3026_v36 = vpack.c.bf16 (!%p2968_p10), %v2442_v27, %v2441_v26 }
 0x1b3   : > { %2363 = vmatprep.subr.bf16.mxu0 %v3557_v37  ;;  %v2426_v37 = vld [vmem:[%s4105_s0 + $0x48] sm:$0xff] (!%p2968_p10) }
 0x1b5   : > { %2200 = vmatpush1.bf16.msra.mxu1 %v3552_v38  ;;  %v2443_v38 = vld [vmem:[%s4105_s0 + $0xd0] sm:$0xff] (!%p2968_p10) }
 0x1b6   : > { %2364 = vmatpush1.bf16.msra.mxu0 %v3555_v39  ;;  %2201 = vmatprep.subr.bf16.mxu1 %v3560_v40  ;;  %v2444_v39 = vld [vmem:[%s4105_s0 + $0xd8] sm:$0xff] (!%p2968_p10)  ;;  %v2406_v40 = vcombine.low (!%p2968_p10), %v2401_v33, %v2405_v35 }
 0x1b7   : > { %2365 = vmatprep.subr.bf16.mxu0 %v3563_v41 }
 0x1b9   : > { %2202 = vmatpush1.bf16.msra.mxu1 %v3558_v42  ;;  %v3028_v42 = vpack.c.bf16 (!%p2968_p10), %v2426_v37, %v2425_v44 }
 0x1ba   : > { %2366 = vmatpush1.bf16.msra.mxu0 %v3561_v43  ;;  %2203 = vmatprep.subr.bf16.mxu1 %v3566_v21  ;;  %v2413_v43 = vrot.slane (!%p2968_p10), %v2406_v40, %v4438_v56  ;;  %v3030_v21 = vpack.c.bf16 (!%p2968_p10), %v2444_v39, %v2443_v38 }
 0x1bb   : > { %2367 = vmatprep.subr.bf16.mxu0 %v3569_v22  ;;  %v2427_v22 = vld [vmem:[%s4105_s0 + $0x50] sm:$0xff] (!%p2968_p10) }
 0x1bd   : > { %2204 = vmatpush1.bf16.msra.mxu1 %v3564_v45  ;;  %v2428_v45 = vld [vmem:[%s4105_s0 + $0x58] sm:$0xff] (!%p2968_p10) }
 0x1be   : > { %2368 = vmatpush1.bf16.msra.mxu0 %v3567_v46  ;;  %v2445_v46 = vld [vmem:[%s4105_s0 + $0xe0] sm:$0xff] (!%p2968_p10)  ;;  %v3032_v49 = vpack.c.bf16 (!%p2968_p10), %v2428_v45, %v2427_v22 }
 0x1bf   : > { %3011 = vmatprep.subr.bf16.mxu0 (!%p2968_p10), %v3010_v2 }
 0x1c0   : > { %2206 = vmatmul.mubr.bf16.vlgmr.msra.gmra.mrb[0].mxu1 %v702_v47  ;;  %v2446_v47 = vld [vmem:[%s4105_s0 + $0xe8] sm:$0xff] (!%p2968_p10) }
 0x1c1   : > { %2370 = vmatmul.mubr.bf16.vlgmr.msra.gmra.mrb[0].mxu0 %v751_v48  ;;  %v3034_v51 = vpack.c.bf16 (!%p2968_p10), %v2446_v47, %v2445_v46 }
 0x1c2   : > { %3013 = vmatpush3.bf16.msra.mxu0 (!%p2968_p10), %v3012_v6 }
 0x1c3   : > { %3015 = vmatprep.subr.bf16.mxu0 (!%p2968_p10), %v3014_v7 }
 0x1c6   : > { %3017 = vmatpush3.bf16.msra.mxu0 (!%p2968_p10), %v3016_v12 }
 0x1c7   : > { %3019 = vmatprep.subr.bf16.mxu0 (!%p2968_p10), %v3018_v13 }
 0x1ca   : > { %3021 = vmatpush3.bf16.msra.mxu0 (!%p2968_p10), %v3020_v18 }
 0x1cb   : > { %3023 = vmatprep.subr.bf16.mxu0 (!%p2968_p10), %v3022_v23 }
 0x1ce   : > { %3025 = vmatpush3.bf16.msra.mxu0 (!%p2968_p10), %v3024_v32 }
 0x1cf   : > { %3027 = vmatprep.subr.bf16.mxu0 (!%p2968_p10), %v3026_v36 }
 0x1d2   : > { %3029 = vmatpush3.bf16.msra.mxu0 (!%p2968_p10), %v3028_v42 }
 0x1d3   : > { %3031 = vmatprep.subr.bf16.mxu0 (!%p2968_p10), %v3030_v21 }
 0x1d6   : > { %3033 = vmatpush3.bf16.msra.mxu0 (!%p2968_p10), %v3032_v49 }
 0x1d7   : > { %3035 = vmatprep.subr.bf16.mxu0 (!%p2968_p10), %v3034_v51 }
 0x293   : > { %v2207_v29 = vpop.f32.mrb[0].mxu1 }
 0x294   : > { %v2371_v52 = vpop.f32.mrb[0].mxu0  ;;  %v2209_v53 = vpop.f32.mrb[1].mxu1 }
 0x295   : > { %v3042_v30 = vadd.f32 %v2371_v52, %v2207_v29  ;;  %v2373_v54 = vpop.f32.mrb[1].mxu0  ;;  %v2211_v31 = vpop.f32.mrb[2].mxu1  ;;  %v2429_v29 = vld [vmem:[%s4105_s0 + $0x60] sm:$0xff] (!%p2968_p10)  ;;  %v2430_v52 = vld [vmem:[%s4105_s0 + $0x68] sm:$0xff] (!%p2968_p10) }
 0x296   : > { %v3043_v55 = vadd.f32 %v2373_v54, %v2209_v53  ;;  %v2375_v57 = vpop.f32.mrb[2].mxu0  ;;  %v2212_v58 = vpop.f32.mrb[3].mxu1  ;;  %v2448_v53 = vld [vmem:[%s4105_s0 + $0xf8] sm:$0xff] (!%p2968_p10) }
 0x297   : > { %v2376_v34 = vpop.f32.mrb[3].mxu0  ;;  %v2431_v58 = vld [vmem:[%s4105_s0 + $0x70] sm:$0xff] (!%p2968_p10) }
 0x298   : > { %v2380_v59 = vcombine.low %v3042_v30, %v3043_v55  ;;  %2394 = sbr.rel (%p2968_p10) target bundleno = 905 (0x389), region = 64  ;;  %v2447_v30 = vld [vmem:[%s4105_s0 + $0xf0] sm:$0xff] (!%p2968_p10)  ;;  %v3036_v55 = vpack.c.bf16 (!%p2968_p10), %v2430_v52, %v2429_v29  ;;  %v2432_v34 = vld [vmem:[%s4105_s0 + $0x78] sm:$0xff] (!%p2968_p10) }
 0x299   : > { %v3038_v57 = vpack.c.bf16 (!%p2968_p10), %v2448_v53, %v2447_v30 }
 0x29a   : > { %v2387_v61 = vrot.slane %v2380_v59, %v4438_v56  ;;  %3037 = vmatpush3.bf16.msra.mxu0 (!%p2968_p10), %v3036_v55  ;;  %v3040_v59 = vpack.c.bf16 (!%p2968_p10), %v2432_v34, %v2431_v58 }
 0x29b   : > { %3039 = vmatprep.subr.bf16.mxu0 (!%p2968_p10), %v3038_v57 }
 0x29c   : > { %v2389_v62 = vadd.f32 %v2387_v61, %v395_v60  ;;  %v2969_v61 = vld [vmem:[%s335_s9] ss:$0 sm:$0xff] (!%p2968_p10) }
 0x29e   : > { %2390 = vst [vmem:[#allocation2] sm:$0xf] %v2389_v62  ;;  %3041 = vmatpush3.bf16.msra.mxu0 (!%p2968_p10), %v3040_v59 }
 0x2a5   : > { %v2395_v41 = vld [vmem:[#allocation2] sm:$0xf] }
 0x2a6   : > { %v2415_v48 = vadd.f32 %v2413_v43, %v2395_v41 }
 0x2a8   : > { %v2416_v50 = vmax.f32 %v2415_v48, 0.0 }
 0x2aa   : > { %v2463_v54 = vrot.slane %v2416_v50, %v4438_v56 }
 0x2ac   : > { %v2464_v31 = vcombine.high %v2463_v54, %v2463_v54 }
 0x2ae   : > { %2531 = vmatprep.mubr.f32.mxu0 %v2464_v31 }
 0x2af   : > { %2532 = vmatmul.mubr.f32.vlgmr.msra.gmra.mrb[0].mxu0 %v2463_v54 }
 0x382   : > { %v3007_v60 = vpop.f32.mrb[0].mxu0 }
 0x383   : > { %v3008_v62 = vpop.f32.mrb[1].mxu0 }
 0x384   : > { %v3009_v63 = vadd.f32 %v3008_v62, %v3007_v60 }
 0x386   : > { %v2534_v56 = vadd.f32 %v3009_v63, %v2969_v61 }
 0x388   : > { %2537 = vst [vmem:[%s4124_s6] sm:$0x3] %v2534_v56 }
 0x389 PF: > { %s24_s28 = sadd.s32 1, %s3788_s28   ;;  %s4570_s25 = sld [smem:[#allocation13_spill]] }
 0x38a   : > { %p21_p12 = scmp.ge.s32.totalorder %s24_s28, 10   ;;  %s4571_s5 = smov %s3991_s18 }
 0x38b   : > { %s4572_s30 = sld [smem:[#allocation17_spill]]  ;;  %s4573_s17 = sld [smem:[#allocation18_spill]] }
 0x38c   : > { %s4575_s19 = smov %s3756_s20  ;;  %s4576_s20 = smov %s3986_s29 }
 0x38d   : > { %s4577_s21 = smov %s3764_s22  ;;  %s4578_s22 = smov %s3768_s23 }
 0x38e   : > { %s4579_s23 = smov %s4571_s5  ;;  %s4580_s24 = smov %s3780_s26 }
 0x38f   : > { %s4574_s18 = smov %s4570_s25  ;;  %s4581_s25 = smov %s3784_s27 }
 0x390   :  { %23 = sbr.rel (!%p21_p12) target bundleno = 16 (0x10), region = 128 }
 0x391   : > { %s4582_s26 = smov %s4572_s30  ;;  %s4583_s27 = smov %s4573_s17 }
 0x397   :  { %2557 = vsyncpa [#allocation4], 1 }
 0x398   :  { %2559 = vsyncpa [#allocation4 + $0x1], 1 }
 0x399   :  { %2560 = vsyncpa [#allocation6], 1 }
 0x39a   :  { %2562 = vsyncpa [#allocation6 + $0x1], 1 }
 0x39b   :  { %2563 = vsyncpa [#allocation9], 1 }
 0x39c   :  { %2565 = vsyncpa [#allocation9 + $0x1], 1 }

// kernel: screen_net_forward.2
= control target key start
LH: loop header
LB: loop body
LE: loop exit
PB: predicated region body
PF: predicated region fallthrough
CT: control target
= control target key end

     0   :  { %10 = vsyncpa [#allocation5], 0  ;;  %s10571_s0 = inlined_call_operand.vmem [shape: f32[2,16,64], index: 0, kind: input, shape index: {}]   ;;  %s10572_s1 = inlined_call_operand.hbm [shape: bf16[5,80,1024], index: 1, kind: input, shape index: {}]   ;;  %s10573_s2 = inlined_call_operand.hbm [shape: f32[1,1024], index: 2, kind: input, shape index: {}]   ;;  %s10574_s3 = inlined_call_operand.hbm [shape: bf16[5,512,128], index: 3, kind: input, shape index: {}]   ;;  %s10575_s4 = inlined_call_operand.hbm [shape: f32[1,128], index: 4, kind: input, shape index: {}]   ;;  %s10576_s5 = inlined_call_operand.vmem [shape: bf16[2,16,512], index: 5, kind: output, shape index: {}]  }
   0x1   :  { %11 = vsyncpa [#allocation7], 0 }
   0x2   :  { %12 = vsyncpa [#allocation10], 0  ;;  %s8662_s18 = smov 0  }
   0x3 LB: > { %s8622_s19 = smov [#allocation6]   ;;  %s8668_s21 = sadd.s32 4294967295, %s8620_s18   ;;  %s8620_s18 = sphi %s8662_s18, %s18_s18  }
   0x4   : > { %s185_s20 = sshll.u32 %s8622_s19, 4  ;;  %p6724_p0 = scmp.ge.s32.totalorder %s8620_s18, 1  ;;  %s186_s20 = int_to_ptr.vmem [resolvable:$true] %s185_s20 }
   0x5   : > { %p159_p1 = scmp.lt.s32.totalorder %s8620_s18, 3  ;;  %p10577_p2 = scmp.eq.s32.totalorder %s8668_s21, 0 }
   0x6   : > { %s8623_s23 = smov [#allocation4]   ;;  %s8624_s26 = smov [#allocation8]  }
   0x7   : > { %p8673_p3 = pnand %p6724_p0, %p159_p1  ;;  %s171_s24 = sshll.u32 %s8623_s23, 4  ;;  %s8679_s24 = int_to_ptr.vmem [resolvable:$true] %s171_s24 }
   0x8   : > { %s195_s27 = sshll.u32 %s8624_s26, 4  ;;  %s8490_s30 = scalar_lea.hbm %s10573_s2, 128  ;;  %s8687_s27 = int_to_ptr.vmem [resolvable:$true] %s195_s27 }
   0x9   : > { %s10695_s22 = scalar_select %p8673_p3, 1, 0 }
   0xa   : > { %p8203_p4 = pneg %p8673_p3  ;;  %p8491_p6 = scmp.ne.s32.totalorder %s10573_s2, %s8490_s30 }
   0xb   : > { %p8497_p10 = scmp.lt.u32.totalorder %s8490_s30, %s10573_s2 }
   0xc   : > { %p8683_p5 = pnand %p10577_p2, %p8203_p4 }
   0xe   : > { %p8697_p7 = pneg %p8683_p5 }
  0x10   : > { %p8493_p8 = pnand %p8697_p7, %p8491_p6 }
  0x12   : > { %p8494_p9 = pneg %p8493_p8 }
  0x14   : > { %p8499_p11 = pnand %p8497_p10, %p8494_p9 }
  0x16   : > { %8502 = shalt.err (!%p8499_p11)
}
  0x17   : > { %s8503_s11 = scalar_lea.vmem %s186_s20, 128  ;;  %p8511_p1 = scmp.lt.s32.totalorder %s186_s20, %s186_s20 }
  0x18   : > { %p8504_p12 = scmp.ne.s32.totalorder %s186_s20, %s8503_s11  ;;  %p8512_p4 = scmp.lt.s32.totalorder %s8503_s11, %s8503_s11 }
  0x1a   : > { %p8506_p13 = pnand %p8504_p12, %p8697_p7  ;;  %p8513_p2 = por %p8512_p4, %p8511_p1 }
  0x1c   : > { %p8507_p0 = pneg %p8506_p13 }
  0x1e   : > { %p8514_p3 = pnand %p8513_p2, %p8507_p0 }
  0x20   : > { %8517 = shalt.err (!%p8514_p3)
}
  0x21   : > { %8209 = dma.hbm_to_vmem [thread:$0]  (!%p8683_p5), %s10573_s2, 128, %s186_s20, [#allocation7]  }
  0x22   : > { %s8518_s16 = scalar_lea.hbm %s10572_s1, 25600 }
  0x23   : > { %p8519_p6 = scmp.ne.s32.totalorder %s10572_s1, %s8518_s16  ;;  %p8525_p2 = scmp.lt.u32.totalorder %s8518_s16, %s10572_s1 }
  0x25   : > { %p8521_p8 = pnand %p8519_p6, %p8697_p7 }
  0x27   : > { %p8522_p9 = pneg %p8521_p8 }
  0x29   : > { %p8527_p3 = pnand %p8525_p2, %p8522_p9 }
  0x2b   : > { %8530 = shalt.err (!%p8527_p3)
}
  0x2c   : > { %s8531_s20 = scalar_lea.vmem %s8679_s24, 25600  ;;  %p8539_p13 = scmp.lt.s32.totalorder %s8679_s24, %s8679_s24 }
  0x2d   : > { %p8532_p10 = scmp.ne.s32.totalorder %s8679_s24, %s8531_s20  ;;  %p8540_p0 = scmp.lt.s32.totalorder %s8531_s20, %s8531_s20 }
  0x2f   : > { %p8534_p11 = pnand %p8532_p10, %p8697_p7  ;;  %p8541_p1 = por %p8540_p0, %p8539_p13 }
  0x31   : > { %p8535_p12 = pneg %p8534_p11 }
  0x33   : > { %p8542_p4 = pnand %p8541_p1, %p8535_p12 }
  0x35   : > { %8545 = shalt.err (!%p8542_p4)
}
  0x36   : > { %s8625_s28 = smov 512   ;;  %s8626_s29 = smov 32  }
  0x37   : > { %8206 = dma.hbm_to_vmem [thread:$0]  (!%p8683_p5), %s10572_s1, 25600, %s8679_s24, [#allocation5], %s8625_s28, %s8625_s28, %s8626_s29  }
  0x38   : > { %s8546_s10 = scalar_lea.hbm %s10574_s3, 20480 }
  0x39   : > { %p8547_p6 = scmp.ne.s32.totalorder %s10574_s3, %s8546_s10  ;;  %p8553_p2 = scmp.lt.u32.totalorder %s8546_s10, %s10574_s3 }
  0x3b   : > { %p8549_p8 = pnand %p8547_p6, %p8697_p7 }
  0x3d   : > { %p8550_p9 = pneg %p8549_p8 }
  0x3f   : > { %p8555_p3 = pnand %p8553_p2, %p8550_p9 }
  0x41   : > { %8558 = shalt.err (!%p8555_p3)
}
  0x42   : > { %s8559_s24 = scalar_lea.vmem %s8687_s27, 20480  ;;  %p8567_p13 = scmp.lt.s32.totalorder %s8687_s27, %s8687_s27 }
  0x43   : > { %p8560_p10 = scmp.ne.s32.totalorder %s8687_s27, %s8559_s24  ;;  %p8568_p0 = scmp.lt.s32.totalorder %s8559_s24, %s8559_s24 }
  0x45   : > { %p8562_p11 = pnand %p8560_p10, %p8697_p7  ;;  %p8569_p1 = por %p8568_p0, %p8567_p13 }
  0x47   : > { %p8563_p12 = pneg %p8562_p11 }
  0x49   : > { %p8570_p4 = pnand %p8569_p1, %p8563_p12 }
  0x4b   : > { %8573 = shalt.err (!%p8570_p4)
}
  0x4c   : > { %s8627_s15 = smov 64   ;;  %s8628_s16 = smov 4  }
  0x4d   : > { %8212 = dma.hbm_to_vmem [thread:$0]  (!%p8683_p5), %s10574_s3, 20480, %s8687_s27, [#allocation7], %s8627_s15, %s8627_s15, %s8628_s16  }
  0x4e   : > { %s8629_s23 = smov [#allocation9]   ;;  %s8574_s29 = scalar_lea.hbm %s10575_s4, 16 }
  0x4f   : > { %s209_s26 = sshll.u32 %s8629_s23, 4  ;;  %p8575_p6 = scmp.ne.s32.totalorder %s10575_s4, %s8574_s29  ;;  %s210_s26 = int_to_ptr.vmem [resolvable:$true] %s209_s26 }
  0x50   : > { %p8581_p2 = scmp.lt.u32.totalorder %s8574_s29, %s10575_s4 }
  0x51   : > { %p8577_p8 = pnand %p8575_p6, %p8697_p7 }
  0x53   : > { %p8578_p9 = pneg %p8577_p8 }
  0x55   : > { %p8583_p3 = pnand %p8581_p2, %p8578_p9 }
  0x57   : > { %8586 = shalt.err (!%p8583_p3)
}
  0x58   : > { %s8587_s27 = scalar_lea.vmem %s210_s26, 16  ;;  %s8594_s10 = scalar_lea.vmem %s210_s26, 32 }
  0x59   : > { %p8588_p10 = scmp.ne.s32.totalorder %s210_s26, %s8587_s27  ;;  %p8595_p13 = scmp.lt.s32.totalorder %s210_s26, %s210_s26 }
  0x5a   : > { %p8596_p0 = scmp.lt.s32.totalorder %s8594_s10, %s8587_s27 }
  0x5b   : > { %p8590_p11 = pnand %p8588_p10, %p8697_p7 }
  0x5c   : > { %p8597_p1 = por %p8596_p0, %p8595_p13 }
  0x5d   : > { %p8591_p12 = pneg %p8590_p11 }
  0x5f   : > { %p8598_p4 = pnand %p8597_p1, %p8591_p12 }
  0x61   : > { %8601 = shalt.err (!%p8598_p4)
}
  0x62   : > { %8215 = dma.hbm_to_vmem [thread:$0]  (!%p8683_p5), %s10575_s4, 16, %s210_s26, [#allocation10]  }
  0x63   : > { %p10698_p6 = scmp.ne.s32.totalorder %s10695_s22, 0 }
  0x65   : > { %230 = sbr.rel (%p10698_p6) target bundleno = 1516 (0x5ec), region = 40 }
  0x6c   : > { %p10699_p8 = scmp.eq.s32.totalorder %s8668_s21, 0 }
  0x6e   : > { %8607 = dma.done.wait (%p10699_p8), [#allocation5], 25600   ;;  %p10700_p7 = pmov %p10699_p8 }
  0x70   : > { %8609 = vsyncadd (%p10700_p7), [#allocation5], 4294941696  ;;  %p10701_p9 = pmov %p10700_p7 }
  0x71   : > { %p10702_p2 = pmov %p10700_p7 }
  0x72   : > { %8611 = dma.done.wait (%p10701_p9), [#allocation7], 20608  }
  0x73   : > { %8613 = vsyncadd (%p10702_p2), [#allocation7], 4294946688  ;;  %p10703_p3 = pmov %p10702_p2 }
  0x74   : > { %p10704_p5 = pmov %p10702_p2 }
  0x75   : > { %8615 = dma.done.wait (%p10703_p3), [#allocation10], 16  }
  0x76   : > { %8617 = vsyncadd (%p10704_p5), [#allocation10], 4294967280  ;;  %p270_p10 = scmp.lt.s32.totalorder %s8668_s21, 1  ;;  %vm285_vm0 = vcmask 60417   ;;  %vm291_vm1 = vcmask 650817   ;;  %v8630_v0 = vmov 0  }
  0x77   : > { %286 = vst.msk [vmem:[#allocation2] sm:$0xe] %vm285_vm0, %v8630_v0  ;;  %297 = vst [vmem:[#allocation3] sm:$0x11] %v8630_v0  ;;  %vm289_vm2 = vcmask 57344   ;;  %vm295_vm3 = vcmask 647744   ;;  %685 = vmatprep.mubr.bf16.mxu0 %v8630_v0  ;;  %728 = vmatprep.mubr.bf16.mxu1 %v8630_v0 }
  0x78   : > { %s10898_s21 = smov (!%p270_p10, %s8668_s21), 1  ;;  %298 = vst [vmem:[#allocation3 + $0x8] sm:$0x11] %v8630_v0  ;;  %299 = vst [vmem:[#allocation3 + $0x10] sm:$0x11] %v8630_v0  ;;  %vm287_vm4 = vcmask 60416  }
  0x79   : > { %300 = vst [vmem:[#allocation3 + $0x18] sm:$0x11] %v8630_v0  ;;  %301 = vst [vmem:[#allocation3 + $0x20] sm:$0x11] %v8630_v0  ;;  %vm293_vm5 = vcmask 650816   ;;  %vm281_vm6 = vcmask 647168  }
  0x7a   : > { %302 = vst [vmem:[#allocation3 + $0x50] sm:$0x22] %v8630_v0  ;;  %303 = vst [vmem:[#allocation3 + $0x58] sm:$0x22] %v8630_v0  ;;  %s7227_s22 = sshll.u32 %s10898_s21, 4  ;;  %v388_v3 = vld [vmem:[#allocation4 + $0x140] sm:$0xff] }
  0x7b   : > { %304 = vst [vmem:[#allocation3 + $0x60] sm:$0x22] %v8630_v0  ;;  %305 = vst [vmem:[#allocation3 + $0x68] sm:$0x22] %v8630_v0  ;;  %s274_s13 = scalar_lea.vmem %s10571_s0, %s7227_s22  ;;  %vm321_vm7 = vcmask 1040384   ;;  %vm322_vm8 = vcmask 1044484  }
  0x7c   : > { %306 = vst [vmem:[#allocation3 + $0x70] sm:$0x22] %v8630_v0  ;;  %307 = vst [vmem:[#allocation3] sm:$0xe] %v8630_v0  ;;  %v313_v1 = vld [vmem:[%s274_s13] sm:$0xff]  ;;  %v314_v2 = vld [vmem:[%s274_s13 + $0x8] sm:$0xff] }
  0x7d   : > { %308 = vst [vmem:[#allocation3 + $0x28] sm:$0xf] %v8630_v0  ;;  %309 = vst [vmem:[#allocation3 + $0x50] sm:$0x1] %v8630_v0  ;;  %v7229_v4 = vpack.c.bf16 %v313_v1, %v313_v1  ;;  %v7230_v5 = vpack.c.bf16 %v314_v2, %v314_v2  ;;  %v392_v6 = vld [vmem:[#allocation4 + $0x160] sm:$0xff]  ;;  %v389_v7 = vld [vmem:[#allocation4 + $0x148] sm:$0xff] }
  0x7e   : > { %310 = vst [vmem:[#allocation3 + $0x24] sm:$0xe] %v8630_v0  ;;  %311 = vst [vmem:[#allocation3 + $0x4c] sm:$0xf] %v8630_v0  ;;  %v393_v8 = vld [vmem:[#allocation4 + $0x168] sm:$0xff]  ;;  %v6744_v9 = vcombine.high %v388_v3, %v392_v6  ;;  %v6743_v11 = vcombine.low %v388_v3, %v392_v6  ;;  %v396_v13 = vld [vmem:[#allocation4 + $0x180] sm:$0xff] }
  0x7f   : > { %312 = vst [vmem:[#allocation3 + $0x74] sm:$0x1] %v8630_v0  ;;  %292 = vst.msk [vmem:[#allocation2] sm:$0xe] %vm291_vm1, %v8630_v0  ;;  %v6746_v10 = vcombine.high %v389_v7, %v393_v8  ;;  %v6745_v12 = vcombine.low %v389_v7, %v393_v8  ;;  %v400_v14 = vld [vmem:[#allocation4 + $0x1a0] sm:$0xff]  ;;  %v397_v15 = vld [vmem:[#allocation4 + $0x188] sm:$0xff] }
  0x80   : > { %290 = vst.msk [vmem:[#allocation2 + $0x8] sm:$0x1] %vm289_vm2, %v8630_v0  ;;  %v324_v16 = vrot.slane %v7229_v4, 7  ;;  %v326_v17 = vrot.slane %v7230_v5, 7  ;;  %v6752_v18 = vcombine.high %v396_v13, %v400_v14  ;;  %v401_v19 = vld [vmem:[#allocation4 + $0x1a8] sm:$0xff]  ;;  %v404_v20 = vld [vmem:[#allocation4 + $0x1c0] sm:$0xff]  ;;  %vm8827_vm9 = vmor %vm321_vm7, %vm322_vm8  ;;  %653 = vmatprep.subr.bf16.mxu0 %v6744_v9  ;;  %v6751_v28 = vcombine.low %v396_v13, %v400_v14 }
  0x81   : > { %288 = vst.msk [vmem:[#allocation2 + $0x4] sm:$0xf] %vm287_vm4, %v8630_v0  ;;  %v408_v21 = vld [vmem:[#allocation4 + $0x1e0] sm:$0xff]  ;;  %696 = vmatprep.subr.bf16.mxu1 %v6746_v10  ;;  %v6754_v23 = vcombine.high %v397_v15, %v401_v19  ;;  %v405_v24 = vld [vmem:[#allocation4 + $0x1c8] sm:$0xff]  ;;  %s8631_s14 = smov 8   ;;  %654 = vmatpush1.bf16.msra.mxu0 %v6743_v11  ;;  %v6753_v29 = vcombine.low %v397_v15, %v401_v19  ;;  %v8833_v37 = vld [vmem:[#allocation4 + $0x150] sm:$0xff] }
  0x82   : > { %296 = vst.msk [vmem:[#allocation2 + $0x8] sm:$0x1] %vm295_vm3, %v8630_v0  ;;  %v409_v25 = vld [vmem:[#allocation4 + $0x1e8] sm:$0xff]  ;;  %329 = vrot.lane.b32.xlu0 %v324_v16, %s8631_s14  ;;  %v325_v26 = vrot.slane %v324_v16, 4  ;;  %v328_v27 = vrot.slane %v326_v17, 4  ;;  %697 = vmatpush1.bf16.msra.mxu1 %v6745_v12  ;;  %v6760_v30 = vcombine.high %v404_v20, %v408_v21  ;;  %v412_v31 = vld [vmem:[#allocation4 + $0x200] sm:$0xff]  ;;  %v6759_v41 = vcombine.low %v404_v20, %v408_v21 }
  0x83   : > { %294 = vst.msk [vmem:[#allocation2 + $0x4] sm:$0xf] %vm293_vm5, %v8630_v0  ;;  %655 = vmatprep.subr.bf16.mxu0 %v6752_v18  ;;  %v416_v32 = vld [vmem:[#allocation4 + $0x220] sm:$0xff]  ;;  %v413_v33 = vld [vmem:[#allocation4 + $0x208] sm:$0xff]  ;;  %698 = vmatprep.subr.bf16.mxu1 %v6754_v23  ;;  %v6762_v35 = vcombine.high %v405_v24, %v409_v25  ;;  %v8835_v38 = vld [vmem:[#allocation4 + $0x170] sm:$0xff]  ;;  %v6761_v46 = vcombine.low %v405_v24, %v409_v25  ;;  %vm338_vm10 = vcmask 584769  }
  0x84   : > { %282 = vst.msk [vmem:[#allocation2] sm:$0x1] %vm281_vm6, %v8630_v0  ;;  %333 = vrot.lane.b32.xlu1 %v328_v27, %s8631_s14  ;;  %v327_v34 = vsel %vm8827_vm9, %v325_v26, %v326_v17  ;;  %v417_v36 = vld [vmem:[#allocation4 + $0x228] sm:$0xff]  ;;  %v8837_v39 = vld [vmem:[#allocation4 + $0x158] sm:$0xff]  ;;  %v420_v42 = vld [vmem:[#allocation4 + $0x240] sm:$0xff]  ;;  %v6747_v44 = vcombine.low %v8833_v37, %v8835_v38  ;;  %v6768_v47 = vcombine.high %v412_v31, %v416_v32  ;;  %vm342_vm11 = vcmask 581696  }
  0x85   : > { %v8839_v40 = vld [vmem:[#allocation4 + $0x178] sm:$0xff]  ;;  %656 = vmatpush1.bf16.msra.mxu0 %v6751_v28  ;;  %v424_v43 = vld [vmem:[#allocation4 + $0x260] sm:$0xff]  ;;  %v6770_v48 = vcombine.high %v413_v33, %v417_v36  ;;  %v421_v49 = vld [vmem:[#allocation4 + $0x248] sm:$0xff]  ;;  %v6767_v51 = vcombine.low %v412_v31, %v416_v32  ;;  %v6769_v52 = vcombine.low %v413_v33, %v417_v36  ;;  %v6748_v57 = vcombine.high %v8833_v37, %v8835_v38  ;;  %s7228_s24 = sshll.u32 %s10898_s21, 5 }
  0x86   : > { %331 = vrot.lane.b32.xlu0 %v327_v34, %s8631_s14  ;;  %v6749_v45 = vcombine.low %v8837_v39, %v8839_v40  ;;  %699 = vmatpush1.bf16.msra.mxu1 %v6753_v29  ;;  %v425_v50 = vld [vmem:[#allocation4 + $0x268] sm:$0xff]  ;;  %v6776_v53 = vcombine.high %v420_v42, %v424_v43  ;;  %v6775_v55 = vcombine.low %v420_v42, %v424_v43  ;;  %vm340_vm12 = vcmask 584768   ;;  %v398_v8 = vld [vmem:[#allocation4 + $0x190] sm:$0xff]  ;;  %v399_v12 = vld [vmem:[#allocation4 + $0x198] sm:$0xff]  ;;  %s10558_s17 = scalar_lea.vmem %s10576_s5, %s7228_s24 }
  0x87   : > { %657 = vmatprep.subr.bf16.mxu0 %v6760_v30  ;;  %700 = vmatprep.subr.bf16.mxu1 %v6762_v35  ;;  %v6778_v54 = vcombine.high %v421_v49, %v425_v50  ;;  %v6777_v56 = vcombine.low %v421_v49, %v425_v50  ;;  %v6750_v58 = vcombine.high %v8837_v39, %v8839_v40  ;;  %vm1244_vm13 = vcmask 1046528   ;;  %v402_v11 = vld [vmem:[#allocation4 + $0x1b0] sm:$0xff]  ;;  %v403_v13 = vld [vmem:[#allocation4 + $0x1b8] sm:$0xff]  ;;  %v351_v49 = vld [vmem:[#allocation4 + $0x28] sm:$0xff] }
  0x88   : > { %vm436_vm14 = vsmask.f32 7424  ;;  %vm649_vm15 = vcmask 654336   ;;  %v406_v18 = vld [vmem:[#allocation4 + $0x1d0] sm:$0xff]  ;;  %v6756_v20 = vcombine.high %v398_v8, %v402_v11  ;;  %v6758_v21 = vcombine.high %v399_v12, %v403_v13  ;;  %v407_v23 = vld [vmem:[#allocation4 + $0x1d8] sm:$0xff] }
  0x89   : > { %658 = vmatpush1.bf16.msra.mxu0 %v6759_v41  ;;  %v410_v19 = vld [vmem:[#allocation4 + $0x1f0] sm:$0xff]  ;;  %v411_v25 = vld [vmem:[#allocation4 + $0x1f8] sm:$0xff]  ;;  %v6755_v26 = vcombine.low %v398_v8, %v402_v11  ;;  %v6757_v27 = vcombine.low %v399_v12, %v403_v13  ;;  %v374_v8 = vld [vmem:[#allocation4 + $0xe0] sm:$0xff]  ;;  %vm1684_vm0 = vsmask.f32 6400  ;;  %vm2138_vm1 = vcmask 1045504  }
  0x8a   : > { %701 = vmatpush1.bf16.msra.mxu1 %v6761_v46  ;;  %659 = vmatprep.subr.bf16.mxu0 %v6768_v47  ;;  %v414_v28 = vld [vmem:[#allocation4 + $0x210] sm:$0xff]  ;;  %v415_v30 = vld [vmem:[#allocation4 + $0x218] sm:$0xff]  ;;  %v6764_v31 = vcombine.high %v406_v18, %v410_v19  ;;  %v6766_v32 = vcombine.high %v407_v23, %v411_v25  ;;  %v6763_v34 = vcombine.low %v406_v18, %v410_v19  ;;  %v347_v46 = vld [vmem:[#allocation4 + $0x8] sm:$0xff] }
  0x8b   : > { %702 = vmatprep.subr.bf16.mxu1 %v6770_v48  ;;  %v418_v29 = vld [vmem:[#allocation4 + $0x230] sm:$0xff]  ;;  %v419_v33 = vld [vmem:[#allocation4 + $0x238] sm:$0xff]  ;;  %v6765_v35 = vcombine.low %v407_v23, %v411_v25  ;;  %v375_v12 = vld [vmem:[#allocation4 + $0xe8] sm:$0xff] }
  0x8c   : > { %v422_v36 = vld [vmem:[#allocation4 + $0x250] sm:$0xff]  ;;  %v423_v38 = vld [vmem:[#allocation4 + $0x258] sm:$0xff]  ;;  %v6772_v39 = vcombine.high %v414_v28, %v418_v29  ;;  %v6774_v40 = vcombine.high %v415_v30, %v419_v33  ;;  %v6771_v42 = vcombine.low %v414_v28, %v418_v29  ;;  %v6773_v43 = vcombine.low %v415_v30, %v419_v33  ;;  %v379_v18 = vld [vmem:[#allocation4 + $0x108] sm:$0xff] }
  0x8d   : > { %660 = vmatpush1.bf16.msra.mxu0 %v6767_v51  ;;  %v426_v37 = vld [vmem:[#allocation4 + $0x270] sm:$0xff]  ;;  %v427_v41 = vld [vmem:[#allocation4 + $0x278] sm:$0xff] }
  0x8e   : > { %703 = vmatpush1.bf16.msra.mxu1 %v6769_v52  ;;  %661 = vmatprep.subr.bf16.mxu0 %v6776_v53  ;;  %v6780_v47 = vcombine.high %v422_v36, %v426_v37  ;;  %v6782_v48 = vcombine.high %v423_v38, %v427_v41  ;;  %v6779_v50 = vcombine.low %v422_v36, %v426_v37  ;;  %v354_v52 = vld [vmem:[#allocation4 + $0x40] sm:$0xff]  ;;  %v348_v25 = vld [vmem:[#allocation4 + $0x10] sm:$0xff]  ;;  %v353_v28 = vld [vmem:[#allocation4 + $0x38] sm:$0xff] }
  0x8f   : > { %704 = vmatprep.subr.bf16.mxu1 %v6778_v54  ;;  %v6781_v51 = vcombine.low %v423_v38, %v427_v41  ;;  %v358_v53 = vld [vmem:[#allocation4 + $0x60] sm:$0xff]  ;;  %v355_v54 = vld [vmem:[#allocation4 + $0x48] sm:$0xff]  ;;  %v356_v33 = vld [vmem:[#allocation4 + $0x50] sm:$0xff] }
  0x90   : > { %v360_v36 = vld [vmem:[#allocation4 + $0x70] sm:$0xff]  ;;  %v357_v37 = vld [vmem:[#allocation4 + $0x58] sm:$0xff] }
  0x91   : > { %662 = vmatpush1.bf16.msra.mxu0 %v6775_v55  ;;  %v361_v38 = vld [vmem:[#allocation4 + $0x78] sm:$0xff]  ;;  %v6800_v41 = vcombine.high %v356_v33, %v360_v36 }
  0x92   : > { %705 = vmatpush1.bf16.msra.mxu1 %v6777_v56  ;;  %739 = vmatprep.subr.bf16.mxu0 %v6748_v57  ;;  %v6790_v56 = vcombine.high %v347_v46, %v351_v49  ;;  %v359_v57 = vld [vmem:[#allocation4 + $0x68] sm:$0xff] }
  0x93   : > { %782 = vmatprep.subr.bf16.mxu1 %v6750_v58 }
  0xf4   : > { %v330_v59 = vpop.permute.xlu0 %329 }
  0xf5   : > { %339 = vst.msk [vmem:[#allocation2] sm:$0xe] %vm338_vm10, %v330_v59  ;;  %v6789_v59 = vcombine.low %v347_v46, %v351_v49  ;;  %v369_v46 = vld [vmem:[#allocation4 + $0xb8] sm:$0xff] }
  0xf6   : > { %v334_v60 = vpop.permute.xlu1 %333 }
  0xf7   : > { %343 = vst.msk [vmem:[#allocation2 + $0x8] sm:$0x1] %vm342_vm11, %v334_v60  ;;  %v362_v60 = vld [vmem:[#allocation4 + $0x80] sm:$0xff] }
  0xf8   : > { %v332_v61 = vpop.permute.xlu0 %331 }
  0xf9   : > { %341 = vst.msk [vmem:[#allocation2 + $0x4] sm:$0xf] %vm340_vm12, %v332_v61  ;;  %v366_v61 = vld [vmem:[#allocation4 + $0xa0] sm:$0xff] }
  0xfa   : > { %v6803_v13 = vcombine.low %v362_v60, %v366_v61 }
  0xfc   : > { %v344_v63 = vld [vmem:[#allocation2] sm:$0xf] }
  0xfd   : > { %v1199_v3 = vld [vmem:[#allocation2] sm:$0xe] }
  0xfe   : > { %v8243_v62 = vld [vmem:[#allocation2 + $0x8] ss:$0 sps:$4 sm:$0x11]  }
  0xff   : > { %v445_v2 = vshll.u32 %v8243_v62, 16  ;;  %v1246_v6 = vrot.slane %v8243_v62, 1  ;;  %v363_v62 = vld [vmem:[#allocation4 + $0x88] sm:$0xff] }
 0x100   : > { %v345_v1 = vld [vmem:[#allocation2 + $0x4] sm:$0xf] }
 0x101   : > { %v8849_v4 = vcombine.low %v344_v63, %v345_v1  ;;  %v8851_v5 = vcombine.low %v1199_v3, %v345_v1  ;;  %v447_v10 = vrot.slane %v445_v2, 1  ;;  %v6796_v63 = vcombine.high %v354_v52, %v358_v53  ;;  %v367_v2 = vld [vmem:[#allocation4 + $0xa8] sm:$0xff] }
 0x102   : > { %v6798_v1 = vcombine.high %v355_v54, %v359_v57  ;;  %v6795_v3 = vcombine.low %v354_v52, %v358_v53  ;;  %v6806_v11 = vcombine.high %v363_v62, %v367_v2  ;;  %v376_v52 = vld [vmem:[#allocation4 + $0xf0] sm:$0xff]  ;;  %v373_v53 = vld [vmem:[#allocation4 + $0xd8] sm:$0xff] }
 0x103   : > { %v440_v7 = vshll.u32 %v8849_v4, 16  ;;  %v1245_v9 = vrot.slane %v8851_v5, 1  ;;  %v438_v14 = vshrl.u32 %v8849_v4, 16 }
 0x105   : > { %v442_v15 = vrot.slane %v440_v7, 1  ;;  %v8857_v16 = vsel %vm1244_vm13, %v1245_v9, %v1246_v6  ;;  %v6797_v6 = vcombine.low %v355_v54, %v359_v57  ;;  %v370_v7 = vld [vmem:[#allocation4 + $0xc0] sm:$0xff]  ;;  %v371_v9 = vld [vmem:[#allocation4 + $0xc8] sm:$0xff]  ;;  %v377_v54 = vld [vmem:[#allocation4 + $0xf8] sm:$0xff] }
 0x106   : > { %v6812_v19 = vcombine.high %v370_v7, %v374_v8  ;;  %v6811_v23 = vcombine.low %v370_v7, %v374_v8  ;;  %v1205_v7 = vld [vmem:[#allocation4 + $0x2a0] sm:$0xff]  ;;  %v1202_v8 = vld [vmem:[#allocation4 + $0x288] sm:$0xff] }
 0x107   : > { %v443_v17 = vor.u32 %v442_v15, %v438_v14  ;;  %v6805_v14 = vcombine.low %v363_v62, %v367_v2  ;;  %v378_v15 = vld [vmem:[#allocation4 + $0x100] sm:$0xff]  ;;  %v385_v62 = vld [vmem:[#allocation4 + $0x138] sm:$0xff] }
 0x109   : > { %v8860_v24 = vsel %vm436_vm14, %v443_v17, %v447_v10  ;;  %v6804_v10 = vcombine.high %v362_v60, %v366_v61  ;;  %v382_v17 = vld [vmem:[#allocation4 + $0x120] sm:$0xff]  ;;  %v384_v60 = vld [vmem:[#allocation4 + $0x130] sm:$0xff]  ;;  %v381_v61 = vld [vmem:[#allocation4 + $0x118] sm:$0xff] }
 0x10a   : > { %6783 = vmatmul.mubr.msk.bf16.vlgmr.msra.gmra.mrb[0].mxu0 %vm649_vm15, %v8860_v24  ;;  %6784 = vmatmul.mubr.msk.bf16.vlgmr.msra.gmra.mrb[0].mxu1 %vm649_vm15, %v8860_v24  ;;  %v6820_v29 = vcombine.high %v378_v15, %v382_v17 }
 0x10b   : > { %740 = vmatpush1.bf16.msra.mxu0 %v6747_v44  ;;  %783 = vmatpush1.bf16.msra.mxu1 %v6749_v45  ;;  %v346_v44 = vld [vmem:[#allocation4] sm:$0xff] }
 0x10c   : > { %741 = vmatprep.subr.bf16.mxu0 %v6756_v20  ;;  %784 = vmatprep.subr.bf16.mxu1 %v6758_v21  ;;  %v350_v45 = vld [vmem:[#allocation4 + $0x20] sm:$0xff]  ;;  %v6814_v20 = vcombine.high %v371_v9, %v375_v12  ;;  %v383_v21 = vld [vmem:[#allocation4 + $0x128] sm:$0xff] }
 0x10d   : > { %771 = vmatprep.mubr.bf16.mxu0 %v8630_v0  ;;  %814 = vmatprep.mubr.bf16.mxu1 %v8630_v0  ;;  %v6788_v55 = vcombine.high %v346_v44, %v350_v45  ;;  %v6787_v58 = vcombine.low %v346_v44, %v350_v45  ;;  %v6822_v30 = vcombine.high %v379_v18, %v383_v21  ;;  %v368_v44 = vld [vmem:[#allocation4 + $0xb0] sm:$0xff]  ;;  %v365_v45 = vld [vmem:[#allocation4 + $0x98] sm:$0xff] }
 0x10f   : > { %742 = vmatpush1.bf16.msra.mxu0 %v6755_v26  ;;  %785 = vmatpush1.bf16.msra.mxu1 %v6757_v27  ;;  %v352_v26 = vld [vmem:[#allocation4 + $0x30] sm:$0xff]  ;;  %v349_v27 = vld [vmem:[#allocation4 + $0x18] sm:$0xff] }
 0x110   : > { %743 = vmatprep.subr.bf16.mxu0 %v6764_v31  ;;  %786 = vmatprep.subr.bf16.mxu1 %v6766_v32  ;;  %v6819_v31 = vcombine.low %v378_v15, %v382_v17  ;;  %v6821_v32 = vcombine.low %v379_v18, %v383_v21  ;;  %v1213_v15 = vld [vmem:[#allocation4 + $0x2e0] sm:$0xff]  ;;  %v1210_v17 = vld [vmem:[#allocation4 + $0x2c8] sm:$0xff] }
 0x111   : > { %v1214_v18 = vld [vmem:[#allocation4 + $0x2e8] sm:$0xff] }
 0x113   : > { %744 = vmatpush1.bf16.msra.mxu0 %v6763_v34  ;;  %787 = vmatpush1.bf16.msra.mxu1 %v6765_v35  ;;  %v6792_v34 = vcombine.high %v348_v25, %v352_v26  ;;  %v6794_v35 = vcombine.high %v349_v27, %v353_v28 }
 0x114   : > { %745 = vmatprep.subr.bf16.mxu0 %v6772_v39  ;;  %788 = vmatprep.subr.bf16.mxu1 %v6774_v40  ;;  %v6791_v39 = vcombine.low %v348_v25, %v352_v26  ;;  %v6793_v40 = vcombine.low %v349_v27, %v353_v28  ;;  %v1221_v25 = vld [vmem:[#allocation4 + $0x320] sm:$0xff]  ;;  %v1218_v26 = vld [vmem:[#allocation4 + $0x308] sm:$0xff] }
 0x115   : > { %v1222_v27 = vld [vmem:[#allocation4 + $0x328] sm:$0xff] }
 0x117   : > { %746 = vmatpush1.bf16.msra.mxu0 %v6771_v42  ;;  %789 = vmatpush1.bf16.msra.mxu1 %v6773_v43  ;;  %v6802_v42 = vcombine.high %v357_v37, %v361_v38  ;;  %v364_v43 = vld [vmem:[#allocation4 + $0x90] sm:$0xff] }
 0x118   : > { %747 = vmatprep.subr.bf16.mxu0 %v6780_v47  ;;  %790 = vmatprep.subr.bf16.mxu1 %v6782_v48  ;;  %v6799_v47 = vcombine.low %v356_v33, %v360_v36  ;;  %v6801_v48 = vcombine.low %v357_v37, %v361_v38  ;;  %v6808_v49 = vcombine.high %v364_v43, %v368_v44  ;;  %v1229_v33 = vld [vmem:[#allocation4 + $0x360] sm:$0xff] }
 0x11b   : > { %748 = vmatpush1.bf16.msra.mxu0 %v6779_v50  ;;  %791 = vmatpush1.bf16.msra.mxu1 %v6781_v51  ;;  %v6810_v50 = vcombine.high %v365_v45, %v369_v46  ;;  %v372_v51 = vld [vmem:[#allocation4 + $0xd0] sm:$0xff] }
 0x11c   : > { %1027 = vmatprep.subr.bf16.mxu0 %v6788_v55  ;;  %1070 = vmatprep.subr.bf16.mxu1 %v6790_v56  ;;  %v6807_v55 = vcombine.low %v364_v43, %v368_v44  ;;  %v6809_v56 = vcombine.low %v365_v45, %v369_v46  ;;  %v6816_v57 = vcombine.high %v372_v51, %v376_v52 }
 0x11e   : > { %6785 = vmatmul.mubr.msk.bf16.vlgmr.msra.gmra.mrb[4].mxu0 %vm649_vm15, %v8860_v24  ;;  %6786 = vmatmul.mubr.msk.bf16.vlgmr.msra.gmra.mrb[4].mxu1 %vm649_vm15, %v8860_v24  ;;  %v6813_v24 = vcombine.low %v371_v9, %v375_v12  ;;  %v1206_v9 = vld [vmem:[#allocation4 + $0x2a8] sm:$0xff] }
 0x11f   : > { %1028 = vmatpush1.bf16.msra.mxu0 %v6787_v58  ;;  %1071 = vmatpush1.bf16.msra.mxu1 %v6789_v59  ;;  %v6818_v58 = vcombine.high %v373_v53, %v377_v54  ;;  %v380_v59 = vld [vmem:[#allocation4 + $0x110] sm:$0xff] }
 0x120   : > { %1029 = vmatprep.subr.bf16.mxu0 %v6796_v63  ;;  %1072 = vmatprep.subr.bf16.mxu1 %v6798_v1  ;;  %v6815_v63 = vcombine.low %v372_v51, %v376_v52  ;;  %v6817_v1 = vcombine.low %v373_v53, %v377_v54  ;;  %v6824_v2 = vcombine.high %v380_v59, %v384_v60 }
 0x121   : > { %1059 = vmatprep.mubr.bf16.mxu0 %v8630_v0  ;;  %1102 = vmatprep.mubr.bf16.mxu1 %v8630_v0 }
 0x123   : > { %1030 = vmatpush1.bf16.msra.mxu0 %v6795_v3  ;;  %1073 = vmatpush1.bf16.msra.mxu1 %v6797_v6  ;;  %v6826_v3 = vcombine.high %v381_v61, %v385_v62  ;;  %v1201_v6 = vld [vmem:[#allocation4 + $0x280] sm:$0xff] }
 0x124   : > { %1031 = vmatprep.subr.bf16.mxu0 %v6804_v10  ;;  %1074 = vmatprep.subr.bf16.mxu1 %v6806_v11  ;;  %v6823_v10 = vcombine.low %v380_v59, %v384_v60  ;;  %v6825_v11 = vcombine.low %v381_v61, %v385_v62  ;;  %v6833_v12 = vcombine.high %v1201_v6, %v1205_v7 }
 0x127   : > { %1032 = vmatpush1.bf16.msra.mxu0 %v6803_v13  ;;  %1075 = vmatpush1.bf16.msra.mxu1 %v6805_v14  ;;  %v6835_v13 = vcombine.high %v1202_v8, %v1206_v9  ;;  %v1209_v14 = vld [vmem:[#allocation4 + $0x2c0] sm:$0xff] }
 0x128   : > { %1033 = vmatprep.subr.bf16.mxu0 %v6812_v19  ;;  %1076 = vmatprep.subr.bf16.mxu1 %v6814_v20  ;;  %v6832_v19 = vcombine.low %v1201_v6, %v1205_v7  ;;  %v6834_v20 = vcombine.low %v1202_v8, %v1206_v9  ;;  %v6841_v21 = vcombine.high %v1209_v14, %v1213_v15 }
 0x129   : > { %v6840_v28 = vcombine.low %v1209_v14, %v1213_v15 }
 0x12b   : > { %1034 = vmatpush1.bf16.msra.mxu0 %v6811_v23  ;;  %1077 = vmatpush1.bf16.msra.mxu1 %v6813_v24  ;;  %v6843_v23 = vcombine.high %v1210_v17, %v1214_v18  ;;  %v1217_v24 = vld [vmem:[#allocation4 + $0x300] sm:$0xff] }
 0x12c   : > { %1035 = vmatprep.subr.bf16.mxu0 %v6820_v29  ;;  %1078 = vmatprep.subr.bf16.mxu1 %v6822_v30  ;;  %v6842_v29 = vcombine.low %v1210_v17, %v1214_v18  ;;  %v6849_v30 = vcombine.high %v1217_v24, %v1221_v25  ;;  %v6848_v36 = vcombine.low %v1217_v24, %v1221_v25 }
 0x12f   : > { %1036 = vmatpush1.bf16.msra.mxu0 %v6819_v31  ;;  %1079 = vmatpush1.bf16.msra.mxu1 %v6821_v32  ;;  %v6851_v31 = vcombine.high %v1218_v26, %v1222_v27  ;;  %v1225_v32 = vld [vmem:[#allocation4 + $0x340] sm:$0xff] }
 0x130   : > { %1113 = vmatprep.subr.bf16.mxu0 %v6792_v34  ;;  %1156 = vmatprep.subr.bf16.mxu1 %v6794_v35  ;;  %v1226_v34 = vld [vmem:[#allocation4 + $0x348] sm:$0xff]  ;;  %v6857_v37 = vcombine.high %v1225_v32, %v1229_v33  ;;  %v6856_v43 = vcombine.low %v1225_v32, %v1229_v33 }
 0x131   : > { %v1230_v35 = vld [vmem:[#allocation4 + $0x368] sm:$0xff] }
 0x132   : > { %6827 = vmatmul.mubr.msk.bf16.vlgmr.msra.gmra.mrb[0].mxu0 %vm649_vm15, %v8849_v4  ;;  %6828 = vmatmul.mubr.msk.bf16.vlgmr.msra.gmra.mrb[0].mxu1 %vm649_vm15, %v8849_v4  ;;  %v6859_v38 = vcombine.high %v1226_v34, %v1230_v35  ;;  %v6858_v44 = vcombine.low %v1226_v34, %v1230_v35 }
 0x133   : > { %1114 = vmatpush1.bf16.msra.mxu0 %v6791_v39  ;;  %1157 = vmatpush1.bf16.msra.mxu1 %v6793_v40  ;;  %v1233_v39 = vld [vmem:[#allocation4 + $0x380] sm:$0xff] }
 0x134   : > { %1115 = vmatprep.subr.bf16.mxu0 %v6800_v41  ;;  %1158 = vmatprep.subr.bf16.mxu1 %v6802_v42  ;;  %v1237_v40 = vld [vmem:[#allocation4 + $0x3a0] sm:$0xff]  ;;  %v1234_v41 = vld [vmem:[#allocation4 + $0x388] sm:$0xff] }
 0x135   : > { %1145 = vmatprep.mubr.bf16.mxu0 %v8630_v0  ;;  %1188 = vmatprep.mubr.bf16.mxu1 %v8630_v0  ;;  %v1238_v42 = vld [vmem:[#allocation4 + $0x3a8] sm:$0xff]  ;;  %v6865_v45 = vcombine.high %v1233_v39, %v1237_v40  ;;  %v6864_v51 = vcombine.low %v1233_v39, %v1237_v40 }
 0x136   : > { %v6867_v46 = vcombine.high %v1234_v41, %v1238_v42  ;;  %v6866_v52 = vcombine.low %v1234_v41, %v1238_v42 }
 0x137   : > { %1116 = vmatpush1.bf16.msra.mxu0 %v6799_v47  ;;  %1159 = vmatpush1.bf16.msra.mxu1 %v6801_v48  ;;  %v1203_v47 = vld [vmem:[#allocation4 + $0x290] sm:$0xff] }
 0x138   : > { %1117 = vmatprep.subr.bf16.mxu0 %v6808_v49  ;;  %1160 = vmatprep.subr.bf16.mxu1 %v6810_v50  ;;  %v1207_v48 = vld [vmem:[#allocation4 + $0x2b0] sm:$0xff]  ;;  %v1204_v49 = vld [vmem:[#allocation4 + $0x298] sm:$0xff] }
 0x139   : > { %v1208_v50 = vld [vmem:[#allocation4 + $0x2b8] sm:$0xff]  ;;  %v6837_v53 = vcombine.high %v1203_v47, %v1207_v48  ;;  %v6836_v59 = vcombine.low %v1203_v47, %v1207_v48 }
 0x13a   : > { %v6839_v54 = vcombine.high %v1204_v49, %v1208_v50  ;;  %v6838_v60 = vcombine.low %v1204_v49, %v1208_v50 }
 0x13b   : > { %1118 = vmatpush1.bf16.msra.mxu0 %v6807_v55  ;;  %1161 = vmatpush1.bf16.msra.mxu1 %v6809_v56  ;;  %v1211_v55 = vld [vmem:[#allocation4 + $0x2d0] sm:$0xff] }
 0x13c   : > { %1119 = vmatprep.subr.bf16.mxu0 %v6816_v57  ;;  %1162 = vmatprep.subr.bf16.mxu1 %v6818_v58  ;;  %v1215_v56 = vld [vmem:[#allocation4 + $0x2f0] sm:$0xff]  ;;  %v1212_v57 = vld [vmem:[#allocation4 + $0x2d8] sm:$0xff] }
 0x13d   : > { %v1216_v58 = vld [vmem:[#allocation4 + $0x2f8] sm:$0xff]  ;;  %v6845_v61 = vcombine.high %v1211_v55, %v1215_v56  ;;  %v6844_v6 = vcombine.low %v1211_v55, %v1215_v56  ;;  %v8904_v55 = vld [vmem:[#allocation2 + $0x8] ss:$0 sps:$4 sm:$0x33]  }
 0x13e   : > { %v6847_v62 = vcombine.high %v1212_v57, %v1216_v58  ;;  %v6846_v7 = vcombine.low %v1212_v57, %v1216_v58 }
 0x13f   : > { %1120 = vmatpush1.bf16.msra.mxu0 %v6815_v63  ;;  %1163 = vmatpush1.bf16.msra.mxu1 %v6817_v1  ;;  %v1219_v63 = vld [vmem:[#allocation4 + $0x310] sm:$0xff] }
 0x140   : > { %1121 = vmatprep.subr.bf16.mxu0 %v6824_v2  ;;  %1164 = vmatprep.subr.bf16.mxu1 %v6826_v3  ;;  %v1223_v1 = vld [vmem:[#allocation4 + $0x330] sm:$0xff]  ;;  %v1220_v2 = vld [vmem:[#allocation4 + $0x318] sm:$0xff] }
 0x141   : > { %v1224_v3 = vld [vmem:[#allocation4 + $0x338] sm:$0xff]  ;;  %v6853_v8 = vcombine.high %v1219_v63, %v1223_v1  ;;  %v6852_v14 = vcombine.low %v1219_v63, %v1223_v1  ;;  %v1686_v63 = vshrl.u32 %v8851_v5, 16  ;;  %v1689_v1 = vshll.u32 %v8851_v5, 16 }
 0x142   : > { %v6855_v9 = vcombine.high %v1220_v2, %v1224_v3  ;;  %v6854_v15 = vcombine.low %v1220_v2, %v1224_v3  ;;  %v1694_v2 = vshrl.u32 %v8904_v55, 16  ;;  %v1697_v3 = vshll.u32 %v8904_v55, 16  ;;  %v1648_v5 = vld [vmem:[#allocation4 + $0x3f8] sm:$0xff] }
 0x143   : > { %1122 = vmatpush1.bf16.msra.mxu0 %v6823_v10  ;;  %1165 = vmatpush1.bf16.msra.mxu1 %v6825_v11  ;;  %v1227_v10 = vld [vmem:[#allocation4 + $0x350] sm:$0xff] }
 0x144   : > { %1451 = vmatprep.subr.bf16.mxu0 %v6833_v12  ;;  %1494 = vmatprep.subr.bf16.mxu1 %v6835_v13  ;;  %v1231_v11 = vld [vmem:[#allocation4 + $0x370] sm:$0xff]  ;;  %v1228_v12 = vld [vmem:[#allocation4 + $0x358] sm:$0xff] }
 0x145   : > { %v1232_v13 = vld [vmem:[#allocation4 + $0x378] sm:$0xff]  ;;  %v6861_v17 = vcombine.high %v1227_v10, %v1231_v11  ;;  %v6860_v24 = vcombine.low %v1227_v10, %v1231_v11  ;;  %v1643_v10 = vld [vmem:[#allocation4 + $0x3d0] sm:$0xff] }
 0x146   : > { %6829 = vmatmul.mubr.msk.bf16.vlgmr.msra.gmra.mrb[4].mxu0 %vm649_vm15, %v8849_v4  ;;  %6830 = vmatmul.mubr.msk.bf16.vlgmr.msra.gmra.mrb[4].mxu1 %vm649_vm15, %v8849_v4  ;;  %v6850_v4 = vcombine.low %v1218_v26, %v1222_v27  ;;  %v6863_v18 = vcombine.high %v1228_v12, %v1232_v13  ;;  %v6862_v25 = vcombine.low %v1228_v12, %v1232_v13  ;;  %v1647_v11 = vld [vmem:[#allocation4 + $0x3f0] sm:$0xff]  ;;  %v1688_v12 = vrot.slane %v1686_v63, 1 }
 0x147   : > { %1452 = vmatpush1.bf16.msra.mxu0 %v6832_v19  ;;  %1495 = vmatpush1.bf16.msra.mxu1 %v6834_v20  ;;  %v1235_v19 = vld [vmem:[#allocation4 + $0x390] sm:$0xff]  ;;  %v1691_v13 = vrot.slane %v1689_v1, 2 }
 0x148   : > { %1453 = vmatprep.subr.bf16.mxu0 %v6841_v21  ;;  %1496 = vmatprep.subr.bf16.mxu1 %v6843_v23  ;;  %v1239_v20 = vld [vmem:[#allocation4 + $0x3b0] sm:$0xff]  ;;  %v1236_v21 = vld [vmem:[#allocation4 + $0x398] sm:$0xff] }
 0x149   : > { %1483 = vmatprep.mubr.bf16.mxu0 %v8630_v0  ;;  %1526 = vmatprep.mubr.bf16.mxu1 %v8630_v0  ;;  %v1240_v23 = vld [vmem:[#allocation4 + $0x3b8] sm:$0xff]  ;;  %v6869_v26 = vcombine.high %v1235_v19, %v1239_v20  ;;  %v6868_v32 = vcombine.low %v1235_v19, %v1239_v20  ;;  %v6882_v20 = vcombine.high %v1643_v10, %v1647_v11 }
 0x14a   : > { %v6871_v27 = vcombine.high %v1236_v21, %v1240_v23  ;;  %v6870_v33 = vcombine.low %v1236_v21, %v1240_v23  ;;  %v1651_v23 = vld [vmem:[#allocation4 + $0x410] sm:$0xff] }
 0x14b   : > { %1454 = vmatpush1.bf16.msra.mxu0 %v6840_v28  ;;  %1497 = vmatpush1.bf16.msra.mxu1 %v6842_v29  ;;  %v1641_v28 = vld [vmem:[#allocation4 + $0x3c0] sm:$0xff] }
 0x14c   : > { %1455 = vmatprep.subr.bf16.mxu0 %v6849_v30  ;;  %1498 = vmatprep.subr.bf16.mxu1 %v6851_v31  ;;  %v1645_v29 = vld [vmem:[#allocation4 + $0x3e0] sm:$0xff]  ;;  %v1642_v30 = vld [vmem:[#allocation4 + $0x3c8] sm:$0xff] }
 0x14d   : > { %v1646_v31 = vld [vmem:[#allocation4 + $0x3e8] sm:$0xff]  ;;  %v6878_v34 = vcombine.high %v1641_v28, %v1645_v29  ;;  %v6877_v39 = vcombine.low %v1641_v28, %v1645_v29  ;;  %v1656_v28 = vld [vmem:[#allocation4 + $0x438] sm:$0xff]  ;;  %v6881_v29 = vcombine.low %v1643_v10, %v1647_v11 }
 0x14e   : > { %v6880_v35 = vcombine.high %v1642_v30, %v1646_v31  ;;  %v6879_v40 = vcombine.low %v1642_v30, %v1646_v31 }
 0x14f   : > { %1456 = vmatpush1.bf16.msra.mxu0 %v6848_v36  ;;  %1499 = vmatpush1.bf16.msra.mxu1 %v6850_v4  ;;  %v1649_v36 = vld [vmem:[#allocation4 + $0x400] sm:$0xff] }
 0x150   : > { %1457 = vmatprep.subr.bf16.mxu0 %v6857_v37  ;;  %1500 = vmatprep.subr.bf16.mxu1 %v6859_v38  ;;  %v1653_v4 = vld [vmem:[#allocation4 + $0x420] sm:$0xff]  ;;  %v1650_v37 = vld [vmem:[#allocation4 + $0x408] sm:$0xff] }
 0x151   : > { %v1654_v38 = vld [vmem:[#allocation4 + $0x428] sm:$0xff]  ;;  %v6886_v41 = vcombine.high %v1649_v36, %v1653_v4  ;;  %v6885_v47 = vcombine.low %v1649_v36, %v1653_v4  ;;  %v1660_v36 = vld [vmem:[#allocation4 + $0x458] sm:$0xff] }
 0x152   : > { %v6888_v42 = vcombine.high %v1650_v37, %v1654_v38  ;;  %v6887_v48 = vcombine.low %v1650_v37, %v1654_v38  ;;  %v1664_v4 = vld [vmem:[#allocation4 + $0x478] sm:$0xff] }
 0x153   : > { %1458 = vmatpush1.bf16.msra.mxu0 %v6856_v43  ;;  %1501 = vmatpush1.bf16.msra.mxu1 %v6858_v44  ;;  %v1657_v43 = vld [vmem:[#allocation4 + $0x440] sm:$0xff] }
 0x154   : > { %1459 = vmatprep.subr.bf16.mxu0 %v6865_v45  ;;  %1502 = vmatprep.subr.bf16.mxu1 %v6867_v46  ;;  %v1661_v44 = vld [vmem:[#allocation4 + $0x460] sm:$0xff]  ;;  %v1658_v45 = vld [vmem:[#allocation4 + $0x448] sm:$0xff] }
 0x155   : > { %v1662_v46 = vld [vmem:[#allocation4 + $0x468] sm:$0xff]  ;;  %v6894_v49 = vcombine.high %v1657_v43, %v1661_v44 }
 0x156   : > { %v6896_v50 = vcombine.high %v1658_v45, %v1662_v46  ;;  %v6895_v56 = vcombine.low %v1658_v45, %v1662_v46  ;;  %v6899_v46 = vcombine.low %v1660_v36, %v1664_v4 }
 0x157   : > { %1460 = vmatpush1.bf16.msra.mxu0 %v6864_v51  ;;  %1503 = vmatpush1.bf16.msra.mxu1 %v6866_v52  ;;  %v1665_v51 = vld [vmem:[#allocation4 + $0x480] sm:$0xff] }
 0x158   : > { %1537 = vmatprep.subr.bf16.mxu0 %v6837_v53  ;;  %1580 = vmatprep.subr.bf16.mxu1 %v6839_v54  ;;  %v1669_v52 = vld [vmem:[#allocation4 + $0x4a0] sm:$0xff]  ;;  %v1666_v53 = vld [vmem:[#allocation4 + $0x488] sm:$0xff] }
 0x159   : > { %v1670_v54 = vld [vmem:[#allocation4 + $0x4a8] sm:$0xff]  ;;  %v6902_v57 = vcombine.high %v1665_v51, %v1669_v52 }
 0x15a   : > { %6872 = vmatmul.mubr.msk.bf16.vlgmr.msra.gmra.mrb[0].mxu0 %vm649_vm15, %v8857_v16  ;;  %6873 = vmatmul.mubr.msk.bf16.vlgmr.msra.gmra.mrb[0].mxu1 %vm649_vm15, %v8857_v16  ;;  %v6904_v58 = vcombine.high %v1666_v53, %v1670_v54 }
 0x15b   : > { %1538 = vmatpush1.bf16.msra.mxu0 %v6836_v59  ;;  %1581 = vmatpush1.bf16.msra.mxu1 %v6838_v60  ;;  %v1673_v59 = vld [vmem:[#allocation4 + $0x4c0] sm:$0xff] }
 0x15c   : > { %1539 = vmatprep.subr.bf16.mxu0 %v6845_v61  ;;  %1582 = vmatprep.subr.bf16.mxu1 %v6847_v62  ;;  %v1677_v60 = vld [vmem:[#allocation4 + $0x4e0] sm:$0xff]  ;;  %v1674_v61 = vld [vmem:[#allocation4 + $0x4c8] sm:$0xff] }
 0x15d   : > { %1569 = vmatprep.mubr.bf16.mxu0 %v8630_v0  ;;  %1612 = vmatprep.mubr.bf16.mxu1 %v8630_v0  ;;  %v1678_v62 = vld [vmem:[#allocation4 + $0x4e8] sm:$0xff] }
 0x15e   : > { %v6911_v19 = vcombine.low %v1674_v61, %v1678_v62 }
 0x15f   : > { %1540 = vmatpush1.bf16.msra.mxu0 %v6844_v6  ;;  %1583 = vmatpush1.bf16.msra.mxu1 %v6846_v7  ;;  %v6901_v6 = vcombine.low %v1665_v51, %v1669_v52  ;;  %v6903_v7 = vcombine.low %v1666_v53, %v1670_v54  ;;  %v1676_v51 = vld [vmem:[#allocation4 + $0x4d8] sm:$0xff] }
 0x160   : > { %1541 = vmatprep.subr.bf16.mxu0 %v6853_v8  ;;  %1584 = vmatprep.subr.bf16.mxu1 %v6855_v9  ;;  %v6910_v8 = vcombine.high %v1673_v59, %v1677_v60  ;;  %v6912_v9 = vcombine.high %v1674_v61, %v1678_v62  ;;  %v1680_v52 = vld [vmem:[#allocation4 + $0x4f8] sm:$0xff] }
 0x161   : > { %v6915_v62 = vcombine.low %v1676_v51, %v1680_v52 }
 0x163   : > { %1542 = vmatpush1.bf16.msra.mxu0 %v6852_v14  ;;  %1585 = vmatpush1.bf16.msra.mxu1 %v6854_v15  ;;  %v1696_v14 = vrot.slane %v1694_v2, 1  ;;  %v1699_v15 = vrot.slane %v1697_v3, 2  ;;  %v2103_v2 = vld [vmem:[#allocation4 + $0x540] sm:$0xff] }
 0x164   : > { %1543 = vmatprep.subr.bf16.mxu0 %v6861_v17  ;;  %1586 = vmatprep.subr.bf16.mxu1 %v6863_v18  ;;  %v1644_v17 = vld [vmem:[#allocation4 + $0x3d8] sm:$0xff]  ;;  %v6909_v18 = vcombine.low %v1673_v59, %v1677_v60  ;;  %v2096_v59 = vld [vmem:[#allocation4 + $0x508] sm:$0xff]  ;;  %v2107_v3 = vld [vmem:[#allocation4 + $0x560] sm:$0xff] }
 0x165   : > { %v6884_v21 = vcombine.high %v1644_v17, %v1648_v5  ;;  %v6883_v30 = vcombine.low %v1644_v17, %v1648_v5  ;;  %v2100_v60 = vld [vmem:[#allocation4 + $0x528] sm:$0xff]  ;;  %v6931_v10 = vcombine.high %v2103_v2, %v2107_v3  ;;  %v6930_v17 = vcombine.low %v2103_v2, %v2107_v3  ;;  %v2121_v2 = vld [vmem:[#allocation4 + $0x5d0] sm:$0xff] }
 0x166   : > { %v6925_v1 = vcombine.high %v2096_v59, %v2100_v60  ;;  %v2125_v3 = vld [vmem:[#allocation4 + $0x5f0] sm:$0xff] }
 0x167   : > { %1544 = vmatpush1.bf16.msra.mxu0 %v6860_v24  ;;  %1587 = vmatpush1.bf16.msra.mxu1 %v6862_v25  ;;  %v1692_v24 = vor.u32 %v1691_v13, %v1688_v12  ;;  %v1700_v25 = vor.u32 %v1699_v15, %v1696_v14  ;;  %v2111_v12 = vld [vmem:[#allocation4 + $0x580] sm:$0xff]  ;;  %v2112_v14 = vld [vmem:[#allocation4 + $0x588] sm:$0xff] }
 0x168   : > { %1545 = vmatprep.subr.bf16.mxu0 %v6869_v26  ;;  %1588 = vmatprep.subr.bf16.mxu1 %v6871_v27  ;;  %v1655_v26 = vld [vmem:[#allocation4 + $0x430] sm:$0xff]  ;;  %v1652_v27 = vld [vmem:[#allocation4 + $0x418] sm:$0xff]  ;;  %v2115_v13 = vld [vmem:[#allocation4 + $0x5a0] sm:$0xff] }
 0x169   : > { %v6890_v31 = vcombine.high %v1651_v23, %v1655_v26  ;;  %v6889_v37 = vcombine.low %v1651_v23, %v1655_v26  ;;  %v6891_v38 = vcombine.low %v1652_v27, %v1656_v28  ;;  %v2116_v15 = vld [vmem:[#allocation4 + $0x5a8] sm:$0xff] }
 0x16a   : > { %v2120_v23 = vld [vmem:[#allocation4 + $0x5c8] sm:$0xff]  ;;  %v6940_v26 = vcombine.low %v2112_v14, %v2116_v15 }
 0x16b   : > { %1546 = vmatpush1.bf16.msra.mxu0 %v6868_v32  ;;  %1589 = vmatpush1.bf16.msra.mxu1 %v6870_v33  ;;  %v6892_v32 = vcombine.high %v1652_v27, %v1656_v28  ;;  %v1659_v33 = vld [vmem:[#allocation4 + $0x450] sm:$0xff] }
 0x16c   : > { %1905 = vmatprep.subr.bf16.mxu0 %v6878_v34  ;;  %1948 = vmatprep.subr.bf16.mxu1 %v6880_v35  ;;  %v8911_v34 = vsel %vm1684_vm0, %v1692_v24, %v1700_v25  ;;  %v1663_v35 = vld [vmem:[#allocation4 + $0x470] sm:$0xff]  ;;  %v2124_v24 = vld [vmem:[#allocation4 + $0x5e8] sm:$0xff]  ;;  %v6938_v25 = vcombine.low %v2111_v12, %v2115_v13 }
 0x16d   : > { %v6897_v45 = vcombine.low %v1659_v33, %v1663_v35  ;;  %v6949_v28 = vcombine.high %v2120_v23, %v2124_v24 }
 0x16e   : > { %6874 = vmatmul.mubr.msk.bf16.vlgmr.msra.gmra.mrb[4].mxu0 %vm649_vm15, %v8857_v16  ;;  %6875 = vmatmul.mubr.msk.bf16.vlgmr.msra.gmra.mrb[4].mxu1 %vm649_vm15, %v8857_v16  ;;  %v6893_v16 = vcombine.low %v1657_v43, %v1661_v44  ;;  %v1668_v43 = vld [vmem:[#allocation4 + $0x498] sm:$0xff] }
 0x16f   : > { %1906 = vmatpush1.bf16.msra.mxu0 %v6877_v39  ;;  %1949 = vmatpush1.bf16.msra.mxu1 %v6879_v40  ;;  %v6898_v39 = vcombine.high %v1659_v33, %v1663_v35  ;;  %v6900_v40 = vcombine.high %v1660_v36, %v1664_v4  ;;  %v1672_v44 = vld [vmem:[#allocation4 + $0x4b8] sm:$0xff] }
 0x170   : > { %1907 = vmatprep.subr.bf16.mxu0 %v6886_v41  ;;  %1950 = vmatprep.subr.bf16.mxu1 %v6888_v42  ;;  %v1667_v41 = vld [vmem:[#allocation4 + $0x490] sm:$0xff]  ;;  %v6907_v54 = vcombine.low %v1668_v43, %v1672_v44  ;;  %v2093_v4 = vld [vmem:[#allocation2] sm:$0xc] }
 0x171   : > { %1937 = vmatprep.mubr.bf16.mxu0 %v8630_v0  ;;  %1980 = vmatprep.mubr.bf16.mxu1 %v8630_v0  ;;  %v1671_v42 = vld [vmem:[#allocation4 + $0x4b0] sm:$0xff] }
 0x172   : > { %v6905_v53 = vcombine.low %v1667_v41, %v1671_v42 }
 0x173   : > { %1908 = vmatpush1.bf16.msra.mxu0 %v6885_v47  ;;  %1951 = vmatpush1.bf16.msra.mxu1 %v6887_v48  ;;  %v6906_v47 = vcombine.high %v1667_v41, %v1671_v42  ;;  %v6908_v48 = vcombine.high %v1668_v43, %v1672_v44  ;;  %v2098_v41 = vld [vmem:[#allocation4 + $0x518] sm:$0xff] }
 0x174   : > { %1909 = vmatprep.subr.bf16.mxu0 %v6894_v49  ;;  %1952 = vmatprep.subr.bf16.mxu1 %v6896_v50  ;;  %v1675_v49 = vld [vmem:[#allocation4 + $0x4d0] sm:$0xff]  ;;  %v2102_v42 = vld [vmem:[#allocation4 + $0x538] sm:$0xff] }
 0x175   : > { %v1679_v50 = vld [vmem:[#allocation4 + $0x4f0] sm:$0xff] }
 0x176   : > { %v6913_v61 = vcombine.low %v1675_v49, %v1679_v50 }
 0x177   : > { %1910 = vmatpush1.bf16.msra.mxu0 %v6893_v16  ;;  %1953 = vmatpush1.bf16.msra.mxu1 %v6895_v56  ;;  %v6914_v16 = vcombine.high %v1675_v49, %v1679_v50  ;;  %v6916_v56 = vcombine.high %v1676_v51, %v1680_v52  ;;  %v2140_v49 = vrot.slane %v8904_v55, 2  ;;  %v2109_v50 = vld [vmem:[#allocation4 + $0x570] sm:$0xff]  ;;  %v2106_v51 = vld [vmem:[#allocation4 + $0x558] sm:$0xff] }
 0x178   : > { %1911 = vmatprep.subr.bf16.mxu0 %v6902_v57  ;;  %1954 = vmatprep.subr.bf16.mxu1 %v6904_v58  ;;  %v2095_v57 = vld [vmem:[#allocation4 + $0x500] sm:$0xff]  ;;  %v2110_v52 = vld [vmem:[#allocation4 + $0x578] sm:$0xff] }
 0x179   : > { %v2099_v58 = vld [vmem:[#allocation4 + $0x520] sm:$0xff] }
 0x17a   : > { %v6923_v63 = vcombine.high %v2095_v57, %v2099_v58 }
 0x17b   : > { %1912 = vmatpush1.bf16.msra.mxu0 %v6901_v6  ;;  %1955 = vmatpush1.bf16.msra.mxu1 %v6903_v7  ;;  %v2104_v6 = vld [vmem:[#allocation4 + $0x548] sm:$0xff] }
 0x17c   : > { %1913 = vmatprep.subr.bf16.mxu0 %v6910_v8  ;;  %1956 = vmatprep.subr.bf16.mxu1 %v6912_v9  ;;  %v2108_v7 = vld [vmem:[#allocation4 + $0x568] sm:$0xff]  ;;  %v6922_v8 = vcombine.low %v2095_v57, %v2099_v58  ;;  %v6924_v9 = vcombine.low %v2096_v59, %v2100_v60  ;;  %v2113_v57 = vld [vmem:[#allocation4 + $0x590] sm:$0xff]  ;;  %v2114_v60 = vld [vmem:[#allocation4 + $0x598] sm:$0xff] }
 0x17d   : > { %v6933_v11 = vcombine.high %v2104_v6, %v2108_v7  ;;  %v6932_v5 = vcombine.low %v2104_v6, %v2108_v7  ;;  %v2117_v59 = vld [vmem:[#allocation4 + $0x5b0] sm:$0xff]  ;;  %v2122_v6 = vld [vmem:[#allocation4 + $0x5d8] sm:$0xff] }
 0x17e   : > { %v2126_v7 = vld [vmem:[#allocation4 + $0x5f8] sm:$0xff] }
 0x17f   : > { %1914 = vmatpush1.bf16.msra.mxu0 %v6909_v18  ;;  %1957 = vmatpush1.bf16.msra.mxu1 %v6911_v19  ;;  %v6939_v18 = vcombine.high %v2111_v12, %v2115_v13  ;;  %v6941_v19 = vcombine.high %v2112_v14, %v2116_v15  ;;  %v2129_v12 = vld [vmem:[#allocation4 + $0x610] sm:$0xff]  ;;  %v2130_v14 = vld [vmem:[#allocation4 + $0x618] sm:$0xff] }
 0x180   : > { %1991 = vmatprep.subr.bf16.mxu0 %v6882_v20  ;;  %2034 = vmatprep.subr.bf16.mxu1 %v6884_v21  ;;  %v2119_v20 = vld [vmem:[#allocation4 + $0x5c0] sm:$0xff]  ;;  %v2133_v13 = vld [vmem:[#allocation4 + $0x630] sm:$0xff]  ;;  %v2134_v15 = vld [vmem:[#allocation4 + $0x638] sm:$0xff] }
 0x181   : > { %v2123_v21 = vld [vmem:[#allocation4 + $0x5e0] sm:$0xff] }
 0x182   : > { %6917 = vmatmul.mubr.msk.bf16.vlgmr.msra.gmra.mrb[0].mxu0 %vm649_vm15, %v8911_v34  ;;  %6918 = vmatmul.mubr.msk.bf16.vlgmr.msra.gmra.mrb[0].mxu1 %vm649_vm15, %v8911_v34  ;;  %v6947_v27 = vcombine.high %v2119_v20, %v2123_v21  ;;  %v6946_v33 = vcombine.low %v2119_v20, %v2123_v21  ;;  %v6960_v20 = vcombine.low %v2130_v14, %v2134_v15  ;;  %v8931_v21 = vld [vmem:[#allocation8 + $0x140] sm:$0xff]  }
 0x183   : > { %1992 = vmatpush1.bf16.msra.mxu0 %v6881_v29  ;;  %2035 = vmatpush1.bf16.msra.mxu1 %v6883_v30  ;;  %v2127_v29 = vld [vmem:[#allocation4 + $0x600] sm:$0xff] }
 0x184   : > { %1993 = vmatprep.subr.bf16.mxu0 %v6890_v31  ;;  %2036 = vmatprep.subr.bf16.mxu1 %v6892_v32  ;;  %v2131_v30 = vld [vmem:[#allocation4 + $0x620] sm:$0xff]  ;;  %v2128_v31 = vld [vmem:[#allocation4 + $0x608] sm:$0xff] }
 0x185   : > { %2023 = vmatprep.mubr.bf16.mxu0 %v8630_v0  ;;  %2066 = vmatprep.mubr.bf16.mxu1 %v8630_v0  ;;  %v2132_v32 = vld [vmem:[#allocation4 + $0x628] sm:$0xff]  ;;  %v6955_v35 = vcombine.high %v2127_v29, %v2131_v30  ;;  %v6954_v43 = vcombine.low %v2127_v29, %v2131_v30  ;;  %v8951_v29 = vld [vmem:[#allocation8 + $0x188] sm:$0xff]   ;;  %v8957_v30 = vld [vmem:[#allocation8 + $0x150] sm:$0xff]  }
 0x186   : > { %v6957_v36 = vcombine.high %v2128_v31, %v2132_v32  ;;  %v6956_v44 = vcombine.low %v2128_v31, %v2132_v32  ;;  %v8959_v31 = vld [vmem:[#allocation8 + $0x1d0] sm:$0xff]  }
 0x187   : > { %1994 = vmatpush1.bf16.msra.mxu0 %v6889_v37  ;;  %2037 = vmatpush1.bf16.msra.mxu1 %v6891_v38  ;;  %v2097_v37 = vld [vmem:[#allocation4 + $0x510] sm:$0xff]  ;;  %v8480_v38 = vld [vmem:[#allocation2 + $0x4] sm:$0xf]  ;;  %v8961_v32 = vld [vmem:[#allocation8 + $0x110] sm:$0xff]  }
 0x188   : > { %1995 = vmatprep.subr.bf16.mxu0 %v6898_v39  ;;  %2038 = vmatprep.subr.bf16.mxu1 %v6900_v40  ;;  %v6921_v39 = vcombine.low %v2093_v4, %v8480_v38  ;;  %v2101_v40 = vld [vmem:[#allocation4 + $0x530] sm:$0xff]  ;;  %v8975_v4 = vld [vmem:[#allocation8 + $0x198] sm:$0xff]   ;;  %v8981_v38 = vld [vmem:[#allocation8 + $0x1e0] sm:$0xff]  }
 0x18b   : > { %1996 = vmatpush1.bf16.msra.mxu0 %v6897_v45  ;;  %2039 = vmatpush1.bf16.msra.mxu1 %v6899_v46  ;;  %v6927_v45 = vcombine.high %v2097_v37, %v2101_v40  ;;  %v6929_v46 = vcombine.high %v2098_v41, %v2102_v42 }
 0x18c   : > { %1997 = vmatprep.subr.bf16.mxu0 %v6906_v47  ;;  %2040 = vmatprep.subr.bf16.mxu1 %v6908_v48  ;;  %v2105_v47 = vld [vmem:[#allocation4 + $0x550] sm:$0xff]  ;;  %v2139_v48 = vrot.slane %v6921_v39, 2  ;;  %v8985_v39 = vld [vmem:[#allocation8 + $0x120] sm:$0xff]  }
 0x18d   : > { %v6934_v55 = vcombine.low %v2105_v47, %v2109_v50 }
 0x18e   : > { %v2141_v58 = vsel %vm2138_vm1, %v2139_v48, %v2140_v49  ;;  %v9011_v48 = vld [vmem:[#allocation8 + $0x1b0] sm:$0xff]   ;;  %v9017_v49 = vld [vmem:[#allocation8 + $0x178] sm:$0xff]  }
 0x18f   : > { %1998 = vmatpush1.bf16.msra.mxu0 %v6905_v53  ;;  %2041 = vmatpush1.bf16.msra.mxu1 %v6907_v54  ;;  %v6926_v53 = vcombine.low %v2097_v37, %v2101_v40  ;;  %v6928_v54 = vcombine.low %v2098_v41, %v2102_v42  ;;  %v8977_v37 = vld [vmem:[#allocation8 + $0x160] sm:$0xff]   ;;  %v8991_v41 = vld [vmem:[#allocation8 + $0x168] sm:$0xff]   ;;  %10711 = vst [vmem:[#allocation18_spill] sm:$0xff] %v9011_v48  ;;  %10712 = vst [vmem:[#allocation19_spill] sm:$0xff] %v9017_v49 }
 0x190   : > { %1999 = vmatprep.subr.bf16.mxu0 %v6914_v16  ;;  %2042 = vmatprep.subr.bf16.mxu1 %v6916_v56  ;;  %v6935_v16 = vcombine.high %v2105_v47, %v2109_v50  ;;  %v6937_v56 = vcombine.high %v2106_v51, %v2110_v52  ;;  %v8987_v40 = vld [vmem:[#allocation8 + $0x1a0] sm:$0xff]   ;;  %v8993_v42 = vld [vmem:[#allocation8 + $0x1e8] sm:$0xff]   ;;  %v9009_v47 = vld [vmem:[#allocation8 + $0x130] sm:$0xff]  }
 0x191   : > { %10710 = vst [vmem:[#allocation17_spill] sm:$0xff] %v9009_v47  ;;  %v9019_v50 = vld [vmem:[#allocation8 + $0x1f8] sm:$0xff]  }
 0x192   : > { %10713 = vst [vmem:[#allocation20_spill] sm:$0xff] %v9019_v50 }
 0x193   : > { %2000 = vmatpush1.bf16.msra.mxu0 %v6913_v61  ;;  %2043 = vmatpush1.bf16.msra.mxu1 %v6915_v62  ;;  %v2118_v61 = vld [vmem:[#allocation4 + $0x5b8] sm:$0xff]  ;;  %v6936_v62 = vcombine.low %v2106_v51, %v2110_v52  ;;  %v9021_v51 = vld [vmem:[#allocation8 + $0x138] sm:$0xff]  }
 0x194   : > { %2345 = vmatprep.subr.bf16.mxu0 %v6923_v63  ;;  %2388 = vmatprep.subr.bf16.mxu1 %v6925_v1  ;;  %v6943_v63 = vcombine.high %v2113_v57, %v2117_v59  ;;  %v6945_v1 = vcombine.high %v2114_v60, %v2118_v61  ;;  %10714 = vst [vmem:[#allocation21_spill] sm:$0xff] %v9021_v51  ;;  %v9023_v52 = vld [vmem:[#allocation8 + $0x1b8] sm:$0xff]  }
 0x195   : > { %10715 = vst [vmem:[#allocation22_spill] sm:$0xff] %v9023_v52 }
 0x196   : > { %6919 = vmatmul.mubr.msk.bf16.vlgmr.msra.gmra.mrb[4].mxu0 %vm649_vm15, %v8911_v34  ;;  %6920 = vmatmul.mubr.msk.bf16.vlgmr.msra.gmra.mrb[4].mxu1 %vm649_vm15, %v8911_v34  ;;  %v6948_v34 = vcombine.low %v2120_v23, %v2124_v24  ;;  %v8933_v23 = vld [vmem:[#allocation8 + $0x1c0] sm:$0xff]  }
 0x197   : > { %2346 = vmatpush1.bf16.msra.mxu0 %v6922_v8  ;;  %2389 = vmatpush1.bf16.msra.mxu1 %v6924_v9  ;;  %v6942_v8 = vcombine.low %v2113_v57, %v2117_v59  ;;  %v6944_v9 = vcombine.low %v2114_v60, %v2118_v61  ;;  %v8935_v24 = vld [vmem:[#allocation8 + $0x100] sm:$0xff]   ;;  %v2533_v59 = vld [vmem:[#allocation6] sm:$0xff] }
 0x198   : > { %2347 = vmatprep.subr.bf16.mxu0 %v6931_v10  ;;  %2390 = vmatprep.subr.bf16.mxu1 %v6933_v11  ;;  %v6951_v10 = vcombine.high %v2121_v2, %v2125_v3  ;;  %v6953_v11 = vcombine.high %v2122_v6, %v2126_v7 }
 0x199   : > { %2377 = vmatprep.mubr.bf16.mxu0 %v8630_v0  ;;  %2420 = vmatprep.mubr.bf16.mxu1 %v8630_v0 }
 0x19b   : > { %2348 = vmatpush1.bf16.msra.mxu0 %v6930_v17  ;;  %2391 = vmatpush1.bf16.msra.mxu1 %v6932_v5  ;;  %v6950_v17 = vcombine.low %v2121_v2, %v2125_v3  ;;  %v6952_v5 = vcombine.low %v2122_v6, %v2126_v7 }
 0x19c   : > { %2349 = vmatprep.subr.bf16.mxu0 %v6939_v18  ;;  %2392 = vmatprep.subr.bf16.mxu1 %v6941_v19  ;;  %v6959_v18 = vcombine.high %v2129_v12, %v2133_v13  ;;  %v6958_v19 = vcombine.low %v2129_v12, %v2133_v13 }
 0x19f   : > { %2350 = vmatpush1.bf16.msra.mxu0 %v6938_v25  ;;  %2393 = vmatpush1.bf16.msra.mxu1 %v6940_v26  ;;  %v8937_v25 = vld [vmem:[#allocation8 + $0x180] sm:$0xff]   ;;  %v8945_v26 = vld [vmem:[#allocation8 + $0x148] sm:$0xff]  }
 0x1a0   : > { %2351 = vmatprep.subr.bf16.mxu0 %v6947_v27  ;;  %2394 = vmatprep.subr.bf16.mxu1 %v6949_v28  ;;  %v8947_v27 = vld [vmem:[#allocation8 + $0x1c8] sm:$0xff]  }
 0x1a1   : > { %v8949_v28 = vld [vmem:[#allocation8 + $0x108] sm:$0xff]  }
 0x1a3   : > { %2352 = vmatpush1.bf16.msra.mxu0 %v6946_v33  ;;  %2395 = vmatpush1.bf16.msra.mxu1 %v6948_v34  ;;  %v8963_v33 = vld [vmem:[#allocation8 + $0x190] sm:$0xff]   ;;  %v8969_v34 = vld [vmem:[#allocation8 + $0x158] sm:$0xff]  }
 0x1a4   : > { %2353 = vmatprep.subr.bf16.mxu0 %v6955_v35  ;;  %2396 = vmatprep.subr.bf16.mxu1 %v6957_v36  ;;  %v8971_v35 = vld [vmem:[#allocation8 + $0x1d8] sm:$0xff]  }
 0x1a5   : > { %v8973_v36 = vld [vmem:[#allocation8 + $0x118] sm:$0xff]  }
 0x1a7   : > { %2354 = vmatpush1.bf16.msra.mxu0 %v6954_v43  ;;  %2397 = vmatpush1.bf16.msra.mxu1 %v6956_v44  ;;  %v8997_v43 = vld [vmem:[#allocation8 + $0x128] sm:$0xff]  }
 0x1a8   : > { %2431 = vmatprep.subr.bf16.mxu0 %v6927_v45  ;;  %2474 = vmatprep.subr.bf16.mxu1 %v6929_v46  ;;  %v8999_v44 = vld [vmem:[#allocation8 + $0x1a8] sm:$0xff]   ;;  %v9005_v45 = vld [vmem:[#allocation8 + $0x170] sm:$0xff]  }
 0x1a9   : > { %10707 = vst [vmem:[#allocation14_spill] sm:$0xff] %v8999_v44  ;;  %10708 = vst [vmem:[#allocation15_spill] sm:$0xff] %v9005_v45  ;;  %v9007_v46 = vld [vmem:[#allocation8 + $0x1f0] sm:$0xff]  }
 0x1aa   : > { %6962 = vmatmul.mubr.msk.bf16.vlgmr.msra.gmra.mrb[0].mxu0 %vm649_vm15, %v2141_v58  ;;  %6963 = vmatmul.mubr.msk.bf16.vlgmr.msra.gmra.mrb[0].mxu1 %vm649_vm15, %v2141_v58  ;;  %10709 = vst [vmem:[#allocation16_spill] sm:$0xff] %v9007_v46 }
 0x1ab   : > { %2432 = vmatpush1.bf16.msra.mxu0 %v6926_v53  ;;  %2475 = vmatpush1.bf16.msra.mxu1 %v6928_v54  ;;  %v9029_v53 = vld [vmem:[#allocation8 + $0x40] sm:$0xff]  }
 0x1ac   : > { %2433 = vmatprep.subr.bf16.mxu0 %v6935_v16  ;;  %2476 = vmatprep.subr.bf16.mxu1 %v6937_v56  ;;  %10716 = vst [vmem:[#allocation23_spill] sm:$0xff] %v9029_v53  ;;  %v9031_v54 = vld [vmem:[#allocation8 + $0xc0] sm:$0xff]   ;;  %v2535_v16 = vlaneseq }
 0x1ad   : > { %2463 = vmatprep.mubr.bf16.mxu0 %v8630_v0  ;;  %2506 = vmatprep.mubr.bf16.mxu1 %v8630_v0  ;;  %v6961_v0 = vcombine.high %v2130_v14, %v2134_v15  ;;  %10717 = vst [vmem:[#allocation24_spill] sm:$0xff] %v9031_v54 }
 0x1ae   : > { %v2536_v56 = vshrl.u32 %v2535_v16, 7 }
 0x1af   : > { %2434 = vmatpush1.bf16.msra.mxu0 %v6934_v55  ;;  %2477 = vmatpush1.bf16.msra.mxu1 %v6936_v62 }
 0x1b0   : > { %2435 = vmatprep.subr.bf16.mxu0 %v6943_v63  ;;  %2478 = vmatprep.subr.bf16.mxu1 %v6945_v1  ;;  %v2537_v57 = vsub.s32 0, %v2536_v56  ;;  %v2541_v60 = vsub.s32 1, %v2536_v56  ;;  %v2549_v61 = vsub.s32 3, %v2536_v56 }
 0x1b2   : > { %v2538_v55 = vrot.slane %v2533_v59, %v2537_v57  ;;  %v2542_v63 = vrot.slane %v2533_v59, %v2541_v60  ;;  %v2550_v1 = vrot.slane %v2533_v59, %v2549_v61 }
 0x1b3   : > { %2436 = vmatpush1.bf16.msra.mxu0 %v6942_v8  ;;  %2479 = vmatpush1.bf16.msra.mxu1 %v6944_v9 }
 0x1b4   : > { %2437 = vmatprep.subr.bf16.mxu0 %v6951_v10  ;;  %2480 = vmatprep.subr.bf16.mxu1 %v6953_v11 }
 0x1b7   : > { %2438 = vmatpush1.bf16.msra.mxu0 %v6950_v17  ;;  %2481 = vmatpush1.bf16.msra.mxu1 %v6952_v5 }
 0x1b8   : > { %2439 = vmatprep.subr.bf16.mxu0 %v6959_v18  ;;  %2482 = vmatprep.subr.bf16.mxu1 %v6961_v0 }
 0x1bb   : > { %2440 = vmatpush1.bf16.msra.mxu0 %v6958_v19  ;;  %2483 = vmatpush1.bf16.msra.mxu1 %v6960_v20 }
 0x1bc   : > { %7243 = vmatprep.subr.bf16.mxu0 %v8931_v21  ;;  %7265 = vmatprep.subr.bf16.mxu1 %v8933_v23 }
 0x1be   : > { %6964 = vmatmul.mubr.msk.bf16.vlgmr.msra.gmra.mrb[4].mxu0 %vm649_vm15, %v2141_v58  ;;  %6965 = vmatmul.mubr.msk.bf16.vlgmr.msra.gmra.mrb[4].mxu1 %vm649_vm15, %v2141_v58  ;;  %v2545_v58 = vsub.s32 2, %v2536_v56 }
 0x1bf   : > { %7244 = vmatpush3.bf16.msra.mxu0 %v8935_v24  ;;  %7266 = vmatpush3.bf16.msra.mxu1 %v8937_v25 }
 0x1c0   : > { %7245 = vmatprep.subr.bf16.mxu0 %v8945_v26  ;;  %7267 = vmatprep.subr.bf16.mxu1 %v8947_v27  ;;  %v2546_v62 = vrot.slane %v2533_v59, %v2545_v58 }
 0x1c3   : > { %7246 = vmatpush3.bf16.msra.mxu0 %v8949_v28  ;;  %7268 = vmatpush3.bf16.msra.mxu1 %v8951_v29 }
 0x1c4   : > { %7247 = vmatprep.subr.bf16.mxu0 %v8957_v30  ;;  %7269 = vmatprep.subr.bf16.mxu1 %v8959_v31 }
 0x1c7   : > { %7248 = vmatpush3.bf16.msra.mxu0 %v8961_v32  ;;  %7270 = vmatpush3.bf16.msra.mxu1 %v8963_v33 }
 0x1c8   : > { %7249 = vmatprep.subr.bf16.mxu0 %v8969_v34  ;;  %7271 = vmatprep.subr.bf16.mxu1 %v8971_v35 }
 0x1cb   : > { %7250 = vmatpush3.bf16.msra.mxu0 %v8973_v36  ;;  %7272 = vmatpush3.bf16.msra.mxu1 %v8975_v4 }
 0x1cc   : > { %7251 = vmatprep.subr.bf16.mxu0 %v8977_v37  ;;  %7273 = vmatprep.subr.bf16.mxu1 %v8981_v38 }
 0x1cf   : > { %7252 = vmatpush3.bf16.msra.mxu0 %v8985_v39  ;;  %7274 = vmatpush3.bf16.msra.mxu1 %v8987_v40 }
 0x1d0   : > { %7253 = vmatprep.subr.bf16.mxu0 %v8991_v41  ;;  %7275 = vmatprep.subr.bf16.mxu1 %v8993_v42 }
 0x1d3   : > { %7254 = vmatpush3.bf16.msra.mxu0 %v8997_v43  ;;  %7276 = vmatpush3.bf16.msra.mxu1 %v8999_v44 }
 0x1d4   : > { %7255 = vmatprep.subr.bf16.mxu0 %v9005_v45  ;;  %7277 = vmatprep.subr.bf16.mxu1 %v9007_v46 }
 0x1d7   : > { %7256 = vmatpush3.bf16.msra.mxu0 %v9009_v47  ;;  %7278 = vmatpush3.bf16.msra.mxu1 %v9011_v48 }
 0x1d8   : > { %7257 = vmatprep.subr.bf16.mxu0 %v9017_v49  ;;  %7279 = vmatprep.subr.bf16.mxu1 %v9019_v50 }
 0x1db   : > { %7258 = vmatpush3.bf16.msra.mxu0 %v9021_v51  ;;  %7280 = vmatpush3.bf16.msra.mxu1 %v9023_v52 }
 0x1dc   : > { %7287 = vmatprep.subr.bf16.mxu0 %v9029_v53  ;;  %7309 = vmatprep.subr.bf16.mxu1 %v9031_v54 }
 0x27d   : > { %v2379_v2 = vpop.f32.mrb[0].mxu0  ;;  %v2422_v3 = vpop.f32.mrb[0].mxu1 }
 0x27e   : > { %v2575_v6 = vadd.f32 %v2538_v55, %v2379_v2  ;;  %v2577_v7 = vadd.f32 %v2546_v62, %v2422_v3  ;;  %v2381_v8 = vpop.f32.mrb[1].mxu0  ;;  %v2424_v9 = vpop.f32.mrb[1].mxu1 }
 0x27f   : > { %v2576_v10 = vadd.f32 %v2542_v63, %v2381_v8  ;;  %v2578_v11 = vadd.f32 %v2550_v1, %v2424_v9  ;;  %v2383_v12 = vpop.f32.mrb[2].mxu0  ;;  %v2426_v13 = vpop.f32.mrb[2].mxu1 }
 0x280   : > { %v2591_v14 = vmax.f32 %v2575_v6, 0.0  ;;  %v2593_v15 = vmax.f32 %v2577_v7, 0.0  ;;  %v2583_v17 = vadd.f32 %v2538_v55, %v2383_v12  ;;  %v2585_v5 = vadd.f32 %v2546_v62, %v2426_v13  ;;  %v2385_v18 = vpop.f32.mrb[3].mxu0  ;;  %v2428_v0 = vpop.f32.mrb[3].mxu1 }
 0x281   : > { %v2592_v19 = vmax.f32 %v2576_v10, 0.0  ;;  %v2594_v20 = vmax.f32 %v2578_v11, 0.0  ;;  %v2584_v16 = vadd.f32 %v2542_v63, %v2385_v18  ;;  %v2586_v57 = vadd.f32 %v2550_v1, %v2428_v0 }
 0x282   : > { %v2599_v58 = vmax.f32 %v2583_v17, 0.0  ;;  %v2601_v60 = vmax.f32 %v2585_v5, 0.0  ;;  %v2553_v12 = vsub.s32 4, %v2536_v56  ;;  %v2561_v13 = vsub.s32 6, %v2536_v56 }
 0x283   : > { %v7231_v61 = vpack.c.bf16 %v2592_v19, %v2591_v14  ;;  %v7232_v2 = vpack.c.bf16 %v2594_v20, %v2593_v15  ;;  %v2600_v3 = vmax.f32 %v2584_v16, 0.0  ;;  %v2602_v54 = vmax.f32 %v2586_v57, 0.0 }
 0x284   : > { %v2565_v14 = vsub.s32 7, %v2536_v56  ;;  %v2554_v15 = vrot.slane %v2533_v59, %v2553_v12  ;;  %v2562_v17 = vrot.slane %v2533_v59, %v2561_v13 }
 0x285   : > { %v2647_v8 = vrot.slane %v7231_v61, 7  ;;  %v2648_v9 = vrot.slane %v7232_v2, 7  ;;  %v7235_v52 = vpack.c.bf16 %v2600_v3, %v2599_v58  ;;  %v7236_v53 = vpack.c.bf16 %v2602_v54, %v2601_v60 }
 0x286   : > { %v2557_v54 = vsub.s32 5, %v2536_v56 }
 0x287   : > { %v2651_v6 = vrot.slane %v2647_v8, 4  ;;  %2679 = vst [vmem:[#allocation3 + $0x4] sm:$0xee] %v2647_v8  ;;  %v2654_v55 = vrot.slane %v2648_v9, 4  ;;  %2680 = vst [vmem:[#allocation3 + $0xc] sm:$0xee] %v2648_v9 }
 0x288   : > { %v2652_v62 = vrot.slane %v7235_v52, 7  ;;  %v2655_v7 = vrot.slane %v7236_v53, 7  ;;  %v2558_v52 = vrot.slane %v2533_v59, %v2557_v54  ;;  %v2566_v53 = vrot.slane %v2533_v59, %v2565_v14 }
 0x28a   : > { %v2653_v63 = vsel %vm8827_vm9, %v2651_v6, %v2652_v62  ;;  %v2663_v1 = vrot.slane %v2652_v62, 4  ;;  %v2656_v10 = vsel %vm8827_vm9, %v2654_v55, %v2655_v7  ;;  %v2664_v11 = vrot.slane %v2655_v7, 4 }
 0x28b   : > { %2683 = vst [vmem:[#allocation3 + $0x2c] sm:$0xff] %v2653_v63  ;;  %2684 = vst [vmem:[#allocation3 + $0x34] sm:$0xff] %v2656_v10 }
 0x28c   : > { %2687 = vst [vmem:[#allocation3 + $0x54] sm:$0x11] %v2663_v1  ;;  %2688 = vst [vmem:[#allocation3 + $0x5c] sm:$0x11] %v2664_v11 }
 0x28e   : > { %v2755_v5 = vld [vmem:[#allocation3] sm:$0xff]  ;;  %v9041_v20 = vld [vmem:[#allocation3 + $0x8] sm:$0xff] }
 0x291   : > { %v2465_v18 = vpop.f32.mrb[4].mxu0  ;;  %v2508_v0 = vpop.f32.mrb[4].mxu1 }
 0x292   : > { %v9039_v19 = vld [vmem:[#allocation3 + $0x28] sm:$0xff]  ;;  %v9043_v16 = vld [vmem:[#allocation3 + $0x30] sm:$0xff]  ;;  %v2579_v57 = vadd.f32 %v2554_v15, %v2465_v18  ;;  %v2581_v58 = vadd.f32 %v2562_v17, %v2508_v0  ;;  %v2467_v60 = vpop.f32.mrb[5].mxu0  ;;  %v2510_v61 = vpop.f32.mrb[5].mxu1 }
 0x293   : > { %10718 = vst [vmem:[#allocation25_spill] sm:$0xff] %v9039_v19  ;;  %10719 = vst [vmem:[#allocation26_spill] sm:$0xff] %v9043_v16  ;;  %v2830_v2 = vld [vmem:[#allocation3 + $0x50] sm:$0x11]  ;;  %v9046_v56 = vcombine.high %v2755_v5, %v9039_v19  ;;  %v2831_v3 = vld [vmem:[#allocation3 + $0x58] sm:$0x11]  ;;  %v9050_v59 = vcombine.high %v9041_v20, %v9043_v16  ;;  %v2580_v8 = vadd.f32 %v2558_v52, %v2467_v60 }
 0x294   : > { %v2582_v9 = vadd.f32 %v2566_v53, %v2510_v61  ;;  %v2469_v6 = vpop.f32.mrb[6].mxu0  ;;  %v2512_v55 = vpop.f32.mrb[6].mxu1  ;;  %v9052_v62 = vcombine.high %v2830_v2, %v2830_v2  ;;  %v9054_v7 = vcombine.high %v2831_v3, %v2831_v3  ;;  %v2595_v63 = vmax.f32 %v2579_v57, 0.0 }
 0x295   : > { %v2597_v1 = vmax.f32 %v2581_v58, 0.0  ;;  %v2587_v10 = vadd.f32 %v2554_v15, %v2469_v6  ;;  %v2589_v11 = vadd.f32 %v2562_v17, %v2512_v55  ;;  %v2471_v12 = vpop.f32.mrb[7].mxu0  ;;  %v2514_v13 = vpop.f32.mrb[7].mxu1  ;;  %v2596_v54 = vmax.f32 %v2580_v8, 0.0 }
 0x296   : > { %10720 = vst [vmem:[#allocation27_spill] sm:$0xff] %v9052_v62  ;;  %10721 = vst [vmem:[#allocation28_spill] sm:$0xff] %v9054_v7  ;;  %v2598_v14 = vmax.f32 %v2582_v9, 0.0  ;;  %v2588_v18 = vadd.f32 %v2558_v52, %v2471_v12  ;;  %v2590_v0 = vadd.f32 %v2566_v53, %v2514_v13  ;;  %v2871_v60 = vshrl.u32 %v9046_v56, 16 }
 0x297   : > { %v2603_v51 = vmax.f32 %v2587_v10, 0.0  ;;  %v2605_v50 = vmax.f32 %v2589_v11, 0.0  ;;  %v2873_v61 = vshll.u32 %v9046_v56, 16  ;;  %v7233_v48 = vpack.c.bf16 %v2596_v54, %v2595_v63 }
 0x298   : > { %v7234_v49 = vpack.c.bf16 %v2598_v14, %v2597_v1  ;;  %v2604_v47 = vmax.f32 %v2588_v18, 0.0  ;;  %v2606_v46 = vmax.f32 %v2590_v0, 0.0  ;;  %v2878_v15 = vshll.u32 %v9052_v62, 16  ;;  %v9174_v62 = vld [vmem:[#allocation8 + $0x78] sm:$0xff]  }
 0x299   : > { %v2875_v57 = vrot.slane %v2873_v61, 1  ;;  %v2895_v17 = vshrl.u32 %v9050_v59, 16  ;;  %v2897_v58 = vshll.u32 %v9050_v59, 16  ;;  %v2649_v8 = vrot.slane %v7233_v48, 7 }
 0x29a   : > { %v2650_v52 = vrot.slane %v7234_v49, 7  ;;  %v7237_v53 = vpack.c.bf16 %v2604_v47, %v2603_v51  ;;  %v7238_v9 = vpack.c.bf16 %v2606_v46, %v2605_v50  ;;  %v2880_v55 = vrot.slane %v2878_v15, 1 }
 0x29b   : > { %v2876_v6 = vor.u32 %v2875_v57, %v2871_v60  ;;  %v2899_v10 = vrot.slane %v2897_v58, 1  ;;  %v2902_v11 = vshll.u32 %v9054_v7, 16  ;;  %v2657_v63 = vrot.slane %v2649_v8, 4  ;;  %2681 = vst [vmem:[#allocation3 + $0x14] sm:$0xee] %v2649_v8 }
 0x29c   : > { %v2660_v1 = vrot.slane %v2650_v52, 4  ;;  %2682 = vst [vmem:[#allocation3 + $0x1c] sm:$0xee] %v2650_v52  ;;  %v2658_v12 = vrot.slane %v7237_v53, 7  ;;  %v2661_v13 = vrot.slane %v7238_v9, 7  ;;  %v9066_v48 = vcombine.low %v2755_v5, %v9039_v19  ;;  %v9087_v52 = vld [vmem:[#allocation8] sm:$0xff]  }
 0x29d   : > { %v2881_v54 = vsel %vm436_vm14, %v2876_v6, %v2880_v55  ;;  %v9063_v14 = vor.u32 %v2899_v10, %v2895_v17  ;;  %v2904_v18 = vrot.slane %v2902_v11, 1  ;;  %v9074_v0 = vcombine.low %v2830_v2, %v2830_v2  ;;  %v9090_v6 = vld [vmem:[#allocation8 + $0x48] sm:$0xff]   ;;  %v9095_v10 = vld [vmem:[#allocation8 + $0x80] sm:$0xff]  }
 0x29e   : > { %v2659_v46 = vsel %vm8827_vm9, %v2657_v63, %v2658_v12  ;;  %v2665_v47 = vrot.slane %v2658_v12, 4  ;;  %v2662_v49 = vsel %vm8827_vm9, %v2660_v1, %v2661_v13  ;;  %v2666_v50 = vrot.slane %v2661_v13, 4  ;;  %3134 = vmatprep.mubr.bf16.mxu0 %v2881_v54  ;;  %v9099_v11 = vld [vmem:[#allocation8 + $0xc8] sm:$0xff]   ;;  %v9106_v12 = vld [vmem:[#allocation8 + $0x50] sm:$0xff]  }
 0x29f   : > { %2685 = vst [vmem:[#allocation3 + $0x3c] sm:$0xff] %v2659_v46  ;;  %2686 = vst [vmem:[#allocation3 + $0x44] sm:$0xff] %v2662_v49  ;;  %v2905_v51 = vsel %vm436_vm14, %v9063_v14, %v2904_v18  ;;  %v2861_v60 = vshll.u32 %v9066_v48, 16  ;;  %v9079_v5 = vcombine.low %v9041_v20, %v9043_v16  ;;  %v9081_v22 = vcombine.low %v2831_v3, %v2831_v3  ;;  %v9101_v63 = vld [vmem:[#allocation8 + $0x8] sm:$0xff]   ;;  %v9116_v54 = vld [vmem:[#allocation8 + $0x10] sm:$0xff]  }
 0x2a0   : > { %10722 = vst [vmem:[#allocation29_spill] sm:$0xff] %v9074_v0  ;;  %2689 = vst [vmem:[#allocation3 + $0x64] sm:$0x11] %v2665_v47  ;;  %3175 = vmatprep.mubr.bf16.mxu1 %v2905_v51  ;;  %v2859_v61 = vshrl.u32 %v9066_v48, 16  ;;  %v2866_v15 = vshll.u32 %v9074_v0, 16  ;;  %v9110_v13 = vld [vmem:[#allocation8 + $0x88] sm:$0xff]  }
 0x2a1   : > { %2690 = vst [vmem:[#allocation3 + $0x6c] sm:$0x11] %v2666_v50  ;;  %10723 = vst [vmem:[#allocation30_spill] sm:$0xff] %v9081_v22  ;;  %v2863_v57 = vrot.slane %v2861_v60, 1  ;;  %v2885_v17 = vshll.u32 %v9079_v5, 16  ;;  %v2890_v2 = vshll.u32 %v9081_v22, 16 }
 0x2a2   : > { %v2868_v8 = vrot.slane %v2866_v15, 1  ;;  %v2883_v53 = vshrl.u32 %v9079_v5, 16  ;;  %10724 = vst [vmem:[#allocation31_spill] sm:$0xff] %v9106_v12  ;;  %10725 = vst [vmem:[#allocation32_spill] sm:$0xff] %v9110_v13  ;;  %v9119_v18 = vld [vmem:[#allocation8 + $0x58] sm:$0xff]   ;;  %v9122_v46 = vld [vmem:[#allocation8 + $0x90] sm:$0xff]  }
 0x2a3   : > { %v2864_v58 = vor.u32 %v2863_v57, %v2859_v61  ;;  %v2887_v9 = vrot.slane %v2885_v17, 1  ;;  %v2892_v20 = vrot.slane %v2890_v2, 1  ;;  %10727 = vst [vmem:[#allocation34_spill] sm:$0xff] %v9116_v54  ;;  %10728 = vst [vmem:[#allocation35_spill] sm:$0xff] %v9119_v18  ;;  %v9126_v47 = vld [vmem:[#allocation8 + $0xd8] sm:$0xff]   ;;  %v9131_v50 = vld [vmem:[#allocation8 + $0x60] sm:$0xff]  }
 0x2a4   : > { %10729 = vst [vmem:[#allocation36_spill] sm:$0xff] %v9122_v46  ;;  %10730 = vst [vmem:[#allocation37_spill] sm:$0xff] %v9126_v47  ;;  %v9128_v49 = vld [vmem:[#allocation8 + $0x18] sm:$0xff]   ;;  %v9138_v60 = vld [vmem:[#allocation8 + $0xe0] sm:$0xff]  }
 0x2a5   : > { %v2869_v3 = vsel %vm436_vm14, %v2864_v58, %v2868_v8  ;;  %v9093_v55 = vor.u32 %v2887_v9, %v2883_v53  ;;  %10731 = vst [vmem:[#allocation38_spill] sm:$0xff] %v9128_v49  ;;  %10732 = vst [vmem:[#allocation39_spill] sm:$0xff] %v9131_v50  ;;  %v9134_v51 = vld [vmem:[#allocation8 + $0x98] sm:$0xff]   ;;  %v9140_v61 = vld [vmem:[#allocation8 + $0x20] sm:$0xff]  }
 0x2a6   : > { %3135 = vmatmul.mubr.bf16.vlgmr.msra.gmra.mrb[8].mxu0 %v2869_v3  ;;  %10733 = vst [vmem:[#allocation40_spill] sm:$0xff] %v9134_v51  ;;  %10734 = vst [vmem:[#allocation41_spill] sm:$0xff] %v9138_v60  ;;  %v9143_v57 = vld [vmem:[#allocation8 + $0x68] sm:$0xff]   ;;  %v9146_v15 = vld [vmem:[#allocation8 + $0xa0] sm:$0xff]  }
 0x2a7   : > { %7288 = vmatpush3.bf16.msra.mxu0 %v9087_v52  ;;  %3412 = vmatprep.mubr.bf16.mxu0 %v9046_v56  ;;  %v2893_v1 = vsel %vm436_vm14, %v9093_v55, %v2892_v20  ;;  %v9114_v56 = vld [vmem:[#allocation8 + $0xd0] sm:$0xff]   ;;  %10735 = vst [vmem:[#allocation42_spill] sm:$0xff] %v9140_v61  ;;  %10736 = vst [vmem:[#allocation43_spill] sm:$0xff] %v9143_v57  ;;  %v9148_v17 = vld [vmem:[#allocation3 + $0x38] sm:$0xff] }
 0x2a8   : > { %7289 = vmatprep.subr.bf16.mxu0 %v9090_v6  ;;  %3176 = vmatmul.mubr.bf16.vlgmr.msra.gmra.mrb[8].mxu1 %v2893_v1  ;;  %10726 = vst [vmem:[#allocation33_spill] sm:$0xff] %v9114_v56  ;;  %10737 = vst [vmem:[#allocation44_spill] sm:$0xff] %v9146_v15  ;;  %v9152_v2 = vld [vmem:[#allocation8 + $0xe8] sm:$0xff]   ;;  %v9157_v8 = vld [vmem:[#allocation8 + $0x70] sm:$0xff]  }
 0x2a9   : > { %7310 = vmatpush3.bf16.msra.mxu1 %v9095_v10  ;;  %3453 = vmatprep.mubr.bf16.mxu1 %v9050_v59  ;;  %10738 = vst [vmem:[#allocation45_spill] sm:$0xff] %v9148_v17  ;;  %10739 = vst [vmem:[#allocation46_spill] sm:$0xff] %v9152_v2  ;;  %v9154_v58 = vld [vmem:[#allocation8 + $0x28] sm:$0xff]   ;;  %v3466_v53 = vld [vmem:[#allocation3 + $0x58] sm:$0x11] }
 0x2aa   : > { %7311 = vmatprep.subr.bf16.mxu1 %v9099_v11  ;;  %10740 = vst [vmem:[#allocation47_spill] sm:$0xff] %v9154_v58  ;;  %10741 = vst [vmem:[#allocation48_spill] sm:$0xff] %v9157_v8  ;;  %v3463_v9 = vld [vmem:[#allocation3 + $0x10] sm:$0xff]  ;;  %v9163_v3 = vld [vmem:[#allocation8 + $0xa8] sm:$0xff]   ;;  %v9171_v7 = vcombine.high %v3466_v53, %v3466_v53 }
 0x2ab   : > { %7290 = vmatpush3.bf16.msra.mxu0 %v9101_v63  ;;  %v9160_v20 = vcombine.high %v3463_v9, %v9148_v17  ;;  %10742 = vst [vmem:[#allocation49_spill] sm:$0xff] %v9163_v3  ;;  %v3467_v1 = vld [vmem:[#allocation3 + $0x60] sm:$0x11]  ;;  %v9167_v22 = vld [vmem:[#allocation8 + $0xf0] sm:$0xff]  }
 0x2ac   : > { %7291 = vmatprep.subr.bf16.mxu0 %v9106_v12  ;;  %10743 = vst [vmem:[#allocation50_spill] sm:$0xff] %v9167_v22  ;;  %v9169_v0 = vld [vmem:[#allocation8 + $0x30] sm:$0xff]   ;;  %10745 = vst [vmem:[#allocation52_spill] sm:$0xff] %v9171_v7  ;;  %v9176_v16 = vcombine.high %v3467_v1, %v3467_v1 }
 0x2ad   : > { %7312 = vmatpush3.bf16.msra.mxu1 %v9110_v13  ;;  %10744 = vst [vmem:[#allocation51_spill] sm:$0xff] %v9169_v0  ;;  %v3533_v19 = vshll.u32 %v9160_v20, 16 }
 0x2ae   : > { %7313 = vmatprep.subr.bf16.mxu1 %v9114_v56  ;;  %10746 = vst [vmem:[#allocation53_spill] sm:$0xff] %v9176_v16 }
 0x2af   : > { %7292 = vmatpush3.bf16.msra.mxu0 %v9116_v54 }
 0x2b0   : > { %7293 = vmatprep.subr.bf16.mxu0 %v9119_v18 }
 0x2b1   : > { %7314 = vmatpush3.bf16.msra.mxu1 %v9122_v46 }
 0x2b2   : > { %7315 = vmatprep.subr.bf16.mxu1 %v9126_v47 }
 0x2b3   : > { %7294 = vmatpush3.bf16.msra.mxu0 %v9128_v49 }
 0x2b4   : > { %7295 = vmatprep.subr.bf16.mxu0 %v9131_v50 }
 0x2b5   : > { %7316 = vmatpush3.bf16.msra.mxu1 %v9134_v51 }
 0x2b6   : > { %7317 = vmatprep.subr.bf16.mxu1 %v9138_v60 }
 0x2b7   : > { %7296 = vmatpush3.bf16.msra.mxu0 %v9140_v61  ;;  %v3538_v61 = vshll.u32 %v9176_v16, 16  ;;  %v10752_v16 = vld [vmem:[#allocation18_spill] sm:$0xff] }
 0x2b8   : > { %7297 = vmatprep.subr.bf16.mxu0 %v9143_v57  ;;  %v3535_v57 = vrot.slane %v3533_v19, 1 }
 0x2b9   : > { %7318 = vmatpush3.bf16.msra.mxu1 %v9146_v15  ;;  %v9180_v15 = vld [vmem:[#allocation8 + $0xb0] sm:$0xff]  }
 0x2ba   : > { %7319 = vmatprep.subr.bf16.mxu1 %v9152_v2  ;;  %v9186_v2 = vld [vmem:[#allocation8 + $0x38] sm:$0xff]  }
 0x2bb   : > { %7298 = vmatpush3.bf16.msra.mxu0 %v9154_v58  ;;  %v9184_v58 = vld [vmem:[#allocation8 + $0xf8] sm:$0xff]  }
 0x2bc   : > { %7299 = vmatprep.subr.bf16.mxu0 %v9157_v8  ;;  %v3514_v8 = vshll.u32 %v9171_v7, 16  ;;  %v3540_v7 = vrot.slane %v3538_v61, 1 }
 0x2bd   : > { %7320 = vmatpush3.bf16.msra.mxu1 %v9163_v3  ;;  %v9192_v3 = vld [vmem:[#allocation8 + $0xb8] sm:$0xff]  }
 0x2be   : > { %7321 = vmatprep.subr.bf16.mxu1 %v9167_v22  ;;  %v3531_v22 = vshrl.u32 %v9160_v20, 16 }
 0x2bf   : > { %7300 = vmatpush3.bf16.msra.mxu0 %v9169_v0  ;;  %v3516_v0 = vrot.slane %v3514_v8, 1  ;;  %v10750_v8 = vld [vmem:[#allocation17_spill] sm:$0xff] }
 0x2c0   : > { %7301 = vmatprep.subr.bf16.mxu0 %v9174_v62  ;;  %v9198_v60 = vor.u32 %v3535_v57, %v3531_v22  ;;  %v10749_v57 = vld [vmem:[#allocation16_spill] sm:$0xff] }
 0x2c1   : > { %7322 = vmatpush3.bf16.msra.mxu1 %v9180_v15  ;;  %v3517_v19 = vsel %vm436_vm14, %v9063_v14, %v3516_v0  ;;  %v9229_v14 = vcombine.low %v3466_v53, %v3466_v53  ;;  %v10751_v53 = vld [vmem:[#allocation19_spill] sm:$0xff] }
 0x2c2   : > { %7323 = vmatprep.subr.bf16.mxu1 %v9184_v58  ;;  %v3541_v22 = vsel %vm436_vm14, %v9198_v60, %v3540_v7  ;;  %v9227_v7 = vcombine.low %v3463_v9, %v9148_v17  ;;  %v10753_v17 = vld [vmem:[#allocation20_spill] sm:$0xff] }
 0x2c3   : > { %7302 = vmatpush3.bf16.msra.mxu0 %v9186_v2  ;;  %10747 = vst [vmem:[#allocation54_spill] sm:$0xff] %v9229_v14  ;;  %v3502_v61 = vshll.u32 %v9229_v14, 16 }
 0x2c4   : > { %7331 = vmatprep.subr.bf16.mxu0 %v8931_v21  ;;  %v3521_v0 = vshll.u32 %v9227_v7, 16 }
 0x2c5   : > { %7324 = vmatpush3.bf16.msra.mxu1 %v9192_v3 }
 0x2c6   : > { %3413 = vmatmul.mubr.bf16.vlgmr.msra.gmra.mrb[12].mxu0 %v9066_v48  ;;  %7353 = vmatprep.subr.bf16.mxu1 %v8933_v23  ;;  %v9235_v48 = vcombine.low %v3467_v1, %v3467_v1  ;;  %v3523_v9 = vrot.slane %v3521_v0, 1  ;;  %v3519_v1 = vshrl.u32 %v9227_v7, 16  ;;  %v10756_v0 = vld [vmem:[#allocation22_spill] sm:$0xff] }
 0x2c7   : > { %7332 = vmatpush3.bf16.msra.mxu0 %v8935_v24  ;;  %3578 = vmatprep.mubr.bf16.mxu0 %v3517_v19 }
 0x2c8   : > { %7333 = vmatprep.subr.bf16.mxu0 %v8945_v26  ;;  %3454 = vmatmul.mubr.bf16.vlgmr.msra.gmra.mrb[12].mxu1 %v9079_v5  ;;  %10748 = vst [vmem:[#allocation55_spill] sm:$0xff] %v9235_v48  ;;  %v3526_v19 = vshll.u32 %v9235_v48, 16  ;;  %v9248_v14 = vor.u32 %v3523_v9, %v3519_v1  ;;  %v3721_v9 = vld [vmem:[#allocation3 + $0x18] sm:$0xff]  ;;  %v3725_v1 = vld [vmem:[#allocation3 + $0x68] sm:$0x11] }
 0x2c9   : > { %7354 = vmatpush3.bf16.msra.mxu1 %v8937_v25  ;;  %3619 = vmatprep.mubr.bf16.mxu1 %v3541_v22  ;;  %v3504_v22 = vrot.slane %v3502_v61, 1  ;;  %v10757_v61 = vld [vmem:[#allocation24_spill] sm:$0xff] }
 0x2ca   : > { %7355 = vmatprep.subr.bf16.mxu1 %v8947_v27 }
 0x2cb   : > { %7334 = vmatpush3.bf16.msra.mxu0 %v8949_v28 }
 0x2cc   : > { %7335 = vmatprep.subr.bf16.mxu0 %v8957_v30 }
 0x2cd   : > { %7356 = vmatpush3.bf16.msra.mxu1 %v8951_v29 }
 0x2ce   : > { %7357 = vmatprep.subr.bf16.mxu1 %v8959_v31 }
 0x2cf   : > { %7336 = vmatpush3.bf16.msra.mxu0 %v8961_v32 }
 0x2d0   : > { %7337 = vmatprep.subr.bf16.mxu0 %v8969_v34 }
 0x2d1   : > { %7358 = vmatpush3.bf16.msra.mxu1 %v8963_v33 }
 0x2d2   : > { %7359 = vmatprep.subr.bf16.mxu1 %v8971_v35 }
 0x2d3   : > { %7338 = vmatpush3.bf16.msra.mxu0 %v8973_v36 }
 0x2d4   : > { %7339 = vmatprep.subr.bf16.mxu0 %v8977_v37 }
 0x2d5   : > { %7360 = vmatpush3.bf16.msra.mxu1 %v8975_v4 }
 0x2d6   : > { %7361 = vmatprep.subr.bf16.mxu1 %v8981_v38 }
 0x2d7   : > { %7340 = vmatpush3.bf16.msra.mxu0 %v8985_v39 }
 0x2d8   : > { %7341 = vmatprep.subr.bf16.mxu0 %v8991_v41 }
 0x2d9   : > { %7362 = vmatpush3.bf16.msra.mxu1 %v8987_v40 }
 0x2da   : > { %7363 = vmatprep.subr.bf16.mxu1 %v8993_v42 }
 0x2db   : > { %7342 = vmatpush3.bf16.msra.mxu0 %v8997_v43 }
 0x2dc   : > { %7343 = vmatprep.subr.bf16.mxu0 %v9005_v45  ;;  %v10754_v45 = vld [vmem:[#allocation21_spill] sm:$0xff] }
 0x2dd   : > { %7364 = vmatpush3.bf16.msra.mxu1 %v8999_v44  ;;  %v3528_v44 = vrot.slane %v3526_v19, 1 }
 0x2de   : > { %7365 = vmatprep.subr.bf16.mxu1 %v10749_v57  ;;  %v10755_v57 = vld [vmem:[#allocation23_spill] sm:$0xff] }
 0x2df   : > { %7344 = vmatpush3.bf16.msra.mxu0 %v10750_v8  ;;  %v3529_v48 = vsel %vm436_vm14, %v9248_v14, %v3528_v44  ;;  %v9274_v44 = vld [vmem:[#allocation3 + $0x40] sm:$0xff] }
 0x2e0   : > { %7345 = vmatprep.subr.bf16.mxu0 %v10751_v53  ;;  %v3505_v53 = vsel %vm436_vm14, %v9093_v55, %v3504_v22  ;;  %10758 = vst [vmem:[#allocation17_spill] sm:$0xff] %v9274_v44  ;;  %v10760_v55 = vld [vmem:[#allocation42_spill] sm:$0xff]  ;;  %v9280_v19 = vcombine.high %v3721_v9, %v9274_v44  ;;  %v10762_v22 = vld [vmem:[#allocation44_spill] sm:$0xff] }
 0x2e1   : > { %7366 = vmatpush3.bf16.msra.mxu1 %v10752_v16 }
 0x2e2   : > { %7367 = vmatprep.subr.bf16.mxu1 %v10753_v17 }
 0x2e3   : > { %7346 = vmatpush3.bf16.msra.mxu0 %v10754_v45 }
 0x2e4   : > { %7375 = vmatprep.subr.bf16.mxu0 %v10755_v57 }
 0x2e5   : > { %7368 = vmatpush3.bf16.msra.mxu1 %v10756_v0 }
 0x2e6   : > { %3579 = vmatmul.mubr.bf16.vlgmr.msra.gmra.mrb[16].mxu0 %v3505_v53  ;;  %7397 = vmatprep.subr.bf16.mxu1 %v10757_v61  ;;  %v3724_v53 = vld [vmem:[#allocation3 + $0x60] sm:$0x11] }
 0x2e7   : > { %7376 = vmatpush3.bf16.msra.mxu0 %v9087_v52  ;;  %3670 = vmatprep.mubr.bf16.mxu0 %v9050_v59  ;;  %v10759_v59 = vld [vmem:[#allocation41_spill] sm:$0xff] }
 0x2e8   : > { %7377 = vmatprep.subr.bf16.mxu0 %v9090_v6  ;;  %3620 = vmatmul.mubr.bf16.vlgmr.msra.gmra.mrb[16].mxu1 %v3529_v48  ;;  %v10761_v48 = vld [vmem:[#allocation43_spill] sm:$0xff] }
 0x2e9   : > { %7398 = vmatpush3.bf16.msra.mxu1 %v9095_v10  ;;  %3711 = vmatprep.mubr.bf16.mxu1 %v9160_v20 }
 0x2ea   : > { %7399 = vmatprep.subr.bf16.mxu1 %v9099_v11 }
 0x2eb   : > { %7378 = vmatpush3.bf16.msra.mxu0 %v9101_v63 }
 0x2ec   : > { %7379 = vmatprep.subr.bf16.mxu0 %v9106_v12 }
 0x2ed   : > { %7400 = vmatpush3.bf16.msra.mxu1 %v9110_v13 }
 0x2ee   : > { %7401 = vmatprep.subr.bf16.mxu1 %v9114_v56 }
 0x2ef   : > { %7380 = vmatpush3.bf16.msra.mxu0 %v9116_v54 }
 0x2f0   : > { %7381 = vmatprep.subr.bf16.mxu0 %v9119_v18  ;;  %v10770_v18 = vld [vmem:[#allocation51_spill] sm:$0xff] }
 0x2f1   : > { %7402 = vmatpush3.bf16.msra.mxu1 %v9122_v46  ;;  %v10769_v46 = vld [vmem:[#allocation50_spill] sm:$0xff] }
 0x2f2   : > { %7403 = vmatprep.subr.bf16.mxu1 %v9126_v47  ;;  %v10766_v47 = vld [vmem:[#allocation48_spill] sm:$0xff] }
 0x2f3   : > { %7382 = vmatpush3.bf16.msra.mxu0 %v9128_v49  ;;  %v10763_v49 = vld [vmem:[#allocation46_spill] sm:$0xff] }
 0x2f4   : > { %7383 = vmatprep.subr.bf16.mxu0 %v9131_v50  ;;  %v10764_v50 = vld [vmem:[#allocation47_spill] sm:$0xff] }
 0x2f5   : > { %7404 = vmatpush3.bf16.msra.mxu1 %v9134_v51  ;;  %v9285_v51 = vcombine.high %v3724_v53, %v3724_v53 }
 0x2f6   : > { %7405 = vmatprep.subr.bf16.mxu1 %v10759_v59  ;;  %v9288_v59 = vcombine.high %v3725_v1, %v3725_v1 }
 0x2f7   : > { %7384 = vmatpush3.bf16.msra.mxu0 %v10760_v55  ;;  %10765 = vst [vmem:[#allocation18_spill] sm:$0xff] %v9285_v51  ;;  %v10768_v55 = vld [vmem:[#allocation49_spill] sm:$0xff] }
 0x2f8   : > { %7385 = vmatprep.subr.bf16.mxu0 %v10761_v48  ;;  %10767 = vst [vmem:[#allocation20_spill] sm:$0xff] %v9288_v59  ;;  %v3791_v48 = vshll.u32 %v9280_v19, 16 }
 0x2f9   : > { %7406 = vmatpush3.bf16.msra.mxu1 %v10762_v22  ;;  %v3772_v22 = vshll.u32 %v9285_v51, 16 }
 0x2fa   : > { %7407 = vmatprep.subr.bf16.mxu1 %v10763_v49  ;;  %v3793_v49 = vrot.slane %v3791_v48, 1 }
 0x2fb   : > { %7386 = vmatpush3.bf16.msra.mxu0 %v10764_v50  ;;  %v3796_v50 = vshll.u32 %v9288_v59, 16 }
 0x2fc   : > { %7387 = vmatprep.subr.bf16.mxu0 %v10766_v47  ;;  %v3774_v47 = vrot.slane %v3772_v22, 1  ;;  %v10774_v22 = vld [vmem:[#allocation14_spill] sm:$0xff] }
 0x2fd   : > { %7408 = vmatpush3.bf16.msra.mxu1 %v10768_v55  ;;  %v3789_v55 = vshrl.u32 %v9280_v19, 16 }
 0x2fe   : > { %7409 = vmatprep.subr.bf16.mxu1 %v10769_v46  ;;  %v3775_v48 = vsel %vm436_vm14, %v9198_v60, %v3774_v47  ;;  %v10772_v47 = vld [vmem:[#allocation15_spill] sm:$0xff] }
 0x2ff   : > { %7388 = vmatpush3.bf16.msra.mxu0 %v10770_v18  ;;  %v9302_v46 = vor.u32 %v3793_v49, %v3789_v55  ;;  %v3798_v18 = vrot.slane %v3796_v50, 1  ;;  %v9339_v50 = vcombine.low %v3725_v1, %v3725_v1 }
 0x300   : > { %7389 = vmatprep.subr.bf16.mxu0 %v9174_v62 }
 0x301   : > { %7410 = vmatpush3.bf16.msra.mxu1 %v9180_v15  ;;  %v3799_v49 = vsel %vm436_vm14, %v9302_v46, %v3798_v18  ;;  %v9333_v18 = vcombine.low %v3724_v53, %v3724_v53  ;;  %10773 = vst [vmem:[#allocation23_spill] sm:$0xff] %v9339_v50  ;;  %v10776_v53 = vld [vmem:[#allocation19_spill] sm:$0xff] }
 0x302   : > { %7411 = vmatprep.subr.bf16.mxu1 %v9184_v58 }
 0x303   : > { %7390 = vmatpush3.bf16.msra.mxu0 %v9186_v2  ;;  %10771 = vst [vmem:[#allocation21_spill] sm:$0xff] %v9333_v18  ;;  %v3760_v55 = vshll.u32 %v9333_v18, 16 }
 0x304   : > { %7419 = vmatprep.subr.bf16.mxu0 %v8931_v21 }
 0x305   : > { %7412 = vmatpush3.bf16.msra.mxu1 %v9192_v3  ;;  %v3762_v59 = vrot.slane %v3760_v55, 1  ;;  %v10782_v55 = vld [vmem:[#allocation40_spill] sm:$0xff] }
 0x306   : > { %3671 = vmatmul.mubr.bf16.vlgmr.msra.gmra.mrb[20].mxu0 %v9079_v5  ;;  %7441 = vmatprep.subr.bf16.mxu1 %v8933_v23  ;;  %v9331_v5 = vcombine.low %v3721_v9, %v9274_v44  ;;  %v10775_v9 = vld [vmem:[#allocation16_spill] sm:$0xff] }
 0x307   : > { %7420 = vmatpush3.bf16.msra.mxu0 %v8935_v24  ;;  %3836 = vmatprep.mubr.bf16.mxu0 %v3775_v48  ;;  %v3763_v44 = vsel %vm436_vm14, %v9248_v14, %v3762_v59  ;;  %v10779_v14 = vld [vmem:[#allocation37_spill] sm:$0xff]  ;;  %v10781_v59 = vld [vmem:[#allocation39_spill] sm:$0xff] }
 0x308   : > { %7421 = vmatprep.subr.bf16.mxu0 %v8945_v26  ;;  %3712 = vmatmul.mubr.bf16.vlgmr.msra.gmra.mrb[20].mxu1 %v9227_v7  ;;  %v3779_v60 = vshll.u32 %v9331_v5, 16  ;;  %v3777_v1 = vshrl.u32 %v9331_v5, 16 }
 0x309   : > { %7442 = vmatpush3.bf16.msra.mxu1 %v8937_v25  ;;  %3877 = vmatprep.mubr.bf16.mxu1 %v3799_v49  ;;  %v3784_v49 = vshll.u32 %v9339_v50, 16  ;;  %v3982_v50 = vld [vmem:[#allocation3 + $0x68] sm:$0x11] }
 0x30a   : > { %7443 = vmatprep.subr.bf16.mxu1 %v8947_v27  ;;  %v3781_v48 = vrot.slane %v3779_v60, 1 }
 0x30b   : > { %7422 = vmatpush3.bf16.msra.mxu0 %v8949_v28  ;;  %v3786_v51 = vrot.slane %v3784_v49, 1  ;;  %v10783_v49 = vld [vmem:[#allocation41_spill] sm:$0xff] }
 0x30c   : > { %7423 = vmatprep.subr.bf16.mxu0 %v8957_v30  ;;  %v9352_v18 = vor.u32 %v3781_v48, %v3777_v1  ;;  %v9378_v48 = vld [vmem:[#allocation3 + $0x48] sm:$0xff] }
 0x30d   : > { %7444 = vmatpush3.bf16.msra.mxu1 %v8951_v29  ;;  %v10784_v1 = vld [vmem:[#allocation42_spill] sm:$0xff] }
 0x30e   : > { %7445 = vmatprep.subr.bf16.mxu1 %v8959_v31  ;;  %v3787_v60 = vsel %vm436_vm14, %v9352_v18, %v3786_v51  ;;  %v10777_v51 = vld [vmem:[#allocation35_spill] sm:$0xff] }
 0x30f   : > { %7424 = vmatpush3.bf16.msra.mxu0 %v8961_v32 }
 0x310   : > { %7425 = vmatprep.subr.bf16.mxu0 %v8969_v34 }
 0x311   : > { %7446 = vmatpush3.bf16.msra.mxu1 %v8963_v33 }
 0x312   : > { %7447 = vmatprep.subr.bf16.mxu1 %v8971_v35 }
 0x313   : > { %7426 = vmatpush3.bf16.msra.mxu0 %v8973_v36 }
 0x314   : > { %7427 = vmatprep.subr.bf16.mxu0 %v8977_v37 }
 0x315   : > { %7448 = vmatpush3.bf16.msra.mxu1 %v8975_v4 }
 0x316   : > { %7449 = vmatprep.subr.bf16.mxu1 %v8981_v38 }
 0x317   : > { %7428 = vmatpush3.bf16.msra.mxu0 %v8985_v39 }
 0x318   : > { %7429 = vmatprep.subr.bf16.mxu0 %v8991_v41 }
 0x319   : > { %7450 = vmatpush3.bf16.msra.mxu1 %v8987_v40 }
 0x31a   : > { %7451 = vmatprep.subr.bf16.mxu1 %v8993_v42 }
 0x31b   : > { %7430 = vmatpush3.bf16.msra.mxu0 %v8997_v43 }
 0x31c   : > { %7431 = vmatprep.subr.bf16.mxu0 %v10772_v47 }
 0x31d   : > { %7452 = vmatpush3.bf16.msra.mxu1 %v10774_v22 }
 0x31e   : > { %7453 = vmatprep.subr.bf16.mxu1 %v10775_v9 }
 0x31f   : > { %7432 = vmatpush3.bf16.msra.mxu0 %v10750_v8 }
 0x320   : > { %7433 = vmatprep.subr.bf16.mxu0 %v10776_v53 }
 0x321   : > { %7454 = vmatpush3.bf16.msra.mxu1 %v10752_v16 }
 0x322   : > { %7455 = vmatprep.subr.bf16.mxu1 %v10753_v17 }
 0x323   : > { %7434 = vmatpush3.bf16.msra.mxu0 %v10754_v45 }
 0x324   : > { %7463 = vmatprep.subr.bf16.mxu0 %v10755_v57 }
 0x325   : > { %7456 = vmatpush3.bf16.msra.mxu1 %v10756_v0 }
 0x326   : > { %3837 = vmatmul.mubr.bf16.vlgmr.msra.gmra.mrb[24].mxu0 %v3763_v44  ;;  %7485 = vmatprep.subr.bf16.mxu1 %v10757_v61  ;;  %v10780_v44 = vld [vmem:[#allocation38_spill] sm:$0xff] }
 0x327   : > { %7464 = vmatpush3.bf16.msra.mxu0 %v9087_v52  ;;  %3928 = vmatprep.mubr.bf16.mxu0 %v9160_v20  ;;  %v10778_v20 = vld [vmem:[#allocation36_spill] sm:$0xff] }
 0x328   : > { %7465 = vmatprep.subr.bf16.mxu0 %v9090_v6  ;;  %3878 = vmatmul.mubr.bf16.vlgmr.msra.gmra.mrb[24].mxu1 %v3787_v60  ;;  %v10785_v60 = vld [vmem:[#allocation43_spill] sm:$0xff] }
 0x329   : > { %7486 = vmatpush3.bf16.msra.mxu1 %v9095_v10  ;;  %3969 = vmatprep.mubr.bf16.mxu1 %v9280_v19 }
 0x32a   : > { %7487 = vmatprep.subr.bf16.mxu1 %v9099_v11 }
 0x32b   : > { %7466 = vmatpush3.bf16.msra.mxu0 %v9101_v63 }
 0x32c   : > { %7467 = vmatprep.subr.bf16.mxu0 %v9106_v12  ;;  %v10792_v12 = vld [vmem:[#allocation51_spill] sm:$0xff] }
 0x32d   : > { %7488 = vmatpush3.bf16.msra.mxu1 %v9110_v13  ;;  %v10791_v13 = vld [vmem:[#allocation50_spill] sm:$0xff] }
 0x32e   : > { %7489 = vmatprep.subr.bf16.mxu1 %v9114_v56  ;;  %v10789_v56 = vld [vmem:[#allocation48_spill] sm:$0xff] }
 0x32f   : > { %7468 = vmatpush3.bf16.msra.mxu0 %v9116_v54  ;;  %v10787_v54 = vld [vmem:[#allocation46_spill] sm:$0xff] }
 0x330   : > { %7469 = vmatprep.subr.bf16.mxu0 %v10777_v51  ;;  %v3979_v51 = vld [vmem:[#allocation3 + $0x20] sm:$0xff] }
 0x331   : > { %7490 = vmatpush3.bf16.msra.mxu1 %v10778_v20  ;;  %v9384_v20 = vcombine.high %v3979_v51, %v9378_v48 }
 0x332   : > { %7491 = vmatprep.subr.bf16.mxu1 %v10779_v14  ;;  %v10786_v14 = vld [vmem:[#allocation44_spill] sm:$0xff] }
 0x333   : > { %7470 = vmatpush3.bf16.msra.mxu0 %v10780_v44  ;;  %v3983_v44 = vld [vmem:[#allocation3 + $0x70] sm:$0x11] }
 0x334   : > { %7471 = vmatprep.subr.bf16.mxu0 %v10781_v59  ;;  %v10788_v59 = vld [vmem:[#allocation47_spill] sm:$0xff] }
 0x335   : > { %7492 = vmatpush3.bf16.msra.mxu1 %v10782_v55  ;;  %v9389_v55 = vcombine.high %v3982_v50, %v3982_v50 }
 0x336   : > { %7493 = vmatprep.subr.bf16.mxu1 %v10783_v49  ;;  %v9392_v49 = vcombine.high %v3983_v44, %v3983_v44 }
 0x337   : > { %7472 = vmatpush3.bf16.msra.mxu0 %v10784_v1  ;;  %v10790_v1 = vld [vmem:[#allocation49_spill] sm:$0xff] }
 0x338   : > { %7473 = vmatprep.subr.bf16.mxu0 %v10785_v60  ;;  %v4049_v60 = vshll.u32 %v9384_v20, 16 }
 0x339   : > { %7494 = vmatpush3.bf16.msra.mxu1 %v10786_v14  ;;  %v4030_v14 = vshll.u32 %v9389_v55, 16 }
 0x33a   : > { %7495 = vmatprep.subr.bf16.mxu1 %v10787_v54  ;;  %v4051_v54 = vrot.slane %v4049_v60, 1 }
 0x33b   : > { %7474 = vmatpush3.bf16.msra.mxu0 %v10788_v59  ;;  %v4054_v59 = vshll.u32 %v9392_v49, 16 }
 0x33c   : > { %7475 = vmatprep.subr.bf16.mxu0 %v10789_v56  ;;  %v4032_v56 = vrot.slane %v4030_v14, 1  ;;  %v9495_v14 = vld [vmem:[#allocation8 + $0x240] sm:$0xff]  }
 0x33d   : > { %7496 = vmatpush3.bf16.msra.mxu1 %v10790_v1  ;;  %v4047_v1 = vshrl.u32 %v9384_v20, 16 }
 0x33e   : > { %7497 = vmatprep.subr.bf16.mxu1 %v10791_v13  ;;  %v4033_v60 = vsel %vm436_vm14, %v9302_v46, %v4032_v56  ;;  %v10808_v56 = vld [vmem:[#allocation47_spill] sm:$0xff] }
 0x33f   : > { %7476 = vmatpush3.bf16.msra.mxu0 %v10792_v12  ;;  %v4052_v13 = vor.u32 %v4051_v54, %v4047_v1  ;;  %v4056_v12 = vrot.slane %v4054_v59, 1  ;;  %v10814_v59 = vld [vmem:[#allocation26_spill] sm:$0xff] }
 0x340   : > { %7477 = vmatprep.subr.bf16.mxu0 %v9174_v62 }
 0x341   : > { %7498 = vmatpush3.bf16.msra.mxu1 %v9180_v15 }
 0x342   : > { %7499 = vmatprep.subr.bf16.mxu1 %v9184_v58 }
 0x343   : > { %7478 = vmatpush3.bf16.msra.mxu0 %v9186_v2 }
 0x344   : > { %7507 = vmatprep.subr.bf16.mxu0 %v8931_v21  ;;  %v4057_v21 = vsel %vm436_vm14, %v4052_v13, %v4056_v12  ;;  %v10807_v12 = vld [vmem:[#allocation46_spill] sm:$0xff] }
 0x345   : > { %7500 = vmatpush3.bf16.msra.mxu1 %v9192_v3 }
 0x346   : > { %3929 = vmatmul.mubr.bf16.vlgmr.msra.gmra.mrb[28].mxu0 %v9227_v7  ;;  %7529 = vmatprep.subr.bf16.mxu1 %v8933_v23  ;;  %v9432_v23 = vcombine.low %v3979_v51, %v9378_v48  ;;  %v10809_v7 = vld [vmem:[#allocation48_spill] sm:$0xff] }
 0x347   : > { %7508 = vmatpush3.bf16.msra.mxu0 %v8935_v24  ;;  %4094 = vmatprep.mubr.bf16.mxu0 %v4033_v60  ;;  %v9434_v24 = vcombine.low %v3982_v50, %v3982_v50  ;;  %v10811_v50 = vld [vmem:[#allocation50_spill] sm:$0xff] }
 0x348   : > { %7509 = vmatprep.subr.bf16.mxu0 %v8945_v26  ;;  %3970 = vmatmul.mubr.bf16.vlgmr.msra.gmra.mrb[28].mxu1 %v9331_v5  ;;  %v4037_v26 = vshll.u32 %v9432_v23, 16 }
 0x349   : > { %7530 = vmatpush3.bf16.msra.mxu1 %v8937_v25  ;;  %4135 = vmatprep.mubr.bf16.mxu1 %v4057_v21  ;;  %v9440_v25 = vcombine.low %v3983_v44, %v3983_v44  ;;  %v9497_v44 = vld [vmem:[#allocation3 + $0x8] sm:$0xee]  ;;  %v9508_v21 = vld [vmem:[#allocation8 + $0x2c0] sm:$0xff]  }
 0x34a   : > { %7531 = vmatprep.subr.bf16.mxu1 %v8947_v27  ;;  %v4018_v27 = vshll.u32 %v9434_v24, 16  ;;  %v9501_v1 = vcombine.high %v9497_v44, %v10814_v59 }
 0x34b   : > { %7510 = vmatpush3.bf16.msra.mxu0 %v8949_v28  ;;  %v4039_v28 = vrot.slane %v4037_v26, 1  ;;  %v9510_v26 = vld [vmem:[#allocation8 + $0x200] sm:$0xff]  }
 0x34c   : > { %7511 = vmatprep.subr.bf16.mxu0 %v8957_v30  ;;  %v4020_v30 = vrot.slane %v4018_v27, 1  ;;  %v10815_v27 = vld [vmem:[#allocation27_spill] sm:$0xff] }
 0x34d   : > { %7532 = vmatpush3.bf16.msra.mxu1 %v8951_v29  ;;  %v4042_v29 = vshll.u32 %v9440_v25, 16 }
 0x34e   : > { %7533 = vmatprep.subr.bf16.mxu1 %v8959_v31  ;;  %v4035_v31 = vshrl.u32 %v9432_v23, 16 }
 0x34f   : > { %7512 = vmatpush3.bf16.msra.mxu0 %v8961_v32 }
 0x350   : > { %7513 = vmatprep.subr.bf16.mxu0 %v8969_v34  ;;  %v4040_v32 = vor.u32 %v4039_v28, %v4035_v31  ;;  %v4021_v34 = vsel %vm436_vm14, %v9352_v18, %v4020_v30  ;;  %v9484_v18 = vld [vmem:[#allocation3] sm:$0xee]  ;;  %v4317_v28 = vrot.slane %v10815_v27, 1  ;;  %v4322_v30 = vrot.slane %v9501_v1, 1  ;;  %v10816_v31 = vld [vmem:[#allocation28_spill] sm:$0xff] }
 0x351   : > { %7534 = vmatpush3.bf16.msra.mxu1 %v8963_v33  ;;  %v4044_v33 = vrot.slane %v4042_v29, 1  ;;  %v9515_v29 = vld [vmem:[#allocation8 + $0x248] sm:$0xff]  }
 0x352   : > { %7535 = vmatprep.subr.bf16.mxu1 %v8971_v35 }
 0x353   : > { %7514 = vmatpush3.bf16.msra.mxu0 %v8973_v36  ;;  %v4045_v35 = vsel %vm436_vm14, %v4040_v32, %v4044_v33  ;;  %v10793_v36 = vld [vmem:[#allocation31_spill] sm:$0xff] }
 0x354   : > { %7515 = vmatprep.subr.bf16.mxu0 %v8977_v37  ;;  %v10795_v37 = vld [vmem:[#allocation33_spill] sm:$0xff]  ;;  %v9526_v32 = vld [vmem:[#allocation8 + $0x2c8] sm:$0xff]  }
 0x355   : > { %7536 = vmatpush3.bf16.msra.mxu1 %v8975_v4  ;;  %v10794_v4 = vld [vmem:[#allocation32_spill] sm:$0xff]  ;;  %v9528_v33 = vld [vmem:[#allocation8 + $0x208] sm:$0xff]  }
 0x356   : > { %7537 = vmatprep.subr.bf16.mxu1 %v8981_v38  ;;  %v10796_v38 = vld [vmem:[#allocation34_spill] sm:$0xff] }
 0x357   : > { %7516 = vmatpush3.bf16.msra.mxu0 %v8985_v39  ;;  %v10797_v39 = vld [vmem:[#allocation35_spill] sm:$0xff] }
 0x358   : > { %7517 = vmatprep.subr.bf16.mxu0 %v8991_v41  ;;  %v10799_v41 = vld [vmem:[#allocation37_spill] sm:$0xff] }
 0x359   : > { %7538 = vmatpush3.bf16.msra.mxu1 %v8987_v40  ;;  %v10798_v40 = vld [vmem:[#allocation36_spill] sm:$0xff] }
 0x35a   : > { %7539 = vmatprep.subr.bf16.mxu1 %v8993_v42  ;;  %v10800_v42 = vld [vmem:[#allocation38_spill] sm:$0xff] }
 0x35b   : > { %7518 = vmatpush3.bf16.msra.mxu0 %v8997_v43  ;;  %v10801_v43 = vld [vmem:[#allocation39_spill] sm:$0xff] }
 0x35c   : > { %7519 = vmatprep.subr.bf16.mxu0 %v10772_v47 }
 0x35d   : > { %7540 = vmatpush3.bf16.msra.mxu1 %v10774_v22  ;;  %v10812_v22 = vld [vmem:[#allocation51_spill] sm:$0xff] }
 0x35e   : > { %7541 = vmatprep.subr.bf16.mxu1 %v10775_v9  ;;  %v10813_v9 = vld [vmem:[#allocation25_spill] sm:$0xff] }
 0x35f   : > { %7520 = vmatpush3.bf16.msra.mxu0 %v10750_v8 }
 0x360   : > { %7521 = vmatprep.subr.bf16.mxu0 %v10776_v53  ;;  %v9490_v53 = vcombine.high %v9484_v18, %v10813_v9  ;;  %v9602_v9 = vld [vmem:[#allocation3 + $0x8] sm:$0xee] }
 0x361   : > { %7542 = vmatpush3.bf16.msra.mxu1 %v10752_v16  ;;  %v10803_v16 = vld [vmem:[#allocation41_spill] sm:$0xff] }
 0x362   : > { %7543 = vmatprep.subr.bf16.mxu1 %v10753_v17 }
 0x363   : > { %7522 = vmatpush3.bf16.msra.mxu0 %v10754_v45  ;;  %v10802_v45 = vld [vmem:[#allocation40_spill] sm:$0xff] }
 0x364   : > { %7551 = vmatprep.subr.bf16.mxu0 %v10755_v57 }
 0x365   : > { %7544 = vmatpush3.bf16.msra.mxu1 %v10756_v0 }
 0x366   : > { %4095 = vmatmul.mubr.bf16.vlgmr.msra.gmra.mrb[32].mxu0 %v4021_v34  ;;  %7573 = vmatprep.subr.bf16.mxu1 %v10757_v61  ;;  %v10810_v61 = vld [vmem:[#allocation49_spill] sm:$0xff]  ;;  %v9531_v34 = vld [vmem:[#allocation8 + $0x250] sm:$0xff]  }
 0x367   : > { %7552 = vmatpush3.bf16.msra.mxu0 %v9087_v52  ;;  %4186 = vmatprep.mubr.bf16.mxu0 %v9280_v19  ;;  %v10804_v52 = vld [vmem:[#allocation42_spill] sm:$0xff] }
 0x368   : > { %7553 = vmatprep.subr.bf16.mxu0 %v9090_v6  ;;  %4136 = vmatmul.mubr.bf16.vlgmr.msra.gmra.mrb[32].mxu1 %v4045_v35  ;;  %v10805_v6 = vld [vmem:[#allocation43_spill] sm:$0xff] }
 0x369   : > { %7574 = vmatpush3.bf16.msra.mxu1 %v9095_v10  ;;  %4227 = vmatprep.mubr.bf16.mxu1 %v9384_v20  ;;  %v9540_v35 = vld [vmem:[#allocation8 + $0x2d0] sm:$0xff]  }
 0x36a   : > { %7575 = vmatprep.subr.bf16.mxu1 %v9099_v11  ;;  %v10806_v11 = vld [vmem:[#allocation44_spill] sm:$0xff] }
 0x36b   : > { %7554 = vmatpush3.bf16.msra.mxu0 %v9101_v63 }
 0x36c   : > { %7555 = vmatprep.subr.bf16.mxu0 %v10793_v36  ;;  %v9542_v36 = vld [vmem:[#allocation8 + $0x210] sm:$0xff]  }
 0x36d   : > { %7576 = vmatpush3.bf16.msra.mxu1 %v10794_v4  ;;  %v9545_v4 = vld [vmem:[#allocation8 + $0x258] sm:$0xff]  }
 0x36e   : > { %7577 = vmatprep.subr.bf16.mxu1 %v10795_v37  ;;  %v9552_v37 = vld [vmem:[#allocation8 + $0x2d8] sm:$0xff]  }
 0x36f   : > { %7556 = vmatpush3.bf16.msra.mxu0 %v10796_v38  ;;  %v9554_v38 = vld [vmem:[#allocation8 + $0x218] sm:$0xff]  }
 0x370   : > { %7557 = vmatprep.subr.bf16.mxu0 %v10797_v39  ;;  %v9557_v39 = vld [vmem:[#allocation8 + $0x260] sm:$0xff]  }
 0x371   : > { %7578 = vmatpush3.bf16.msra.mxu1 %v10798_v40  ;;  %v9560_v40 = vld [vmem:[#allocation8 + $0x298] sm:$0xff]  }
 0x372   : > { %7579 = vmatprep.subr.bf16.mxu1 %v10799_v41  ;;  %v9564_v41 = vld [vmem:[#allocation8 + $0x2e0] sm:$0xff]  }
 0x373   : > { %7558 = vmatpush3.bf16.msra.mxu0 %v10800_v42  ;;  %v9566_v42 = vld [vmem:[#allocation8 + $0x220] sm:$0xff]  }
 0x374   : > { %7559 = vmatprep.subr.bf16.mxu0 %v10801_v43  ;;  %v9569_v43 = vld [vmem:[#allocation8 + $0x268] sm:$0xff]  }
 0x375   : > { %7580 = vmatpush3.bf16.msra.mxu1 %v10802_v45  ;;  %v9572_v45 = vld [vmem:[#allocation8 + $0x2a0] sm:$0xff]  }
 0x376   : > { %7581 = vmatprep.subr.bf16.mxu1 %v10803_v16  ;;  %v9576_v16 = vld [vmem:[#allocation8 + $0x2e8] sm:$0xff]  }
 0x377   : > { %7560 = vmatpush3.bf16.msra.mxu0 %v10804_v52  ;;  %v9578_v52 = vld [vmem:[#allocation8 + $0x228] sm:$0xff]  }
 0x378   : > { %7561 = vmatprep.subr.bf16.mxu0 %v10805_v6  ;;  %v9581_v6 = vld [vmem:[#allocation8 + $0x270] sm:$0xff]  }
 0x379   : > { %v7259_v10 = vpop.f32.mrb[8].mxu0  ;;  %7582 = vmatpush3.bf16.msra.mxu1 %v10806_v11 }
 0x37a   : > { %v7260_v63 = vpop.f32.mrb[9].mxu0  ;;  %7583 = vmatprep.subr.bf16.mxu1 %v10807_v12 }
 0x37b   : > { %v7261_v13 = vadd.f32 %v7260_v63, %v7259_v10  ;;  %7562 = vmatpush3.bf16.msra.mxu0 %v10808_v56  ;;  %v7262_v54 = vpop.f32.mrb[10].mxu0  ;;  %v7281_v46 = vpop.f32.mrb[8].mxu1  ;;  %v9584_v63 = vld [vmem:[#allocation8 + $0x2a8] sm:$0xff]   ;;  %v9588_v56 = vld [vmem:[#allocation8 + $0x2f0] sm:$0xff]  }
 0x37c   : > { %v7263_v17 = vpop.f32.mrb[11].mxu0  ;;  %7563 = vmatprep.subr.bf16.mxu0 %v10809_v7  ;;  %v7282_v57 = vpop.f32.mrb[9].mxu1  ;;  %v9593_v7 = vld [vmem:[#allocation8 + $0x278] sm:$0xff]  }
 0x37d   : > { %v7264_v8 = vadd.f32 %v7263_v17, %v7262_v54  ;;  %v7283_v0 = vadd.f32 %v7282_v57, %v7281_v46  ;;  %7584 = vmatpush3.bf16.msra.mxu1 %v10810_v61  ;;  %v7284_v19 = vpop.f32.mrb[10].mxu1  ;;  %v9590_v54 = vld [vmem:[#allocation8 + $0x230] sm:$0xff]   ;;  %v8481_v61 = vld [vmem:[#allocation3 + $0x28] sm:$0xff] }
 0x37e   : > { %v7285_v47 = vpop.f32.mrb[11].mxu1  ;;  %7585 = vmatprep.subr.bf16.mxu1 %v10811_v50 }
 0x37f   : > { %7564 = vmatpush3.bf16.msra.mxu0 %v10812_v22  ;;  %v9492_v51 = vadd.f32 %v7283_v0, %v7261_v13  ;;  %v7286_v20 = vadd.f32 %v7285_v47, %v7284_v19  ;;  %v9597_v19 = vcombine.low %v9484_v18, %v8481_v61  ;;  %v9600_v22 = vld [vmem:[#allocation8 + $0x2b0] sm:$0xff]  }
 0x380   : > { %7565 = vmatprep.subr.bf16.mxu0 %v9174_v62  ;;  %v4316_v62 = vrot.slane %v9490_v53, 1  ;;  %v8482_v18 = vld [vmem:[#allocation3 + $0x30] sm:$0xff] }
 0x381   : > { %v9503_v60 = vadd.f32 %v7286_v20, %v7264_v8  ;;  %7586 = vmatpush3.bf16.msra.mxu1 %v9180_v15  ;;  %v4323_v15 = vrot.slane %v10816_v31, 1  ;;  %v9612_v27 = vcombine.high %v9602_v9, %v8482_v18  ;;  %v9620_v31 = vld [vmem:[#allocation3 + $0x10] sm:$0xee] }
 0x382   : > { %7587 = vmatprep.subr.bf16.mxu1 %v9184_v58  ;;  %v4318_v58 = vsel %vm1244_vm13, %v4316_v62, %v4317_v28  ;;  %v9609_v62 = vld [vmem:[#allocation8 + $0x238] sm:$0xff]  }
 0x383   : > { %7566 = vmatpush3.bf16.msra.mxu0 %v9186_v2  ;;  %v9521_v2 = vld [vmem:[#allocation8 + $0x280] sm:$0xff]  }
 0x384   : > { %7595 = vmatprep.subr.bf16.mxu0 %v9495_v14 }
 0x385   : > { %7588 = vmatpush3.bf16.msra.mxu1 %v9192_v3  ;;  %v4324_v3 = vsel %vm1244_vm13, %v4322_v30, %v4323_v15  ;;  %v4313_v15 = vrot.slane %v9597_v19, 1 }
 0x386   : > { %4187 = vmatmul.mubr.bf16.vlgmr.msra.gmra.mrb[36].mxu0 %v9331_v5  ;;  %7617 = vmatprep.subr.bf16.mxu1 %v9508_v21  ;;  %v9536_v5 = vld [vmem:[#allocation8 + $0x288] sm:$0xff]  }
 0x387   : > { %7596 = vmatpush3.bf16.msra.mxu0 %v9510_v26  ;;  %4553 = vmatprep.mubr.bf16.mxu0 %v4318_v58  ;;  %v10818_v58 = vld [vmem:[#allocation29_spill] sm:$0xff] }
 0x388   : > { %7597 = vmatprep.subr.bf16.mxu0 %v9515_v29  ;;  %4228 = vmatmul.mubr.bf16.vlgmr.msra.gmra.mrb[36].mxu1 %v9432_v23  ;;  %v9548_v23 = vld [vmem:[#allocation8 + $0x290] sm:$0xff]  }
 0x389   : > { %7618 = vmatpush3.bf16.msra.mxu1 %v9521_v2  ;;  %4594 = vmatprep.mubr.bf16.mxu1 %v4324_v3  ;;  %v4314_v3 = vrot.slane %v10818_v58, 1 }
 0x38a   : > { %7619 = vmatprep.subr.bf16.mxu1 %v9526_v32 }
 0x38b   : > { %7598 = vmatpush3.bf16.msra.mxu0 %v9528_v33  ;;  %v4315_v61 = vsel %vm1244_vm13, %v4313_v15, %v4314_v3 }
 0x38c   : > { %7599 = vmatprep.subr.bf16.mxu0 %v9531_v34 }
 0x38d   : > { %7620 = vmatpush3.bf16.msra.mxu1 %v9536_v5 }
 0x38e   : > { %7621 = vmatprep.subr.bf16.mxu1 %v9540_v35 }
 0x38f   : > { %7600 = vmatpush3.bf16.msra.mxu0 %v9542_v36 }
 0x390   : > { %7601 = vmatprep.subr.bf16.mxu0 %v9545_v4 }
 0x391   : > { %7622 = vmatpush3.bf16.msra.mxu1 %v9548_v23 }
 0x392   : > { %7623 = vmatprep.subr.bf16.mxu1 %v9552_v37 }
 0x393   : > { %7602 = vmatpush3.bf16.msra.mxu0 %v9554_v38 }
 0x394   : > { %7603 = vmatprep.subr.bf16.mxu0 %v9557_v39 }
 0x395   : > { %7624 = vmatpush3.bf16.msra.mxu1 %v9560_v40 }
 0x396   : > { %7625 = vmatprep.subr.bf16.mxu1 %v9564_v41 }
 0x397   : > { %7604 = vmatpush3.bf16.msra.mxu0 %v9566_v42 }
 0x398   : > { %7605 = vmatprep.subr.bf16.mxu0 %v9569_v43 }
 0x399   : > { %v7303_v10 = vpop.f32.mrb[12].mxu0  ;;  %7626 = vmatpush3.bf16.msra.mxu1 %v9572_v45 }
 0x39a   : > { %v7304_v11 = vpop.f32.mrb[13].mxu0  ;;  %7627 = vmatprep.subr.bf16.mxu1 %v9576_v16 }
 0x39b   : > { %v7305_v12 = vadd.f32 %v7304_v11, %v7303_v10  ;;  %v7306_v13 = vpop.f32.mrb[14].mxu0  ;;  %7606 = vmatpush3.bf16.msra.mxu0 %v9578_v52  ;;  %v7325_v46 = vpop.f32.mrb[12].mxu1  ;;  %v10819_v10 = vld [vmem:[#allocation45_spill] sm:$0xff] }
 0x39c   : > { %v7307_v17 = vpop.f32.mrb[15].mxu0  ;;  %7607 = vmatprep.subr.bf16.mxu0 %v9581_v6  ;;  %v7326_v8 = vpop.f32.mrb[13].mxu1  ;;  %v9626_v11 = vcombine.high %v9620_v31, %v10819_v10 }
 0x39d   : > { %v3415_v57 = vadd.f32 %v7305_v12, %v9492_v51  ;;  %v7308_v0 = vadd.f32 %v7307_v17, %v7306_v13  ;;  %v7327_v47 = vadd.f32 %v7326_v8, %v7325_v46  ;;  %v7328_v50 = vpop.f32.mrb[14].mxu1  ;;  %7628 = vmatpush3.bf16.msra.mxu1 %v9584_v63  ;;  %v9607_v51 = vld [vmem:[#allocation8 + $0x2f8] sm:$0xff]   ;;  %v10822_v8 = vld [vmem:[#allocation30_spill] sm:$0xff] }
 0x39e   : > { %v7329_v59 = vpop.f32.mrb[15].mxu1  ;;  %7629 = vmatprep.subr.bf16.mxu1 %v9588_v56  ;;  %v9631_v13 = vld [vmem:[#allocation8 + $0x2b8] sm:$0xff]  }
 0x39f   : > { %v3418_v20 = vadd.f32 %v7308_v0, %v9503_v60  ;;  %7608 = vmatpush3.bf16.msra.mxu0 %v9590_v54  ;;  %v9614_v28 = vadd.f32 %v7327_v47, %v3415_v57  ;;  %v7330_v30 = vadd.f32 %v7329_v59, %v7328_v50  ;;  %v9618_v60 = vcombine.low %v9497_v44, %v8482_v18  ;;  %v10821_v46 = vld [vmem:[#allocation52_spill] sm:$0xff]  ;;  %v10823_v50 = vld [vmem:[#allocation53_spill] sm:$0xff] }
 0x3a0   : > { %7609 = vmatprep.subr.bf16.mxu0 %v9593_v7  ;;  %v4620_v44 = vrot.slane %v9612_v27, 1  ;;  %v4621_v17 = vrot.slane %v10821_v46, 1  ;;  %v4320_v0 = vrot.slane %v10822_v8, 1  ;;  %v4626_v47 = vrot.slane %v9626_v11, 1 }
 0x3a1   : > { %10817 = vst [vmem:[#allocation22_spill] sm:$0xff] %v9614_v28  ;;  %v9628_v12 = vadd.f32 %v7330_v30, %v3418_v20  ;;  %7630 = vmatpush3.bf16.msra.mxu1 %v9600_v22  ;;  %v4319_v57 = vrot.slane %v9618_v60, 1  ;;  %v4627_v20 = vrot.slane %v10823_v50, 1 }
 0x3a2   : > { %7631 = vmatprep.subr.bf16.mxu1 %v9607_v51  ;;  %v4622_v59 = vsel %vm1244_vm13, %v4620_v44, %v4621_v17 }
 0x3a3   : > { %10820 = vst [vmem:[#allocation24_spill] sm:$0xff] %v9628_v12  ;;  %7610 = vmatpush3.bf16.msra.mxu0 %v9609_v62  ;;  %v4321_v30 = vsel %vm1244_vm13, %v4319_v57, %v4320_v0  ;;  %v4628_v15 = vsel %vm1244_vm13, %v4626_v47, %v4627_v20  ;;  %v9674_v20 = vld [vmem:[#allocation3 + $0x10] sm:$0xee] }
 0x3a4   : > { %7639 = vmatprep.subr.bf16.mxu0 %v9495_v14 }
 0x3a5   : > { %7632 = vmatpush3.bf16.msra.mxu1 %v9631_v13 }
 0x3a6   : > { %4554 = vmatmul.mubr.bf16.vlgmr.msra.gmra.mrb[40].mxu0 %v4315_v61  ;;  %7661 = vmatprep.subr.bf16.mxu1 %v9508_v21  ;;  %v9671_v61 = vcombine.low %v9602_v9, %v8482_v18  ;;  %v9685_v9 = vcombine.low %v9620_v31, %v10819_v10  ;;  %v9687_v18 = vld [vmem:[#allocation3 + $0x18] sm:$0xee] }
 0x3a7   : > { %7640 = vmatpush3.bf16.msra.mxu0 %v9510_v26  ;;  %4665 = vmatprep.mubr.bf16.mxu0 %v4622_v59 }
 0x3a8   : > { %7641 = vmatprep.subr.bf16.mxu0 %v9515_v29  ;;  %4595 = vmatmul.mubr.bf16.vlgmr.msra.gmra.mrb[40].mxu1 %v4321_v30  ;;  %v9680_v30 = vcombine.high %v9674_v20, %v10819_v10  ;;  %v10828_v10 = vld [vmem:[#allocation18_spill] sm:$0xff] }
 0x3a9   : > { %7662 = vmatpush3.bf16.msra.mxu1 %v9521_v2  ;;  %4706 = vmatprep.mubr.bf16.mxu1 %v4628_v15 }
 0x3aa   : > { %7663 = vmatprep.subr.bf16.mxu1 %v9526_v32  ;;  %10824 = vst [vmem:[#allocation15_spill] sm:$0xff] %v9680_v30  ;;  %v4732_v31 = vrot.slane %v9680_v30, 1 }
 0x3ab   : > { %7642 = vmatpush3.bf16.msra.mxu0 %v9528_v33 }
 0x3ac   : > { %7643 = vmatprep.subr.bf16.mxu0 %v9531_v34 }
 0x3ad   : > { %7664 = vmatpush3.bf16.msra.mxu1 %v9536_v5 }
 0x3ae   : > { %7665 = vmatprep.subr.bf16.mxu1 %v9540_v35 }
 0x3af   : > { %7644 = vmatpush3.bf16.msra.mxu0 %v9542_v36 }
 0x3b0   : > { %7645 = vmatprep.subr.bf16.mxu0 %v9545_v4 }
 0x3b1   : > { %7666 = vmatpush3.bf16.msra.mxu1 %v9548_v23 }
 0x3b2   : > { %7667 = vmatprep.subr.bf16.mxu1 %v9552_v37 }
 0x3b3   : > { %7646 = vmatpush3.bf16.msra.mxu0 %v9554_v38 }
 0x3b4   : > { %7647 = vmatprep.subr.bf16.mxu0 %v9557_v39 }
 0x3b5   : > { %7668 = vmatpush3.bf16.msra.mxu1 %v9560_v40 }
 0x3b6   : > { %7669 = vmatprep.subr.bf16.mxu1 %v9564_v41 }
 0x3b7   : > { %7648 = vmatpush3.bf16.msra.mxu0 %v9566_v42 }
 0x3b8   : > { %7649 = vmatprep.subr.bf16.mxu0 %v9569_v43 }
 0x3b9   : > { %v7347_v58 = vpop.f32.mrb[16].mxu0  ;;  %7670 = vmatpush3.bf16.msra.mxu1 %v9572_v45 }
 0x3ba   : > { %v7348_v3 = vpop.f32.mrb[17].mxu0  ;;  %7671 = vmatprep.subr.bf16.mxu1 %v9576_v16 }
 0x3bb   : > { %v7349_v44 = vadd.f32 %v7348_v3, %v7347_v58  ;;  %v7350_v46 = vpop.f32.mrb[18].mxu0  ;;  %7650 = vmatpush3.bf16.msra.mxu0 %v9578_v52  ;;  %v7369_v17 = vpop.f32.mrb[16].mxu1  ;;  %v4617_v3 = vrot.slane %v9671_v61, 1 }
 0x3bc   : > { %v7351_v57 = vpop.f32.mrb[19].mxu0  ;;  %7651 = vmatprep.subr.bf16.mxu0 %v9581_v6  ;;  %v7370_v8 = vpop.f32.mrb[17].mxu1 }
 0x3bd   : > { %v7352_v0 = vadd.f32 %v7351_v57, %v7350_v46  ;;  %v7371_v47 = vadd.f32 %v7370_v8, %v7369_v17  ;;  %v7372_v50 = vpop.f32.mrb[18].mxu1  ;;  %7672 = vmatpush3.bf16.msra.mxu1 %v9584_v63  ;;  %v10825_v46 = vld [vmem:[#allocation54_spill] sm:$0xff]  ;;  %v10826_v57 = vld [vmem:[#allocation17_spill] sm:$0xff] }
 0x3be   : > { %v7373_v59 = vpop.f32.mrb[19].mxu1  ;;  %7673 = vmatprep.subr.bf16.mxu1 %v9588_v56  ;;  %v4618_v17 = vrot.slane %v10825_v46, 1  ;;  %v9693_v8 = vcombine.high %v9687_v18, %v10826_v57 }
 0x3bf   : > { %7652 = vmatpush3.bf16.msra.mxu0 %v9590_v54  ;;  %v3622_v15 = vadd.f32 %v7371_v47, %v7349_v44  ;;  %v7374_v58 = vadd.f32 %v7373_v59, %v7372_v50  ;;  %v4733_v44 = vrot.slane %v10828_v10, 1  ;;  %v4623_v47 = vrot.slane %v9685_v9, 1  ;;  %v10829_v50 = vld [vmem:[#allocation55_spill] sm:$0xff] }
 0x3c0   : > { %7653 = vmatprep.subr.bf16.mxu0 %v9593_v7  ;;  %10827 = vst [vmem:[#allocation14_spill] sm:$0xff] %v9693_v8  ;;  %v4624_v59 = vrot.slane %v10829_v50, 1  ;;  %v4619_v46 = vsel %vm1244_vm13, %v4617_v3, %v4618_v17 }
 0x3c1   : > { %v3625_v12 = vadd.f32 %v7374_v58, %v7352_v0  ;;  %7674 = vmatpush3.bf16.msra.mxu1 %v9600_v22  ;;  %v4738_v0 = vrot.slane %v9693_v8, 1  ;;  %v10830_v58 = vld [vmem:[#allocation20_spill] sm:$0xff]  ;;  %v4734_v10 = vsel %vm1244_vm13, %v4732_v31, %v4733_v44 }
 0x3c2   : > { %7675 = vmatprep.subr.bf16.mxu1 %v9607_v51  ;;  %v4739_v28 = vrot.slane %v10830_v58, 1  ;;  %v4625_v30 = vsel %vm1244_vm13, %v4623_v47, %v4624_v59 }
 0x3c3   : > { %7654 = vmatpush3.bf16.msra.mxu0 %v9609_v62 }
 0x3c4   : > { %7683 = vmatprep.subr.bf16.mxu0 %v9495_v14  ;;  %v4740_v3 = vsel %vm1244_vm13, %v4738_v0, %v4739_v28  ;;  %v8483_v0 = vld [vmem:[#allocation3 + $0x38] sm:$0xff] }
 0x3c5   : > { %7676 = vmatpush3.bf16.msra.mxu1 %v9631_v13  ;;  %v9734_v58 = vcombine.low %v9674_v20, %v8483_v0 }
 0x3c6   : > { %4666 = vmatmul.mubr.bf16.vlgmr.msra.gmra.mrb[44].mxu0 %v4619_v46  ;;  %7705 = vmatprep.subr.bf16.mxu1 %v9508_v21 }
 0x3c7   : > { %7684 = vmatpush3.bf16.msra.mxu0 %v9510_v26  ;;  %4777 = vmatprep.mubr.bf16.mxu0 %v4734_v10  ;;  %10831 = vst [vmem:[#allocation16_spill] sm:$0xff] %v9734_v58 }
 0x3c8   : > { %7685 = vmatprep.subr.bf16.mxu0 %v9515_v29  ;;  %4707 = vmatmul.mubr.bf16.vlgmr.msra.gmra.mrb[44].mxu1 %v4625_v30 }
 0x3c9   : > { %7706 = vmatpush3.bf16.msra.mxu1 %v9521_v2  ;;  %4818 = vmatprep.mubr.bf16.mxu1 %v4740_v3 }
 0x3ca   : > { %7707 = vmatprep.subr.bf16.mxu1 %v9526_v32 }
 0x3cb   : > { %7686 = vmatpush3.bf16.msra.mxu0 %v9528_v33 }
 0x3cc   : > { %7687 = vmatprep.subr.bf16.mxu0 %v9531_v34 }
 0x3cd   : > { %7708 = vmatpush3.bf16.msra.mxu1 %v9536_v5 }
 0x3ce   : > { %7709 = vmatprep.subr.bf16.mxu1 %v9540_v35 }
 0x3cf   : > { %7688 = vmatpush3.bf16.msra.mxu0 %v9542_v36 }
 0x3d0   : > { %7689 = vmatprep.subr.bf16.mxu0 %v9545_v4 }
 0x3d1   : > { %7710 = vmatpush3.bf16.msra.mxu1 %v9548_v23 }
 0x3d2   : > { %7711 = vmatprep.subr.bf16.mxu1 %v9552_v37 }
 0x3d3   : > { %7690 = vmatpush3.bf16.msra.mxu0 %v9554_v38 }
 0x3d4   : > { %7691 = vmatprep.subr.bf16.mxu0 %v9557_v39 }
 0x3d5   : > { %7712 = vmatpush3.bf16.msra.mxu1 %v9560_v40 }
 0x3d6   : > { %7713 = vmatprep.subr.bf16.mxu1 %v9564_v41 }
 0x3d7   : > { %7692 = vmatpush3.bf16.msra.mxu0 %v9566_v42 }
 0x3d8   : > { %7693 = vmatprep.subr.bf16.mxu0 %v9569_v43 }
 0x3d9   : > { %v7391_v28 = vpop.f32.mrb[20].mxu0  ;;  %7714 = vmatpush3.bf16.msra.mxu1 %v9572_v45 }
 0x3da   : > { %v7392_v30 = vpop.f32.mrb[21].mxu0  ;;  %7715 = vmatprep.subr.bf16.mxu1 %v9576_v16 }
 0x3db   : > { %v7393_v17 = vadd.f32 %v7392_v30, %v7391_v28  ;;  %v7394_v31 = vpop.f32.mrb[22].mxu0  ;;  %7694 = vmatpush3.bf16.msra.mxu0 %v9578_v52  ;;  %v7413_v44 = vpop.f32.mrb[20].mxu1  ;;  %v9737_v28 = vld [vmem:[#allocation3 + $0x18] sm:$0xee] }
 0x3dc   : > { %v7395_v47 = vpop.f32.mrb[23].mxu0  ;;  %7695 = vmatprep.subr.bf16.mxu0 %v9581_v6  ;;  %v7414_v59 = vpop.f32.mrb[21].mxu1 }
 0x3dd   : > { %v3673_v50 = vadd.f32 %v7393_v17, %v3622_v15  ;;  %v7396_v46 = vadd.f32 %v7395_v47, %v7394_v31  ;;  %v7415_v10 = vadd.f32 %v7414_v59, %v7413_v44  ;;  %v7416_v3 = vpop.f32.mrb[22].mxu1  ;;  %7716 = vmatpush3.bf16.msra.mxu1 %v9584_v63  ;;  %v9743_v15 = vcombine.high %v9737_v28, %v10826_v57  ;;  %v9752_v44 = vld [vmem:[#allocation3 + $0x20] sm:$0xee] }
 0x3de   : > { %v7417_v8 = vpop.f32.mrb[23].mxu1  ;;  %7717 = vmatprep.subr.bf16.mxu1 %v9588_v56  ;;  %v9750_v31 = vcombine.low %v9687_v18, %v10826_v57  ;;  %v10835_v47 = vld [vmem:[#allocation21_spill] sm:$0xff]  ;;  %v4845_v57 = vrot.slane %v9389_v55, 1 }
 0x3df   : > { %v3676_v30 = vadd.f32 %v7396_v46, %v3625_v12  ;;  %7696 = vmatpush3.bf16.msra.mxu0 %v9590_v54  ;;  %10832 = vst [vmem:[#allocation19_spill] sm:$0xff] %v9743_v15  ;;  %v9745_v17 = vadd.f32 %v7415_v10, %v3673_v50  ;;  %v7418_v20 = vadd.f32 %v7417_v8, %v7416_v3  ;;  %v4729_v12 = vrot.slane %v9734_v58, 1  ;;  %v10838_v50 = vld [vmem:[#allocation23_spill] sm:$0xff] }
 0x3e0   : > { %7697 = vmatprep.subr.bf16.mxu0 %v9593_v7  ;;  %10834 = vst [vmem:[#allocation32_spill] sm:$0xff] %v9750_v31  ;;  %v4730_v59 = vrot.slane %v10835_v47, 1  ;;  %v9758_v46 = vcombine.high %v9752_v44, %v9378_v48  ;;  %v4844_v18 = vrot.slane %v9743_v15, 1  ;;  %v4735_v8 = vrot.slane %v9750_v31, 1  ;;  %v9977_v31 = vld [vmem:[#allocation8 + $0x3b0] sm:$0xff]  }
 0x3e1   : > { %10833 = vst [vmem:[#allocation31_spill] sm:$0xff] %v9745_v17  ;;  %v9760_v0 = vadd.f32 %v7418_v20, %v3676_v30  ;;  %7718 = vmatpush3.bf16.msra.mxu1 %v9600_v22  ;;  %v4736_v10 = vrot.slane %v10838_v50, 1  ;;  %v4851_v20 = vrot.slane %v9392_v49, 1  ;;  %v9792_v49 = vld [vmem:[#allocation3 + $0x50] sm:$0x33] }
 0x3e2   : > { %10836 = vst [vmem:[#allocation33_spill] sm:$0xff] %v9758_v46  ;;  %7719 = vmatprep.subr.bf16.mxu1 %v9607_v51  ;;  %v4731_v3 = vsel %vm1244_vm13, %v4729_v12, %v4730_v59  ;;  %v4850_v30 = vrot.slane %v9758_v46, 1  ;;  %v4846_v55 = vsel %vm1244_vm13, %v4844_v18, %v4845_v57 }
 0x3e3   : > { %10837 = vst [vmem:[#allocation34_spill] sm:$0xff] %v9760_v0  ;;  %7698 = vmatpush3.bf16.msra.mxu0 %v9609_v62  ;;  %v4737_v47 = vsel %vm1244_vm13, %v4735_v8, %v4736_v10 }
 0x3e4   : > { %7727 = vmatprep.subr.bf16.mxu0 %v9495_v14  ;;  %v4852_v14 = vsel %vm1244_vm13, %v4850_v30, %v4851_v20  ;;  %v9844_v20 = vld [vmem:[#allocation8 + $0x300] sm:$0xff]  }
 0x3e5   : > { %7720 = vmatpush3.bf16.msra.mxu1 %v9631_v13 }
 0x3e6   : > { %4778 = vmatmul.mubr.bf16.vlgmr.msra.gmra.mrb[48].mxu0 %v4731_v3  ;;  %7749 = vmatprep.subr.bf16.mxu1 %v9508_v21  ;;  %v9795_v21 = vld [vmem:[#allocation3 + $0x58] sm:$0x33] }
 0x3e7   : > { %7728 = vmatpush3.bf16.msra.mxu0 %v9510_v26  ;;  %4889 = vmatprep.mubr.bf16.mxu0 %v4846_v55  ;;  %v9801_v26 = vcombine.high %v9792_v49, %v9792_v49 }
 0x3e8   : > { %7729 = vmatprep.subr.bf16.mxu0 %v9515_v29  ;;  %4819 = vmatmul.mubr.bf16.vlgmr.msra.gmra.mrb[48].mxu1 %v4737_v47  ;;  %v4848_v47 = vrot.slane %v9440_v25, 1  ;;  %v9858_v25 = vld [vmem:[#allocation8 + $0x3c8] sm:$0xff]  }
 0x3e9   : > { %7750 = vmatpush3.bf16.msra.mxu1 %v9521_v2  ;;  %4930 = vmatprep.mubr.bf16.mxu1 %v4852_v14  ;;  %10839 = vst [vmem:[#allocation35_spill] sm:$0xff] %v9801_v26  ;;  %v9806_v2 = vcombine.high %v9795_v21, %v9795_v21  ;;  %v9849_v14 = vld [vmem:[#allocation8 + $0x348] sm:$0xff]  }
 0x3ea   : > { %7751 = vmatprep.subr.bf16.mxu1 %v9526_v32 }
 0x3eb   : > { %7730 = vmatpush3.bf16.msra.mxu0 %v9528_v33  ;;  %10840 = vst [vmem:[#allocation36_spill] sm:$0xff] %v9806_v2  ;;  %v5036_v33 = vshrl.u32 %v9490_v53, 16 }
 0x3ec   : > { %7731 = vmatprep.subr.bf16.mxu0 %v9531_v34 }
 0x3ed   : > { %7752 = vmatpush3.bf16.msra.mxu1 %v9536_v5 }
 0x3ee   : > { %7753 = vmatprep.subr.bf16.mxu1 %v9540_v35  ;;  %v5039_v35 = vshll.u32 %v9490_v53, 16  ;;  %v5078_v53 = vshrl.u32 %v9806_v2, 16 }
 0x3ef   : > { %7732 = vmatpush3.bf16.msra.mxu0 %v9542_v36  ;;  %v5044_v36 = vshrl.u32 %v9801_v26, 16 }
 0x3f0   : > { %7733 = vmatprep.subr.bf16.mxu0 %v9545_v4  ;;  %v5047_v4 = vshll.u32 %v9801_v26, 16  ;;  %v5041_v59 = vrot.slane %v5039_v35, 2  ;;  %v9868_v35 = vld [vmem:[#allocation8 + $0x388] sm:$0xff]  }
 0x3f1   : > { %7754 = vmatpush3.bf16.msra.mxu1 %v9548_v23  ;;  %v5046_v18 = vrot.slane %v5044_v36, 1  ;;  %v9872_v36 = vld [vmem:[#allocation8 + $0x3d0] sm:$0xff]  }
 0x3f2   : > { %7755 = vmatprep.subr.bf16.mxu1 %v9552_v37  ;;  %v5049_v57 = vrot.slane %v5047_v4, 2  ;;  %v9874_v4 = vld [vmem:[#allocation8 + $0x310] sm:$0xff]  }
 0x3f3   : > { %7734 = vmatpush3.bf16.msra.mxu0 %v9554_v38  ;;  %v8484_v38 = vld [vmem:[#allocation3 + $0x40] sm:$0xff] }
 0x3f4   : > { %7735 = vmatprep.subr.bf16.mxu0 %v9557_v39  ;;  %v9817_v39 = vcombine.low %v9737_v28, %v8484_v38  ;;  %v5038_v28 = vrot.slane %v5036_v33, 1  ;;  %v9860_v33 = vld [vmem:[#allocation8 + $0x308] sm:$0xff]   ;;  %v9884_v38 = vld [vmem:[#allocation8 + $0x3d8] sm:$0xff]  }
 0x3f5   : > { %7756 = vmatpush3.bf16.msra.mxu1 %v9560_v40  ;;  %v5070_v40 = vshrl.u32 %v9501_v1, 16 }
 0x3f6   : > { %7757 = vmatprep.subr.bf16.mxu1 %v9564_v41  ;;  %10841 = vst [vmem:[#allocation37_spill] sm:$0xff] %v9817_v39  ;;  %v4841_v50 = vrot.slane %v9817_v39, 1 }
 0x3f7   : > { %7736 = vmatpush3.bf16.msra.mxu0 %v9566_v42 }
 0x3f8   : > { %7737 = vmatprep.subr.bf16.mxu0 %v9569_v43  ;;  %v5073_v43 = vshll.u32 %v9501_v1, 16 }
 0x3f9   : > { %v7435_v29 = vpop.f32.mrb[24].mxu0  ;;  %7758 = vmatpush3.bf16.msra.mxu1 %v9572_v45  ;;  %v5081_v45 = vshll.u32 %v9806_v2, 16  ;;  %v5433_v2 = vshll.u32 %v9626_v11, 16 }
 0x3fa   : > { %v7436_v32 = vpop.f32.mrb[25].mxu0  ;;  %7759 = vmatprep.subr.bf16.mxu1 %v9576_v16  ;;  %v5075_v10 = vrot.slane %v5073_v43, 2  ;;  %v9896_v43 = vld [vmem:[#allocation8 + $0x398] sm:$0xff]  }
 0x3fb   : > { %v7437_v34 = vadd.f32 %v7436_v32, %v7435_v29  ;;  %v7438_v5 = vpop.f32.mrb[26].mxu0  ;;  %7738 = vmatpush3.bf16.msra.mxu0 %v9578_v52  ;;  %v7457_v23 = vpop.f32.mrb[24].mxu1  ;;  %v5083_v3 = vrot.slane %v5081_v45, 2  ;;  %v5022_v45 = vshll.u32 %v9597_v19, 16 }
 0x3fc   : > { %v7439_v37 = vpop.f32.mrb[27].mxu0  ;;  %7739 = vmatprep.subr.bf16.mxu0 %v9581_v6  ;;  %v7458_v41 = vpop.f32.mrb[25].mxu1  ;;  %v4842_v6 = vrot.slane %v9434_v24, 1  ;;  %v9835_v24 = vld [vmem:[#allocation8 + $0x340] sm:$0xff]  }
 0x3fd   : > { %v7440_v42 = vadd.f32 %v7439_v37, %v7438_v5  ;;  %v7459_v16 = vadd.f32 %v7458_v41, %v7457_v23  ;;  %v7460_v52 = vpop.f32.mrb[26].mxu1  ;;  %7760 = vmatpush3.bf16.msra.mxu1 %v9584_v63  ;;  %v9833_v63 = vcombine.low %v9752_v44, %v9378_v48  ;;  %v5042_v48 = vor.u32 %v5041_v59, %v5038_v28  ;;  %v9864_v5 = vld [vmem:[#allocation8 + $0x350] sm:$0xff]   ;;  %v9877_v23 = vld [vmem:[#allocation8 + $0x358] sm:$0xff]   ;;  %v9889_v41 = vld [vmem:[#allocation8 + $0x360] sm:$0xff]  }
 0x3fe   : > { %v7461_v12 = vpop.f32.mrb[27].mxu1  ;;  %7761 = vmatprep.subr.bf16.mxu1 %v9588_v56  ;;  %v5072_v56 = vrot.slane %v5070_v40, 1  ;;  %v5050_v44 = vor.u32 %v5049_v57, %v5046_v18  ;;  %v9880_v37 = vld [vmem:[#allocation8 + $0x390] sm:$0xff]   ;;  %v9886_v40 = vld [vmem:[#allocation8 + $0x318] sm:$0xff]   ;;  %v9918_v18 = vrot.slane %v5022_v45, 2  ;;  %v9922_v57 = vcombine.low %v9795_v21, %v9795_v21 }
 0x3ff   : > { %7740 = vmatpush3.bf16.msra.mxu0 %v9590_v54  ;;  %v9827_v1 = vadd.f32 %v7459_v16, %v7437_v34  ;;  %v7462_v8 = vadd.f32 %v7461_v12, %v7460_v52  ;;  %10842 = vst [vmem:[#allocation38_spill] sm:$0xff] %v9833_v63  ;;  %v5080_v54 = vrot.slane %v5078_v53, 1  ;;  %v4847_v55 = vrot.slane %v9833_v63, 1  ;;  %v9902_v16 = vld [vmem:[#allocation8 + $0x3e0] sm:$0xff]   ;;  %v9911_v28 = vld [vmem:[#allocation3 + $0x58] sm:$0x33] }
 0x400   : > { %7741 = vmatprep.subr.bf16.mxu0 %v9593_v7  ;;  %v9842_v7 = vld [vmem:[#allocation8 + $0x3c0] sm:$0xff]   ;;  %v5076_v29 = vor.u32 %v5075_v10, %v5072_v56  ;;  %v5051_v32 = vsel %vm1684_vm0, %v5042_v48, %v5050_v44  ;;  %v5019_v53 = vshrl.u32 %v9597_v19, 16  ;;  %10844 = vst [vmem:[#allocation40_spill] sm:$0xff] %v9922_v57  ;;  %v9930_v56 = vld [vmem:[#allocation8 + $0x328] sm:$0xff]   ;;  %v9934_v10 = vcombine.high %v9911_v28, %v9911_v28  ;;  %v9958_v45 = vld [vmem:[#allocation8 + $0x3f0] sm:$0xff]  }
 0x401   : > { %v9837_v30 = vadd.f32 %v7462_v8, %v7440_v42  ;;  %7762 = vmatpush3.bf16.msra.mxu1 %v9600_v22  ;;  %v4843_v22 = vsel %vm1244_vm13, %v4841_v50, %v4842_v6  ;;  %v4849_v34 = vsel %vm1244_vm13, %v4847_v55, %v4848_v47  ;;  %v9893_v42 = vcombine.low %v9792_v49, %v9792_v49  ;;  %v9904_v52 = vld [vmem:[#allocation8 + $0x320] sm:$0xff]   ;;  %v9907_v49 = vld [vmem:[#allocation8 + $0x368] sm:$0xff]  }
 0x402   : > { %7763 = vmatprep.subr.bf16.mxu1 %v9607_v51  ;;  %v5084_v51 = vor.u32 %v5083_v3, %v5080_v54  ;;  %v9914_v19 = vld [vmem:[#allocation8 + $0x3a0] sm:$0xff]   ;;  %v9916_v59 = vrot.slane %v5019_v53, 1  ;;  %v9928_v50 = vld [vmem:[#allocation8 + $0x3e8] sm:$0xff]   ;;  %10845 = vst [vmem:[#allocation41_spill] sm:$0xff] %v9930_v56  ;;  %10846 = vst [vmem:[#allocation42_spill] sm:$0xff] %v9934_v10  ;;  %v5053_v44 = vshrl.u32 %v9618_v60, 16 }
 0x403   : > { %7742 = vmatpush3.bf16.msra.mxu0 %v9609_v62  ;;  %v9853_v62 = vld [vmem:[#allocation8 + $0x380] sm:$0xff]   ;;  %10843 = vst [vmem:[#allocation39_spill] sm:$0xff] %v9893_v42  ;;  %v5027_v6 = vshrl.u32 %v9893_v42, 16  ;;  %v5030_v12 = vshll.u32 %v9893_v42, 16  ;;  %v9937_v54 = vld [vmem:[#allocation8 + $0x370] sm:$0xff]   ;;  %10850 = vst [vmem:[#allocation47_spill] sm:$0xff] %v9958_v45 }
 0x404   : > { %7771 = vmatprep.subr.bf16.mxu0 %v9835_v24  ;;  %v9924_v8 = vld [vmem:[#allocation3 + $0x60] sm:$0x33]  ;;  %10847 = vst [vmem:[#allocation43_spill] sm:$0xff] %v9937_v54  ;;  %v5064_v17 = vshll.u32 %v9922_v57, 16  ;;  %v5430_v42 = vshrl.u32 %v9626_v11, 16 }
 0x405   : > { %7764 = vmatpush3.bf16.msra.mxu1 %v9631_v13  ;;  %v5085_v13 = vsel %vm1684_vm0, %v5076_v29, %v5084_v51  ;;  %v9939_v21 = vrot.slane %v5027_v6, 1  ;;  %v9941_v3 = vrot.slane %v5030_v12, 2  ;;  %v9946_v55 = vcombine.high %v9924_v8, %v9924_v8  ;;  %v9960_v6 = vld [vmem:[#allocation8 + $0x330] sm:$0xff]  }
 0x406   : > { %4890 = vmatmul.mubr.bf16.vlgmr.msra.gmra.mrb[52].mxu0 %v4843_v22  ;;  %7793 = vmatprep.subr.bf16.mxu1 %v9842_v7  ;;  %v9949_v22 = vld [vmem:[#allocation8 + $0x3a8] sm:$0xff]   ;;  %v5025_v29 = vor.u32 %v9918_v18, %v9916_v59  ;;  %v5056_v51 = vshll.u32 %v9618_v60, 16  ;;  %10851 = vst [vmem:[#allocation48_spill] sm:$0xff] %v9960_v6  ;;  %v5399_v12 = vshll.u32 %v9612_v27, 16  ;;  %v5404_v59 = vshrl.u32 %v9934_v10, 16 }
 0x407   : > { %7772 = vmatpush3.bf16.msra.mxu0 %v9844_v20  ;;  %5314 = vmatprep.mubr.bf16.mxu0 %v5051_v32  ;;  %10848 = vst [vmem:[#allocation44_spill] sm:$0xff] %v9946_v55  ;;  %10849 = vst [vmem:[#allocation46_spill] sm:$0xff] %v9949_v22  ;;  %v5061_v32 = vshrl.u32 %v9922_v57, 16  ;;  %v5407_v60 = vshll.u32 %v9934_v10, 16  ;;  %v5438_v10 = vshrl.u32 %v9946_v55, 16  ;;  %v5441_v39 = vshll.u32 %v9946_v55, 16 }
 0x408   : > { %7773 = vmatprep.subr.bf16.mxu0 %v9849_v14  ;;  %4931 = vmatmul.mubr.bf16.vlgmr.msra.gmra.mrb[52].mxu1 %v4849_v34  ;;  %v5396_v34 = vshrl.u32 %v9612_v27, 16 }
 0x409   : > { %7794 = vmatpush3.bf16.msra.mxu1 %v9853_v62  ;;  %5355 = vmatprep.mubr.bf16.mxu1 %v5085_v13 }
 0x40a   : > { %7795 = vmatprep.subr.bf16.mxu1 %v9858_v25  ;;  %v5398_v57 = vrot.slane %v5396_v34, 1  ;;  %v5440_v34 = vrot.slane %v5438_v10, 1  ;;  %v10015_v10 = vcombine.low %v9911_v28, %v9911_v28 }
 0x40b   : > { %7774 = vmatpush3.bf16.msra.mxu0 %v9860_v33 }
 0x40c   : > { %7775 = vmatprep.subr.bf16.mxu0 %v9864_v5  ;;  %10854 = vst [vmem:[#allocation51_spill] sm:$0xff] %v10015_v10  ;;  %v5390_v28 = vshll.u32 %v10015_v10, 16 }
 0x40d   : > { %7796 = vmatpush3.bf16.msra.mxu1 %v9868_v35 }
 0x40e   : > { %7797 = vmatprep.subr.bf16.mxu1 %v9872_v36 }
 0x40f   : > { %7776 = vmatpush3.bf16.msra.mxu0 %v9874_v4 }
 0x410   : > { %7777 = vmatprep.subr.bf16.mxu0 %v9877_v23 }
 0x411   : > { %7798 = vmatpush3.bf16.msra.mxu1 %v9880_v37 }
 0x412   : > { %7799 = vmatprep.subr.bf16.mxu1 %v9884_v38 }
 0x413   : > { %7778 = vmatpush3.bf16.msra.mxu0 %v9886_v40 }
 0x414   : > { %7779 = vmatprep.subr.bf16.mxu0 %v9889_v41 }
 0x415   : > { %7800 = vmatpush3.bf16.msra.mxu1 %v9896_v43 }
 0x416   : > { %7801 = vmatprep.subr.bf16.mxu1 %v9902_v16 }
 0x417   : > { %7780 = vmatpush3.bf16.msra.mxu0 %v9904_v52 }
 0x418   : > { %7781 = vmatprep.subr.bf16.mxu0 %v9907_v49 }
 0x419   : > { %v7479_v48 = vpop.f32.mrb[28].mxu0  ;;  %7802 = vmatpush3.bf16.msra.mxu1 %v9914_v19 }
 0x41a   : > { %v7480_v47 = vpop.f32.mrb[29].mxu0  ;;  %7803 = vmatprep.subr.bf16.mxu1 %v9928_v50 }
 0x41b   : > { %v7481_v13 = vadd.f32 %v7480_v47, %v7479_v48  ;;  %v7482_v53 = vpop.f32.mrb[30].mxu0  ;;  %7782 = vmatpush3.bf16.msra.mxu0 %v9930_v56  ;;  %v7501_v18 = vpop.f32.mrb[28].mxu1  ;;  %v9966_v48 = vld [vmem:[#allocation8 + $0x378] sm:$0xff]   ;;  %v5033_v47 = vor.u32 %v9941_v3, %v9939_v21  ;;  %v5055_v21 = vrot.slane %v5053_v44, 1  ;;  %v5058_v3 = vrot.slane %v5056_v51, 2 }
 0x41c   : > { %v7483_v0 = vpop.f32.mrb[31].mxu0  ;;  %7783 = vmatprep.subr.bf16.mxu0 %v9937_v54  ;;  %v7502_v26 = vpop.f32.mrb[29].mxu1  ;;  %v5063_v44 = vrot.slane %v5061_v32, 1  ;;  %v5066_v51 = vrot.slane %v5064_v17, 2  ;;  %v10023_v32 = vld [vmem:[#allocation3 + $0x60] sm:$0x33] }
 0x41d   : > { %v3931_v27 = vadd.f32 %v7481_v13, %v9827_v1  ;;  %v7484_v63 = vadd.f32 %v7483_v0, %v7482_v53  ;;  %v7503_v46 = vadd.f32 %v7502_v26, %v7501_v18  ;;  %v7504_v15 = vpop.f32.mrb[30].mxu1  ;;  %7804 = vmatpush3.bf16.msra.mxu1 %v9949_v22  ;;  %v9982_v0 = vld [vmem:[#allocation8 + $0x3f8] sm:$0xff]   ;;  %v5401_v26 = vrot.slane %v5399_v12, 2 }
 0x41e   : > { %v7505_v11 = vpop.f32.mrb[31].mxu1  ;;  %7805 = vmatprep.subr.bf16.mxu1 %v9958_v45  ;;  %v9984_v1 = vld [vmem:[#allocation8 + $0x338] sm:$0xff]   ;;  %v5406_v13 = vrot.slane %v5404_v59, 1  ;;  %v5409_v53 = vrot.slane %v5407_v60, 2  ;;  %v5443_v45 = vrot.slane %v5441_v39, 2  ;;  %v5059_v12 = vor.u32 %v5058_v3, %v5055_v21 }
 0x41f   : > { %v3934_v58 = vadd.f32 %v7484_v63, %v9837_v30  ;;  %7784 = vmatpush3.bf16.msra.mxu0 %v9960_v6  ;;  %v9986_v18 = vadd.f32 %v7503_v46, %v3931_v27  ;;  %v7506_v55 = vadd.f32 %v7505_v11, %v7504_v15  ;;  %v5432_v63 = vrot.slane %v5430_v42, 1  ;;  %v9992_v6 = vld [vmem:[#allocation8 + $0x3b8] sm:$0xff]   ;;  %v10028_v60 = vld [vmem:[#allocation3 + $0x68] sm:$0x33] }
 0x420   : > { %7785 = vmatprep.subr.bf16.mxu0 %v9966_v48  ;;  %v5435_v30 = vrot.slane %v5433_v2, 2  ;;  %v5402_v46 = vor.u32 %v5401_v26, %v5398_v57  ;;  %v5410_v15 = vor.u32 %v5409_v53, %v5406_v13  ;;  %v5067_v59 = vor.u32 %v5066_v51, %v5063_v44 }
 0x421   : > { %10852 = vst [vmem:[#allocation49_spill] sm:$0xff] %v9986_v18  ;;  %v9989_v22 = vadd.f32 %v7506_v55, %v3934_v58  ;;  %7806 = vmatpush3.bf16.msra.mxu1 %v9977_v31  ;;  %v5034_v17 = vsel %vm1684_vm0, %v5025_v29, %v5033_v47  ;;  %v5444_v39 = vor.u32 %v5443_v45, %v5440_v34  ;;  %v5379_v55 = vshrl.u32 %v9671_v61, 16  ;;  %v10861_v18 = vld [vmem:[#allocation47_spill] sm:$0xff] }
 0x422   : > { %7807 = vmatprep.subr.bf16.mxu1 %v9982_v0  ;;  %v5436_v2 = vor.u32 %v5435_v30, %v5432_v63  ;;  %v5411_v58 = vsel %vm1684_vm0, %v5402_v46, %v5410_v15  ;;  %v5068_v42 = vsel %vm1684_vm0, %v5059_v12, %v5067_v59  ;;  %v5382_v29 = vshll.u32 %v9671_v61, 16  ;;  %v10858_v63 = vld [vmem:[#allocation15_spill] sm:$0xff] }
 0x423   : > { %10853 = vst [vmem:[#allocation50_spill] sm:$0xff] %v9989_v22  ;;  %7786 = vmatpush3.bf16.msra.mxu0 %v9984_v1  ;;  %v5387_v45 = vshrl.u32 %v10015_v10, 16  ;;  %v10034_v47 = vcombine.high %v10023_v32, %v10023_v32  ;;  %v10037_v61 = vrot.slane %v5379_v55, 1  ;;  %v10043_v21 = vcombine.low %v9924_v8, %v9924_v8 }
 0x424   : > { %7815 = vmatprep.subr.bf16.mxu0 %v9835_v24  ;;  %v5445_v57 = vsel %vm1684_vm0, %v5436_v2, %v5444_v39  ;;  %v10039_v27 = vrot.slane %v5382_v29, 2  ;;  %v10047_v26 = vcombine.high %v10028_v60, %v10028_v60  ;;  %v5392_v53 = vrot.slane %v5390_v28, 2 }
 0x425   : > { %7808 = vmatpush3.bf16.msra.mxu1 %v9992_v6  ;;  %10855 = vst [vmem:[#allocation25_spill] sm:$0xff] %v10034_v47  ;;  %10856 = vst [vmem:[#allocation26_spill] sm:$0xff] %v10043_v21  ;;  %v5389_v11 = vrot.slane %v5387_v45, 1  ;;  %v5413_v44 = vshrl.u32 %v9685_v9, 16  ;;  %v5416_v51 = vshll.u32 %v9685_v9, 16  ;;  %v5564_v30 = vshrl.u32 %v10858_v63, 16 }
 0x426   : > { %5315 = vmatmul.mubr.bf16.vlgmr.msra.gmra.mrb[56].mxu0 %v5034_v17  ;;  %7837 = vmatprep.subr.bf16.mxu1 %v9842_v7  ;;  %10857 = vst [vmem:[#allocation27_spill] sm:$0xff] %v10047_v26  ;;  %v5567_v46 = vshll.u32 %v10858_v63, 16  ;;  %v5572_v15 = vshrl.u32 %v10034_v47, 16  ;;  %v5575_v12 = vshll.u32 %v10034_v47, 16  ;;  %v5385_v9 = vor.u32 %v10039_v27, %v10037_v61  ;;  %v10860_v63 = vld [vmem:[#allocation46_spill] sm:$0xff] }
 0x427   : > { %7816 = vmatpush3.bf16.msra.mxu0 %v9844_v20  ;;  %5482 = vmatprep.mubr.bf16.mxu0 %v5411_v58  ;;  %v5421_v2 = vshrl.u32 %v10043_v21, 16  ;;  %v5424_v39 = vshll.u32 %v10043_v21, 16  ;;  %v10859_v58 = vld [vmem:[#allocation14_spill] sm:$0xff]  ;;  %v5606_v45 = vshrl.u32 %v10047_v26, 16  ;;  %v5609_v28 = vshll.u32 %v10047_v26, 16  ;;  %v10862_v21 = vld [vmem:[#allocation48_spill] sm:$0xff] }
 0x428   : > { %7817 = vmatprep.subr.bf16.mxu0 %v9849_v14  ;;  %5356 = vmatmul.mubr.bf16.vlgmr.msra.gmra.mrb[56].mxu1 %v5068_v42  ;;  %v5598_v42 = vshrl.u32 %v10859_v58, 16  ;;  %v5601_v29 = vshll.u32 %v10859_v58, 16  ;;  %v5393_v22 = vor.u32 %v5392_v53, %v5389_v11  ;;  %v5415_v61 = vrot.slane %v5413_v44, 1 }
 0x429   : > { %7838 = vmatpush3.bf16.msra.mxu1 %v9853_v62  ;;  %5523 = vmatprep.mubr.bf16.mxu1 %v5445_v57  ;;  %v5418_v27 = vrot.slane %v5416_v51, 2  ;;  %v5566_v10 = vrot.slane %v5564_v30, 1  ;;  %v5577_v58 = vrot.slane %v5575_v12, 2  ;;  %v5608_v53 = vrot.slane %v5606_v45, 1  ;;  %v10107_v45 = vld [vmem:[#allocation3 + $0x68] sm:$0x33] }
 0x42a   : > { %7839 = vmatprep.subr.bf16.mxu1 %v9858_v25  ;;  %v5600_v26 = vrot.slane %v5598_v42, 1  ;;  %v5603_v11 = vrot.slane %v5601_v29, 2  ;;  %v5611_v44 = vrot.slane %v5609_v28, 2 }
 0x42b   : > { %7818 = vmatpush3.bf16.msra.mxu0 %v9860_v33 }
 0x42c   : > { %7819 = vmatprep.subr.bf16.mxu0 %v9864_v5  ;;  %v5604_v12 = vor.u32 %v5603_v11, %v5600_v26  ;;  %v10864_v26 = vld [vmem:[#allocation16_spill] sm:$0xff] }
 0x42d   : > { %7840 = vmatpush3.bf16.msra.mxu1 %v9868_v35  ;;  %v5550_v42 = vshll.u32 %v10864_v26, 16 }
 0x42e   : > { %7841 = vmatprep.subr.bf16.mxu1 %v9872_v36 }
 0x42f   : > { %7820 = vmatpush3.bf16.msra.mxu0 %v9874_v4  ;;  %v10112_v28 = vrot.slane %v5550_v42, 2 }
 0x430   : > { %7821 = vmatprep.subr.bf16.mxu0 %v9877_v23 }
 0x431   : > { %7842 = vmatpush3.bf16.msra.mxu1 %v9880_v37 }
 0x432   : > { %7843 = vmatprep.subr.bf16.mxu1 %v9884_v38 }
 0x433   : > { %7822 = vmatpush3.bf16.msra.mxu0 %v9886_v40 }
 0x434   : > { %7823 = vmatprep.subr.bf16.mxu0 %v9889_v41 }
 0x435   : > { %7844 = vmatpush3.bf16.msra.mxu1 %v9896_v43 }
 0x436   : > { %7845 = vmatprep.subr.bf16.mxu1 %v9902_v16 }
 0x437   : > { %7824 = vmatpush3.bf16.msra.mxu0 %v9904_v52 }
 0x438   : > { %7825 = vmatprep.subr.bf16.mxu0 %v9907_v49 }
 0x439   : > { %v7523_v3 = vpop.f32.mrb[32].mxu0  ;;  %7846 = vmatpush3.bf16.msra.mxu1 %v9914_v19 }
 0x43a   : > { %v7524_v13 = vpop.f32.mrb[33].mxu0  ;;  %7847 = vmatprep.subr.bf16.mxu1 %v9928_v50 }
 0x43b   : > { %v7525_v34 = vadd.f32 %v7524_v13, %v7523_v3  ;;  %v7526_v8 = vpop.f32.mrb[34].mxu0  ;;  %7826 = vmatpush3.bf16.msra.mxu0 %v9930_v56  ;;  %v7545_v59 = vpop.f32.mrb[32].mxu1 }
 0x43c   : > { %v7527_v17 = vpop.f32.mrb[35].mxu0  ;;  %7827 = vmatprep.subr.bf16.mxu0 %v9937_v54  ;;  %v7546_v57 = vpop.f32.mrb[33].mxu1 }
 0x43d   : > { %v7528_v55 = vadd.f32 %v7527_v17, %v7526_v8  ;;  %v7547_v3 = vadd.f32 %v7546_v57, %v7545_v59  ;;  %v7548_v13 = vpop.f32.mrb[34].mxu1  ;;  %7848 = vmatpush3.bf16.msra.mxu1 %v10860_v63  ;;  %v5569_v8 = vrot.slane %v5567_v46, 2  ;;  %v5574_v17 = vrot.slane %v5572_v15, 1 }
 0x43e   : > { %v7549_v47 = vpop.f32.mrb[35].mxu1  ;;  %7849 = vmatprep.subr.bf16.mxu1 %v10861_v18  ;;  %v5423_v59 = vrot.slane %v5421_v2, 1  ;;  %v5426_v57 = vrot.slane %v5424_v39, 2  ;;  %v5419_v46 = vor.u32 %v5418_v27, %v5415_v61  ;;  %v5394_v15 = vsel %vm1684_vm0, %v5385_v9, %v5393_v22 }
 0x43f   : > { %7828 = vmatpush3.bf16.msra.mxu0 %v10862_v21  ;;  %v10070_v54 = vadd.f32 %v7547_v3, %v7525_v34  ;;  %v7550_v56 = vadd.f32 %v7549_v47, %v7548_v13  ;;  %v5570_v30 = vor.u32 %v5569_v8, %v5566_v10  ;;  %v5578_v34 = vor.u32 %v5577_v58, %v5574_v17  ;;  %v10118_v13 = vld [vmem:[#allocation3 + $0x70] sm:$0x33] }
 0x440   : > { %7829 = vmatprep.subr.bf16.mxu0 %v9966_v48  ;;  %v5427_v47 = vor.u32 %v5426_v57, %v5423_v59  ;;  %v5612_v2 = vor.u32 %v5611_v44, %v5608_v53  ;;  %v10097_v22 = vcombine.low %v10023_v32, %v10023_v32  ;;  %v5547_v9 = vshrl.u32 %v10864_v26, 16  ;;  %v10867_v58 = vld [vmem:[#allocation32_spill] sm:$0xff]  ;;  %v10871_v26 = vld [vmem:[#allocation43_spill] sm:$0xff] }
 0x441   : > { %v10073_v51 = vadd.f32 %v7550_v56, %v7528_v55  ;;  %7850 = vmatpush3.bf16.msra.mxu1 %v9977_v31  ;;  %v5579_v56 = vsel %vm1684_vm0, %v5570_v30, %v5578_v34  ;;  %v10116_v3 = vcombine.low %v10028_v60, %v10028_v60  ;;  %v10124_v61 = vcombine.high %v10107_v45, %v10107_v45  ;;  %v10869_v30 = vld [vmem:[#allocation19_spill] sm:$0xff] }
 0x442   : > { %7851 = vmatprep.subr.bf16.mxu1 %v9982_v0  ;;  %v5428_v10 = vsel %vm1684_vm0, %v5419_v46, %v5427_v47  ;;  %v5613_v39 = vsel %vm1684_vm0, %v5604_v12, %v5612_v2  ;;  %10863 = vst [vmem:[#allocation28_spill] sm:$0xff] %v10097_v22  ;;  %v5555_v55 = vshrl.u32 %v10097_v22, 16  ;;  %v5558_v29 = vshll.u32 %v10097_v22, 16 }
 0x443   : > { %7830 = vmatpush3.bf16.msra.mxu0 %v9984_v1  ;;  %v10110_v32 = vrot.slane %v5547_v9, 1  ;;  %10865 = vst [vmem:[#allocation29_spill] sm:$0xff] %v10116_v3  ;;  %10866 = vst [vmem:[#allocation45_spill] sm:$0xff] %v10124_v61  ;;  %v5581_v59 = vshrl.u32 %v10867_v58, 16  ;;  %v10132_v60 = vcombine.high %v10118_v13, %v10118_v13  ;;  %v5584_v53 = vshll.u32 %v10867_v58, 16 }
 0x444   : > { %7859 = vmatprep.subr.bf16.mxu0 %v9835_v24  ;;  %v10127_v27 = vrot.slane %v5555_v55, 1  ;;  %v5560_v8 = vrot.slane %v5558_v29, 2  ;;  %v5589_v44 = vshrl.u32 %v10116_v3, 16  ;;  %v5732_v34 = vshrl.u32 %v10869_v30, 16  ;;  %v10872_v55 = vld [vmem:[#allocation33_spill] sm:$0xff] }
 0x445   : > { %7852 = vmatpush3.bf16.msra.mxu1 %v9992_v6  ;;  %10868 = vst [vmem:[#allocation52_spill] sm:$0xff] %v10132_v60  ;;  %v5553_v11 = vor.u32 %v10112_v28, %v10110_v32  ;;  %v5735_v12 = vshll.u32 %v10869_v30, 16  ;;  %v5740_v2 = vshrl.u32 %v10124_v61, 16  ;;  %v5592_v42 = vshll.u32 %v10116_v3, 16 }
 0x446   : > { %5483 = vmatmul.mubr.bf16.vlgmr.msra.gmra.mrb[60].mxu0 %v5394_v15  ;;  %7881 = vmatprep.subr.bf16.mxu1 %v9842_v7  ;;  %v10870_v15 = vld [vmem:[#allocation41_spill] sm:$0xff]  ;;  %v5561_v9 = vor.u32 %v5560_v8, %v10127_v27  ;;  %v5766_v29 = vshrl.u32 %v10872_v55, 16  ;;  %v5769_v32 = vshll.u32 %v10872_v55, 16  ;;  %v5777_v30 = vshll.u32 %v10132_v60, 16 }
 0x447   : > { %7860 = vmatpush3.bf16.msra.mxu0 %v9844_v20  ;;  %5650 = vmatprep.mubr.bf16.mxu0 %v5579_v56  ;;  %v5743_v56 = vshll.u32 %v10124_v61, 16  ;;  %v5586_v27 = vrot.slane %v5584_v53, 2  ;;  %v5734_v8 = vrot.slane %v5732_v34, 1 }
 0x448   : > { %7861 = vmatprep.subr.bf16.mxu0 %v9849_v14  ;;  %5524 = vmatmul.mubr.bf16.vlgmr.msra.gmra.mrb[60].mxu1 %v5428_v10  ;;  %v5771_v53 = vrot.slane %v5769_v32, 2  ;;  %v10211_v32 = vld [vmem:[#allocation3] sm:$0xcc] }
 0x449   : > { %7882 = vmatpush3.bf16.msra.mxu1 %v9853_v62  ;;  %5691 = vmatprep.mubr.bf16.mxu1 %v5613_v39 }
 0x44a   : > { %7883 = vmatprep.subr.bf16.mxu1 %v9858_v25 }
 0x44b   : > { %7862 = vmatpush3.bf16.msra.mxu0 %v9860_v33 }
 0x44c   : > { %7863 = vmatprep.subr.bf16.mxu0 %v9864_v5 }
 0x44d   : > { %7884 = vmatpush3.bf16.msra.mxu1 %v9868_v35 }
 0x44e   : > { %7885 = vmatprep.subr.bf16.mxu1 %v9872_v36 }
 0x44f   : > { %7864 = vmatpush3.bf16.msra.mxu0 %v9874_v4 }
 0x450   : > { %7865 = vmatprep.subr.bf16.mxu0 %v9877_v23 }
 0x451   : > { %7886 = vmatpush3.bf16.msra.mxu1 %v9880_v37 }
 0x452   : > { %7887 = vmatprep.subr.bf16.mxu1 %v9884_v38 }
 0x453   : > { %7866 = vmatpush3.bf16.msra.mxu0 %v9886_v40 }
 0x454   : > { %7867 = vmatprep.subr.bf16.mxu0 %v9889_v41 }
 0x455   : > { %7888 = vmatpush3.bf16.msra.mxu1 %v9896_v43 }
 0x456   : > { %7889 = vmatprep.subr.bf16.mxu1 %v9902_v16 }
 0x457   : > { %7868 = vmatpush3.bf16.msra.mxu0 %v9904_v52 }
 0x458   : > { %7869 = vmatprep.subr.bf16.mxu0 %v9907_v49 }
 0x459   : > { %v7567_v17 = vpop.f32.mrb[36].mxu0  ;;  %7890 = vmatpush3.bf16.msra.mxu1 %v9914_v19 }
 0x45a   : > { %v7568_v57 = vpop.f32.mrb[37].mxu0  ;;  %7891 = vmatprep.subr.bf16.mxu1 %v9928_v50 }
 0x45b   : > { %v7569_v46 = vadd.f32 %v7568_v57, %v7567_v17  ;;  %v7570_v47 = vpop.f32.mrb[38].mxu0  ;;  %7870 = vmatpush3.bf16.msra.mxu0 %v10870_v15  ;;  %v7589_v10 = vpop.f32.mrb[36].mxu1  ;;  %v5774_v57 = vshrl.u32 %v10132_v60, 16  ;;  %v5779_v60 = vrot.slane %v5777_v30, 2  ;;  %v10215_v30 = vld [vmem:[#allocation3 + $0x28] sm:$0xff] }
 0x45c   : > { %v7571_v39 = vpop.f32.mrb[39].mxu0  ;;  %7871 = vmatprep.subr.bf16.mxu0 %v10871_v26  ;;  %v7590_v17 = vpop.f32.mrb[37].mxu1  ;;  %v5583_v26 = vrot.slane %v5581_v59, 1  ;;  %v5768_v59 = vrot.slane %v5766_v29, 1 }
 0x45d   : > { %v4189_v28 = vadd.f32 %v7569_v46, %v10070_v54  ;;  %v7572_v58 = vadd.f32 %v7571_v39, %v7570_v47  ;;  %v7591_v61 = vadd.f32 %v7590_v17, %v7589_v10  ;;  %v7592_v22 = vpop.f32.mrb[38].mxu1  ;;  %7892 = vmatpush3.bf16.msra.mxu1 %v10860_v63  ;;  %v5737_v54 = vrot.slane %v5735_v12, 2 }
 0x45e   : > { %v7593_v15 = vpop.f32.mrb[39].mxu1  ;;  %7893 = vmatprep.subr.bf16.mxu1 %v10861_v18  ;;  %v5742_v46 = vrot.slane %v5740_v2, 1  ;;  %v5745_v47 = vrot.slane %v5743_v56, 2  ;;  %v5591_v10 = vrot.slane %v5589_v44, 1  ;;  %v5594_v17 = vrot.slane %v5592_v42, 2 }
 0x45f   : > { %v4192_v3 = vadd.f32 %v7572_v58, %v10073_v51  ;;  %7872 = vmatpush3.bf16.msra.mxu0 %v10862_v21  ;;  %v10157_v39 = vadd.f32 %v7591_v61, %v4189_v28  ;;  %v7594_v55 = vadd.f32 %v7593_v15, %v7592_v22  ;;  %v5776_v34 = vrot.slane %v5774_v57, 1 }
 0x460   : > { %7873 = vmatprep.subr.bf16.mxu0 %v9966_v48  ;;  %v5738_v12 = vor.u32 %v5737_v54, %v5734_v8  ;;  %v5746_v61 = vor.u32 %v5745_v47, %v5742_v46  ;;  %v5587_v2 = vor.u32 %v5586_v27, %v5583_v26  ;;  %v5595_v22 = vor.u32 %v5594_v17, %v5591_v10  ;;  %v10220_v47 = vld [vmem:[#allocation8 + $0x440] sm:$0xff]  }
 0x461   : > { %v10160_v51 = vadd.f32 %v7594_v55, %v4192_v3  ;;  %7894 = vmatpush3.bf16.msra.mxu1 %v9977_v31  ;;  %v5562_v44 = vsel %vm1684_vm0, %v5553_v11, %v5561_v9  ;;  %v5772_v15 = vor.u32 %v5771_v53, %v5768_v59  ;;  %v5780_v56 = vor.u32 %v5779_v60, %v5776_v34  ;;  %v10222_v55 = vld [vmem:[#allocation3 + $0x8] sm:$0xcc]  ;;  %v10877_v59 = vld [vmem:[#allocation22_spill] sm:$0xff] }
 0x462   : > { %7895 = vmatprep.subr.bf16.mxu1 %v9982_v0  ;;  %v5747_v3 = vsel %vm1684_vm0, %v5738_v12, %v5746_v61  ;;  %v5596_v42 = vsel %vm1684_vm0, %v5587_v2, %v5595_v22  ;;  %v7173_v27 = vcombine.high %v10211_v32, %v10215_v30  ;;  %v10236_v12 = vld [vmem:[#allocation8 + $0x400] sm:$0xff]   ;;  %v10878_v2 = vld [vmem:[#allocation35_spill] sm:$0xff] }
 0x463   : > { %7874 = vmatpush3.bf16.msra.mxu0 %v9984_v1  ;;  %v5951_v22 = vrot.slane %v10878_v2, 2  ;;  %v10331_v2 = vld [vmem:[#allocation8 + $0x4f8] sm:$0xff]  }
 0x464   : > { %7903 = vmatprep.subr.bf16.mxu0 %v9835_v24  ;;  %v5781_v24 = vsel %vm1684_vm0, %v5772_v15, %v5780_v56  ;;  %v5950_v61 = vrot.slane %v7173_v27, 2 }
 0x465   : > { %7896 = vmatpush3.bf16.msra.mxu1 %v9992_v6 }
 0x466   : > { %5651 = vmatmul.mubr.bf16.vlgmr.msra.gmra.mrb[64].mxu0 %v5562_v44  ;;  %7925 = vmatprep.subr.bf16.mxu1 %v9842_v7  ;;  %v10188_v7 = vcombine.low %v10107_v45, %v10107_v45  ;;  %v10879_v44 = vld [vmem:[#allocation24_spill] sm:$0xff] }
 0x467   : > { %7904 = vmatpush3.bf16.msra.mxu0 %v9844_v20  ;;  %5818 = vmatprep.mubr.bf16.mxu0 %v5747_v3  ;;  %v10873_v20 = vld [vmem:[#allocation37_spill] sm:$0xff] }
 0x468   : > { %7905 = vmatprep.subr.bf16.mxu0 %v9849_v14  ;;  %5692 = vmatmul.mubr.bf16.vlgmr.msra.gmra.mrb[64].mxu1 %v5596_v42  ;;  %v5715_v14 = vshrl.u32 %v10873_v20, 16  ;;  %v10243_v42 = vld [vmem:[#allocation8 + $0x448] sm:$0xff]  }
 0x469   : > { %7926 = vmatpush3.bf16.msra.mxu1 %v9853_v62  ;;  %5859 = vmatprep.mubr.bf16.mxu1 %v5781_v24  ;;  %v10197_v62 = vcombine.low %v10118_v13, %v10118_v13 }
 0x46a   : > { %7927 = vmatprep.subr.bf16.mxu1 %v9858_v25 }
 0x46b   : > { %7906 = vmatpush3.bf16.msra.mxu0 %v9860_v33  ;;  %v5718_v33 = vshll.u32 %v10873_v20, 16  ;;  %v5757_v45 = vshrl.u32 %v10197_v62, 16  ;;  %v10248_v20 = vld [vmem:[#allocation8 + $0x480] sm:$0xff]  }
 0x46c   : > { %7907 = vmatprep.subr.bf16.mxu0 %v9864_v5  ;;  %v5723_v5 = vshrl.u32 %v10188_v7, 16 }
 0x46d   : > { %7928 = vmatpush3.bf16.msra.mxu1 %v9868_v35  ;;  %v5726_v35 = vshll.u32 %v10188_v7, 16  ;;  %v5720_v11 = vrot.slane %v5718_v33, 2  ;;  %v5759_v46 = vrot.slane %v5757_v45, 1  ;;  %v10255_v33 = vld [vmem:[#allocation8 + $0x408] sm:$0xff]  }
 0x46e   : > { %7929 = vmatprep.subr.bf16.mxu1 %v9872_v36  ;;  %v10296_v45 = vld [vmem:[#allocation8 + $0x468] sm:$0xff]  }
 0x46f   : > { %7908 = vmatpush3.bf16.msra.mxu0 %v9874_v4  ;;  %v5728_v26 = vrot.slane %v5726_v35, 2  ;;  %v10259_v35 = vld [vmem:[#allocation8 + $0x450] sm:$0xff]  }
 0x470   : > { %7909 = vmatprep.subr.bf16.mxu0 %v9877_v23 }
 0x471   : > { %7930 = vmatpush3.bf16.msra.mxu1 %v9880_v37  ;;  %v10874_v37 = vld [vmem:[#allocation41_spill] sm:$0xff] }
 0x472   : > { %7931 = vmatprep.subr.bf16.mxu1 %v9884_v38  ;;  %v10875_v38 = vld [vmem:[#allocation38_spill] sm:$0xff] }
 0x473   : > { %7910 = vmatpush3.bf16.msra.mxu0 %v9886_v40  ;;  %v5749_v40 = vshrl.u32 %v10875_v38, 16 }
 0x474   : > { %7911 = vmatprep.subr.bf16.mxu0 %v9889_v41  ;;  %v5752_v41 = vshll.u32 %v10875_v38, 16  ;;  %v10275_v38 = vld [vmem:[#allocation8 + $0x490] sm:$0xff]  }
 0x475   : > { %7932 = vmatpush3.bf16.msra.mxu1 %v9896_v43  ;;  %v5751_v58 = vrot.slane %v5749_v40, 1  ;;  %v10279_v40 = vld [vmem:[#allocation8 + $0x4d8] sm:$0xff]  }
 0x476   : > { %7933 = vmatprep.subr.bf16.mxu1 %v9902_v16  ;;  %v5754_v57 = vrot.slane %v5752_v41, 2  ;;  %v10281_v41 = vld [vmem:[#allocation8 + $0x418] sm:$0xff]  }
 0x477   : > { %7912 = vmatpush3.bf16.msra.mxu0 %v9904_v52  ;;  %v10876_v52 = vld [vmem:[#allocation43_spill] sm:$0xff] }
 0x478   : > { %7913 = vmatprep.subr.bf16.mxu0 %v9907_v49  ;;  %v5717_v49 = vrot.slane %v5715_v14, 1  ;;  %v5755_v56 = vor.u32 %v5754_v57, %v5751_v58  ;;  %v5952_v14 = vsel %vm2138_vm1, %v5950_v61, %v5951_v22  ;;  %v10315_v58 = vld [vmem:[#allocation8 + $0x4f0] sm:$0xff]   ;;  %v10333_v22 = vld [vmem:[#allocation8 + $0x438] sm:$0xff]  }
 0x479   : > { %v7611_v25 = vpop.f32.mrb[40].mxu0  ;;  %7934 = vmatpush3.bf16.msra.mxu1 %v9914_v19  ;;  %v5760_v19 = vshll.u32 %v10197_v62, 16  ;;  %v10317_v57 = vld [vmem:[#allocation8 + $0x430] sm:$0xff]  }
 0x47a   : > { %v7612_v36 = vpop.f32.mrb[41].mxu0  ;;  %7935 = vmatprep.subr.bf16.mxu1 %v9928_v50  ;;  %v5725_v50 = vrot.slane %v5723_v5, 1 }
 0x47b   : > { %v7613_v4 = vadd.f32 %v7612_v36, %v7611_v25  ;;  %v7614_v23 = vpop.f32.mrb[42].mxu0  ;;  %7914 = vmatpush3.bf16.msra.mxu0 %v10874_v37  ;;  %v7633_v43 = vpop.f32.mrb[40].mxu1  ;;  %v10253_v25 = vld [vmem:[#allocation8 + $0x4c8] sm:$0xff]   ;;  %v10272_v37 = vld [vmem:[#allocation8 + $0x458] sm:$0xff]  }
 0x47c   : > { %v7615_v16 = vpop.f32.mrb[43].mxu0  ;;  %7915 = vmatprep.subr.bf16.mxu0 %v10876_v52  ;;  %v7634_v13 = vpop.f32.mrb[41].mxu1  ;;  %v5729_v10 = vor.u32 %v5728_v26, %v5725_v50  ;;  %v10263_v36 = vld [vmem:[#allocation8 + $0x488] sm:$0xff]   ;;  %v10291_v52 = vld [vmem:[#allocation8 + $0x4e0] sm:$0xff]  }
 0x47d   : > { %v7616_v60 = vadd.f32 %v7615_v16, %v7614_v23  ;;  %v7635_v9 = vadd.f32 %v7634_v13, %v7633_v43  ;;  %v7636_v29 = vpop.f32.mrb[42].mxu1  ;;  %7936 = vmatpush3.bf16.msra.mxu1 %v10860_v63  ;;  %v5762_v63 = vrot.slane %v5760_v19, 2  ;;  %v10269_v23 = vld [vmem:[#allocation8 + $0x410] sm:$0xff]   ;;  %v10284_v43 = vld [vmem:[#allocation8 + $0x460] sm:$0xff]   ;;  %v10287_v16 = vld [vmem:[#allocation8 + $0x498] sm:$0xff]  }
 0x47e   : > { %v7637_v28 = vpop.f32.mrb[43].mxu1  ;;  %7937 = vmatprep.subr.bf16.mxu1 %v10861_v18  ;;  %v5721_v18 = vor.u32 %v5720_v11, %v5717_v49  ;;  %v10293_v49 = vld [vmem:[#allocation8 + $0x420] sm:$0xff]   ;;  %v10303_v13 = vld [vmem:[#allocation8 + $0x4e8] sm:$0xff]   ;;  %v10308_v11 = vld [vmem:[#allocation8 + $0x470] sm:$0xff]  }
 0x47f   : > { %7916 = vmatpush3.bf16.msra.mxu0 %v10862_v21  ;;  %v4597_v8 = vadd.f32 %v7635_v9, %v7613_v4  ;;  %v7638_v54 = vadd.f32 %v7637_v28, %v7636_v29  ;;  %v10224_v21 = vld [vmem:[#allocation3 + $0x30] sm:$0xff]  ;;  %v5763_v3 = vor.u32 %v5762_v63, %v5759_v46  ;;  %v10299_v19 = vld [vmem:[#allocation8 + $0x4a0] sm:$0xff]   ;;  %v10311_v9 = vld [vmem:[#allocation8 + $0x4a8] sm:$0xff]  }
 0x480   : > { %7917 = vmatprep.subr.bf16.mxu0 %v9966_v48  ;;  %v7175_v17 = vcombine.high %v10222_v55, %v10224_v21  ;;  %v10234_v48 = vld [vmem:[#allocation8 + $0x4c0] sm:$0xff]   ;;  %v10267_v4 = vld [vmem:[#allocation8 + $0x4d0] sm:$0xff]  }
 0x481   : > { %v10229_v53 = vadd.f32 %v4597_v8, %v10877_v59  ;;  %v4600_v34 = vadd.f32 %v7638_v54, %v7616_v60  ;;  %7938 = vmatpush3.bf16.msra.mxu1 %v9977_v31  ;;  %v5730_v31 = vsel %vm1684_vm0, %v5721_v18, %v5729_v10  ;;  %v5764_v5 = vsel %vm1684_vm0, %v5755_v56, %v5763_v3  ;;  %v10305_v60 = vld [vmem:[#allocation8 + $0x428] sm:$0xff]   ;;  %v10320_v54 = vld [vmem:[#allocation8 + $0x478] sm:$0xff]   ;;  %v10325_v59 = vld [vmem:[#allocation8 + $0x4b0] sm:$0xff]  }
 0x482   : > { %7939 = vmatprep.subr.bf16.mxu1 %v9982_v0  ;;  %v5956_v0 = vrot.slane %v7175_v17, 2  ;;  %v7172_v18 = vcombine.low %v10211_v32, %v10215_v30  ;;  %v7174_v56 = vcombine.low %v10222_v55, %v10224_v21  ;;  %v10340_v3 = vld [vmem:[#allocation3 + $0x10] sm:$0xcc] }
 0x483   : > { %7918 = vmatpush3.bf16.msra.mxu0 %v9984_v1  ;;  %v10240_v15 = vadd.f32 %v4600_v34, %v10879_v44  ;;  %v10880_v1 = vld [vmem:[#allocation36_spill] sm:$0xff]  ;;  %v10327_v34 = vld [vmem:[#allocation3 + $0x8] sm:$0xcc] }
 0x484   : > { %7947 = vmatprep.subr.bf16.mxu0 %v10220_v47  ;;  %v5957_v24 = vrot.slane %v10880_v1, 2  ;;  %v7209_v32 = vcombine.high %v10327_v34, %v10224_v21 }
 0x485   : > { %7940 = vmatpush3.bf16.msra.mxu1 %v9992_v6 }
 0x486   : > { %5819 = vmatmul.mubr.bf16.vlgmr.msra.gmra.mrb[68].mxu0 %v5730_v31  ;;  %7969 = vmatprep.subr.bf16.mxu1 %v10234_v48  ;;  %v5958_v6 = vsel %vm2138_vm1, %v5956_v0, %v5957_v24  ;;  %v5947_v31 = vrot.slane %v7172_v18, 2  ;;  %v10881_v0 = vld [vmem:[#allocation39_spill] sm:$0xff]  ;;  %v10343_v24 = vld [vmem:[#allocation3 + $0x38] sm:$0xff]  ;;  %v6254_v55 = vrot.slane %v7209_v32, 2 }
 0x487   : > { %7948 = vmatpush3.bf16.msra.mxu0 %v10236_v12  ;;  %6187 = vmatprep.mubr.bf16.mxu0 %v5952_v14  ;;  %v5948_v1 = vrot.slane %v10881_v0, 2  ;;  %v7211_v14 = vcombine.high %v10340_v3, %v10343_v24  ;;  %v10885_v18 = vld [vmem:[#allocation40_spill] sm:$0xff] }
 0x488   : > { %7949 = vmatprep.subr.bf16.mxu0 %v10243_v42  ;;  %5860 = vmatmul.mubr.bf16.vlgmr.msra.gmra.mrb[68].mxu1 %v5764_v5  ;;  %v10882_v5 = vld [vmem:[#allocation31_spill] sm:$0xff] }
 0x489   : > { %7970 = vmatpush3.bf16.msra.mxu1 %v10248_v20  ;;  %6228 = vmatprep.mubr.bf16.mxu1 %v5958_v6 }
 0x48a   : > { %7971 = vmatprep.subr.bf16.mxu1 %v10253_v25 }
 0x48b   : > { %7950 = vmatpush3.bf16.msra.mxu0 %v10255_v33 }
 0x48c   : > { %7951 = vmatprep.subr.bf16.mxu0 %v10259_v35 }
 0x48d   : > { %7972 = vmatpush3.bf16.msra.mxu1 %v10263_v36 }
 0x48e   : > { %7973 = vmatprep.subr.bf16.mxu1 %v10267_v4 }
 0x48f   : > { %7952 = vmatpush3.bf16.msra.mxu0 %v10269_v23 }
 0x490   : > { %7953 = vmatprep.subr.bf16.mxu0 %v10272_v37 }
 0x491   : > { %7974 = vmatpush3.bf16.msra.mxu1 %v10275_v38 }
 0x492   : > { %7975 = vmatprep.subr.bf16.mxu1 %v10279_v40 }
 0x493   : > { %7954 = vmatpush3.bf16.msra.mxu0 %v10281_v41 }
 0x494   : > { %7955 = vmatprep.subr.bf16.mxu0 %v10284_v43 }
 0x495   : > { %7976 = vmatpush3.bf16.msra.mxu1 %v10287_v16 }
 0x496   : > { %7977 = vmatprep.subr.bf16.mxu1 %v10291_v52 }
 0x497   : > { %7956 = vmatpush3.bf16.msra.mxu0 %v10293_v49 }
 0x498   : > { %7957 = vmatprep.subr.bf16.mxu0 %v10296_v45 }
 0x499   : > { %v7655_v50 = vpop.f32.mrb[44].mxu0  ;;  %7978 = vmatpush3.bf16.msra.mxu1 %v10299_v19 }
 0x49a   : > { %v7656_v26 = vpop.f32.mrb[45].mxu0  ;;  %7979 = vmatprep.subr.bf16.mxu1 %v10303_v13 }
 0x49b   : > { %v7657_v29 = vadd.f32 %v7656_v26, %v7655_v50  ;;  %v7658_v28 = vpop.f32.mrb[46].mxu0  ;;  %7958 = vmatpush3.bf16.msra.mxu0 %v10305_v60  ;;  %v7677_v27 = vpop.f32.mrb[44].mxu1  ;;  %v10351_v26 = vld [vmem:[#allocation8 + $0x4b8] sm:$0xff]  }
 0x49c   : > { %v7659_v8 = vpop.f32.mrb[47].mxu0  ;;  %7959 = vmatprep.subr.bf16.mxu0 %v10308_v11  ;;  %v7678_v46 = vpop.f32.mrb[45].mxu1 }
 0x49d   : > { %v7660_v63 = vadd.f32 %v7659_v8, %v7658_v28  ;;  %v7679_v10 = vadd.f32 %v7678_v46, %v7677_v27  ;;  %v7680_v17 = vpop.f32.mrb[46].mxu1  ;;  %7980 = vmatpush3.bf16.msra.mxu1 %v10311_v9  ;;  %v10884_v27 = vld [vmem:[#allocation34_spill] sm:$0xff]  ;;  %v5953_v46 = vrot.slane %v7174_v56, 2 }
 0x49e   : > { %v7681_v61 = vpop.f32.mrb[47].mxu1  ;;  %7981 = vmatprep.subr.bf16.mxu1 %v10315_v58 }
 0x49f   : > { %7960 = vmatpush3.bf16.msra.mxu0 %v10317_v57  ;;  %v4709_v30 = vadd.f32 %v7679_v10, %v7657_v29  ;;  %v7682_v44 = vadd.f32 %v7681_v61, %v7680_v17  ;;  %v10883_v29 = vld [vmem:[#allocation42_spill] sm:$0xff]  ;;  %v5954_v10 = vrot.slane %v10885_v18, 2  ;;  %v6260_v17 = vrot.slane %v7211_v14, 2  ;;  %v10886_v61 = vld [vmem:[#allocation44_spill] sm:$0xff] }
 0x4a0   : > { %7961 = vmatprep.subr.bf16.mxu0 %v10320_v54  ;;  %v6255_v28 = vrot.slane %v10883_v29, 2  ;;  %v10393_v18 = vld [vmem:[#allocation3 + $0x10] sm:$0xcc] }
 0x4a1   : > { %v10348_v6 = vadd.f32 %v4709_v30, %v10882_v5  ;;  %v4712_v50 = vadd.f32 %v7682_v44, %v7660_v63  ;;  %7982 = vmatpush3.bf16.msra.mxu1 %v10325_v59  ;;  %v5949_v63 = vsel %vm2138_vm1, %v5947_v31, %v5948_v1  ;;  %v6261_v30 = vrot.slane %v10886_v61, 2 }
 0x4a2   : > { %7983 = vmatprep.subr.bf16.mxu1 %v10331_v2  ;;  %v6256_v32 = vsel %vm2138_vm1, %v6254_v55, %v6255_v28  ;;  %v5955_v44 = vsel %vm2138_vm1, %v5953_v46, %v5954_v10  ;;  %v7208_v28 = vcombine.low %v10327_v34, %v10224_v21  ;;  %v7210_v21 = vcombine.low %v10340_v3, %v10343_v24  ;;  %v10402_v34 = vld [vmem:[#allocation3 + $0x18] sm:$0xcc] }
 0x4a3   : > { %7962 = vmatpush3.bf16.msra.mxu0 %v10333_v22  ;;  %v10357_v8 = vadd.f32 %v4712_v50, %v10884_v27  ;;  %v6262_v56 = vsel %vm2138_vm1, %v6260_v17, %v6261_v30 }
 0x4a4   : > { %7991 = vmatprep.subr.bf16.mxu0 %v10220_v47  ;;  %v6251_v30 = vrot.slane %v7208_v28, 2 }
 0x4a5   : > { %7984 = vmatpush3.bf16.msra.mxu1 %v10351_v26 }
 0x4a6   : > { %6188 = vmatmul.mubr.bf16.vlgmr.msra.gmra.mrb[72].mxu0 %v5949_v63  ;;  %8013 = vmatprep.subr.bf16.mxu1 %v10234_v48  ;;  %v7213_v63 = vcombine.high %v10393_v18, %v10343_v24 }
 0x4a7   : > { %7992 = vmatpush3.bf16.msra.mxu0 %v10236_v12  ;;  %6299 = vmatprep.mubr.bf16.mxu0 %v6256_v32  ;;  %v10887_v32 = vld [vmem:[#allocation51_spill] sm:$0xff] }
 0x4a8   : > { %7993 = vmatprep.subr.bf16.mxu0 %v10243_v42  ;;  %6229 = vmatmul.mubr.bf16.vlgmr.msra.gmra.mrb[72].mxu1 %v5955_v44  ;;  %v6252_v44 = vrot.slane %v10887_v32, 2  ;;  %v6366_v3 = vrot.slane %v7213_v63, 2 }
 0x4a9   : > { %8014 = vmatpush3.bf16.msra.mxu1 %v10248_v20  ;;  %6340 = vmatprep.mubr.bf16.mxu1 %v6262_v56  ;;  %v10405_v56 = vld [vmem:[#allocation3 + $0x40] sm:$0xff] }
 0x4aa   : > { %8015 = vmatprep.subr.bf16.mxu1 %v10253_v25 }
 0x4ab   : > { %7994 = vmatpush3.bf16.msra.mxu0 %v10255_v33 }
 0x4ac   : > { %7995 = vmatprep.subr.bf16.mxu0 %v10259_v35 }
 0x4ad   : > { %8016 = vmatpush3.bf16.msra.mxu1 %v10263_v36 }
 0x4ae   : > { %8017 = vmatprep.subr.bf16.mxu1 %v10267_v4 }
 0x4af   : > { %7996 = vmatpush3.bf16.msra.mxu0 %v10269_v23 }
 0x4b0   : > { %7997 = vmatprep.subr.bf16.mxu0 %v10272_v37 }
 0x4b1   : > { %8018 = vmatpush3.bf16.msra.mxu1 %v10275_v38 }
 0x4b2   : > { %8019 = vmatprep.subr.bf16.mxu1 %v10279_v40 }
 0x4b3   : > { %7998 = vmatpush3.bf16.msra.mxu0 %v10281_v41 }
 0x4b4   : > { %7999 = vmatprep.subr.bf16.mxu0 %v10284_v43 }
 0x4b5   : > { %8020 = vmatpush3.bf16.msra.mxu1 %v10287_v16 }
 0x4b6   : > { %8021 = vmatprep.subr.bf16.mxu1 %v10291_v52 }
 0x4b7   : > { %8000 = vmatpush3.bf16.msra.mxu0 %v10293_v49 }
 0x4b8   : > { %8001 = vmatprep.subr.bf16.mxu0 %v10296_v45 }
 0x4b9   : > { %v7699_v31 = vpop.f32.mrb[48].mxu0  ;;  %8022 = vmatpush3.bf16.msra.mxu1 %v10299_v19 }
 0x4ba   : > { %v7700_v0 = vpop.f32.mrb[49].mxu0  ;;  %8023 = vmatprep.subr.bf16.mxu1 %v10303_v13 }
 0x4bb   : > { %v7701_v1 = vadd.f32 %v7700_v0, %v7699_v31  ;;  %v7702_v14 = vpop.f32.mrb[50].mxu0  ;;  %8002 = vmatpush3.bf16.msra.mxu0 %v10305_v60  ;;  %v7721_v5 = vpop.f32.mrb[48].mxu1  ;;  %v7215_v31 = vcombine.high %v10402_v34, %v10405_v56  ;;  %v10888_v0 = vld [vmem:[#allocation49_spill] sm:$0xff] }
 0x4bc   : > { %v7703_v50 = vpop.f32.mrb[51].mxu0  ;;  %8003 = vmatprep.subr.bf16.mxu0 %v10308_v11  ;;  %v7722_v55 = vpop.f32.mrb[49].mxu1 }
 0x4bd   : > { %v7704_v29 = vadd.f32 %v7703_v50, %v7702_v14  ;;  %v7723_v27 = vadd.f32 %v7722_v55, %v7721_v5  ;;  %v7724_v46 = vpop.f32.mrb[50].mxu1  ;;  %8024 = vmatpush3.bf16.msra.mxu1 %v10311_v9  ;;  %v10889_v5 = vld [vmem:[#allocation25_spill] sm:$0xff]  ;;  %v10890_v55 = vld [vmem:[#allocation50_spill] sm:$0xff] }
 0x4be   : > { %v7725_v10 = vpop.f32.mrb[51].mxu1  ;;  %8025 = vmatprep.subr.bf16.mxu1 %v10315_v58  ;;  %v6367_v50 = vrot.slane %v10889_v5, 2 }
 0x4bf   : > { %8004 = vmatpush3.bf16.msra.mxu0 %v10317_v57  ;;  %v4821_v17 = vadd.f32 %v7723_v27, %v7701_v1  ;;  %v7726_v61 = vadd.f32 %v7725_v10, %v7724_v46  ;;  %v6257_v27 = vrot.slane %v7210_v21, 2  ;;  %v10891_v46 = vld [vmem:[#allocation26_spill] sm:$0xff] }
 0x4c0   : > { %8005 = vmatprep.subr.bf16.mxu0 %v10320_v54  ;;  %v6258_v10 = vrot.slane %v10891_v46, 2  ;;  %v6368_v63 = vsel %vm2138_vm1, %v6366_v3, %v6367_v50 }
 0x4c1   : > { %v10410_v14 = vadd.f32 %v4821_v17, %v10888_v0  ;;  %v4824_v1 = vadd.f32 %v7726_v61, %v7704_v29  ;;  %8026 = vmatpush3.bf16.msra.mxu1 %v10325_v59  ;;  %v6253_v17 = vsel %vm2138_vm1, %v6251_v30, %v6252_v44  ;;  %v6372_v29 = vrot.slane %v7215_v31, 2  ;;  %v10892_v61 = vld [vmem:[#allocation27_spill] sm:$0xff] }
 0x4c2   : > { %8027 = vmatprep.subr.bf16.mxu1 %v10331_v2  ;;  %v6373_v32 = vrot.slane %v10892_v61, 2  ;;  %v6259_v21 = vsel %vm2138_vm1, %v6257_v27, %v6258_v10  ;;  %v7212_v27 = vcombine.low %v10393_v18, %v10343_v24  ;;  %v7214_v24 = vcombine.low %v10402_v34, %v10405_v56  ;;  %v10462_v18 = vld [vmem:[#allocation3 + $0x20] sm:$0xcc] }
 0x4c3   : > { %8006 = vmatpush3.bf16.msra.mxu0 %v10333_v22  ;;  %v10417_v28 = vadd.f32 %v4824_v1, %v10890_v55 }
 0x4c4   : > { %8035 = vmatprep.subr.bf16.mxu0 %v10220_v47  ;;  %v6374_v30 = vsel %vm2138_vm1, %v6372_v29, %v6373_v32 }
 0x4c5   : > { %8028 = vmatpush3.bf16.msra.mxu1 %v10351_v26 }
 0x4c6   : > { %6300 = vmatmul.mubr.bf16.vlgmr.msra.gmra.mrb[76].mxu0 %v6253_v17  ;;  %8057 = vmatprep.subr.bf16.mxu1 %v10234_v48  ;;  %v10453_v17 = vld [vmem:[#allocation3 + $0x18] sm:$0xcc] }
 0x4c7   : > { %8036 = vmatpush3.bf16.msra.mxu0 %v10236_v12  ;;  %6411 = vmatprep.mubr.bf16.mxu0 %v6368_v63  ;;  %v7217_v61 = vcombine.high %v10453_v17, %v10405_v56 }
 0x4c8   : > { %8037 = vmatprep.subr.bf16.mxu0 %v10243_v42  ;;  %6341 = vmatmul.mubr.bf16.vlgmr.msra.gmra.mrb[76].mxu1 %v6259_v21  ;;  %v6363_v21 = vrot.slane %v7212_v27, 2 }
 0x4c9   : > { %8058 = vmatpush3.bf16.msra.mxu1 %v10248_v20  ;;  %6452 = vmatprep.mubr.bf16.mxu1 %v6374_v30  ;;  %v10893_v30 = vld [vmem:[#allocation28_spill] sm:$0xff]  ;;  %v6478_v34 = vrot.slane %v7217_v61, 2 }
 0x4ca   : > { %8059 = vmatprep.subr.bf16.mxu1 %v10253_v25 }
 0x4cb   : > { %8038 = vmatpush3.bf16.msra.mxu0 %v10255_v33 }
 0x4cc   : > { %8039 = vmatprep.subr.bf16.mxu0 %v10259_v35 }
 0x4cd   : > { %8060 = vmatpush3.bf16.msra.mxu1 %v10263_v36 }
 0x4ce   : > { %8061 = vmatprep.subr.bf16.mxu1 %v10267_v4 }
 0x4cf   : > { %8040 = vmatpush3.bf16.msra.mxu0 %v10269_v23 }
 0x4d0   : > { %8041 = vmatprep.subr.bf16.mxu0 %v10272_v37 }
 0x4d1   : > { %8062 = vmatpush3.bf16.msra.mxu1 %v10275_v38 }
 0x4d2   : > { %8063 = vmatprep.subr.bf16.mxu1 %v10279_v40 }
 0x4d3   : > { %8042 = vmatpush3.bf16.msra.mxu0 %v10281_v41 }
 0x4d4   : > { %8043 = vmatprep.subr.bf16.mxu0 %v10284_v43 }
 0x4d5   : > { %8064 = vmatpush3.bf16.msra.mxu1 %v10287_v16 }
 0x4d6   : > { %8065 = vmatprep.subr.bf16.mxu1 %v10291_v52 }
 0x4d7   : > { %8044 = vmatpush3.bf16.msra.mxu0 %v10293_v49 }
 0x4d8   : > { %8045 = vmatprep.subr.bf16.mxu0 %v10296_v45 }
 0x4d9   : > { %v7743_v44 = vpop.f32.mrb[52].mxu0  ;;  %8066 = vmatpush3.bf16.msra.mxu1 %v10299_v19 }
 0x4da   : > { %v7744_v31 = vpop.f32.mrb[53].mxu0  ;;  %8067 = vmatprep.subr.bf16.mxu1 %v10303_v13 }
 0x4db   : > { %v7745_v0 = vadd.f32 %v7744_v31, %v7743_v44  ;;  %v7746_v1 = vpop.f32.mrb[54].mxu0  ;;  %8046 = vmatpush3.bf16.msra.mxu0 %v10305_v60  ;;  %v7765_v3 = vpop.f32.mrb[52].mxu1  ;;  %v6364_v44 = vrot.slane %v10893_v30, 2  ;;  %v10465_v31 = vld [vmem:[#allocation3 + $0x48] sm:$0xff] }
 0x4dc   : > { %v7747_v5 = vpop.f32.mrb[55].mxu0  ;;  %8047 = vmatprep.subr.bf16.mxu0 %v10308_v11  ;;  %v7766_v50 = vpop.f32.mrb[53].mxu1 }
 0x4dd   : > { %v7748_v55 = vadd.f32 %v7747_v5, %v7746_v1  ;;  %v7767_v46 = vadd.f32 %v7766_v50, %v7765_v3  ;;  %v7768_v10 = vpop.f32.mrb[54].mxu1  ;;  %8068 = vmatpush3.bf16.msra.mxu1 %v10311_v9  ;;  %v7219_v1 = vcombine.high %v10462_v18, %v10465_v31  ;;  %v10894_v5 = vld [vmem:[#allocation45_spill] sm:$0xff] }
 0x4de   : > { %v7769_v29 = vpop.f32.mrb[55].mxu1  ;;  %8069 = vmatprep.subr.bf16.mxu1 %v10315_v58  ;;  %v6479_v50 = vrot.slane %v10894_v5, 2 }
 0x4df   : > { %8048 = vmatpush3.bf16.msra.mxu0 %v10317_v57  ;;  %v4933_v32 = vadd.f32 %v7767_v46, %v7745_v0  ;;  %v7770_v63 = vadd.f32 %v7769_v29, %v7768_v10  ;;  %v6369_v46 = vrot.slane %v7214_v24, 2  ;;  %v10895_v10 = vld [vmem:[#allocation29_spill] sm:$0xff] }
 0x4e0   : > { %8049 = vmatprep.subr.bf16.mxu0 %v10320_v54  ;;  %v6370_v29 = vrot.slane %v10895_v10, 2 }
 0x4e1   : > { %v10470_v3 = vadd.f32 %v4933_v32, %v10157_v39  ;;  %v4936_v0 = vadd.f32 %v7770_v63, %v7748_v55  ;;  %8070 = vmatpush3.bf16.msra.mxu1 %v10325_v59  ;;  %v6365_v39 = vsel %vm2138_vm1, %v6363_v21, %v6364_v44  ;;  %v6484_v55 = vrot.slane %v7219_v1, 2  ;;  %v10896_v32 = vld [vmem:[#allocation52_spill] sm:$0xff] }
 0x4e2   : > { %8071 = vmatprep.subr.bf16.mxu1 %v10331_v2  ;;  %v6485_v63 = vrot.slane %v10896_v32, 2  ;;  %v6371_v61 = vsel %vm2138_vm1, %v6369_v46, %v6370_v29 }
 0x4e3   : > { %8050 = vmatpush3.bf16.msra.mxu0 %v10333_v22  ;;  %v10477_v27 = vadd.f32 %v4936_v0, %v10160_v51  ;;  %v6480_v51 = vsel %vm2138_vm1, %v6478_v34, %v6479_v50 }
 0x4e4   : > { %8079 = vmatprep.subr.bf16.mxu0 %v10220_v47  ;;  %v6486_v47 = vsel %vm2138_vm1, %v6484_v55, %v6485_v63 }
 0x4e5   : > { %8072 = vmatpush3.bf16.msra.mxu1 %v10351_v26 }
 0x4e6   : > { %6412 = vmatmul.mubr.bf16.vlgmr.msra.gmra.mrb[80].mxu0 %v6365_v39  ;;  %8101 = vmatprep.subr.bf16.mxu1 %v10234_v48 }
 0x4e7   : > { %8080 = vmatpush3.bf16.msra.mxu0 %v10236_v12  ;;  %6523 = vmatprep.mubr.bf16.mxu0 %v6480_v51 }
 0x4e8   : > { %8081 = vmatprep.subr.bf16.mxu0 %v10243_v42  ;;  %6453 = vmatmul.mubr.bf16.vlgmr.msra.gmra.mrb[80].mxu1 %v6371_v61 }
 0x4e9   : > { %8102 = vmatpush3.bf16.msra.mxu1 %v10248_v20  ;;  %6564 = vmatprep.mubr.bf16.mxu1 %v6486_v47 }
 0x4ea   : > { %8103 = vmatprep.subr.bf16.mxu1 %v10253_v25 }
 0x4eb   : > { %8082 = vmatpush3.bf16.msra.mxu0 %v10255_v33 }
 0x4ec   : > { %8083 = vmatprep.subr.bf16.mxu0 %v10259_v35 }
 0x4ed   : > { %8104 = vmatpush3.bf16.msra.mxu1 %v10263_v36 }
 0x4ee   : > { %8105 = vmatprep.subr.bf16.mxu1 %v10267_v4  ;;  %v7216_v4 = vcombine.low %v10453_v17, %v10405_v56 }
 0x4ef   : > { %8084 = vmatpush3.bf16.msra.mxu0 %v10269_v23 }
 0x4f0   : > { %8085 = vmatprep.subr.bf16.mxu0 %v10272_v37 }
 0x4f1   : > { %8106 = vmatpush3.bf16.msra.mxu1 %v10275_v38 }
 0x4f2   : > { %8107 = vmatprep.subr.bf16.mxu1 %v10279_v40 }
 0x4f3   : > { %8086 = vmatpush3.bf16.msra.mxu0 %v10281_v41 }
 0x4f4   : > { %8087 = vmatprep.subr.bf16.mxu0 %v10284_v43  ;;  %v7218_v43 = vcombine.low %v10462_v18, %v10465_v31 }
 0x4f5   : > { %8108 = vmatpush3.bf16.msra.mxu1 %v10287_v16  ;;  %v6475_v16 = vrot.slane %v7216_v4, 2 }
 0x4f6   : > { %8109 = vmatprep.subr.bf16.mxu1 %v10291_v52  ;;  %v6476_v52 = vrot.slane %v10188_v7, 2 }
 0x4f7   : > { %8088 = vmatpush3.bf16.msra.mxu0 %v10293_v49 }
 0x4f8   : > { %8089 = vmatprep.subr.bf16.mxu0 %v10296_v45 }
 0x4f9   : > { %v7787_v48 = vpop.f32.mrb[56].mxu0  ;;  %8110 = vmatpush3.bf16.msra.mxu1 %v10299_v19 }
 0x4fa   : > { %v7788_v12 = vpop.f32.mrb[57].mxu0  ;;  %8111 = vmatprep.subr.bf16.mxu1 %v10303_v13  ;;  %v6481_v13 = vrot.slane %v7218_v43, 2 }
 0x4fb   : > { %v7789_v42 = vadd.f32 %v7788_v12, %v7787_v48  ;;  %v7790_v20 = vpop.f32.mrb[58].mxu0  ;;  %8090 = vmatpush3.bf16.msra.mxu0 %v10305_v60  ;;  %v7809_v25 = vpop.f32.mrb[56].mxu1  ;;  %v6482_v60 = vrot.slane %v10197_v62, 2 }
 0x4fc   : > { %v7791_v33 = vpop.f32.mrb[59].mxu0  ;;  %8091 = vmatprep.subr.bf16.mxu0 %v10308_v11  ;;  %v7810_v35 = vpop.f32.mrb[57].mxu1  ;;  %v6477_v11 = vsel %vm2138_vm1, %v6475_v16, %v6476_v52 }
 0x4fd   : > { %v7792_v36 = vadd.f32 %v7791_v33, %v7790_v20  ;;  %v7811_v23 = vadd.f32 %v7810_v35, %v7809_v25  ;;  %v7812_v37 = vpop.f32.mrb[58].mxu1  ;;  %8112 = vmatpush3.bf16.msra.mxu1 %v10311_v9  ;;  %v6483_v7 = vsel %vm2138_vm1, %v6481_v13, %v6482_v60 }
 0x4fe   : > { %v7813_v38 = vpop.f32.mrb[59].mxu1  ;;  %8113 = vmatprep.subr.bf16.mxu1 %v10315_v58 }
 0x4ff   : > { %8092 = vmatpush3.bf16.msra.mxu0 %v10317_v57  ;;  %v5358_v40 = vadd.f32 %v7811_v23, %v7789_v42  ;;  %v7814_v41 = vadd.f32 %v7813_v38, %v7812_v37 }
 0x500   : > { %8093 = vmatprep.subr.bf16.mxu0 %v10320_v54 }
 0x501   : > { %v10520_v49 = vadd.f32 %v5358_v40, %v10229_v53  ;;  %v5361_v45 = vadd.f32 %v7814_v41, %v7792_v36  ;;  %8114 = vmatpush3.bf16.msra.mxu1 %v10325_v59 }
 0x502   : > { %8115 = vmatprep.subr.bf16.mxu1 %v10331_v2 }
 0x503   : > { %8094 = vmatpush3.bf16.msra.mxu0 %v10333_v22  ;;  %v10526_v19 = vadd.f32 %v5361_v45, %v10240_v15 }
 0x505   : > { %8116 = vmatpush3.bf16.msra.mxu1 %v10351_v26 }
 0x506   : > { %6524 = vmatmul.mubr.bf16.vlgmr.msra.gmra.mrb[84].mxu0 %v6477_v11 }
 0x508   : > { %6565 = vmatmul.mubr.bf16.vlgmr.msra.gmra.mrb[84].mxu1 %v6483_v7 }
 0x519   : > { %v7831_v53 = vpop.f32.mrb[60].mxu0 }
 0x51a   : > { %v7832_v9 = vpop.f32.mrb[61].mxu0 }
 0x51b   : > { %v7833_v58 = vadd.f32 %v7832_v9, %v7831_v53  ;;  %v7834_v57 = vpop.f32.mrb[62].mxu0  ;;  %v7853_v54 = vpop.f32.mrb[60].mxu1 }
 0x51c   : > { %v7835_v59 = vpop.f32.mrb[63].mxu0  ;;  %v7854_v2 = vpop.f32.mrb[61].mxu1 }
 0x51d   : > { %v7836_v15 = vadd.f32 %v7835_v59, %v7834_v57  ;;  %v7855_v22 = vadd.f32 %v7854_v2, %v7853_v54  ;;  %v7856_v56 = vpop.f32.mrb[62].mxu1 }
 0x51e   : > { %v7857_v17 = vpop.f32.mrb[63].mxu1 }
 0x51f   : > { %v5526_v62 = vadd.f32 %v7855_v22, %v7833_v58  ;;  %v7858_v24 = vadd.f32 %v7857_v17, %v7856_v56 }
 0x521   : > { %v10533_v18 = vadd.f32 %v5526_v62, %v10348_v6  ;;  %v5529_v26 = vadd.f32 %v7858_v24, %v7836_v15  ;;  %v7220_v24 = vld [vmem:[#allocation9] ss:$0 sm:$0xff] }
 0x523   : > { %v10536_v21 = vadd.f32 %v5529_v26, %v10357_v8 }
 0x539   : > { %v7875_v30 = vpop.f32.mrb[64].mxu0 }
 0x53a   : > { %v7876_v44 = vpop.f32.mrb[65].mxu0 }
 0x53b   : > { %v7877_v31 = vadd.f32 %v7876_v44, %v7875_v30  ;;  %v7878_v1 = vpop.f32.mrb[66].mxu0  ;;  %v7897_v0 = vpop.f32.mrb[64].mxu1 }
 0x53c   : > { %v7879_v34 = vpop.f32.mrb[67].mxu0  ;;  %v7898_v5 = vpop.f32.mrb[65].mxu1 }
 0x53d   : > { %v7880_v50 = vadd.f32 %v7879_v34, %v7878_v1  ;;  %v7899_v46 = vadd.f32 %v7898_v5, %v7897_v0  ;;  %v7900_v10 = vpop.f32.mrb[66].mxu1 }
 0x53e   : > { %v7901_v29 = vpop.f32.mrb[67].mxu1 }
 0x53f   : > { %v5694_v39 = vadd.f32 %v7899_v46, %v7877_v31  ;;  %v7902_v55 = vadd.f32 %v7901_v29, %v7900_v10 }
 0x541   : > { %v10539_v6 = vadd.f32 %v5694_v39, %v10410_v14  ;;  %v5697_v32 = vadd.f32 %v7902_v55, %v7880_v50 }
 0x543   : > { %v10542_v8 = vadd.f32 %v5697_v32, %v10417_v28 }
 0x559   : > { %v7919_v63 = vpop.f32.mrb[68].mxu0 }
 0x55a   : > { %v7920_v51 = vpop.f32.mrb[69].mxu0 }
 0x55b   : > { %v7921_v61 = vadd.f32 %v7920_v51, %v7919_v63  ;;  %v7922_v47 = vpop.f32.mrb[70].mxu0  ;;  %v7941_v48 = vpop.f32.mrb[68].mxu1 }
 0x55c   : > { %v7923_v12 = vpop.f32.mrb[71].mxu0  ;;  %v7942_v42 = vpop.f32.mrb[69].mxu1 }
 0x55d   : > { %v7924_v20 = vadd.f32 %v7923_v12, %v7922_v47  ;;  %v7943_v25 = vadd.f32 %v7942_v42, %v7941_v48  ;;  %v7944_v33 = vpop.f32.mrb[70].mxu1 }
 0x55e   : > { %v7945_v35 = vpop.f32.mrb[71].mxu1 }
 0x55f   : > { %v5862_v36 = vadd.f32 %v7943_v25, %v7921_v61  ;;  %v7946_v4 = vadd.f32 %v7945_v35, %v7944_v33 }
 0x561   : > { %v10545_v14 = vadd.f32 %v5862_v36, %v10470_v3  ;;  %v5865_v23 = vadd.f32 %v7946_v4, %v7924_v20 }
 0x563   : > { %v10548_v28 = vadd.f32 %v5865_v23, %v10477_v27 }
 0x579   : > { %v7963_v37 = vpop.f32.mrb[72].mxu0 }
 0x57a   : > { %v7964_v38 = vpop.f32.mrb[73].mxu0 }
 0x57b   : > { %v7965_v40 = vadd.f32 %v7964_v38, %v7963_v37  ;;  %v7966_v41 = vpop.f32.mrb[74].mxu0  ;;  %v7985_v43 = vpop.f32.mrb[72].mxu1 }
 0x57c   : > { %v7967_v16 = vpop.f32.mrb[75].mxu0  ;;  %v7986_v52 = vpop.f32.mrb[73].mxu1 }
 0x57d   : > { %v7968_v45 = vadd.f32 %v7967_v16, %v7966_v41  ;;  %v7987_v13 = vadd.f32 %v7986_v52, %v7985_v43  ;;  %v7988_v60 = vpop.f32.mrb[74].mxu1 }
 0x57e   : > { %v7989_v11 = vpop.f32.mrb[75].mxu1 }
 0x57f   : > { %v6231_v7 = vadd.f32 %v7987_v13, %v7965_v40  ;;  %v7990_v53 = vadd.f32 %v7989_v11, %v7988_v60 }
 0x581   : > { %v6237_v3 = vadd.f32 %v6231_v7, %v10520_v49  ;;  %v6234_v9 = vadd.f32 %v7990_v53, %v7968_v45 }
 0x583   : > { %v6238_v58 = vadd.f32 %v6234_v9, %v10526_v19  ;;  %v6582_v31 = vadd.f32 %v7220_v24, %v6237_v3 }
 0x585   : > { %v6583_v19 = vadd.f32 %v7220_v24, %v6238_v58  ;;  %v6584_v5 = vmax.f32 %v6582_v31, 0.0 }
 0x587   : > { %v6585_v10 = vmax.f32 %v6583_v19, 0.0 }
 0x599   : > { %v8007_v27 = vpop.f32.mrb[76].mxu0 }
 0x59a   : > { %v8008_v57 = vpop.f32.mrb[77].mxu0 }
 0x59b   : > { %v8009_v54 = vadd.f32 %v8008_v57, %v8007_v27  ;;  %v8010_v59 = vpop.f32.mrb[78].mxu0  ;;  %v8029_v2 = vpop.f32.mrb[76].mxu1 }
 0x59c   : > { %v8011_v15 = vpop.f32.mrb[79].mxu0  ;;  %v8030_v22 = vpop.f32.mrb[77].mxu1 }
 0x59d   : > { %v8012_v56 = vadd.f32 %v8011_v15, %v8010_v59  ;;  %v8031_v17 = vadd.f32 %v8030_v22, %v8029_v2  ;;  %v8032_v62 = vpop.f32.mrb[78].mxu1 }
 0x59e   : > { %v8033_v26 = vpop.f32.mrb[79].mxu1 }
 0x59f   : > { %v6343_v30 = vadd.f32 %v8031_v17, %v8009_v54  ;;  %v8034_v44 = vadd.f32 %v8033_v26, %v8032_v62 }
 0x5a1   : > { %v6349_v49 = vadd.f32 %v6343_v30, %v10533_v18  ;;  %v6346_v1 = vadd.f32 %v8034_v44, %v8012_v56 }
 0x5a3   : > { %v6586_v0 = vadd.f32 %v7220_v24, %v6349_v49  ;;  %v6350_v34 = vadd.f32 %v6346_v1, %v10536_v21 }
 0x5a5   : > { %v6588_v50 = vmax.f32 %v6586_v0, 0.0  ;;  %v6587_v46 = vadd.f32 %v7220_v24, %v6350_v34 }
 0x5a7   : > { %v7239_v29 = vpack.c.bf16 %v6588_v50, %v6584_v5  ;;  %v6589_v39 = vmax.f32 %v6587_v46, 0.0 }
 0x5a9   : > { %6622 = vst [vmem:[%s10558_s17] sm:$0xff] %v7239_v29  ;;  %v7241_v18 = vpack.c.bf16 %v6589_v39, %v6585_v10 }
 0x5ab   : > { %6624 = vst [vmem:[%s10558_s17 + $0x10] sm:$0xff] %v7241_v18 }
 0x5b9   : > { %v8051_v55 = vpop.f32.mrb[80].mxu0 }
 0x5ba   : > { %v8052_v32 = vpop.f32.mrb[81].mxu0 }
 0x5bb   : > { %v8053_v63 = vadd.f32 %v8052_v32, %v8051_v55  ;;  %v8054_v21 = vpop.f32.mrb[82].mxu0  ;;  %v8073_v51 = vpop.f32.mrb[80].mxu1 }
 0x5bc   : > { %v8055_v61 = vpop.f32.mrb[83].mxu0  ;;  %v8074_v47 = vpop.f32.mrb[81].mxu1 }
 0x5bd   : > { %v8056_v48 = vadd.f32 %v8055_v61, %v8054_v21  ;;  %v8075_v12 = vadd.f32 %v8074_v47, %v8073_v51  ;;  %v8076_v42 = vpop.f32.mrb[82].mxu1 }
 0x5be   : > { %v8077_v20 = vpop.f32.mrb[83].mxu1 }
 0x5bf   : > { %v6455_v25 = vadd.f32 %v8075_v12, %v8053_v63  ;;  %v8078_v33 = vadd.f32 %v8077_v20, %v8076_v42 }
 0x5c1   : > { %v6461_v35 = vadd.f32 %v6455_v25, %v10539_v6  ;;  %v6458_v36 = vadd.f32 %v8078_v33, %v8056_v48 }
 0x5c3   : > { %v6462_v4 = vadd.f32 %v6458_v36, %v10542_v8  ;;  %v6590_v53 = vadd.f32 %v7220_v24, %v6461_v35 }
 0x5c5   : > { %v6591_v8 = vadd.f32 %v7220_v24, %v6462_v4  ;;  %v6592_v27 = vmax.f32 %v6590_v53, 0.0 }
 0x5c7   : > { %v6593_v59 = vmax.f32 %v6591_v8, 0.0 }
 0x5d9   : > { %v8095_v23 = vpop.f32.mrb[84].mxu0 }
 0x5da   : > { %v8096_v37 = vpop.f32.mrb[85].mxu0 }
 0x5db   : > { %v8097_v38 = vadd.f32 %v8096_v37, %v8095_v23  ;;  %v8098_v40 = vpop.f32.mrb[86].mxu0  ;;  %v8117_v41 = vpop.f32.mrb[84].mxu1 }
 0x5dc   : > { %v8099_v43 = vpop.f32.mrb[87].mxu0  ;;  %v8118_v16 = vpop.f32.mrb[85].mxu1 }
 0x5dd   : > { %v8100_v52 = vadd.f32 %v8099_v43, %v8098_v40  ;;  %v8119_v45 = vadd.f32 %v8118_v16, %v8117_v41  ;;  %v8120_v13 = vpop.f32.mrb[86].mxu1 }
 0x5de   : > { %v8121_v60 = vpop.f32.mrb[87].mxu1 }
 0x5df   : > { %v6567_v11 = vadd.f32 %v8119_v45, %v8097_v38  ;;  %v8122_v7 = vadd.f32 %v8121_v60, %v8120_v13 }
 0x5e1   : > { %v6573_v6 = vadd.f32 %v6567_v11, %v10545_v14  ;;  %v6570_v3 = vadd.f32 %v8122_v7, %v8100_v52 }
 0x5e3   : > { %v6594_v9 = vadd.f32 %v7220_v24, %v6573_v6  ;;  %v6574_v58 = vadd.f32 %v6570_v3, %v10548_v28 }
 0x5e5   : > { %v6596_v57 = vmax.f32 %v6594_v9, 0.0  ;;  %v6595_v54 = vadd.f32 %v7220_v24, %v6574_v58 }
 0x5e7   : > { %v7240_v2 = vpack.c.bf16 %v6596_v57, %v6592_v27  ;;  %v6597_v15 = vmax.f32 %v6595_v54, 0.0 }
 0x5e9   : > { %6623 = vst [vmem:[%s10558_s17 + $0x8] sm:$0xff] %v7240_v2  ;;  %v7242_v22 = vpack.c.bf16 %v6597_v15, %v6593_v59 }
 0x5eb   : > { %6625 = vst [vmem:[%s10558_s17 + $0x18] sm:$0xff] %v7242_v22 }
 0x5ec PF: > { %s18_s18 = sadd.s32 1, %s8620_s18  }
 0x5ed   : > { %p15_p11 = scmp.ge.s32.totalorder %s18_s18, 4  }
 0x5ef   :  { %17 = sbr.rel (!%p15_p11) target bundleno = 3 (0x3), region = 95 }
 0x5f6   :  { %6647 = vsyncpa [#allocation5], 1 }
 0x5f7   :  { %6649 = vsyncpa [#allocation5 + $0x1], 1 }
 0x5f8   :  { %6650 = vsyncpa [#allocation7], 1 }
 0x5f9   :  { %6651 = vsyncpa [#allocation10], 1 }

</bundles_post_ra>
